<compile_context>
chip_gen: v7x
topology: tpu7x:2x2x1
jax: 0.10.0
libtpu: 0.0.40
codegen_flags: <defaults>
</compile_context>

<pallas_src>
import math

import jax
import jax.numpy as jnp
from jax.experimental import pallas as pl
from jax.experimental.pallas import tpu as pltpu


def _round_up(n, m):
    return ((n + m - 1) // m) * m


# -----------------------------------------------------------------------------------
# Pallas kernel: fused residual block for ONE batch element.
#   h   = prelu( conv1(x) (BN1-scale folded into w1) + shift1 )
#   r   =        conv2(h) (BN2-scale folded into w2) + shift2
#   out = x + r
# Each conv = 9 shifted bf16 matmuls on the MXU accumulated in f32.
# -----------------------------------------------------------------------------------
def _resblock_kernel(x_ref, w1_ref, b1_ref, pw_ref, w2_ref, b2_ref, o_ref,
                     xpad_ref, hpad_ref):
    H, W, Cp = x_ref.shape                 # batch dim squeezed by BlockSpec
    Hp, Wp = H + 2, W + 2
    M = H * W

    # ---- read the f32 input block once (also used for the residual add) ----
    x_f32 = x_ref[...]                     # (H, W, Cp) f32

    # ---- stage bf16 zero-bordered copy of x in VMEM: conv1's padded input ----
    # (border re-zeroed every step -> safe when the batch axis is sharded across cores)
    xpad_ref[...] = jnp.zeros((Hp, Wp, Cp), xpad_ref.dtype)
    xpad_ref[1:1 + H, 1:1 + W, :] = x_f32.astype(xpad_ref.dtype)

    # ---- conv1: 9 shifted taps, bf16 inputs, f32 accumulation on the MXU ----
    acc = jnp.zeros((M, Cp), jnp.float32)
    for t in range(9):
        dy, dx = t // 3, t % 3
        a = xpad_ref[dy:dy + H, dx:dx + W, :].reshape(M, Cp)
        acc = acc + jnp.dot(a, w1_ref[t], preferred_element_type=jnp.float32)

    # ---- bn1 shift (conv1 bias folded in) + PReLU, all in f32 ----
    h = acc + b1_ref[...]
    h = jnp.where(h >= 0.0, h, pw_ref[...] * h)

    # ---- stage h (bf16, zero halo) in VMEM: conv2's padded input ----
    hpad_ref[...] = jnp.zeros((Hp, Wp, Cp), hpad_ref.dtype)
    hpad_ref[1:1 + H, 1:1 + W, :] = h.reshape(H, W, Cp).astype(hpad_ref.dtype)

    # ---- conv2: 9 shifted taps over the staged activation ----
    acc2 = jnp.zeros((M, Cp), jnp.float32)
    for t in range(9):
        dy, dx = t // 3, t % 3
        a = hpad_ref[dy:dy + H, dx:dx + W, :].reshape(M, Cp)
        acc2 = acc2 + jnp.dot(a, w2_ref[t], preferred_element_type=jnp.float32)

    r = acc2 + b2_ref[...]

    # ---- residual add with the original f32 input; lane-dense f32 store ----
    o_ref[...] = (x_f32 + r.reshape(H, W, Cp)).astype(o_ref.dtype)


def _resblock_pallas(x, w1, b1, pw, w2, b2, *, H, W, Cp):
    B = x.shape[0]
    return pl.pallas_call(
        _resblock_kernel,
        out_shape=jax.ShapeDtypeStruct((B, H, W, Cp), jnp.float32),
        grid=(B,),
        in_specs=[
            pl.BlockSpec((None, H, W, Cp), lambda b: (b, 0, 0, 0)),  # x block (f32)
            pl.BlockSpec((9, Cp, Cp), lambda b: (0, 0, 0)),          # conv1 taps (bf16, bn1 scale folded)
            pl.BlockSpec((1, Cp), lambda b: (0, 0)),                 # bn1 shift (+conv1 bias)
            pl.BlockSpec((1, Cp), lambda b: (0, 0)),                 # prelu weight (broadcast)
            pl.BlockSpec((9, Cp, Cp), lambda b: (0, 0, 0)),          # conv2 taps (bf16, bn2 scale folded)
            pl.BlockSpec((1, Cp), lambda b: (0, 0)),                 # bn2 shift (+conv2 bias)
        ],
        out_specs=pl.BlockSpec((None, H, W, Cp), lambda b: (b, 0, 0, 0)),
        scratch_shapes=[
            pltpu.VMEM((H + 2, W + 2, Cp), jnp.bfloat16),            # staged conv1 input (padded x, bf16)
            pltpu.VMEM((H + 2, W + 2, Cp), jnp.bfloat16),            # staged conv2 input (padded h, bf16)
        ],
        compiler_params=pltpu.CompilerParams(
            dimension_semantics=("parallel",),   # batch steps shard across TCs (v7x megacore)
            vmem_limit_bytes=32 * 1024 * 1024,
        ),
    )(x, w1, b1, pw, w2, b2)


# -----------------------------------------------------------------------------------
# Glue: layout conversion (NCHW<->NHWC) and channel lane-padding.  No halo pad in HBM;
# the kernel does it in VMEM.
# -----------------------------------------------------------------------------------
def residual_block_forward(x_nchw, params):
    """x: (B, C, H, W) f32 -> (B, C, H, W) f32, matching ResidualBlock.forward (eval BN)."""
    B, C, H, W = x_nchw.shape
    Cp = params['w1'].shape[-1]
    x = jnp.transpose(x_nchw, (0, 2, 3, 1))                        # NCHW -> NHWC
    x = jnp.pad(x, ((0, 0), (0, 0), (0, 0), (0, Cp - C)))          # lane padding (static widths)
    out = _resblock_pallas(x, params['w1'], params['b1'], params['pw'],
                           params['w2'], params['b2'], H=H, W=W, Cp=Cp)
    return jnp.transpose(out[..., :C], (0, 3, 1, 2))               # NHWC -> NCHW


# -----------------------------------------------------------------------------------
# Deterministic parameters (mirrors nn.Conv2d / BatchNorm2d / PReLU default init).
# -----------------------------------------------------------------------------------
def init_raw_params(key, channels):
    k1, k2, k3, k4 = jax.random.split(key, 4)
    bound = 1.0 / math.sqrt(channels * 3 * 3)
    return {
        'w1': jax.random.uniform(k1, (channels, channels, 3, 3), jnp.float32, -bound, bound),
        'bc1': jax.random.uniform(k2, (channels,), jnp.float32, -bound, bound),
        'w2': jax.random.uniform(k3, (channels, channels, 3, 3), jnp.float32, -bound, bound),
        'bc2': jax.random.uniform(k4, (channels,), jnp.float32, -bound, bound),
        'g1': jnp.ones((channels,), jnp.float32), 'be1': jnp.zeros((channels,), jnp.float32),
        'm1': jnp.zeros((channels,), jnp.float32), 'v1': jnp.ones((channels,), jnp.float32),
        'g2': jnp.ones((channels,), jnp.float32), 'be2': jnp.zeros((channels,), jnp.float32),
        'm2': jnp.zeros((channels,), jnp.float32), 'v2': jnp.ones((channels,), jnp.float32),
        'prelu': jnp.float32(0.25),
    }


def pack_params(raw, eps=1e-5):
    """Fold conv bias + BN(eval) into the weights / a per-channel shift; pad channels to lane width."""
    C = raw['w1'].shape[0]
    Cp = max(128, _round_up(C, 128))

    def fold(w, b, g, be, m, v):
        scale = g * jax.lax.rsqrt(v + eps)                 # (Cout,)
        shift = (b - m) * scale + be                       # (Cout,)
        # (Cout, Cin, kh, kw) -> per-tap (Cin, Cout) matrices in (dy, dx) order.
        wt = jnp.transpose(w, (2, 3, 1, 0)).reshape(9, C, C)
        wt = wt * scale[None, None, :]                     # fold BN scale into output columns
        wt = jnp.pad(wt, ((0, 0), (0, Cp - C), (0, Cp - C)))
        sh = jnp.pad(shift, (0, Cp - C)).reshape(1, Cp).astype(jnp.float32)
        return wt.astype(jnp.bfloat16), sh

    w1, b1 = fold(raw['w1'], raw['bc1'], raw['g1'], raw['be1'], raw['m1'], raw['v1'])
    w2, b2 = fold(raw['w2'], raw['bc2'], raw['g2'], raw['be2'], raw['m2'], raw['v2'])
    pw = jnp.full((1, Cp), raw['prelu'], jnp.float32)
    return {'w1': w1, 'b1': b1, 'pw': pw, 'w2': w2, 'b2': b2}


# -----------------------------------------------------------------------------------
# Pure-JAX reference (f32) for correctness checking.
# -----------------------------------------------------------------------------------
def reference_forward(x, raw, eps=1e-5):
    def conv(z, w, b):
        y = jax.lax.conv_general_dilated(z, w, (1, 1), ((1, 1), (1, 1)),
                                         dimension_numbers=('NCHW', 'OIHW', 'NCHW'))
        return y + b[None, :, None, None]

    def bn(y, g, be, m, v):
        s = (g * jax.lax.rsqrt(v + eps))[None, :, None, None]
        return (y - m[None, :, None, None]) * s + be[None, :, None, None]

    h = bn(conv(x, raw['w1'], raw['bc1']), raw['g1'], raw['be1'], raw['m1'], raw['v1'])
    h = jnp.where(h >= 0.0, h, raw['prelu'] * h)
    r = bn(conv(h, raw['w2'], raw['bc2']), raw['g2'], raw['be2'], raw['m2'], raw['v2'])
    return x + r


# -----------------------------------------------------------------------------------
if __name__ == "__main__":
    key = jax.random.PRNGKey(0)
    kx, kp = jax.random.split(key)

    B, C, H, W = 2, 64, 16, 16                        # small shapes; C padded to 128 lanes internally
    x = jax.random.normal(kx, (B, C, H, W), jnp.float32)

    raw = init_raw_params(kp, C)
    params = pack_params(raw)

    fwd = jax.jit(residual_block_forward)
    out = fwd(x, params)
    jax.block_until_ready(out)

    assert out.shape == (B, C, H, W), out.shape
    assert out.dtype == jnp.float32
    assert bool(jnp.all(jnp.isfinite(out)))

    ref = reference_forward(x, raw)
    err = float(jnp.max(jnp.abs(out - ref)))
    assert err < 3e-2, f"max abs error vs reference: {err}"

    print("KERNEL_OK")
</pallas_src>

<mosaic_0001>
module attributes {stable_mosaic.version = 11 : i64} {
  func.func @_resblock_kernel(%arg0: i32, %arg1: memref<1x16x16x128xf32, #tpu.memory_space<vmem>>, %arg2: memref<9x128x128xbf16, #tpu.memory_space<vmem>>, %arg3: memref<1x128xf32, #tpu.memory_space<vmem>>, %arg4: memref<1x128xf32, #tpu.memory_space<vmem>>, %arg5: memref<9x128x128xbf16, #tpu.memory_space<vmem>>, %arg6: memref<1x128xf32, #tpu.memory_space<vmem>>, %arg7: memref<1x16x16x128xf32, #tpu.memory_space<vmem>>, %arg8: memref<18x18x128xbf16, #tpu.memory_space<vmem>>, %arg9: memref<18x18x128xbf16, #tpu.memory_space<vmem>>) attributes {dimension_semantics = [#tpu.dimension_semantics<parallel>], iteration_bounds = array<i64: 2>, scalar_prefetch = 0 : i64, scratch_operands = 2 : i64, tpu.core_type = #tpu.core_type<tc>, window_params = [{transform_indices = @transform_0, window_bounds = array<i64: 1, 16, 16, 128>}, {pipeline_mode = #tpu.pipeline_mode<synchronous>, transform_indices = @transform_1, window_bounds = array<i64: 9, 128, 128>}, {pipeline_mode = #tpu.pipeline_mode<synchronous>, transform_indices = @transform_2, window_bounds = array<i64: 1, 128>}, {pipeline_mode = #tpu.pipeline_mode<synchronous>, transform_indices = @transform_3, window_bounds = array<i64: 1, 128>}, {pipeline_mode = #tpu.pipeline_mode<synchronous>, transform_indices = @transform_4, window_bounds = array<i64: 9, 128, 128>}, {pipeline_mode = #tpu.pipeline_mode<synchronous>, transform_indices = @transform_5, window_bounds = array<i64: 1, 128>}, {transform_indices = @transform_6, window_bounds = array<i64: 1, 16, 16, 128>}]} {
    %c0 = arith.constant 0 : index
    %c0_0 = arith.constant 0 : index
    %c0_1 = arith.constant 0 : index
    %c0_2 = arith.constant 0 : index
    %0 = vector.load %arg1[%c0, %c0_0, %c0_1, %c0_2] : memref<1x16x16x128xf32, #tpu.memory_space<vmem>>, vector<1x16x16x128xf32>
    %1 = vector.shape_cast %0 : vector<1x16x16x128xf32> to vector<16x16x128xf32>
    %cst = arith.constant 0.000000e+00 : bf16
    %2 = vector.broadcast %cst : bf16 to vector<18x18x128xbf16>
    %c0_3 = arith.constant 0 : index
    %c0_4 = arith.constant 0 : index
    %c0_5 = arith.constant 0 : index
    %3 = vector.load %arg8[%c0_3, %c0_4, %c0_5] : memref<18x18x128xbf16, #tpu.memory_space<vmem>>, vector<18x18x128xbf16>
    tpu.vector_store %arg8[%c0_3, %c0_4, %c0_5], %2 {strides = array<i32>} : memref<18x18x128xbf16, #tpu.memory_space<vmem>>, vector<18x18x128xbf16>,
    %4 = arith.truncf %1 : vector<16x16x128xf32> to vector<16x16x128xbf16>
    %c1 = arith.constant 1 : index
    %c1_6 = arith.constant 1 : index
    %c0_7 = arith.constant 0 : index
    %5 = vector.load %arg8[%c1, %c1_6, %c0_7] : memref<18x18x128xbf16, #tpu.memory_space<vmem>>, vector<16x16x128xbf16>
    tpu.vector_store %arg8[%c1, %c1_6, %c0_7], %4 {strides = array<i32>} : memref<18x18x128xbf16, #tpu.memory_space<vmem>>, vector<16x16x128xbf16>,
    %cst_8 = arith.constant 0.000000e+00 : f32
    %6 = vector.broadcast %cst_8 : f32 to vector<256x128xf32>
    %c0_9 = arith.constant 0 : index
    %c0_10 = arith.constant 0 : index
    %c0_11 = arith.constant 0 : index
    %7 = vector.load %arg8[%c0_9, %c0_10, %c0_11] : memref<18x18x128xbf16, #tpu.memory_space<vmem>>, vector<16x16x128xbf16>
    %8 = vector.shape_cast %7 : vector<16x16x128xbf16> to vector<256x128xbf16>
    %c0_12 = arith.constant 0 : index
    %c0_13 = arith.constant 0 : index
    %c0_14 = arith.constant 0 : index
    %9 = vector.load %arg2[%c0_12, %c0_13, %c0_14] : memref<9x128x128xbf16, #tpu.memory_space<vmem>>, vector<1x128x128xbf16>
    %10 = vector.shape_cast %9 : vector<1x128x128xbf16> to vector<128x128xbf16>
    %cst_15 = arith.constant dense<0.000000e+00> : vector<256x128xf32>
    %11 = tpu.matmul %8, %10, %cst_15 {dimension_numbers = #tpu.dot_dimension_numbers<[1], [0], [0], [1], [0, 0, 1, 1], [], []>} : vector<256x128xbf16>, vector<128x128xbf16>, vector<256x128xf32> -> vector<256x128xf32>
    %12 = arith.addf %6, %11 : vector<256x128xf32>
    %c0_16 = arith.constant 0 : index
    %c1_17 = arith.constant 1 : index
    %c0_18 = arith.constant 0 : index
    %13 = vector.load %arg8[%c0_16, %c1_17, %c0_18] : memref<18x18x128xbf16, #tpu.memory_space<vmem>>, vector<16x16x128xbf16>
    %14 = vector.shape_cast %13 : vector<16x16x128xbf16> to vector<256x128xbf16>
    %c1_19 = arith.constant 1 : index
    %c0_20 = arith.constant 0 : index
    %c0_21 = arith.constant 0 : index
    %15 = vector.load %arg2[%c1_19, %c0_20, %c0_21] : memref<9x128x128xbf16, #tpu.memory_space<vmem>>, vector<1x128x128xbf16>
    %16 = vector.shape_cast %15 : vector<1x128x128xbf16> to vector<128x128xbf16>
    %cst_22 = arith.constant dense<0.000000e+00> : vector<256x128xf32>
    %17 = tpu.matmul %14, %16, %cst_22 {dimension_numbers = #tpu.dot_dimension_numbers<[1], [0], [0], [1], [0, 0, 1, 1], [], []>} : vector<256x128xbf16>, vector<128x128xbf16>, vector<256x128xf32> -> vector<256x128xf32>
    %18 = arith.addf %12, %17 : vector<256x128xf32>
    %c0_23 = arith.constant 0 : index
    %c2 = arith.constant 2 : index
    %c0_24 = arith.constant 0 : index
    %19 = vector.load %arg8[%c0_23, %c2, %c0_24] : memref<18x18x128xbf16, #tpu.memory_space<vmem>>, vector<16x16x128xbf16>
    %20 = vector.shape_cast %19 : vector<16x16x128xbf16> to vector<256x128xbf16>
    %c2_25 = arith.constant 2 : index
    %c0_26 = arith.constant 0 : index
    %c0_27 = arith.constant 0 : index
    %21 = vector.load %arg2[%c2_25, %c0_26, %c0_27] : memref<9x128x128xbf16, #tpu.memory_space<vmem>>, vector<1x128x128xbf16>
    %22 = vector.shape_cast %21 : vector<1x128x128xbf16> to vector<128x128xbf16>
    %cst_28 = arith.constant dense<0.000000e+00> : vector<256x128xf32>
    %23 = tpu.matmul %20, %22, %cst_28 {dimension_numbers = #tpu.dot_dimension_numbers<[1], [0], [0], [1], [0, 0, 1, 1], [], []>} : vector<256x128xbf16>, vector<128x128xbf16>, vector<256x128xf32> -> vector<256x128xf32>
    %24 = arith.addf %18, %23 : vector<256x128xf32>
    %c1_29 = arith.constant 1 : index
    %c0_30 = arith.constant 0 : index
    %c0_31 = arith.constant 0 : index
    %25 = vector.load %arg8[%c1_29, %c0_30, %c0_31] : memref<18x18x128xbf16, #tpu.memory_space<vmem>>, vector<16x16x128xbf16>
    %26 = vector.shape_cast %25 : vector<16x16x128xbf16> to vector<256x128xbf16>
    %c3 = arith.constant 3 : index
    %c0_32 = arith.constant 0 : index
    %c0_33 = arith.constant 0 : index
    %27 = vector.load %arg2[%c3, %c0_32, %c0_33] : memref<9x128x128xbf16, #tpu.memory_space<vmem>>, vector<1x128x128xbf16>
    %28 = vector.shape_cast %27 : vector<1x128x128xbf16> to vector<128x128xbf16>
    %cst_34 = arith.constant dense<0.000000e+00> : vector<256x128xf32>
    %29 = tpu.matmul %26, %28, %cst_34 {dimension_numbers = #tpu.dot_dimension_numbers<[1], [0], [0], [1], [0, 0, 1, 1], [], []>} : vector<256x128xbf16>, vector<128x128xbf16>, vector<256x128xf32> -> vector<256x128xf32>
    %30 = arith.addf %24, %29 : vector<256x128xf32>
    %c1_35 = arith.constant 1 : index
    %c1_36 = arith.constant 1 : index
    %c0_37 = arith.constant 0 : index
    %31 = vector.load %arg8[%c1_35, %c1_36, %c0_37] : memref<18x18x128xbf16, #tpu.memory_space<vmem>>, vector<16x16x128xbf16>
    %32 = vector.shape_cast %31 : vector<16x16x128xbf16> to vector<256x128xbf16>
    %c4 = arith.constant 4 : index
    %c0_38 = arith.constant 0 : index
    %c0_39 = arith.constant 0 : index
    %33 = vector.load %arg2[%c4, %c0_38, %c0_39] : memref<9x128x128xbf16, #tpu.memory_space<vmem>>, vector<1x128x128xbf16>
    %34 = vector.shape_cast %33 : vector<1x128x128xbf16> to vector<128x128xbf16>
    %cst_40 = arith.constant dense<0.000000e+00> : vector<256x128xf32>
    %35 = tpu.matmul %32, %34, %cst_40 {dimension_numbers = #tpu.dot_dimension_numbers<[1], [0], [0], [1], [0, 0, 1, 1], [], []>} : vector<256x128xbf16>, vector<128x128xbf16>, vector<256x128xf32> -> vector<256x128xf32>
    %36 = arith.addf %30, %35 : vector<256x128xf32>
    %c1_41 = arith.constant 1 : index
    %c2_42 = arith.constant 2 : index
    %c0_43 = arith.constant 0 : index
    %37 = vector.load %arg8[%c1_41, %c2_42, %c0_43] : memref<18x18x128xbf16, #tpu.memory_space<vmem>>, vector<16x16x128xbf16>
    %38 = vector.shape_cast %37 : vector<16x16x128xbf16> to vector<256x128xbf16>
    %c5 = arith.constant 5 : index
    %c0_44 = arith.constant 0 : index
    %c0_45 = arith.constant 0 : index
    %39 = vector.load %arg2[%c5, %c0_44, %c0_45] : memref<9x128x128xbf16, #tpu.memory_space<vmem>>, vector<1x128x128xbf16>
    %40 = vector.shape_cast %39 : vector<1x128x128xbf16> to vector<128x128xbf16>
    %cst_46 = arith.constant dense<0.000000e+00> : vector<256x128xf32>
    %41 = tpu.matmul %38, %40, %cst_46 {dimension_numbers = #tpu.dot_dimension_numbers<[1], [0], [0], [1], [0, 0, 1, 1], [], []>} : vector<256x128xbf16>, vector<128x128xbf16>, vector<256x128xf32> -> vector<256x128xf32>
    %42 = arith.addf %36, %41 : vector<256x128xf32>
    %c2_47 = arith.constant 2 : index
    %c0_48 = arith.constant 0 : index
    %c0_49 = arith.constant 0 : index
    %43 = vector.load %arg8[%c2_47, %c0_48, %c0_49] : memref<18x18x128xbf16, #tpu.memory_space<vmem>>, vector<16x16x128xbf16>
    %44 = vector.shape_cast %43 : vector<16x16x128xbf16> to vector<256x128xbf16>
    %c6 = arith.constant 6 : index
    %c0_50 = arith.constant 0 : index
    %c0_51 = arith.constant 0 : index
    %45 = vector.load %arg2[%c6, %c0_50, %c0_51] : memref<9x128x128xbf16, #tpu.memory_space<vmem>>, vector<1x128x128xbf16>
    %46 = vector.shape_cast %45 : vector<1x128x128xbf16> to vector<128x128xbf16>
    %cst_52 = arith.constant dense<0.000000e+00> : vector<256x128xf32>
    %47 = tpu.matmul %44, %46, %cst_52 {dimension_numbers = #tpu.dot_dimension_numbers<[1], [0], [0], [1], [0, 0, 1, 1], [], []>} : vector<256x128xbf16>, vector<128x128xbf16>, vector<256x128xf32> -> vector<256x128xf32>
    %48 = arith.addf %42, %47 : vector<256x128xf32>
    %c2_53 = arith.constant 2 : index
    %c1_54 = arith.constant 1 : index
    %c0_55 = arith.constant 0 : index
    %49 = vector.load %arg8[%c2_53, %c1_54, %c0_55] : memref<18x18x128xbf16, #tpu.memory_space<vmem>>, vector<16x16x128xbf16>
    %50 = vector.shape_cast %49 : vector<16x16x128xbf16> to vector<256x128xbf16>
    %c7 = arith.constant 7 : index
    %c0_56 = arith.constant 0 : index
    %c0_57 = arith.constant 0 : index
    %51 = vector.load %arg2[%c7, %c0_56, %c0_57] : memref<9x128x128xbf16, #tpu.memory_space<vmem>>, vector<1x128x128xbf16>
    %52 = vector.shape_cast %51 : vector<1x128x128xbf16> to vector<128x128xbf16>
    %cst_58 = arith.constant dense<0.000000e+00> : vector<256x128xf32>
    %53 = tpu.matmul %50, %52, %cst_58 {dimension_numbers = #tpu.dot_dimension_numbers<[1], [0], [0], [1], [0, 0, 1, 1], [], []>} : vector<256x128xbf16>, vector<128x128xbf16>, vector<256x128xf32> -> vector<256x128xf32>
    %54 = arith.addf %48, %53 : vector<256x128xf32>
    %c2_59 = arith.constant 2 : index
    %c2_60 = arith.constant 2 : index
    %c0_61 = arith.constant 0 : index
    %55 = vector.load %arg8[%c2_59, %c2_60, %c0_61] : memref<18x18x128xbf16, #tpu.memory_space<vmem>>, vector<16x16x128xbf16>
    %56 = vector.shape_cast %55 : vector<16x16x128xbf16> to vector<256x128xbf16>
    %c8 = arith.constant 8 : index
    %c0_62 = arith.constant 0 : index
    %c0_63 = arith.constant 0 : index
    %57 = vector.load %arg2[%c8, %c0_62, %c0_63] : memref<9x128x128xbf16, #tpu.memory_space<vmem>>, vector<1x128x128xbf16>
    %58 = vector.shape_cast %57 : vector<1x128x128xbf16> to vector<128x128xbf16>
    %cst_64 = arith.constant dense<0.000000e+00> : vector<256x128xf32>
    %59 = tpu.matmul %56, %58, %cst_64 {dimension_numbers = #tpu.dot_dimension_numbers<[1], [0], [0], [1], [0, 0, 1, 1], [], []>} : vector<256x128xbf16>, vector<128x128xbf16>, vector<256x128xf32> -> vector<256x128xf32>
    %60 = arith.addf %54, %59 : vector<256x128xf32>
    %c0_65 = arith.constant 0 : index
    %c0_66 = arith.constant 0 : index
    %61 = vector.load %arg3[%c0_65, %c0_66] : memref<1x128xf32, #tpu.memory_space<vmem>>, vector<1x128xf32>
    %62 = vector.broadcast %61 : vector<1x128xf32> to vector<256x128xf32>
    %63 = arith.addf %60, %62 : vector<256x128xf32>
    %cst_67 = arith.constant 0.000000e+00 : f32
    %64 = vector.broadcast %cst_67 : f32 to vector<256x128xf32>
    %65 = arith.cmpf oge, %63, %64 : vector<256x128xf32>
    %c0_68 = arith.constant 0 : index
    %c0_69 = arith.constant 0 : index
    %66 = vector.load %arg4[%c0_68, %c0_69] : memref<1x128xf32, #tpu.memory_space<vmem>>, vector<1x128xf32>
    %67 = vector.broadcast %66 : vector<1x128xf32> to vector<256x128xf32>
    %68 = arith.mulf %67, %63 : vector<256x128xf32>
    %69 = arith.select %65, %63, %68 : vector<256x128xi1>, vector<256x128xf32>
    %cst_70 = arith.constant 0.000000e+00 : bf16
    %70 = vector.broadcast %cst_70 : bf16 to vector<18x18x128xbf16>
    %c0_71 = arith.constant 0 : index
    %c0_72 = arith.constant 0 : index
    %c0_73 = arith.constant 0 : index
    %71 = vector.load %arg9[%c0_71, %c0_72, %c0_73] : memref<18x18x128xbf16, #tpu.memory_space<vmem>>, vector<18x18x128xbf16>
    tpu.vector_store %arg9[%c0_71, %c0_72, %c0_73], %70 {strides = array<i32>} : memref<18x18x128xbf16, #tpu.memory_space<vmem>>, vector<18x18x128xbf16>,
    %72 = vector.shape_cast %69 : vector<256x128xf32> to vector<16x16x128xf32>
    %73 = arith.truncf %72 : vector<16x16x128xf32> to vector<16x16x128xbf16>
    %c1_74 = arith.constant 1 : index
    %c1_75 = arith.constant 1 : index
    %c0_76 = arith.constant 0 : index
    %74 = vector.load %arg9[%c1_74, %c1_75, %c0_76] : memref<18x18x128xbf16, #tpu.memory_space<vmem>>, vector<16x16x128xbf16>
    tpu.vector_store %arg9[%c1_74, %c1_75, %c0_76], %73 {strides = array<i32>} : memref<18x18x128xbf16, #tpu.memory_space<vmem>>, vector<16x16x128xbf16>,
    %cst_77 = arith.constant 0.000000e+00 : f32
    %75 = vector.broadcast %cst_77 : f32 to vector<256x128xf32>
    %c0_78 = arith.constant 0 : index
    %c0_79 = arith.constant 0 : index
    %c0_80 = arith.constant 0 : index
    %76 = vector.load %arg9[%c0_78, %c0_79, %c0_80] : memref<18x18x128xbf16, #tpu.memory_space<vmem>>, vector<16x16x128xbf16>
    %77 = vector.shape_cast %76 : vector<16x16x128xbf16> to vector<256x128xbf16>
    %c0_81 = arith.constant 0 : index
    %c0_82 = arith.constant 0 : index
    %c0_83 = arith.constant 0 : index
    %78 = vector.load %arg5[%c0_81, %c0_82, %c0_83] : memref<9x128x128xbf16, #tpu.memory_space<vmem>>, vector<1x128x128xbf16>
    %79 = vector.shape_cast %78 : vector<1x128x128xbf16> to vector<128x128xbf16>
    %cst_84 = arith.constant dense<0.000000e+00> : vector<256x128xf32>
    %80 = tpu.matmul %77, %79, %cst_84 {dimension_numbers = #tpu.dot_dimension_numbers<[1], [0], [0], [1], [0, 0, 1, 1], [], []>} : vector<256x128xbf16>, vector<128x128xbf16>, vector<256x128xf32> -> vector<256x128xf32>
    %81 = arith.addf %75, %80 : vector<256x128xf32>
    %c0_85 = arith.constant 0 : index
    %c1_86 = arith.constant 1 : index
    %c0_87 = arith.constant 0 : index
    %82 = vector.load %arg9[%c0_85, %c1_86, %c0_87] : memref<18x18x128xbf16, #tpu.memory_space<vmem>>, vector<16x16x128xbf16>
    %83 = vector.shape_cast %82 : vector<16x16x128xbf16> to vector<256x128xbf16>
    %c1_88 = arith.constant 1 : index
    %c0_89 = arith.constant 0 : index
    %c0_90 = arith.constant 0 : index
    %84 = vector.load %arg5[%c1_88, %c0_89, %c0_90] : memref<9x128x128xbf16, #tpu.memory_space<vmem>>, vector<1x128x128xbf16>
    %85 = vector.shape_cast %84 : vector<1x128x128xbf16> to vector<128x128xbf16>
    %cst_91 = arith.constant dense<0.000000e+00> : vector<256x128xf32>
    %86 = tpu.matmul %83, %85, %cst_91 {dimension_numbers = #tpu.dot_dimension_numbers<[1], [0], [0], [1], [0, 0, 1, 1], [], []>} : vector<256x128xbf16>, vector<128x128xbf16>, vector<256x128xf32> -> vector<256x128xf32>
    %87 = arith.addf %81, %86 : vector<256x128xf32>
    %c0_92 = arith.constant 0 : index
    %c2_93 = arith.constant 2 : index
    %c0_94 = arith.constant 0 : index
    %88 = vector.load %arg9[%c0_92, %c2_93, %c0_94] : memref<18x18x128xbf16, #tpu.memory_space<vmem>>, vector<16x16x128xbf16>
    %89 = vector.shape_cast %88 : vector<16x16x128xbf16> to vector<256x128xbf16>
    %c2_95 = arith.constant 2 : index
    %c0_96 = arith.constant 0 : index
    %c0_97 = arith.constant 0 : index
    %90 = vector.load %arg5[%c2_95, %c0_96, %c0_97] : memref<9x128x128xbf16, #tpu.memory_space<vmem>>, vector<1x128x128xbf16>
    %91 = vector.shape_cast %90 : vector<1x128x128xbf16> to vector<128x128xbf16>
    %cst_98 = arith.constant dense<0.000000e+00> : vector<256x128xf32>
    %92 = tpu.matmul %89, %91, %cst_98 {dimension_numbers = #tpu.dot_dimension_numbers<[1], [0], [0], [1], [0, 0, 1, 1], [], []>} : vector<256x128xbf16>, vector<128x128xbf16>, vector<256x128xf32> -> vector<256x128xf32>
    %93 = arith.addf %87, %92 : vector<256x128xf32>
    %c1_99 = arith.constant 1 : index
    %c0_100 = arith.constant 0 : index
    %c0_101 = arith.constant 0 : index
    %94 = vector.load %arg9[%c1_99, %c0_100, %c0_101] : memref<18x18x128xbf16, #tpu.memory_space<vmem>>, vector<16x16x128xbf16>
    %95 = vector.shape_cast %94 : vector<16x16x128xbf16> to vector<256x128xbf16>
    %c3_102 = arith.constant 3 : index
    %c0_103 = arith.constant 0 : index
    %c0_104 = arith.constant 0 : index
    %96 = vector.load %arg5[%c3_102, %c0_103, %c0_104] : memref<9x128x128xbf16, #tpu.memory_space<vmem>>, vector<1x128x128xbf16>
    %97 = vector.shape_cast %96 : vector<1x128x128xbf16> to vector<128x128xbf16>
    %cst_105 = arith.constant dense<0.000000e+00> : vector<256x128xf32>
    %98 = tpu.matmul %95, %97, %cst_105 {dimension_numbers = #tpu.dot_dimension_numbers<[1], [0], [0], [1], [0, 0, 1, 1], [], []>} : vector<256x128xbf16>, vector<128x128xbf16>, vector<256x128xf32> -> vector<256x128xf32>
    %99 = arith.addf %93, %98 : vector<256x128xf32>
    %c1_106 = arith.constant 1 : index
    %c1_107 = arith.constant 1 : index
    %c0_108 = arith.constant 0 : index
    %100 = vector.load %arg9[%c1_106, %c1_107, %c0_108] : memref<18x18x128xbf16, #tpu.memory_space<vmem>>, vector<16x16x128xbf16>
    %101 = vector.shape_cast %100 : vector<16x16x128xbf16> to vector<256x128xbf16>
    %c4_109 = arith.constant 4 : index
    %c0_110 = arith.constant 0 : index
    %c0_111 = arith.constant 0 : index
    %102 = vector.load %arg5[%c4_109, %c0_110, %c0_111] : memref<9x128x128xbf16, #tpu.memory_space<vmem>>, vector<1x128x128xbf16>
    %103 = vector.shape_cast %102 : vector<1x128x128xbf16> to vector<128x128xbf16>
    %cst_112 = arith.constant dense<0.000000e+00> : vector<256x128xf32>
    %104 = tpu.matmul %101, %103, %cst_112 {dimension_numbers = #tpu.dot_dimension_numbers<[1], [0], [0], [1], [0, 0, 1, 1], [], []>} : vector<256x128xbf16>, vector<128x128xbf16>, vector<256x128xf32> -> vector<256x128xf32>
    %105 = arith.addf %99, %104 : vector<256x128xf32>
    %c1_113 = arith.constant 1 : index
    %c2_114 = arith.constant 2 : index
    %c0_115 = arith.constant 0 : index
    %106 = vector.load %arg9[%c1_113, %c2_114, %c0_115] : memref<18x18x128xbf16, #tpu.memory_space<vmem>>, vector<16x16x128xbf16>
    %107 = vector.shape_cast %106 : vector<16x16x128xbf16> to vector<256x128xbf16>
    %c5_116 = arith.constant 5 : index
    %c0_117 = arith.constant 0 : index
    %c0_118 = arith.constant 0 : index
    %108 = vector.load %arg5[%c5_116, %c0_117, %c0_118] : memref<9x128x128xbf16, #tpu.memory_space<vmem>>, vector<1x128x128xbf16>
    %109 = vector.shape_cast %108 : vector<1x128x128xbf16> to vector<128x128xbf16>
    %cst_119 = arith.constant dense<0.000000e+00> : vector<256x128xf32>
    %110 = tpu.matmul %107, %109, %cst_119 {dimension_numbers = #tpu.dot_dimension_numbers<[1], [0], [0], [1], [0, 0, 1, 1], [], []>} : vector<256x128xbf16>, vector<128x128xbf16>, vector<256x128xf32> -> vector<256x128xf32>
    %111 = arith.addf %105, %110 : vector<256x128xf32>
    %c2_120 = arith.constant 2 : index
    %c0_121 = arith.constant 0 : index
    %c0_122 = arith.constant 0 : index
    %112 = vector.load %arg9[%c2_120, %c0_121, %c0_122] : memref<18x18x128xbf16, #tpu.memory_space<vmem>>, vector<16x16x128xbf16>
    %113 = vector.shape_cast %112 : vector<16x16x128xbf16> to vector<256x128xbf16>
    %c6_123 = arith.constant 6 : index
    %c0_124 = arith.constant 0 : index
    %c0_125 = arith.constant 0 : index
    %114 = vector.load %arg5[%c6_123, %c0_124, %c0_125] : memref<9x128x128xbf16, #tpu.memory_space<vmem>>, vector<1x128x128xbf16>
    %115 = vector.shape_cast %114 : vector<1x128x128xbf16> to vector<128x128xbf16>
    %cst_126 = arith.constant dense<0.000000e+00> : vector<256x128xf32>
    %116 = tpu.matmul %113, %115, %cst_126 {dimension_numbers = #tpu.dot_dimension_numbers<[1], [0], [0], [1], [0, 0, 1, 1], [], []>} : vector<256x128xbf16>, vector<128x128xbf16>, vector<256x128xf32> -> vector<256x128xf32>
    %117 = arith.addf %111, %116 : vector<256x128xf32>
    %c2_127 = arith.constant 2 : index
    %c1_128 = arith.constant 1 : index
    %c0_129 = arith.constant 0 : index
    %118 = vector.load %arg9[%c2_127, %c1_128, %c0_129] : memref<18x18x128xbf16, #tpu.memory_space<vmem>>, vector<16x16x128xbf16>
    %119 = vector.shape_cast %118 : vector<16x16x128xbf16> to vector<256x128xbf16>
    %c7_130 = arith.constant 7 : index
    %c0_131 = arith.constant 0 : index
    %c0_132 = arith.constant 0 : index
    %120 = vector.load %arg5[%c7_130, %c0_131, %c0_132] : memref<9x128x128xbf16, #tpu.memory_space<vmem>>, vector<1x128x128xbf16>
    %121 = vector.shape_cast %120 : vector<1x128x128xbf16> to vector<128x128xbf16>
    %cst_133 = arith.constant dense<0.000000e+00> : vector<256x128xf32>
    %122 = tpu.matmul %119, %121, %cst_133 {dimension_numbers = #tpu.dot_dimension_numbers<[1], [0], [0], [1], [0, 0, 1, 1], [], []>} : vector<256x128xbf16>, vector<128x128xbf16>, vector<256x128xf32> -> vector<256x128xf32>
    %123 = arith.addf %117, %122 : vector<256x128xf32>
    %c2_134 = arith.constant 2 : index
    %c2_135 = arith.constant 2 : index
    %c0_136 = arith.constant 0 : index
    %124 = vector.load %arg9[%c2_134, %c2_135, %c0_136] : memref<18x18x128xbf16, #tpu.memory_space<vmem>>, vector<16x16x128xbf16>
    %125 = vector.shape_cast %124 : vector<16x16x128xbf16> to vector<256x128xbf16>
    %c8_137 = arith.constant 8 : index
    %c0_138 = arith.constant 0 : index
    %c0_139 = arith.constant 0 : index
    %126 = vector.load %arg5[%c8_137, %c0_138, %c0_139] : memref<9x128x128xbf16, #tpu.memory_space<vmem>>, vector<1x128x128xbf16>
    %127 = vector.shape_cast %126 : vector<1x128x128xbf16> to vector<128x128xbf16>
    %cst_140 = arith.constant dense<0.000000e+00> : vector<256x128xf32>
    %128 = tpu.matmul %125, %127, %cst_140 {dimension_numbers = #tpu.dot_dimension_numbers<[1], [0], [0], [1], [0, 0, 1, 1], [], []>} : vector<256x128xbf16>, vector<128x128xbf16>, vector<256x128xf32> -> vector<256x128xf32>
    %129 = arith.addf %123, %128 : vector<256x128xf32>
    %c0_141 = arith.constant 0 : index
    %c0_142 = arith.constant 0 : index
    %130 = vector.load %arg6[%c0_141, %c0_142] : memref<1x128xf32, #tpu.memory_space<vmem>>, vector<1x128xf32>
    %131 = vector.broadcast %130 : vector<1x128xf32> to vector<256x128xf32>
    %132 = arith.addf %129, %131 : vector<256x128xf32>
    %133 = vector.shape_cast %132 : vector<256x128xf32> to vector<16x16x128xf32>
    %134 = arith.addf %1, %133 : vector<16x16x128xf32>
    %c0_143 = arith.constant 0 : index
    %c0_144 = arith.constant 0 : index
    %c0_145 = arith.constant 0 : index
    %c0_146 = arith.constant 0 : index
    %135 = vector.load %arg7[%c0_143, %c0_144, %c0_145, %c0_146] : memref<1x16x16x128xf32, #tpu.memory_space<vmem>>, vector<1x16x16x128xf32>
    %136 = vector.shape_cast %135 : vector<1x16x16x128xf32> to vector<16x16x128xf32>
    %137 = vector.shape_cast %134 : vector<16x16x128xf32> to vector<1x16x16x128xf32>
    tpu.vector_store %arg7[%c0_143, %c0_144, %c0_145, %c0_146], %137 {strides = array<i32>} : memref<1x16x16x128xf32, #tpu.memory_space<vmem>>, vector<1x16x16x128xf32>,
    return
  }
  func.func @transform_0(%arg0: i32) -> (i32, i32, i32, i32) {
    %c0_i32 = arith.constant 0 : i32
    %c0_i32_0 = arith.constant 0 : i32
    %c0_i32_1 = arith.constant 0 : i32
    %c0_i32_2 = arith.constant 0 : i32
    return %arg0, %c0_i32, %c0_i32_0, %c0_i32_1 : i32, i32, i32, i32
  }
  func.func @transform_1(%arg0: i32) -> (i32, i32, i32) {
    %c0_i32 = arith.constant 0 : i32
    %c0_i32_0 = arith.constant 0 : i32
    %c0_i32_1 = arith.constant 0 : i32
    %c0_i32_2 = arith.constant 0 : i32
    return %c0_i32, %c0_i32_0, %c0_i32_1 : i32, i32, i32
  }
  func.func @transform_2(%arg0: i32) -> (i32, i32) {
    %c0_i32 = arith.constant 0 : i32
    %c0_i32_0 = arith.constant 0 : i32
    %c0_i32_1 = arith.constant 0 : i32
    return %c0_i32, %c0_i32_0 : i32, i32
  }
  func.func @transform_3(%arg0: i32) -> (i32, i32) {
    %c0_i32 = arith.constant 0 : i32
    %c0_i32_0 = arith.constant 0 : i32
    %c0_i32_1 = arith.constant 0 : i32
    return %c0_i32, %c0_i32_0 : i32, i32
  }
  func.func @transform_4(%arg0: i32) -> (i32, i32, i32) {
    %c0_i32 = arith.constant 0 : i32
    %c0_i32_0 = arith.constant 0 : i32
    %c0_i32_1 = arith.constant 0 : i32
    %c0_i32_2 = arith.constant 0 : i32
    return %c0_i32, %c0_i32_0, %c0_i32_1 : i32, i32, i32
  }
  func.func @transform_5(%arg0: i32) -> (i32, i32) {
    %c0_i32 = arith.constant 0 : i32
    %c0_i32_0 = arith.constant 0 : i32
    %c0_i32_1 = arith.constant 0 : i32
    return %c0_i32, %c0_i32_0 : i32, i32
  }
  func.func @transform_6(%arg0: i32) -> (i32, i32, i32, i32) {
    %c0_i32 = arith.constant 0 : i32
    %c0_i32_0 = arith.constant 0 : i32
    %c0_i32_1 = arith.constant 0 : i32
    %c0_i32_2 = arith.constant 0 : i32
    return %arg0, %c0_i32, %c0_i32_0, %c0_i32_1 : i32, i32, i32, i32
  }
}

</mosaic_0001>

<bundles_post_ra>
// kernel: residual_block_forward.1
= control target key start
LH: loop header
LB: loop body
LE: loop exit
PB: predicated region body
PF: predicated region fallthrough
CT: control target
= control target key end

     0   :  { %11 = vsyncpa [#allocation5], 0  ;;  %s14453_s21 = smov 0   ;;  %s18007_s0 = inlined_call_operand.vmem [shape: f32[2,16,16,128], index: 0, kind: input, shape index: {}]   ;;  %s18008_s1 = inlined_call_operand.vmem [shape: bf16[9,128,128], index: 1, kind: input, shape index: {}]   ;;  %s18009_s2 = inlined_call_operand.vmem [shape: f32[1,128], index: 2, kind: input, shape index: {}]   ;;  %s18010_s3 = inlined_call_operand.vmem [shape: f32[1,128], index: 3, kind: input, shape index: {}]   ;;  %s18011_s4 = inlined_call_operand.hbm [shape: bf16[9,128,128], index: 4, kind: input, shape index: {}]   ;;  %s18012_s5 = inlined_call_operand.vmem [shape: f32[1,128], index: 5, kind: input, shape index: {}]   ;;  %s18013_s6 = inlined_call_operand.vmem [shape: f32[2,16,16,128], index: 6, kind: output, shape index: {}]  }
   0x1 LB: > { %s14459_s22 = sadd.s32 4294967295, %s14412_s21   ;;  %p11398_p0 = scmp.ge.s32.totalorder %s14412_s21, 1  ;;  %s14412_s21 = sphi %s14453_s21, %s17_s21  }
   0x2   : > { %p179_p1 = scmp.lt.s32.totalorder %s14412_s21, 3  ;;  %s14414_s23 = smov [#allocation4]  }
   0x3   : > { %s200_s24 = sshll.u32 %s14414_s23, 4  ;;  %p18014_p3 = scmp.eq.s32.totalorder %s14459_s22, 0  ;;  %s201_s24 = int_to_ptr.vmem [resolvable:$true] %s200_s24 }
   0x4   : > { %p14463_p2 = pnand %p11398_p0, %p179_p1  ;;  %s14374_s29 = scalar_lea.hbm %s18011_s4, 9216 }
   0x5   : > { %p14375_p6 = scmp.ne.s32.totalorder %s18011_s4, %s14374_s29  ;;  %p14381_p10 = scmp.lt.u32.totalorder %s14374_s29, %s18011_s4 }
   0x6   : > { %s18119_s25 = scalar_select %p14463_p2, 1, 0 }
   0x7   : > { %p14010_p4 = pneg %p14463_p2 }
   0x9   : > { %p14472_p5 = pnand %p18014_p3, %p14010_p4 }
   0xb   : > { %p14376_p7 = pneg %p14472_p5 }
   0xd   : > { %p14377_p8 = pnand %p14376_p7, %p14375_p6 }
   0xf   : > { %p14378_p9 = pneg %p14377_p8 }
  0x11   : > { %p14383_p11 = pnand %p14381_p10, %p14378_p9 }
  0x13   : > { %14386 = shalt.err (!%p14383_p11)
}
  0x14   : > { %s14387_s10 = scalar_lea.vmem %s201_s24, 9216  ;;  %p14395_p1 = scmp.lt.s32.totalorder %s201_s24, %s201_s24 }
  0x15   : > { %p14388_p12 = scmp.ne.s32.totalorder %s201_s24, %s14387_s10  ;;  %p14396_p4 = scmp.lt.s32.totalorder %s14387_s10, %s14387_s10 }
  0x17   : > { %p14390_p13 = pnand %p14388_p12, %p14376_p7  ;;  %p14397_p3 = por %p14396_p4, %p14395_p1 }
  0x19   : > { %p14391_p0 = pneg %p14390_p13 }
  0x1b   : > { %p14398_p2 = pnand %p14397_p3, %p14391_p0 }
  0x1d   : > { %14401 = shalt.err (!%p14398_p2)
}
  0x1e   : > { %s14415_s11 = smov 64   ;;  %s14416_s12 = smov 4  }
  0x1f   : > { %14013 = dma.hbm_to_vmem [thread:$0]  (!%p14472_p5), %s18011_s4, 9216, %s201_s24, [#allocation5], %s14415_s11, %s14415_s11, %s14416_s12  }
  0x20   : > { %p18121_p6 = scmp.ne.s32.totalorder %s18119_s25, 0 }
  0x22   : > { %227 = sbr.rel (%p18121_p6) target bundleno = 1793 (0x701), region = 44 }
  0x29   : > { %p18122_p8 = scmp.eq.s32.totalorder %s14459_s22, 0 }
  0x2b   : > { %14407 = dma.done.wait (%p18122_p8), [#allocation5], 9216   ;;  %p18123_p7 = pmov %p18122_p8 }
  0x2c   : > { %v14417_v0 = vmov 0   ;;  %p257_p2 = scmp.lt.s32.totalorder %s14459_s22, 1  ;;  %v14028_v1 = vld [vmem:[%s18008_s1 + $0x40] sm:$0xff]   ;;  %v14029_v2 = vld [vmem:[%s18008_s1 + $0x48] sm:$0xff]   ;;  %vm955_vm0 = vsmask.f32 3328 }
  0x2d   : > { %14409 = vsyncadd (%p18123_p7), [#allocation5], 4294958080  ;;  %300 = vst [vmem:[#allocation2] sm:$0xf] %v14417_v0  ;;  %vm956_vm1 = vsmask.f32 7440  ;;  %12630 = vmatprep.subr.bf16.mxu0 %v14028_v1 }
  0x2e   : > { %301 = vst [vmem:[#allocation2 + $0x4] sm:$0xf] %v14417_v0  ;;  %302 = vst [vmem:[#allocation2 + $0x8] sm:$0x1] %v14417_v0  ;;  %s18393_s22 = smov (!%p257_p2, %s14459_s22), 1  ;;  %12631 = vmatpush3.bf16.msra.mxu0 %v14028_v1  ;;  %v14030_v3 = vld [vmem:[%s18008_s1 + $0x50] sm:$0xff]  }
  0x2f   : > { %303 = vst [vmem:[#allocation2 + $0xc] sm:$0xf] %v14417_v0  ;;  %304 = vst [vmem:[#allocation2 + $0x10] sm:$0xf] %v14417_v0  ;;  %vm450_vm2 = vsmask.f32 256  ;;  %12632 = vmatprep.subr.bf16.mxu0 %v14029_v2 }
  0x30   : > { %305 = vst [vmem:[#allocation2 + $0x14] sm:$0x1] %v14417_v0  ;;  %306 = vst [vmem:[#allocation2 + $0x18] sm:$0xf] %v14417_v0  ;;  %s12132_s19 = sshll.u32 %s18393_s22, 8  ;;  %v14031_v4 = vld [vmem:[%s18008_s1 + $0x58] sm:$0xff]  }
  0x31   : > { %307 = vst [vmem:[#allocation2 + $0x1c] sm:$0xf] %v14417_v0  ;;  %308 = vst [vmem:[#allocation2 + $0x20] sm:$0x1] %v14417_v0  ;;  %vm451_vm3 = vsmask.f32 4368  ;;  %s14625_s26 = scalar_lea.vmem %s18007_s0, %s12132_s19  ;;  %s17907_s13 = scalar_lea.vmem %s18013_s6, %s12132_s19 }
  0x32   : > { %309 = vst [vmem:[#allocation2 + $0x24] sm:$0xf] %v14417_v0  ;;  %310 = vst [vmem:[#allocation2 + $0x28] sm:$0xf] %v14417_v0  ;;  %vm775_vm4 = vsmask.f32 7938  ;;  %12633 = vmatpush3.bf16.msra.mxu0 %v14029_v2 }
  0x33   : > { %311 = vst [vmem:[#allocation2 + $0x2c] sm:$0x1] %v14417_v0  ;;  %312 = vst [vmem:[#allocation2 + $0x30] sm:$0xf] %v14417_v0  ;;  %vm774_vm5 = vcmask 1043456   ;;  %12634 = vmatprep.subr.bf16.mxu0 %v14030_v3  ;;  %v268_v12 = vld [vmem:[%s14625_s26] sm:$0xff] }
  0x34   : > { %313 = vst [vmem:[#allocation2 + $0x34] sm:$0xf] %v14417_v0  ;;  %314 = vst [vmem:[#allocation2 + $0x38] sm:$0x1] %v14417_v0  ;;  %v891_v5 = vld [vmem:[#allocation2] sm:$0xf]  ;;  %v12134_v15 = vpack.c.bf16 %v268_v12, %v268_v12 }
  0x35   : > { %315 = vst [vmem:[#allocation2 + $0x3c] sm:$0xf] %v14417_v0  ;;  %316 = vst [vmem:[#allocation2 + $0x40] sm:$0xf] %v14417_v0  ;;  %v892_v6 = vld [vmem:[#allocation2 + $0x4] sm:$0xf] }
  0x36   : > { %317 = vst [vmem:[#allocation2 + $0x44] sm:$0x1] %v14417_v0  ;;  %318 = vst [vmem:[#allocation2 + $0x48] sm:$0xf] %v14417_v0  ;;  %v939_v7 = vld [vmem:[#allocation2 + $0x8] sm:$0x1]  ;;  %12635 = vmatpush3.bf16.msra.mxu0 %v14030_v3 }
  0x37   : > { %319 = vst [vmem:[#allocation2 + $0x4c] sm:$0xf] %v14417_v0  ;;  %320 = vst [vmem:[#allocation2 + $0x50] sm:$0x1] %v14417_v0  ;;  %v959_v8 = vshrl.u32 %v891_v5, 16  ;;  %v962_v9 = vshll.u32 %v891_v5, 16  ;;  %12636 = vmatprep.subr.bf16.mxu0 %v14031_v4 }
  0x38   : > { %321 = vst [vmem:[#allocation2 + $0x54] sm:$0xf] %v14417_v0  ;;  %322 = vst [vmem:[#allocation2 + $0x58] sm:$0xf] %v14417_v0  ;;  %v968_v10 = vshll.u32 %v892_v6, 16  ;;  %v972_v11 = vshrl.u32 %v892_v6, 16 }
  0x39   : > { %323 = vst [vmem:[#allocation2 + $0x5c] sm:$0x1] %v14417_v0  ;;  %324 = vst [vmem:[#allocation2 + $0x60] sm:$0xf] %v14417_v0  ;;  %v269_v13 = vld [vmem:[%s14625_s26 + $0x8] sm:$0xff]  ;;  %v978_v14 = vshll.u32 %v939_v7, 16 }
  0x3a   : > { %325 = vst [vmem:[#allocation2 + $0x64] sm:$0xf] %v14417_v0  ;;  %326 = vst [vmem:[#allocation2 + $0x68] sm:$0x1] %v14417_v0  ;;  %v12135_v16 = vpack.c.bf16 %v269_v13, %v269_v13  ;;  %vm781_vm6 = vcmask 1040384   ;;  %v961_v17 = vrot.slane %v959_v8, 4  ;;  %12637 = vmatpush3.bf16.msra.mxu0 %v14031_v4 }
  0x3b   : > { %327 = vst [vmem:[#allocation2 + $0x6c] sm:$0xf] %v14417_v0  ;;  %328 = vst [vmem:[#allocation2 + $0x70] sm:$0xf] %v14417_v0  ;;  %v964_v18 = vrot.slane %v962_v9, 5  ;;  %v970_v19 = vrot.slane %v968_v10, 5 }
  0x3c   : > { %329 = vst [vmem:[#allocation2 + $0x74] sm:$0x1] %v14417_v0  ;;  %330 = vst [vmem:[#allocation2 + $0x78] sm:$0xf] %v14417_v0  ;;  %v974_v20 = vrot.slane %v972_v11, 4  ;;  %v14032_v21 = vld [vmem:[%s18008_s1 + $0x60] sm:$0xff]  }
  0x3d   : > { %331 = vst [vmem:[#allocation2 + $0x7c] sm:$0xf] %v14417_v0  ;;  %332 = vst [vmem:[#allocation2 + $0x80] sm:$0x1] %v14417_v0  ;;  %v454_v23 = vshrl.u32 %v12134_v15, 16  ;;  %v457_v24 = vshll.u32 %v12134_v15, 16  ;;  %v965_v26 = vor.u32 %v964_v18, %v961_v17  ;;  %12638 = vmatprep.subr.bf16.mxu0 %v14032_v21 }
  0x3e   : > { %333 = vst [vmem:[#allocation2 + $0x84] sm:$0xf] %v14417_v0  ;;  %334 = vst [vmem:[#allocation2 + $0x88] sm:$0xf] %v14417_v0  ;;  %v462_v25 = vshrl.u32 %v12135_v16, 16  ;;  %v975_v27 = vor.u32 %v974_v20, %v970_v19  ;;  %v980_v28 = vrot.slane %v978_v14, 5  ;;  %12639 = vmatpush3.bf16.msra.mxu0 %v14032_v21 }
  0x3f   : > { %335 = vst [vmem:[#allocation2 + $0x8c] sm:$0x1] %v14417_v0  ;;  %336 = vst [vmem:[#allocation2 + $0x90] sm:$0xf] %v14417_v0  ;;  %v18126_v29 = vmov 0  ;;  %v465_v30 = vshll.u32 %v12135_v16, 16 }
  0x40   : > { %337 = vst [vmem:[#allocation2 + $0x94] sm:$0xf] %v14417_v0  ;;  %338 = vst [vmem:[#allocation2 + $0x98] sm:$0x1] %v14417_v0  ;;  %v270_v31 = vld [vmem:[%s14625_s26 + $0x10] sm:$0xff]  ;;  %v271_v32 = vld [vmem:[%s14625_s26 + $0x18] sm:$0xff] }
  0x41   : > { %339 = vst [vmem:[#allocation2 + $0x9c] sm:$0xf] %v14417_v0  ;;  %340 = vst [vmem:[#allocation2 + $0xa0] sm:$0xf] %v14417_v0  ;;  %v456_v33 = vrot.slane %v454_v23, 7  ;;  %v464_v34 = vrot.slane %v462_v25, 7  ;;  %v12136_v36 = vpack.c.bf16 %v270_v31, %v270_v31  ;;  %v12137_v42 = vpack.c.bf16 %v271_v32, %v271_v32 }
  0x42   : > { %341 = vst [vmem:[#allocation2 + $0xa4] sm:$0x1] %v14417_v0  ;;  %342 = vst [vmem:[#allocation2 + $0xa8] sm:$0xf] %v14417_v0  ;;  %v18129_v35 = vmov 0  ;;  %v966_v37 = vrot.slane %v965_v26, 4 }
  0x43   : > { %343 = vst [vmem:[#allocation2 + $0xac] sm:$0xf] %v14417_v0  ;;  %344 = vst [vmem:[#allocation2 + $0xb0] sm:$0x1] %v14417_v0  ;;  %v976_v38 = vrot.slane %v975_v27, 4  ;;  %v18132_v40 = vmov 0  ;;  %v459_v44 = vor.u32 %v457_v24, %v456_v33  ;;  %v467_v46 = vor.u32 %v465_v30, %v464_v34 }
  0x44   : > { %345 = vst [vmem:[#allocation2 + $0xb4] sm:$0xf] %v14417_v0  ;;  %346 = vst [vmem:[#allocation2 + $0xb8] sm:$0xf] %v14417_v0  ;;  %v777_v39 = vld [vmem:[#allocation2 + $0xc] sm:$0xf] }
  0x45   : > { %347 = vst [vmem:[#allocation2 + $0xbc] sm:$0x1] %v14417_v0  ;;  %348 = vst [vmem:[#allocation2 + $0xc0] sm:$0xf] %v14417_v0  ;;  %v783_v41 = vld [vmem:[#allocation2 + $0x14] sm:$0x1] }
  0x46   : > { %349 = vst [vmem:[#allocation2 + $0xc4] sm:$0xf] %v14417_v0  ;;  %350 = vst [vmem:[#allocation2 + $0xc8] sm:$0x1] %v14417_v0  ;;  %v14033_v43 = vld [vmem:[%s18008_s1 + $0x68] sm:$0xff]   ;;  %v460_v45 = vrot.slane %v456_v33, 4 }
  0x47   : > { %351 = vst [vmem:[#allocation2 + $0xcc] sm:$0xf] %v14417_v0  ;;  %352 = vst [vmem:[#allocation2 + $0xd0] sm:$0xf] %v14417_v0  ;;  %v469_v47 = vrot.slane %v464_v34, 4  ;;  %v272_v48 = vld [vmem:[%s14625_s26 + $0x20] sm:$0xff]  ;;  %12640 = vmatprep.subr.bf16.mxu0 %v14033_v43 }
  0x48   : > { %353 = vst [vmem:[#allocation2 + $0xd4] sm:$0x1] %v14417_v0  ;;  %5841 = vst [vmem:[#allocation3] sm:$0xf] %v14417_v0  ;;  %v471_v51 = vshrl.u32 %v12136_v36, 16  ;;  %v474_v52 = vshll.u32 %v12136_v36, 16  ;;  %v12138_v63 = vpack.c.bf16 %v272_v48, %v272_v48  ;;  %12641 = vmatpush3.bf16.msra.mxu0 %v14033_v43 }
  0x49   : > { %5842 = vst [vmem:[#allocation3 + $0x4] sm:$0xf] %v14417_v0  ;;  %5843 = vst [vmem:[#allocation3 + $0x8] sm:$0x1] %v14417_v0  ;;  %v273_v53 = vld [vmem:[%s14625_s26 + $0x28] sm:$0xff]  ;;  %v274_v54 = vld [vmem:[%s14625_s26 + $0x30] sm:$0xff] }
  0x4a   : > { %5844 = vst [vmem:[#allocation3 + $0xc] sm:$0xf] %v14417_v0  ;;  %5845 = vst [vmem:[#allocation3 + $0x10] sm:$0xf] %v14417_v0  ;;  %v275_v59 = vld [vmem:[%s14625_s26 + $0x38] sm:$0xff]  ;;  %v473_v60 = vrot.slane %v471_v51, 7  ;;  %v12139_v2 = vpack.c.bf16 %v273_v53, %v273_v53  ;;  %v12140_v3 = vpack.c.bf16 %v274_v54, %v274_v54 }
  0x4b   : > { %5846 = vst [vmem:[#allocation3 + $0x14] sm:$0x1] %v14417_v0  ;;  %5847 = vst [vmem:[#allocation3 + $0x18] sm:$0xf] %v14417_v0  ;;  %v479_v61 = vshrl.u32 %v12137_v42, 16  ;;  %v482_v62 = vshll.u32 %v12137_v42, 16  ;;  %v14681_v4 = vpack.c.bf16 %v275_v59, %v275_v59 }
  0x4c   : > { %5848 = vst [vmem:[#allocation3 + $0x1c] sm:$0xf] %v14417_v0  ;;  %5849 = vst [vmem:[#allocation3 + $0x20] sm:$0x1] %v14417_v0  ;;  %v786_v1 = vld [vmem:[#allocation2 + $0x18] sm:$0xf]  ;;  %v476_v5 = vor.u32 %v474_v52, %v473_v60 }
  0x4d   : > { %5850 = vst [vmem:[#allocation3 + $0x24] sm:$0xf] %v14417_v0  ;;  %5851 = vst [vmem:[#allocation3 + $0x28] sm:$0xf] %v14417_v0  ;;  %v477_v6 = vrot.slane %v473_v60, 4  ;;  %v481_v7 = vrot.slane %v479_v61, 7 }
  0x4e   : > { %5852 = vst [vmem:[#allocation3 + $0x2c] sm:$0x1] %v14417_v0  ;;  %5853 = vst [vmem:[#allocation3 + $0x30] sm:$0xf] %v14417_v0  ;;  %v488_v8 = vshrl.u32 %v12138_v63, 16  ;;  %v491_v10 = vshll.u32 %v12138_v63, 16 }
  0x4f   : > { %5854 = vst [vmem:[#allocation3 + $0x34] sm:$0xf] %v14417_v0  ;;  %5855 = vst [vmem:[#allocation3 + $0x38] sm:$0x1] %v14417_v0  ;;  %v790_v9 = vld [vmem:[#allocation2 + $0x20] sm:$0x1]  ;;  %v484_v14 = vor.u32 %v482_v62, %v481_v7 }
  0x50   : > { %5856 = vst [vmem:[#allocation3 + $0x3c] sm:$0xf] %v14417_v0  ;;  %5857 = vst [vmem:[#allocation3 + $0x40] sm:$0xf] %v14417_v0  ;;  %v496_v11 = vshrl.u32 %v12139_v2, 16  ;;  %v499_v12 = vshll.u32 %v12139_v2, 16 }
  0x51   : > { %5858 = vst [vmem:[#allocation3 + $0x44] sm:$0x1] %v14417_v0  ;;  %5859 = vst [vmem:[#allocation3 + $0x48] sm:$0xf] %v14417_v0  ;;  %v505_v13 = vshrl.u32 %v12140_v3, 16  ;;  %v486_v15 = vrot.slane %v481_v7, 4 }
  0x52   : > { %5860 = vst [vmem:[#allocation3 + $0x4c] sm:$0xf] %v14417_v0  ;;  %5861 = vst [vmem:[#allocation3 + $0x50] sm:$0x1] %v14417_v0  ;;  %v490_v17 = vrot.slane %v488_v8, 7  ;;  %v276_v18 = vld [vmem:[%s14625_s26 + $0x40] sm:$0xff] }
  0x53   : > { %5862 = vst [vmem:[#allocation3 + $0x54] sm:$0xf] %v14417_v0  ;;  %5863 = vst [vmem:[#allocation3 + $0x58] sm:$0xf] %v14417_v0  ;;  %v498_v20 = vrot.slane %v496_v11, 7  ;;  %v14689_v21 = vrot.slane %v505_v13, 7 }
  0x54   : > { %5864 = vst [vmem:[#allocation3 + $0x5c] sm:$0x1] %v14417_v0  ;;  %5865 = vst [vmem:[#allocation3 + $0x60] sm:$0xf] %v14417_v0  ;;  %v508_v23 = vshll.u32 %v12140_v3, 16  ;;  %v494_v26 = vrot.slane %v490_v17, 4  ;;  %v493_v36 = vor.u32 %v491_v10, %v490_v17 }
  0x55   : > { %5866 = vst [vmem:[#allocation3 + $0x64] sm:$0xf] %v14417_v0  ;;  %5867 = vst [vmem:[#allocation3 + $0x68] sm:$0x1] %v14417_v0  ;;  %v793_v27 = vld [vmem:[#allocation2 + $0x24] sm:$0xf] }
  0x56   : > { %5868 = vst [vmem:[#allocation3 + $0x6c] sm:$0xf] %v14417_v0  ;;  %5869 = vst [vmem:[#allocation3 + $0x70] sm:$0xf] %v14417_v0  ;;  %v513_v30 = vshrl.u32 %v14681_v4, 16  ;;  %v277_v31 = vld [vmem:[%s14625_s26 + $0x48] sm:$0xff] }
  0x57   : > { %5870 = vst [vmem:[#allocation3 + $0x74] sm:$0x1] %v14417_v0  ;;  %5871 = vst [vmem:[#allocation3 + $0x78] sm:$0xf] %v14417_v0  ;;  %v503_v48 = vrot.slane %v498_v20, 4  ;;  %v278_v59 = vld [vmem:[%s14625_s26 + $0x50] sm:$0xff] }
  0x58   : > { %5872 = vst [vmem:[#allocation3 + $0x7c] sm:$0xf] %v14417_v0  ;;  %5873 = vst [vmem:[#allocation3 + $0x80] sm:$0x1] %v14417_v0  ;;  %v800_v54 = vld [vmem:[#allocation2 + $0x30] sm:$0xf]  ;;  %v14720_v11 = vpack.c.bf16 %v278_v59, %v278_v59 }
  0x59   : > { %5874 = vst [vmem:[#allocation3 + $0x84] sm:$0xf] %v14417_v0  ;;  %5875 = vst [vmem:[#allocation3 + $0x88] sm:$0xf] %v14417_v0  ;;  %v515_v63 = vrot.slane %v513_v30, 7  ;;  %vm1985_vm11 = vcmask 1042432  }
  0x5a   : > { %5876 = vst [vmem:[#allocation3 + $0x8c] sm:$0x1] %v14417_v0  ;;  %5877 = vst [vmem:[#allocation3 + $0x90] sm:$0xf] %v14417_v0  ;;  %vm1986_vm12 = vcmask 1046532  }
  0x5b   : > { %5878 = vst [vmem:[#allocation3 + $0x94] sm:$0xf] %v14417_v0  ;;  %5879 = vst [vmem:[#allocation3 + $0x98] sm:$0x1] %v14417_v0 }
  0x5c   : > { %5880 = vst [vmem:[#allocation3 + $0x9c] sm:$0xf] %v14417_v0  ;;  %5881 = vst [vmem:[#allocation3 + $0xa0] sm:$0xf] %v14417_v0 }
  0x5d   : > { %5882 = vst [vmem:[#allocation3 + $0xa4] sm:$0x1] %v14417_v0  ;;  %5883 = vst [vmem:[#allocation3 + $0xa8] sm:$0xf] %v14417_v0 }
  0x5e   : > { %5884 = vst [vmem:[#allocation3 + $0xac] sm:$0xf] %v14417_v0  ;;  %5885 = vst [vmem:[#allocation3 + $0xb0] sm:$0x1] %v14417_v0 }
  0x5f   : > { %5886 = vst [vmem:[#allocation3 + $0xb4] sm:$0xf] %v14417_v0  ;;  %5887 = vst [vmem:[#allocation3 + $0xb8] sm:$0xf] %v14417_v0 }
  0x60   : > { %5888 = vst [vmem:[#allocation3 + $0xbc] sm:$0x1] %v14417_v0  ;;  %5889 = vst [vmem:[#allocation3 + $0xc0] sm:$0xf] %v14417_v0 }
  0x61   : > { %5890 = vst [vmem:[#allocation3 + $0xc4] sm:$0xf] %v14417_v0  ;;  %5891 = vst [vmem:[#allocation3 + $0xc8] sm:$0x1] %v14417_v0 }
  0x62   : > { %5892 = vst [vmem:[#allocation3 + $0xcc] sm:$0xf] %v14417_v0  ;;  %5893 = vst [vmem:[#allocation3 + $0xd0] sm:$0xf] %v14417_v0 }
  0x63   : > { %5894 = vst [vmem:[#allocation3 + $0xd4] sm:$0x1] %v14417_v0  ;;  %vm14637_vm7 = vmor %vm955_vm0, %vm956_vm1  ;;  %v14034_v0 = vld [vmem:[%s18008_s1 + $0x70] sm:$0xff]  }
  0x64   : > { %vm14643_vm8 = vmor %vm450_vm2, %vm451_vm3  ;;  %v971_v49 = vsel %vm14637_vm7, %v966_v37, %v970_v19  ;;  %v981_v50 = vsel %vm14637_vm7, %v976_v38, %v980_v28  ;;  %12642 = vmatprep.subr.bf16.mxu0 %v14034_v0  ;;  %v14035_v19 = vld [vmem:[%s18008_s1 + $0x78] sm:$0xff]   ;;  %v797_v28 = vld [vmem:[#allocation2 + $0x2c] sm:$0x1]  ;;  %v501_v37 = vor.u32 %v499_v12, %v498_v20  ;;  %v510_v38 = vor.u32 %v508_v23, %v14689_v21 }
  0x65   : > { %v18127_v29 = vsel %vm14643_vm8, 4294967295, %v18126_v29  ;;  %vm14651_vm9 = vmand %vm774_vm5, %vm775_vm4  ;;  %v11455_v55 = vcombine.low %v971_v49, %v981_v50  ;;  %v468_v56 = vsel %vm14643_vm8, %v460_v45, %v467_v46  ;;  %v485_v24 = vsel %vm14643_vm8, %v477_v6, %v484_v14  ;;  %12643 = vmatpush3.bf16.msra.mxu0 %v14034_v0  ;;  %v14703_v46 = vld [vmem:[%s18008_s1] sm:$0xff]  }
  0x66   : > { %18128 = vst [vmem:[#allocation7_spill] sm:$0xff] %v18127_v29  ;;  %v18130_v35 = vsel %vm14651_vm9, 4294967295, %v18129_v35  ;;  %vm14657_vm10 = vmand %vm781_vm6, %vm450_vm2  ;;  %v778_v57 = vsel %vm14651_vm9, %v459_v44, %v777_v39  ;;  %v787_v16 = vsel %vm14651_vm9, %v476_v5, %v786_v1  ;;  %v14698_v39 = vpack.c.bf16 %v276_v18, %v276_v18  ;;  %12644 = vmatprep.subr.bf16.mxu0 %v14035_v19 }
  0x67   : > { %18131 = vst [vmem:[#allocation8_spill] sm:$0xff] %v18130_v35  ;;  %v18133_v40 = vsel %vm14657_vm10, 4294967295, %v18132_v40  ;;  %v784_v58 = vsel %vm14657_vm10, %v469_v47, %v783_v41  ;;  %779 = vst [vmem:[#allocation2 + $0xc] sm:$0xf] %v778_v57  ;;  %12646 = vmatprep.mubr.bf16.mxu0 %v11455_v55  ;;  %v791_v25 = vsel %vm14657_vm10, %v486_v15, %v790_v9  ;;  %v516_v0 = vshll.u32 %v14681_v4, 16 }
  0x68   : > { %18134 = vst [vmem:[#allocation9_spill] sm:$0xff] %v18133_v40  ;;  %780 = vst [vmem:[#allocation2 + $0x10] sm:$0xf] %v468_v56  ;;  %v502_v47 = vsel %vm14643_vm8, %v494_v26, %v501_v37  ;;  %v14707_v49 = vpack.c.bf16 %v277_v31, %v277_v31  ;;  %v794_v56 = vsel %vm14651_vm9, %v493_v36, %v793_v27  ;;  %v522_v5 = vshrl.u32 %v14698_v39, 16  ;;  %v14037_v26 = vld [vmem:[%s18008_s1 + $0x8] sm:$0xff]  }
  0x69   : > { %785 = vst [vmem:[#allocation2 + $0x14] sm:$0x1] %v784_v58  ;;  %788 = vst [vmem:[#allocation2 + $0x18] sm:$0xf] %v787_v16  ;;  %v798_v57 = vsel %vm14657_vm10, %v503_v48, %v797_v28  ;;  %v511_v58 = vrot.slane %v14689_v21, 4  ;;  %12645 = vmatpush3.bf16.msra.mxu0 %v14035_v19  ;;  %v801_v3 = vsel %vm14651_vm9, %v510_v38, %v800_v54  ;;  %v279_v19 = vld [vmem:[%s14625_s26 + $0x58] sm:$0xff] }
  0x6a   : > { %789 = vst [vmem:[#allocation2 + $0x1c] sm:$0xf] %v485_v24  ;;  %792 = vst [vmem:[#allocation2 + $0x20] sm:$0x1] %v791_v25  ;;  %12678 = vmatprep.subr.bf16.mxu0 %v14703_v46  ;;  %v518_v10 = vor.u32 %v516_v0, %v515_v63  ;;  %v520_v31 = vrot.slane %v515_v63, 4  ;;  %v14732_v38 = vrot.slane %v522_v5, 7 }
  0x6b   : > { %796 = vst [vmem:[#allocation2 + $0x28] sm:$0xf] %v502_v47  ;;  %795 = vst [vmem:[#allocation2 + $0x24] sm:$0xf] %v794_v56 }
  0x6c   : > { %799 = vst [vmem:[#allocation2 + $0x2c] sm:$0x1] %v798_v57  ;;  %802 = vst [vmem:[#allocation2 + $0x30] sm:$0xf] %v801_v3  ;;  %v519_v18 = vsel %vm14643_vm8, %v511_v58, %v518_v10  ;;  %v528_v10 = vrot.slane %v14732_v38, 4 }
  0x6d   : > { %803 = vst [vmem:[#allocation2 + $0x34] sm:$0xf] %v519_v18  ;;  %vm15052_vm13 = vmor %vm1985_vm11, %vm1986_vm12 }
  0x6e   : > { %v893_v32 = vld [vmem:[#allocation2 + $0xc] sm:$0xf] }
  0x6f   : > { %v894_v33 = vld [vmem:[#allocation2 + $0x10] sm:$0xf]  ;;  %v983_v41 = vshrl.u32 %v893_v32, 16  ;;  %v986_v42 = vshll.u32 %v893_v32, 16  ;;  %v804_v32 = vld [vmem:[#allocation2 + $0x38] sm:$0x1] }
  0x70   : > { %v940_v34 = vld [vmem:[#allocation2 + $0x14] sm:$0x1]  ;;  %v992_v43 = vshll.u32 %v894_v33, 16  ;;  %v996_v44 = vshrl.u32 %v894_v33, 16  ;;  %v895_v62 = vld [vmem:[#allocation2 + $0x18] sm:$0xf] }
  0x71   : > { %v1002_v45 = vshll.u32 %v940_v34, 16  ;;  %v985_v50 = vrot.slane %v983_v41, 4  ;;  %v988_v51 = vrot.slane %v986_v42, 5  ;;  %v1007_v1 = vshrl.u32 %v895_v62, 16  ;;  %v896_v8 = vld [vmem:[#allocation2 + $0x1c] sm:$0xf] }
  0x72   : > { %v994_v52 = vrot.slane %v992_v43, 5  ;;  %v998_v53 = vrot.slane %v996_v44, 4  ;;  %v1010_v2 = vshll.u32 %v895_v62, 16  ;;  %v941_v9 = vld [vmem:[#allocation2 + $0x20] sm:$0x1]  ;;  %v1016_v13 = vshll.u32 %v896_v8, 16 }
  0x73   : > { %v1004_v55 = vrot.slane %v1002_v45, 5  ;;  %v989_v60 = vor.u32 %v988_v51, %v985_v50  ;;  %v1009_v12 = vrot.slane %v1007_v1, 4  ;;  %v1020_v14 = vshrl.u32 %v896_v8, 16  ;;  %v898_v25 = vld [vmem:[#allocation2 + $0x28] sm:$0xf]  ;;  %v14039_v8 = vld [vmem:[%s18008_s1 + $0x18] sm:$0xff]  }
  0x74   : > { %v999_v61 = vor.u32 %v998_v53, %v994_v52  ;;  %v1012_v4 = vrot.slane %v1010_v2, 5  ;;  %v1026_v17 = vshll.u32 %v941_v9, 16  ;;  %v1018_v23 = vrot.slane %v1016_v13, 5  ;;  %v897_v36 = vld [vmem:[#allocation2 + $0x24] sm:$0xf]  ;;  %v14038_v53 = vld [vmem:[%s18008_s1 + $0x10] sm:$0xff]  }
  0x75   : > { %v990_v6 = vrot.slane %v989_v60, 4  ;;  %v1022_v24 = vrot.slane %v1020_v14, 4  ;;  %v1040_v28 = vshll.u32 %v898_v25, 16  ;;  %v1044_v30 = vshrl.u32 %v898_v25, 16  ;;  %v942_v37 = vld [vmem:[#allocation2 + $0x2c] sm:$0x1] }
  0x76   : > { %v1000_v7 = vrot.slane %v999_v61, 4  ;;  %v1013_v21 = vor.u32 %v1012_v4, %v1009_v12  ;;  %v1028_v27 = vrot.slane %v1026_v17, 5  ;;  %v14734_v41 = vpack.c.bf16 %v279_v19, %v279_v19  ;;  %v900_v0 = vld [vmem:[#allocation2 + $0x34] sm:$0xf] }
  0x77   : > { %v995_v15 = vsel %vm14637_vm7, %v990_v6, %v994_v52  ;;  %v1023_v34 = vor.u32 %v1022_v24, %v1018_v23  ;;  %v1031_v42 = vshrl.u32 %v897_v36, 16  ;;  %v1034_v43 = vshll.u32 %v897_v36, 16  ;;  %v899_v52 = vld [vmem:[#allocation2 + $0x30] sm:$0xf] }
  0x78   : > { %v1005_v16 = vsel %vm14637_vm7, %v1000_v7, %v1004_v55  ;;  %v1014_v33 = vrot.slane %v1013_v21, 4  ;;  %v1042_v44 = vrot.slane %v1040_v28, 5  ;;  %v1046_v45 = vrot.slane %v1044_v30, 4  ;;  %v807_v7 = vld [vmem:[#allocation2 + $0x3c] sm:$0xf]  ;;  %v280_v21 = vld [vmem:[%s14625_s26 + $0x60] sm:$0xff] }
  0x79   : > { %v11456_v20 = vcombine.low %v995_v15, %v1005_v16  ;;  %v1024_v48 = vrot.slane %v1023_v34, 4  ;;  %v1050_v50 = vshll.u32 %v942_v37, 16  ;;  %v805_v51 = vsel %vm14657_vm10, %v520_v31, %v804_v32  ;;  %v811_v16 = vld [vmem:[#allocation2 + $0x44] sm:$0x1]  ;;  %v281_v34 = vld [vmem:[%s14625_s26 + $0x68] sm:$0xff] }
  0x7a   : > { %v1019_v47 = vsel %vm14637_vm7, %v1014_v33, %v1018_v23  ;;  %v1033_v54 = vrot.slane %v1031_v42, 4  ;;  %v1047_v55 = vor.u32 %v1046_v45, %v1042_v44  ;;  %806 = vst [vmem:[#allocation2 + $0x38] sm:$0x1] %v805_v51  ;;  %v1055_v56 = vshrl.u32 %v899_v52, 16  ;;  %v14040_v23 = vld [vmem:[%s18008_s1 + $0x20] sm:$0xff]  }
  0x7b   : > { %12647 = vmatmul.mubr.bf16.vlgmr.msra.gmra.mrb[0].mxu0 %v11456_v20  ;;  %v1029_v57 = vsel %vm14637_vm7, %v1024_v48, %v1028_v27  ;;  %v1052_v58 = vrot.slane %v1050_v50, 5  ;;  %v1058_v59 = vshll.u32 %v899_v52, 16  ;;  %v525_v60 = vshll.u32 %v14698_v39, 16  ;;  %v814_v33 = vld [vmem:[#allocation2 + $0x48] sm:$0xf] }
  0x7c   : > { %12679 = vmatpush3.bf16.msra.mxu0 %v14703_v46  ;;  %v1036_v46 = vrot.slane %v1034_v43, 5  ;;  %v11457_v61 = vcombine.low %v1019_v47, %v1029_v57  ;;  %v1048_v63 = vrot.slane %v1047_v55, 4  ;;  %v1057_v1 = vrot.slane %v1055_v56, 4  ;;  %v282_v43 = vld [vmem:[%s14625_s26 + $0x70] sm:$0xff] }
  0x7d   : > { %12680 = vmatprep.subr.bf16.mxu0 %v14037_v26  ;;  %v1060_v2 = vrot.slane %v1058_v59, 5  ;;  %v1064_v3 = vshll.u32 %v900_v0, 16  ;;  %v1068_v5 = vshrl.u32 %v900_v0, 16  ;;  %v527_v6 = vor.u32 %v525_v60, %v14732_v38  ;;  %v818_v55 = vld [vmem:[#allocation2 + $0x50] sm:$0x1] }
  0x7e   : > { %v1037_v62 = vor.u32 %v1036_v46, %v1033_v54  ;;  %12650 = vmatprep.mubr.bf16.mxu0 %v11457_v61  ;;  %v1053_v9 = vsel %vm14637_vm7, %v1048_v63, %v1052_v58  ;;  %v530_v12 = vshrl.u32 %v14707_v49, 16  ;;  %v533_v15 = vshll.u32 %v14707_v49, 16 }
  0x7f   : > { %v1061_v4 = vor.u32 %v1060_v2, %v1057_v1  ;;  %v1066_v13 = vrot.slane %v1064_v3, 5  ;;  %v1070_v14 = vrot.slane %v1068_v5, 4  ;;  %v808_v19 = vsel %vm14651_vm9, %v527_v6, %v807_v7 }
  0x80   : > { %12681 = vmatpush3.bf16.msra.mxu0 %v14037_v26  ;;  %v1038_v39 = vrot.slane %v1037_v62, 4  ;;  %v532_v18 = vrot.slane %v530_v12, 7  ;;  %v539_v20 = vshrl.u32 %v14720_v11, 16  ;;  %809 = vst [vmem:[#allocation2 + $0x3c] sm:$0xf] %v808_v19  ;;  %v542_v27 = vshll.u32 %v14720_v11, 16 }
  0x81   : > { %12682 = vmatprep.subr.bf16.mxu0 %v14038_v53  ;;  %v943_v25 = vld [vmem:[#allocation2 + $0x38] sm:$0x1]  ;;  %v1062_v49 = vrot.slane %v1061_v4, 4  ;;  %v1071_v26 = vor.u32 %v1070_v14, %v1066_v13  ;;  %v547_v38 = vshrl.u32 %v14734_v41, 16  ;;  %v550_v42 = vshll.u32 %v14734_v41, 16  ;;  %v14041_v41 = vld [vmem:[%s18008_s1 + $0x28] sm:$0xff]  }
  0x82   : > { %v1043_v17 = vsel %vm14637_vm7, %v1038_v39, %v1042_v44  ;;  %v1074_v28 = vshll.u32 %v943_v25, 16  ;;  %v535_v30 = vor.u32 %v533_v15, %v532_v18  ;;  %v537_v31 = vrot.slane %v532_v18, 4  ;;  %v283_v44 = vld [vmem:[%s14625_s26 + $0x78] sm:$0xff]  ;;  %v14042_v62 = vld [vmem:[%s18008_s1 + $0x30] sm:$0xff]   ;;  %v828_v25 = vld [vmem:[#allocation2 + $0x60] sm:$0xf] }
  0x83   : > { %v11458_v24 = vcombine.low %v1043_v17, %v1053_v9  ;;  %v541_v32 = vrot.slane %v539_v20, 7  ;;  %v1067_v36 = vsel %vm14637_vm7, %v1062_v49, %v1066_v13  ;;  %v1072_v37 = vrot.slane %v1071_v26, 4  ;;  %v821_v39 = vld [vmem:[#allocation2 + $0x54] sm:$0xf]  ;;  %v825_v9 = vld [vmem:[#allocation2 + $0x5c] sm:$0x1] }
  0x84   : > { %12683 = vmatpush3.bf16.msra.mxu0 %v14038_v53  ;;  %v1076_v45 = vrot.slane %v1074_v28, 5  ;;  %v536_v11 = vsel %vm14643_vm8, %v528_v10, %v535_v30  ;;  %v812_v47 = vsel %vm14657_vm10, %v537_v31, %v811_v16  ;;  %v549_v51 = vrot.slane %v547_v38, 7  ;;  %v14043_v30 = vld [vmem:[%s18008_s1 + $0x38] sm:$0xff]  }
  0x85   : > { %12684 = vmatprep.subr.bf16.mxu0 %v14039_v8  ;;  %12651 = vmatmul.mubr.bf16.gmra.mrb[4].mxu0 %v11458_v24  ;;  %v544_v48 = vor.u32 %v542_v27, %v541_v32  ;;  %810 = vst [vmem:[#allocation2 + $0x40] sm:$0xf] %v536_v11  ;;  %813 = vst [vmem:[#allocation2 + $0x44] sm:$0x1] %v812_v47  ;;  %v545_v50 = vrot.slane %v541_v32, 4  ;;  %v12146_v52 = vpack.c.bf16 %v280_v21, %v280_v21 }
  0x86   : > { %v12147_v53 = vpack.c.bf16 %v281_v34, %v281_v34  ;;  %v1077_v54 = vsel %vm14637_vm7, %v1072_v37, %v1076_v45  ;;  %v12148_v56 = vpack.c.bf16 %v282_v43, %v282_v43  ;;  %v14784_v57 = vpack.c.bf16 %v283_v44, %v283_v44  ;;  %v284_v37 = vld [vmem:[%s14625_s26 + $0x80] sm:$0xff]  ;;  %v285_v45 = vld [vmem:[%s14625_s26 + $0x88] sm:$0xff] }
  0x87   : > { %v815_v46 = vsel %vm14651_vm9, %v544_v48, %v814_v33  ;;  %v11459_v58 = vcombine.low %v1067_v36, %v1077_v54  ;;  %v552_v59 = vor.u32 %v550_v42, %v549_v51  ;;  %v554_v60 = vrot.slane %v549_v51, 4  ;;  %v901_v63 = vld [vmem:[#allocation2 + $0x3c] sm:$0xf]  ;;  %v832_v51 = vld [vmem:[#allocation2 + $0x68] sm:$0x1] }
  0x88   : > { %12685 = vmatpush3.bf16.msra.mxu0 %v14039_v8  ;;  %816 = vst [vmem:[#allocation2 + $0x48] sm:$0xf] %v815_v46  ;;  %v556_v61 = vshrl.u32 %v12146_v52, 16  ;;  %v559_v0 = vshll.u32 %v12146_v52, 16  ;;  %v564_v1 = vshrl.u32 %v12147_v53, 16  ;;  %v567_v2 = vshll.u32 %v12147_v53, 16 }
  0x89   : > { %12686 = vmatprep.subr.bf16.mxu0 %v14040_v23  ;;  %v573_v3 = vshrl.u32 %v12148_v56, 16  ;;  %12654 = vmatprep.mubr.bf16.mxu0 %v11459_v58  ;;  %v1079_v5 = vshrl.u32 %v901_v63, 16  ;;  %v1082_v6 = vshll.u32 %v901_v63, 16  ;;  %v553_v7 = vsel %vm14643_vm8, %v545_v50, %v552_v59 }
  0x8a   : > { %v819_v8 = vsel %vm14657_vm10, %v554_v60, %v818_v55  ;;  %817 = vst [vmem:[#allocation2 + $0x4c] sm:$0xf] %v553_v7  ;;  %v558_v10 = vrot.slane %v556_v61, 7  ;;  %v566_v12 = vrot.slane %v564_v1, 7  ;;  %v576_v13 = vshll.u32 %v12148_v56, 16  ;;  %v14819_v56 = vld [vmem:[%s18008_s1 + $0x80] sm:$0xff]  }
  0x8b   : > { %820 = vst [vmem:[#allocation2 + $0x50] sm:$0x1] %v819_v8  ;;  %v14793_v4 = vrot.slane %v573_v3, 7  ;;  %v1081_v14 = vrot.slane %v1079_v5, 4  ;;  %v1084_v15 = vrot.slane %v1082_v6, 5  ;;  %v581_v16 = vshrl.u32 %v14784_v57, 16 }
  0x8c   : > { %12687 = vmatpush3.bf16.msra.mxu0 %v14040_v23  ;;  %v584_v17 = vshll.u32 %v14784_v57, 16  ;;  %v902_v18 = vld [vmem:[#allocation2 + $0x40] sm:$0xf]  ;;  %v944_v19 = vld [vmem:[#allocation2 + $0x44] sm:$0x1]  ;;  %v561_v20 = vor.u32 %v559_v0, %v558_v10  ;;  %v562_v21 = vrot.slane %v558_v10, 4  ;;  %v569_v23 = vor.u32 %v567_v2, %v566_v12 }
  0x8d   : > { %12688 = vmatprep.subr.bf16.mxu0 %v14041_v41  ;;  %v571_v24 = vrot.slane %v566_v12, 4  ;;  %v1085_v49 = vor.u32 %v1084_v15, %v1081_v14  ;;  %v1088_v26 = vshll.u32 %v902_v18, 16  ;;  %v1092_v27 = vshrl.u32 %v902_v18, 16 }
  0x8e   : > { %v1098_v28 = vshll.u32 %v944_v19, 16  ;;  %v570_v32 = vsel %vm14643_vm8, %v562_v21, %v569_v23  ;;  %v822_v33 = vsel %vm14651_vm9, %v561_v20, %v821_v39  ;;  %v578_v36 = vor.u32 %v576_v13, %v14793_v4 }
  0x8f   : > { %v903_v31 = vld [vmem:[#allocation2 + $0x48] sm:$0xf]  ;;  %v826_v34 = vsel %vm14657_vm10, %v571_v24, %v825_v9  ;;  %v1086_v38 = vrot.slane %v1085_v49, 4  ;;  %v1090_v42 = vrot.slane %v1088_v26, 5  ;;  %v1094_v43 = vrot.slane %v1092_v27, 4 }
  0x90   : > { %12689 = vmatpush3.bf16.msra.mxu0 %v14041_v41  ;;  %v1100_v44 = vrot.slane %v1098_v28, 5  ;;  %823 = vst [vmem:[#allocation2 + $0x54] sm:$0xf] %v822_v33  ;;  %824 = vst [vmem:[#allocation2 + $0x58] sm:$0xf] %v570_v32  ;;  %v1103_v11 = vshrl.u32 %v903_v31, 16  ;;  %v829_v46 = vsel %vm14651_vm9, %v578_v36, %v828_v25  ;;  %v14814_v55 = vpack.c.bf16 %v284_v37, %v284_v37 }
  0x91   : > { %12690 = vmatprep.subr.bf16.mxu0 %v14042_v62  ;;  %827 = vst [vmem:[#allocation2 + $0x5c] sm:$0x1] %v826_v34  ;;  %v1106_v47 = vshll.u32 %v903_v31, 16  ;;  %v579_v48 = vrot.slane %v14793_v4, 4  ;;  %v583_v50 = vrot.slane %v581_v16, 7  ;;  %v1091_v52 = vsel %vm14637_vm7, %v1086_v38, %v1090_v42  ;;  %v286_v34 = vld [vmem:[%s14625_s26 + $0x90] sm:$0xff] }
  0x92   : > { %v1095_v53 = vor.u32 %v1094_v43, %v1090_v42  ;;  %v904_v41 = vld [vmem:[#allocation2 + $0x4c] sm:$0xf]  ;;  %v945_v54 = vld [vmem:[#allocation2 + $0x50] sm:$0x1]  ;;  %v1105_v57 = vrot.slane %v1103_v11, 4  ;;  %v14821_v5 = vpack.c.bf16 %v285_v45, %v285_v45  ;;  %v590_v14 = vshrl.u32 %v14814_v55, 16 }
  0x93   : > { %v1108_v58 = vrot.slane %v1106_v47, 5  ;;  %v1112_v59 = vshll.u32 %v904_v41, 16  ;;  %v1116_v60 = vshrl.u32 %v904_v41, 16  ;;  %830 = vst [vmem:[#allocation2 + $0x60] sm:$0xf] %v829_v46  ;;  %v586_v63 = vor.u32 %v584_v17, %v583_v50  ;;  %v287_v41 = vld [vmem:[%s14625_s26 + $0x98] sm:$0xff] }
  0x94   : > { %12691 = vmatpush3.bf16.msra.mxu0 %v14042_v62  ;;  %v1096_v61 = vrot.slane %v1095_v53, 4  ;;  %v1122_v62 = vshll.u32 %v945_v54, 16  ;;  %v588_v0 = vrot.slane %v583_v50, 4  ;;  %v592_v24 = vrot.slane %v590_v14, 7  ;;  %v835_v47 = vld [vmem:[#allocation2 + $0x6c] sm:$0xf] }
  0x95   : > { %12692 = vmatprep.subr.bf16.mxu0 %v14043_v30  ;;  %v1109_v1 = vor.u32 %v1108_v58, %v1105_v57  ;;  %v1114_v2 = vrot.slane %v1112_v59, 5  ;;  %v1118_v3 = vrot.slane %v1116_v60, 4  ;;  %v587_v8 = vsel %vm14643_vm8, %v579_v48, %v586_v63  ;;  %v839_v59 = vld [vmem:[#allocation2 + $0x74] sm:$0x1]  ;;  %v288_v60 = vld [vmem:[%s14625_s26 + $0xa0] sm:$0xff] }
  0x96   : > { %v1101_v6 = vsel %vm14637_vm7, %v1096_v61, %v1100_v44  ;;  %v1124_v7 = vrot.slane %v1122_v62, 5  ;;  %v833_v39 = vsel %vm14657_vm10, %v588_v0, %v832_v51  ;;  %831 = vst [vmem:[#allocation2 + $0x64] sm:$0xf] %v587_v8  ;;  %v593_v42 = vshll.u32 %v14814_v55, 16  ;;  %v290_v14 = vld [vmem:[%s14625_s26 + $0xb0] sm:$0xff] }
  0x97   : > { %v11460_v9 = vcombine.low %v1091_v52, %v1101_v6  ;;  %v1110_v10 = vrot.slane %v1109_v1, 4  ;;  %v1119_v12 = vor.u32 %v1118_v3, %v1114_v2  ;;  %v905_v4 = vld [vmem:[#allocation2 + $0x54] sm:$0xf]  ;;  %v906_v13 = vld [vmem:[#allocation2 + $0x58] sm:$0xf]  ;;  %v596_v45 = vrot.slane %v592_v24, 4 }
  0x98   : > { %12693 = vmatpush3.bf16.msra.mxu0 %v14043_v30  ;;  %834 = vst [vmem:[#allocation2 + $0x68] sm:$0x1] %v833_v39  ;;  %v946_v15 = vld [vmem:[#allocation2 + $0x5c] sm:$0x1]  ;;  %v1127_v16 = vshrl.u32 %v905_v4, 16  ;;  %v1130_v17 = vshll.u32 %v905_v4, 16  ;;  %v595_v53 = vor.u32 %v593_v42, %v592_v24  ;;  %v12152_v54 = vpack.c.bf16 %v286_v34, %v286_v34 }
  0x99   : > { %12726 = vmatprep.subr.bf16.mxu0 %v14819_v56  ;;  %v1136_v18 = vshll.u32 %v906_v13, 16  ;;  %v1140_v19 = vshrl.u32 %v906_v13, 16  ;;  %12655 = vmatmul.mubr.bf16.gmra.mrb[8].mxu0 %v11460_v9  ;;  %v1115_v20 = vsel %vm14637_vm7, %v1110_v10, %v1114_v2  ;;  %v1120_v21 = vrot.slane %v1119_v12, 4 }
  0x9a   : > { %v1146_v23 = vshll.u32 %v946_v15, 16  ;;  %v1129_v25 = vrot.slane %v1127_v16, 4  ;;  %v1132_v49 = vrot.slane %v1130_v17, 5  ;;  %v907_v28 = vld [vmem:[#allocation2 + $0x60] sm:$0xf]  ;;  %v598_v11 = vshrl.u32 %v14821_v5, 16 }
  0x9b   : > { %v1138_v26 = vrot.slane %v1136_v18, 5  ;;  %v1142_v27 = vrot.slane %v1140_v19, 4  ;;  %v1125_v30 = vsel %vm14637_vm7, %v1120_v21, %v1124_v7  ;;  %v1151_v32 = vshrl.u32 %v907_v28, 16  ;;  %v289_v7 = vld [vmem:[%s14625_s26 + $0xa8] sm:$0xff]  ;;  %v842_v18 = vld [vmem:[#allocation2 + $0x78] sm:$0xf] }
  0x9c   : > { %v1148_v31 = vrot.slane %v1146_v23, 5  ;;  %v1154_v33 = vshll.u32 %v907_v28, 16  ;;  %v11461_v36 = vcombine.low %v1115_v20, %v1125_v30  ;;  %v1133_v37 = vor.u32 %v1132_v49, %v1129_v25  ;;  %v291_v25 = vld [vmem:[%s14625_s26 + $0xb8] sm:$0xff]  ;;  %v846_v49 = vld [vmem:[#allocation2 + $0x80] sm:$0x1] }
  0x9d   : > { %v1143_v38 = vor.u32 %v1142_v27, %v1138_v26  ;;  %v1153_v43 = vrot.slane %v1151_v32, 4  ;;  %v908_v51 = vld [vmem:[#allocation2 + $0x64] sm:$0xf]  ;;  %v600_v63 = vrot.slane %v598_v11, 7  ;;  %v601_v0 = vshll.u32 %v14821_v5, 16 }
  0x9e   : > { %v1156_v44 = vrot.slane %v1154_v33, 5  ;;  %12658 = vmatprep.mubr.bf16.mxu0 %v11461_v36  ;;  %v1134_v48 = vrot.slane %v1133_v37, 4  ;;  %v1160_v57 = vshll.u32 %v908_v51, 16  ;;  %v1164_v58 = vshrl.u32 %v908_v51, 16  ;;  %v849_v36 = vld [vmem:[#allocation2 + $0x84] sm:$0xf] }
  0x9f   : > { %v1144_v50 = vrot.slane %v1143_v38, 4  ;;  %v947_v52 = vld [vmem:[#allocation2 + $0x68] sm:$0x1]  ;;  %v603_v39 = vor.u32 %v601_v0, %v600_v63  ;;  %v605_v9 = vrot.slane %v600_v63, 4  ;;  %v836_v10 = vsel %vm14651_vm9, %v595_v53, %v835_v47  ;;  %v853_v47 = vld [vmem:[#allocation2 + $0x8c] sm:$0x1] }
  0xa0   : > { %v1157_v46 = vor.u32 %v1156_v44, %v1153_v43  ;;  %v1170_v55 = vshll.u32 %v947_v52, 16  ;;  %v1139_v61 = vsel %vm14637_vm7, %v1134_v48, %v1138_v26  ;;  %v1162_v3 = vrot.slane %v1160_v57, 5  ;;  %837 = vst [vmem:[#allocation2 + $0x6c] sm:$0xf] %v836_v10  ;;  %v292_v10 = vld [vmem:[%s14625_s26 + $0xc0] sm:$0xff] }
  0xa1   : > { %v1149_v62 = vsel %vm14637_vm7, %v1144_v50, %v1148_v31  ;;  %v1166_v6 = vrot.slane %v1164_v58, 4  ;;  %v12153_v5 = vpack.c.bf16 %v287_v41, %v287_v41  ;;  %v607_v13 = vshrl.u32 %v12152_v54, 16 }
  0xa2   : > { %v11462_v1 = vcombine.low %v1139_v61, %v1149_v62  ;;  %v1158_v2 = vrot.slane %v1157_v46, 4  ;;  %v1172_v8 = vrot.slane %v1170_v55, 5  ;;  %v604_v15 = vsel %vm14643_vm8, %v596_v45, %v603_v39 }
  0xa3   : > { %v1167_v4 = vor.u32 %v1166_v6, %v1162_v3  ;;  %v840_v16 = vsel %vm14657_vm10, %v605_v9, %v839_v59  ;;  %v610_v17 = vshll.u32 %v12152_v54, 16  ;;  %v12154_v19 = vpack.c.bf16 %v288_v60, %v288_v60  ;;  %838 = vst [vmem:[#allocation2 + $0x70] sm:$0xf] %v604_v15  ;;  %v856_v9 = vld [vmem:[#allocation2 + $0x90] sm:$0xf] }
  0xa4   : > { %12659 = vmatmul.mubr.bf16.gmra.mrb[12].mxu0 %v11462_v1  ;;  %v1163_v12 = vsel %vm14637_vm7, %v1158_v2, %v1162_v3  ;;  %841 = vst [vmem:[#allocation2 + $0x74] sm:$0x1] %v840_v16  ;;  %v609_v21 = vrot.slane %v607_v13, 7  ;;  %v615_v23 = vshrl.u32 %v12153_v5, 16  ;;  %v618_v24 = vshll.u32 %v12153_v5, 16 }
  0xa5   : > { %v1168_v20 = vrot.slane %v1167_v4, 4  ;;  %v12155_v26 = vpack.c.bf16 %v289_v7, %v289_v7  ;;  %v624_v27 = vshrl.u32 %v12154_v19, 16  ;;  %v627_v28 = vshll.u32 %v12154_v19, 16  ;;  %v294_v19 = vld [vmem:[%s14625_s26 + $0xd0] sm:$0xff] }
  0xa6   : > { %v12156_v30 = vpack.c.bf16 %v290_v14, %v290_v14  ;;  %v612_v32 = vor.u32 %v610_v17, %v609_v21  ;;  %v613_v33 = vrot.slane %v609_v21, 4  ;;  %v617_v34 = vrot.slane %v615_v23, 7 }
  0xa7   : > { %v1173_v31 = vsel %vm14637_vm7, %v1168_v20, %v1172_v8  ;;  %v626_v38 = vrot.slane %v624_v27, 7  ;;  %v632_v42 = vshrl.u32 %v12155_v26, 16  ;;  %v635_v43 = vshll.u32 %v12155_v26, 16  ;;  %v14862_v50 = vld [vmem:[#allocation2 + $0x6c] sm:$0xf] }
  0xa8   : > { %v11463_v37 = vcombine.low %v1163_v12, %v1173_v31  ;;  %v620_v44 = vor.u32 %v618_v24, %v617_v34  ;;  %v622_v45 = vrot.slane %v617_v34, 4  ;;  %v843_v11 = vsel %vm14651_vm9, %v612_v32, %v842_v18  ;;  %v293_v12 = vld [vmem:[%s14625_s26 + $0xc8] sm:$0xff] }
  0xa9   : > { %v14860_v48 = vpack.c.bf16 %v291_v25, %v291_v25  ;;  %844 = vst [vmem:[#allocation2 + $0x78] sm:$0xf] %v843_v11  ;;  %v629_v51 = vor.u32 %v627_v28, %v626_v38  ;;  %v630_v52 = vrot.slane %v626_v38, 4  ;;  %v634_v53 = vrot.slane %v632_v42, 7 }
  0xaa   : > { %12662 = vmatprep.mubr.bf16.mxu0 %v11463_v37  ;;  %v641_v41 = vshrl.u32 %v12156_v30, 16  ;;  %v1175_v54 = vshrl.u32 %v14862_v50, 16  ;;  %v1178_v46 = vshll.u32 %v14862_v50, 16  ;;  %v621_v57 = vsel %vm14643_vm8, %v613_v33, %v620_v44  ;;  %v14870_v55 = vld [vmem:[#allocation2 + $0x70] sm:$0xf] }
  0xab   : > { %v847_v58 = vsel %vm14657_vm10, %v622_v45, %v846_v49  ;;  %v14872_v59 = vld [vmem:[#allocation2 + $0x74] sm:$0x1]  ;;  %845 = vst [vmem:[#allocation2 + $0x7c] sm:$0xf] %v621_v57  ;;  %v637_v60 = vor.u32 %v635_v43, %v634_v53  ;;  %v639_v61 = vrot.slane %v634_v53, 4  ;;  %v850_v62 = vsel %vm14651_vm9, %v629_v51, %v849_v36 }
  0xac   : > { %848 = vst [vmem:[#allocation2 + $0x80] sm:$0x1] %v847_v58  ;;  %v14876_v63 = vrot.slane %v641_v41, 7  ;;  %v1177_v0 = vrot.slane %v1175_v54, 4  ;;  %v1180_v1 = vrot.slane %v1178_v46, 5  ;;  %v1184_v2 = vshll.u32 %v14870_v55, 16 }
  0xad   : > { %v1188_v3 = vshrl.u32 %v14870_v55, 16  ;;  %851 = vst [vmem:[#allocation2 + $0x84] sm:$0xf] %v850_v62  ;;  %v1194_v6 = vshll.u32 %v14872_v59, 16  ;;  %v638_v7 = vsel %vm14643_vm8, %v630_v52, %v637_v60  ;;  %v854_v8 = vsel %vm14657_vm10, %v639_v61, %v853_v47  ;;  %v860_v62 = vld [vmem:[#allocation2 + $0x98] sm:$0x1] }
  0xae   : > { %v644_v39 = vshll.u32 %v12156_v30, 16  ;;  %v1181_v4 = vor.u32 %v1180_v1, %v1177_v0  ;;  %v1186_v5 = vrot.slane %v1184_v2, 5  ;;  %852 = vst [vmem:[#allocation2 + $0x88] sm:$0xf] %v638_v7  ;;  %855 = vst [vmem:[#allocation2 + $0x8c] sm:$0x1] %v854_v8  ;;  %v14894_v24 = vpack.c.bf16 %v292_v10, %v292_v10 }
  0xaf   : > { %v1190_v13 = vrot.slane %v1188_v3, 4  ;;  %v647_v14 = vrot.slane %v14876_v63, 4  ;;  %v1196_v15 = vrot.slane %v1194_v6, 5  ;;  %v649_v17 = vshrl.u32 %v14860_v48, 16 }
  0xb0   : > { %v646_v16 = vor.u32 %v644_v39, %v14876_v63  ;;  %v652_v18 = vshll.u32 %v14860_v48, 16  ;;  %v1182_v20 = vrot.slane %v1181_v4, 4  ;;  %v14892_v23 = vld [vmem:[#allocation2 + $0x78] sm:$0xf]  ;;  %v14896_v25 = vpack.c.bf16 %v293_v12, %v293_v12 }
  0xb1   : > { %v1191_v21 = vor.u32 %v1190_v13, %v1186_v5  ;;  %v1199_v49 = vshrl.u32 %v14892_v23, 16  ;;  %v1202_v26 = vshll.u32 %v14892_v23, 16  ;;  %v651_v27 = vrot.slane %v649_v17, 7 }
  0xb2   : > { %v857_v28 = vsel %vm14651_vm9, %v646_v16, %v856_v9  ;;  %v1187_v30 = vsel %vm14637_vm7, %v1182_v20, %v1186_v5  ;;  %v14904_v32 = vld [vmem:[#allocation2 + $0x7c] sm:$0xf]  ;;  %v658_v34 = vshrl.u32 %v14894_v24, 16  ;;  %v14909_v36 = vpack.c.bf16 %v294_v19, %v294_v19 }
  0xb3   : > { %v1192_v31 = vrot.slane %v1191_v21, 4  ;;  %v14906_v33 = vld [vmem:[#allocation2 + $0x80] sm:$0x1]  ;;  %858 = vst [vmem:[#allocation2 + $0x90] sm:$0xf] %v857_v28  ;;  %v1201_v37 = vrot.slane %v1199_v49, 4  ;;  %v654_v7 = vor.u32 %v652_v18, %v651_v27 }
  0xb4   : > { %v1204_v38 = vrot.slane %v1202_v26, 5  ;;  %v1208_v42 = vshll.u32 %v14904_v32, 16  ;;  %v1212_v43 = vshrl.u32 %v14904_v32, 16  ;;  %v14913_v44 = vld [vmem:[#allocation2 + $0x84] sm:$0xf]  ;;  %v1218_v11 = vshll.u32 %v14906_v33, 16 }
  0xb5   : > { %v1197_v45 = vsel %vm14637_vm7, %v1192_v31, %v1196_v15  ;;  %v1223_v47 = vshrl.u32 %v14913_v44, 16  ;;  %v1226_v48 = vshll.u32 %v14913_v44, 16  ;;  %v14920_v54 = vld [vmem:[#allocation2 + $0x88] sm:$0xf]  ;;  %v14922_v46 = vld [vmem:[#allocation2 + $0x8c] sm:$0x1]  ;;  %v655_v13 = vsel %vm14643_vm8, %v647_v14, %v654_v7 }
  0xb6   : > { %v11464_v51 = vcombine.low %v1187_v30, %v1197_v45  ;;  %v1205_v52 = vor.u32 %v1204_v38, %v1201_v37  ;;  %v1210_v53 = vrot.slane %v1208_v42, 5  ;;  %v1214_v41 = vrot.slane %v1212_v43, 4  ;;  %859 = vst [vmem:[#allocation2 + $0x94] sm:$0xf] %v655_v13  ;;  %v295_v21 = vld [vmem:[%s14625_s26 + $0xd8] sm:$0xff]  ;;  %v296_v42 = vld [vmem:[%s14625_s26 + $0xe0] sm:$0xff] }
  0xb7   : > { %v1220_v57 = vrot.slane %v1218_v11, 5  ;;  %v1225_v58 = vrot.slane %v1223_v47, 4  ;;  %v1228_v60 = vrot.slane %v1226_v48, 5  ;;  %v1232_v61 = vshll.u32 %v14920_v54, 16  ;;  %v863_v28 = vld [vmem:[#allocation2 + $0x9c] sm:$0xf] }
  0xb8   : > { %12663 = vmatmul.mubr.bf16.gmra.mrb[16].mxu0 %v11464_v51  ;;  %v1206_v63 = vrot.slane %v1205_v52, 4  ;;  %v1215_v0 = vor.u32 %v1214_v41, %v1210_v53  ;;  %v1236_v1 = vshrl.u32 %v14920_v54, 16  ;;  %v1242_v2 = vshll.u32 %v14922_v46, 16  ;;  %v867_v51 = vld [vmem:[#allocation2 + $0xa4] sm:$0x1] }
  0xb9   : > { %v1229_v3 = vor.u32 %v1228_v60, %v1225_v58  ;;  %v1234_v6 = vrot.slane %v1232_v61, 5  ;;  %v656_v8 = vrot.slane %v651_v27, 4  ;;  %v660_v20 = vrot.slane %v658_v34, 7 }
  0xba   : > { %v1211_v39 = vsel %vm14637_vm7, %v1206_v63, %v1210_v53  ;;  %v1216_v9 = vrot.slane %v1215_v0, 4  ;;  %v1238_v10 = vrot.slane %v1236_v1, 4  ;;  %v1244_v12 = vrot.slane %v1242_v2, 5  ;;  %v14929_v4 = vld [vmem:[#allocation2 + $0x90] sm:$0xf]  ;;  %v297_v0 = vld [vmem:[%s14625_s26 + $0xe8] sm:$0xff] }
  0xbb   : > { %v1230_v5 = vrot.slane %v1229_v3, 4  ;;  %v861_v15 = vsel %vm14657_vm10, %v656_v8, %v860_v62  ;;  %v1247_v16 = vshrl.u32 %v14929_v4, 16  ;;  %v1250_v19 = vshll.u32 %v14929_v4, 16  ;;  %v870_v53 = vld [vmem:[#allocation2 + $0xa8] sm:$0xf] }
  0xbc   : > { %v1221_v17 = vsel %vm14637_vm7, %v1216_v9, %v1220_v57  ;;  %v1239_v18 = vor.u32 %v1238_v10, %v1234_v6  ;;  %862 = vst [vmem:[#allocation2 + $0x98] sm:$0x1] %v861_v15  ;;  %v661_v27 = vshll.u32 %v14894_v24, 16  ;;  %v664_v37 = vrot.slane %v660_v20, 4 }
  0xbd   : > { %v11465_v49 = vcombine.low %v1211_v39, %v1221_v17  ;;  %v1235_v14 = vsel %vm14637_vm7, %v1230_v5, %v1234_v6  ;;  %v1249_v26 = vrot.slane %v1247_v16, 4  ;;  %v1252_v31 = vrot.slane %v1250_v19, 5  ;;  %v14953_v1 = vld [vmem:[#allocation2 + $0x94] sm:$0xf] }
  0xbe   : > { %v1240_v30 = vrot.slane %v1239_v18, 4  ;;  %v666_v38 = vshrl.u32 %v14896_v25, 16  ;;  %v663_v43 = vor.u32 %v661_v27, %v660_v20  ;;  %v669_v45 = vshll.u32 %v14896_v25, 16 }
  0xbf   : > { %12666 = vmatprep.mubr.bf16.mxu0 %v11465_v49  ;;  %v12161_v34 = vpack.c.bf16 %v295_v21, %v295_v21  ;;  %v675_v11 = vshrl.u32 %v14909_v36, 16  ;;  %v1253_v48 = vor.u32 %v1252_v31, %v1249_v26  ;;  %v678_v52 = vshll.u32 %v14909_v36, 16  ;;  %v877_v31 = vld [vmem:[#allocation2 + $0xb4] sm:$0xf] }
  0xc0   : > { %v1245_v47 = vsel %vm14637_vm7, %v1240_v30, %v1244_v12  ;;  %v668_v24 = vrot.slane %v666_v38, 7  ;;  %v864_v57 = vsel %vm14651_vm9, %v663_v43, %v863_v28  ;;  %v12162_v7 = vpack.c.bf16 %v296_v42, %v296_v42  ;;  %v874_v12 = vld [vmem:[#allocation2 + $0xb0] sm:$0x1] }
  0xc1   : > { %v11466_v41 = vcombine.low %v1235_v14, %v1245_v47  ;;  %v677_v58 = vrot.slane %v675_v11, 7  ;;  %v683_v60 = vshrl.u32 %v12161_v34, 16  ;;  %v1254_v25 = vrot.slane %v1253_v48, 4  ;;  %865 = vst [vmem:[#allocation2 + $0x9c] sm:$0xf] %v864_v57 }
  0xc2   : > { %v671_v61 = vor.u32 %v669_v45, %v668_v24  ;;  %v673_v62 = vrot.slane %v668_v24, 4  ;;  %v686_v63 = vshll.u32 %v12161_v34, 16  ;;  %v1256_v8 = vshll.u32 %v14953_v1, 16 }
  0xc3   : > { %12667 = vmatmul.mubr.bf16.gmra.mrb[20].mxu0 %v11466_v41  ;;  %v14955_v2 = vld [vmem:[#allocation2 + $0x98] sm:$0x1]  ;;  %v680_v3 = vor.u32 %v678_v52, %v677_v58  ;;  %v681_v36 = vrot.slane %v677_v58, 4  ;;  %v685_v6 = vrot.slane %v683_v60, 7  ;;  %v1260_v39 = vshrl.u32 %v14953_v1, 16 }
  0xc4   : > { %v1266_v9 = vshll.u32 %v14955_v2, 16  ;;  %v672_v10 = vsel %vm14643_vm8, %v664_v37, %v671_v61  ;;  %v868_v5 = vsel %vm14657_vm10, %v673_v62, %v867_v51  ;;  %v1258_v17 = vrot.slane %v1256_v8, 5 }
  0xc5   : > { %866 = vst [vmem:[#allocation2 + $0xa0] sm:$0xf] %v672_v10  ;;  %v688_v13 = vor.u32 %v686_v63, %v685_v6  ;;  %v690_v15 = vrot.slane %v685_v6, 4  ;;  %v871_v16 = vsel %vm14651_vm9, %v680_v3, %v870_v53  ;;  %v1262_v18 = vrot.slane %v1260_v39, 4  ;;  %869 = vst [vmem:[#allocation2 + $0xa4] sm:$0x1] %v868_v5 }
  0xc6   : > { %v1268_v19 = vrot.slane %v1266_v9, 5  ;;  %872 = vst [vmem:[#allocation2 + $0xa8] sm:$0xf] %v871_v16  ;;  %v12163_v20 = vpack.c.bf16 %v297_v0, %v297_v0  ;;  %v692_v14 = vshrl.u32 %v12162_v7, 16  ;;  %v695_v26 = vshll.u32 %v12162_v7, 16 }
  0xc7   : > { %v689_v21 = vsel %vm14643_vm8, %v681_v36, %v688_v13  ;;  %v875_v49 = vsel %vm14657_vm10, %v690_v15, %v874_v12  ;;  %v1263_v27 = vor.u32 %v1262_v18, %v1258_v17  ;;  %v1259_v37 = vsel %vm14637_vm7, %v1254_v25, %v1258_v17  ;;  %v881_v15 = vld [vmem:[#allocation2 + $0xbc] sm:$0x1] }
  0xc8   : > { %873 = vst [vmem:[#allocation2 + $0xac] sm:$0xf] %v689_v21  ;;  %876 = vst [vmem:[#allocation2 + $0xb0] sm:$0x1] %v875_v49  ;;  %v700_v28 = vshrl.u32 %v12163_v20, 16  ;;  %v703_v30 = vshll.u32 %v12163_v20, 16 }
  0xc9   : > { %v14972_v38 = vld [vmem:[#allocation2 + $0x9c] sm:$0xf]  ;;  %v694_v42 = vrot.slane %v692_v14, 7  ;;  %v1264_v43 = vrot.slane %v1263_v27, 4 }
  0xca   : > { %v1271_v45 = vshrl.u32 %v14972_v38, 16  ;;  %v1274_v34 = vshll.u32 %v14972_v38, 16  ;;  %v702_v11 = vrot.slane %v700_v28, 7 }
  0xcb   : > { %v697_v47 = vor.u32 %v695_v26, %v694_v42  ;;  %v698_v48 = vrot.slane %v694_v42, 4  ;;  %v1269_v24 = vsel %vm14637_vm7, %v1264_v43, %v1268_v19 }
  0xcc   : > { %v14978_v51 = vld [vmem:[#allocation2 + $0xa0] sm:$0xf]  ;;  %v1273_v52 = vrot.slane %v1271_v45, 4  ;;  %v1276_v53 = vrot.slane %v1274_v34, 5  ;;  %v705_v41 = vor.u32 %v703_v30, %v702_v11  ;;  %v11467_v57 = vcombine.low %v1259_v37, %v1269_v24  ;;  %v14980_v58 = vld [vmem:[#allocation2 + $0xa4] sm:$0x1] }
  0xcd   : > { %v1280_v60 = vshll.u32 %v14978_v51, 16  ;;  %v1284_v25 = vshrl.u32 %v14978_v51, 16  ;;  %v14984_v61 = vld [vmem:[#allocation2 + $0xa8] sm:$0xf]  ;;  %v878_v62 = vsel %vm14651_vm9, %v697_v47, %v877_v31  ;;  %v1290_v0 = vshll.u32 %v14980_v58, 16 }
  0xce   : > { %v1277_v63 = vor.u32 %v1276_v53, %v1273_v52  ;;  %v1295_v3 = vshrl.u32 %v14984_v61, 16  ;;  %v1298_v36 = vshll.u32 %v14984_v61, 16  ;;  %879 = vst [vmem:[#allocation2 + $0xb4] sm:$0xf] %v878_v62  ;;  %12670 = vmatprep.mubr.bf16.mxu0 %v11467_v57  ;;  %v706_v9 = vsel %vm14643_vm8, %v698_v48, %v705_v41 }
  0xcf   : > { %v1282_v6 = vrot.slane %v1280_v60, 5  ;;  %v1286_v7 = vrot.slane %v1284_v25, 4  ;;  %v14991_v8 = vld [vmem:[#allocation2 + $0xac] sm:$0xf]  ;;  %v14993_v39 = vld [vmem:[#allocation2 + $0xb0] sm:$0x1]  ;;  %v11488_v45 = vcombine.low %v14862_v50, %v14870_v55  ;;  %v11489_v34 = vcombine.low %v14892_v23, %v14904_v32 }
  0xd0   : > { %v1278_v10 = vrot.slane %v1277_v63, 4  ;;  %v1292_v12 = vrot.slane %v1290_v0, 5  ;;  %v1297_v5 = vrot.slane %v1295_v3, 4  ;;  %v1300_v13 = vrot.slane %v1298_v36, 5  ;;  %880 = vst [vmem:[#allocation2 + $0xb8] sm:$0xf] %v706_v9 }
  0xd1   : > { %v1287_v16 = vor.u32 %v1286_v7, %v1282_v6  ;;  %v1304_v17 = vshll.u32 %v14991_v8, 16  ;;  %v1308_v18 = vshrl.u32 %v14991_v8, 16  ;;  %v1314_v19 = vshll.u32 %v14993_v39, 16 }
  0xd2   : > { %v1301_v20 = vor.u32 %v1300_v13, %v1297_v5  ;;  %v707_v21 = vrot.slane %v702_v11, 4  ;;  %v1283_v49 = vsel %vm14637_vm7, %v1278_v10, %v1282_v6  ;;  %v11490_v41 = vcombine.low %v14913_v44, %v14920_v54 }
  0xd3   : > { %v1288_v14 = vrot.slane %v1287_v16, 4  ;;  %v1306_v26 = vrot.slane %v1304_v17, 5  ;;  %v1310_v27 = vrot.slane %v1308_v18, 4  ;;  %v1316_v30 = vrot.slane %v1314_v19, 5 }
  0xd4   : > { %v1302_v28 = vrot.slane %v1301_v20, 4  ;;  %v882_v31 = vsel %vm14657_vm10, %v707_v21, %v881_v15  ;;  %v11491_v57 = vcombine.low %v14929_v4, %v14953_v1  ;;  %v11492_v60 = vcombine.low %v14972_v38, %v14978_v51  ;;  %v14268_v21 = vld [vmem:[#allocation2] sm:$0xf]  ;;  %v1938_v4 = vld [vmem:[#allocation2 + $0xc] sm:$0xe] }
  0xd5   : > { %v1293_v37 = vsel %vm14637_vm7, %v1288_v14, %v1292_v12  ;;  %v1311_v42 = vor.u32 %v1310_v27, %v1306_v26  ;;  %883 = vst [vmem:[#allocation2 + $0xbc] sm:$0x1] %v882_v31  ;;  %v15006_v43 = vld [vmem:[#allocation2 + $0xb4] sm:$0xf]  ;;  %v11493_v36 = vcombine.low %v14984_v61, %v14991_v8  ;;  %v14270_v27 = vld [vmem:[#allocation2 + $0xc] sm:$0xf] }
  0xd6   : > { %v11468_v11 = vcombine.low %v1283_v49, %v1293_v37  ;;  %v1307_v47 = vsel %vm14637_vm7, %v1302_v28, %v1306_v26  ;;  %v1319_v48 = vshrl.u32 %v15006_v43, 16  ;;  %v1322_v24 = vshll.u32 %v15006_v43, 16  ;;  %v15039_v49 = vld [vmem:[#allocation2 + $0x4] sm:$0xf]  ;;  %v15042_v28 = vld [vmem:[#allocation2 + $0x10] sm:$0xf] }
  0xd7   : > { %v1312_v52 = vrot.slane %v1311_v42, 4  ;;  %v15016_v53 = vld [vmem:[#allocation2 + $0xb8] sm:$0xf]  ;;  %v11479_v14 = vcombine.low %v14268_v21, %v15039_v49  ;;  %v14049_v31 = vld [vmem:[%s18008_s1 + $0x88] sm:$0xff]   ;;  %v2063_v21 = vrot.slane %v14906_v33, 5  ;;  %v2074_v33 = vrot.slane %v14953_v1, 5 }
  0xd8   : > { %12671 = vmatmul.mubr.bf16.gmra.mrb[24].mxu0 %v11468_v11  ;;  %v1321_v25 = vrot.slane %v1319_v48, 4  ;;  %v1324_v62 = vrot.slane %v1322_v24, 5  ;;  %v1328_v63 = vshll.u32 %v15016_v53, 16  ;;  %v1332_v0 = vshrl.u32 %v15016_v53, 16  ;;  %v1946_v37 = vld [vmem:[#allocation2 + $0x6c] sm:$0xe] }
  0xd9   : > { %v1317_v3 = vsel %vm14637_vm7, %v1312_v52, %v1316_v30  ;;  %v11494_v6 = vcombine.low %v15006_v43, %v15016_v53  ;;  %v11480_v30 = vcombine.low %v14270_v27, %v15042_v28  ;;  %v1947_v42 = vld [vmem:[#allocation2 + $0x78] sm:$0xe]  ;;  %v1948_v24 = vld [vmem:[#allocation2 + $0x84] sm:$0xe]  ;;  %v11512_v52 = vrot.slane %v1946_v37, 9 }
  0xda   : > { %v11469_v7 = vcombine.low %v1307_v47, %v1317_v3  ;;  %v1325_v9 = vor.u32 %v1324_v62, %v1321_v25  ;;  %v1330_v10 = vrot.slane %v1328_v63, 5  ;;  %v1334_v12 = vrot.slane %v1332_v0, 4  ;;  %v14272_v11 = vld [vmem:[#allocation2 + $0x18] sm:$0xf]  ;;  %v15048_v47 = vld [vmem:[#allocation2 + $0x1c] sm:$0xf] }
  0xdb   : > { %v11481_v48 = vcombine.low %v14272_v11, %v15048_v47  ;;  %v2053_v25 = vrot.slane %v14870_v55, 5  ;;  %v1949_v62 = vld [vmem:[#allocation2 + $0x90] sm:$0xe]  ;;  %v2056_v0 = vrot.slane %v14872_v59, 5  ;;  %v11513_v3 = vrot.slane %v1947_v42, 9 }
  0xdc   : > { %12674 = vmatprep.mubr.bf16.mxu0 %v11469_v7  ;;  %v15032_v5 = vld [vmem:[#allocation2 + $0xbc] sm:$0x1]  ;;  %v1326_v13 = vrot.slane %v1325_v9, 4  ;;  %v1335_v15 = vor.u32 %v1334_v12, %v1330_v10  ;;  %v2060_v7 = vrot.slane %v14904_v32, 5  ;;  %v15059_v9 = vld [vmem:[#allocation2 + $0x28] sm:$0xf] }
  0xdd   : > { %v1338_v16 = vshll.u32 %v15032_v5, 16  ;;  %v2055_v59 = vrot.slane %v2053_v25, 4  ;;  %v11514_v27 = vrot.slane %v1948_v24, 9  ;;  %v2070_v37 = vrot.slane %v14922_v46, 5  ;;  %v1939_v1 = vld [vmem:[#allocation2 + $0x18] sm:$0xe] }
  0xde   : > { %v1336_v17 = vrot.slane %v1335_v15, 4  ;;  %v1331_v18 = vsel %vm14637_vm7, %v1326_v13, %v1330_v10  ;;  %v14275_v10 = vld [vmem:[#allocation2 + $0x24] sm:$0xf]  ;;  %v14052_v13 = vld [vmem:[%s18008_s1 + $0x90] sm:$0xff]   ;;  %v15067_v15 = vsel %vm15052_vm13, %v11512_v52, %v2053_v25  ;;  %v2077_v46 = vrot.slane %v14955_v2, 5 }
  0xdf   : > { %v1340_v19 = vrot.slane %v1338_v16, 5  ;;  %v11482_v12 = vcombine.low %v14275_v10, %v15059_v9  ;;  %v1950_v16 = vld [vmem:[#allocation2 + $0x9c] sm:$0xe]  ;;  %v2081_v10 = vrot.slane %v14978_v51, 5  ;;  %v2084_v2 = vrot.slane %v14980_v58, 5 }
  0xe0   : > { %v11504_v51 = vrot.slane %v1938_v4, 9 }
  0xe1   : > { %v1341_v20 = vsel %vm14637_vm7, %v1336_v17, %v1340_v19  ;;  %v14276_v17 = vld [vmem:[#allocation2 + $0x30] sm:$0xf]  ;;  %v15074_v19 = vsel %vm15052_vm13, %v11513_v3, %v2060_v7  ;;  %v14055_v3 = vld [vmem:[%s18008_s1 + $0x98] sm:$0xff]  }
  0xe2   : > { %v11470_v26 = vcombine.low %v1331_v18, %v1341_v20  ;;  %v15069_v18 = vld [vmem:[#allocation2 + $0x34] sm:$0xf]  ;;  %v2062_v20 = vrot.slane %v2060_v7, 4  ;;  %v11516_v7 = vrot.slane %v1950_v16, 9 }
  0xe3   : > { %v2018_v43 = vrot.slane %v15069_v18, 5 }
  0xe4   : > { %12675 = vmatmul.mubr.bf16.gmra.mrb[28].mxu0 %v11470_v26  ;;  %v15079_v26 = vsel %vm15052_vm13, %v2055_v59, %v2056_v0  ;;  %v15087_v11 = vsel %vm15052_vm13, %v2062_v20, %v2063_v21  ;;  %v1952_v0 = vld [vmem:[#allocation2 + $0xb4] sm:$0xe]  ;;  %v2088_v20 = vrot.slane %v14991_v8, 5  ;;  %v15119_v16 = vsel %vm15052_vm13, %v11516_v7, %v2081_v10  ;;  %v15143_v7 = vld [vmem:[#allocation2 + $0x40] sm:$0xf] }
  0xe5   : > { %12694 = vmatprep.mubr.bf16.mxu0 %v11479_v14  ;;  %v1951_v14 = vld [vmem:[#allocation2 + $0xa8] sm:$0xe]  ;;  %v11544_v42 = vcombine.low %v15067_v15, %v15079_v26  ;;  %v11545_v52 = vcombine.low %v15074_v19, %v15087_v11  ;;  %v1940_v8 = vld [vmem:[#allocation2 + $0x24] sm:$0xe]  ;;  %v14076_v26 = vld [vmem:[#allocation2 + $0xc] sm:$0xff]  }
  0xe6   : > { %v14077_v11 = vld [vmem:[#allocation2 + $0x18] sm:$0xff]  }
  0xec   : > { %12695 = vmatmul.mubr.bf16.vlgmr.msra.gmra.mrb[0].mxu0 %v11480_v30  ;;  %v2067_v30 = vrot.slane %v14920_v54, 5 }
  0xed   : > { %12727 = vmatpush3.bf16.msra.mxu0 %v14819_v56  ;;  %12698 = vmatprep.mubr.bf16.mxu0 %v11481_v48  ;;  %v11483_v56 = vcombine.low %v14276_v17, %v15069_v18  ;;  %v11515_v48 = vrot.slane %v1949_v62, 9  ;;  %v11517_v17 = vrot.slane %v1951_v14, 9  ;;  %v2090_v14 = vrot.slane %v2088_v20, 4 }
  0xee   : > { %12728 = vmatprep.subr.bf16.mxu0 %v14049_v31  ;;  %v15094_v24 = vsel %vm15052_vm13, %v11514_v27, %v2067_v30  ;;  %v2069_v25 = vrot.slane %v2067_v30, 4  ;;  %v2083_v30 = vrot.slane %v2081_v10, 4 }
  0xef   : > { %v15102_v62 = vsel %vm15052_vm13, %v11515_v48, %v2074_v33  ;;  %v14058_v48 = vld [vmem:[%s18008_s1 + $0xa0] sm:$0xff]  }
  0xf0   : > { %v15107_v59 = vsel %vm15052_vm13, %v2069_v25, %v2070_v37  ;;  %v2091_v37 = vrot.slane %v14993_v39, 5  ;;  %v2098_v25 = vrot.slane %v15032_v5, 5 }
  0xf1   : > { %12729 = vmatpush3.bf16.msra.mxu0 %v14049_v31  ;;  %v2076_v31 = vrot.slane %v2074_v33, 4  ;;  %v11546_v21 = vcombine.low %v15094_v24, %v15107_v59  ;;  %v15133_v33 = vsel %vm15052_vm13, %v2083_v30, %v2084_v2  ;;  %v15155_v30 = vld [vmem:[#allocation2 + $0x4c] sm:$0xf]  ;;  %v15167_v2 = vld [vmem:[#allocation2 + $0x58] sm:$0xf]  ;;  %v14080_v59 = vld [vmem:[#allocation2 + $0x30] sm:$0xff]  }
  0xf2   : > { %12730 = vmatprep.subr.bf16.mxu0 %v14052_v13  ;;  %v15141_v39 = vsel %vm15052_vm13, %v2090_v14, %v2091_v37  ;;  %v14081_v24 = vld [vmem:[%s18008_s1 + $0x108] sm:$0xff]  }
  0xf3   : > { %v15115_v27 = vsel %vm15052_vm13, %v2076_v31, %v2077_v46  ;;  %v11548_v46 = vcombine.low %v15119_v16, %v15133_v33  ;;  %v14278_v31 = vld [vmem:[#allocation2 + $0x3c] sm:$0xf]  ;;  %v15312_v16 = vld [vmem:[#allocation2 + $0x10] sm:$0xf]  ;;  %v2811_v33 = vld [vmem:[#allocation2 + $0x18] sm:$0xf] }
  0xf4   : > { %12699 = vmatmul.mubr.bf16.gmra.mrb[4].mxu0 %v11482_v12  ;;  %v11547_v58 = vcombine.low %v15102_v62, %v15115_v27  ;;  %v15125_v12 = vsel %vm15052_vm13, %v11517_v17, %v2088_v20  ;;  %v11484_v10 = vcombine.low %v14278_v31, %v15143_v7  ;;  %v14280_v20 = vld [vmem:[#allocation2 + $0x48] sm:$0xf]  ;;  %v2808_v62 = vld [vmem:[#allocation2 + $0xc] sm:$0xf]  ;;  %v14082_v27 = vld [vmem:[#allocation2 + $0x3c] sm:$0xff]  }
  0xf5   : > { %12702 = vmatprep.mubr.bf16.mxu0 %v11483_v56  ;;  %12731 = vmatpush3.bf16.msra.mxu0 %v14052_v13  ;;  %v11518_v13 = vrot.slane %v1952_v0, 9  ;;  %v2095_v56 = vrot.slane %v15016_v53, 5  ;;  %v14061_v0 = vld [vmem:[%s18008_s1 + $0xa8] sm:$0xff]   ;;  %v11485_v14 = vcombine.low %v14280_v20, %v15155_v30  ;;  %v15179_v20 = vld [vmem:[%s18008_s1 + $0xc0] sm:$0xff]   ;;  %v18137_v15 = vcombine.low %v15125_v12, %v15141_v39  ;;  %v14087_v12 = vld [vmem:[%s18008_s1 + $0x118] sm:$0xff]  }
  0xf6   : > { %12732 = vmatprep.subr.bf16.mxu0 %v14055_v3  ;;  %v14286_v31 = vld [vmem:[#allocation2 + $0x8] sm:$0x1]  ;;  %v2860_v39 = vshll.u32 %v2808_v62, 16 }
  0xf7   : > { %v15153_v5 = vsel %vm15052_vm13, %v11518_v13, %v2095_v56  ;;  %v2097_v17 = vrot.slane %v2095_v56, 4  ;;  %v14064_v13 = vld [vmem:[%s18008_s1 + $0xb0] sm:$0xff]   ;;  %v1993_v50 = vrot.slane %v14286_v31, 5 }
  0xf8   : > { %v14282_v56 = vld [vmem:[#allocation2 + $0x54] sm:$0xf] }
  0xf9   : > { %12733 = vmatpush3.bf16.msra.mxu0 %v14055_v3  ;;  %v15160_v37 = vsel %vm15052_vm13, %v2097_v17, %v2098_v25  ;;  %v11486_v3 = vcombine.low %v14282_v56, %v15167_v2  ;;  %v14067_v25 = vld [vmem:[%s18008_s1 + $0xb8] sm:$0xff]   ;;  %v14284_v17 = vld [vmem:[#allocation2 + $0x60] sm:$0xf] }
  0xfa   : > { %12734 = vmatprep.subr.bf16.mxu0 %v14058_v48 }
  0xfc   : > { %12703 = vmatmul.mubr.bf16.gmra.mrb[8].mxu0 %v11484_v10  ;;  %v15173_v10 = vld [vmem:[#allocation2 + $0x64] sm:$0xf] }
  0xfd   : > { %12706 = vmatprep.mubr.bf16.mxu0 %v11485_v14  ;;  %12735 = vmatpush3.bf16.msra.mxu0 %v14058_v48  ;;  %v11487_v48 = vcombine.low %v14284_v17, %v15173_v10  ;;  %v298_v14 = vld [vmem:[%s14625_s26 + $0xf0] sm:$0xff] }
  0xfe   : > { %12736 = vmatprep.subr.bf16.mxu0 %v14061_v0  ;;  %v12164_v56 = vpack.c.bf16 %v298_v14, %v298_v14 }
 0x100   : > { %v709_v17 = vshrl.u32 %v12164_v56, 16  ;;  %v712_v32 = vshll.u32 %v12164_v56, 16 }
 0x101   : > { %12737 = vmatpush3.bf16.msra.mxu0 %v14061_v0  ;;  %v1937_v0 = vld [vmem:[#allocation2] sm:$0xe] }
 0x102   : > { %12738 = vmatprep.subr.bf16.mxu0 %v14064_v13  ;;  %v11503_v55 = vrot.slane %v1937_v0, 9  ;;  %v711_v23 = vrot.slane %v709_v17, 7  ;;  %v2004_v0 = vrot.slane %v15048_v47, 5  ;;  %v14287_v17 = vld [vmem:[#allocation2 + $0x14] sm:$0x1] }
 0x104   : > { %12707 = vmatmul.mubr.bf16.gmra.mrb[12].mxu0 %v11486_v3  ;;  %v715_v44 = vrot.slane %v711_v23, 4 }
 0x105   : > { %12710 = vmatprep.mubr.bf16.mxu0 %v11487_v48  ;;  %12739 = vmatpush3.bf16.msra.mxu0 %v14064_v13  ;;  %v299_v13 = vld [vmem:[%s14625_s26 + $0xf8] sm:$0xff] }
 0x106   : > { %12740 = vmatprep.subr.bf16.mxu0 %v14067_v25  ;;  %v12165_v3 = vpack.c.bf16 %v299_v13, %v299_v13  ;;  %v714_v13 = vor.u32 %v712_v32, %v711_v23  ;;  %v11505_v23 = vrot.slane %v1939_v1, 9  ;;  %v2006_v32 = vrot.slane %v2004_v0, 4 }
 0x108   : > { %v717_v48 = vshrl.u32 %v12165_v3, 16 }
 0x109   : > { %12741 = vmatpush3.bf16.msra.mxu0 %v14067_v25  ;;  %v1990_v25 = vrot.slane %v15039_v49, 5 }
 0x10a   : > { %12774 = vmatprep.subr.bf16.mxu0 %v15179_v20 }
 0x10b   : > { %v1992_v14 = vrot.slane %v1990_v25, 4  ;;  %v1991_v56 = vsel %vm15052_vm13, %v11503_v55, %v1990_v25  ;;  %v2011_v25 = vrot.slane %v15059_v9, 5  ;;  %v2020_v9 = vrot.slane %v2018_v43, 4 }
 0x10c   : > { %12711 = vmatmul.mubr.bf16.gmra.mrb[16].mxu0 %v11488_v45  ;;  %v15197_v45 = vrot.slane %v717_v48, 7  ;;  %v2000_v48 = vrot.slane %v14287_v17, 5  ;;  %v2032_v17 = vrot.slane %v15155_v30, 5 }
 0x10d   : > { %12714 = vmatprep.mubr.bf16.mxu0 %v11489_v34  ;;  %v720_v34 = vshll.u32 %v12165_v3, 16  ;;  %v1994_v3 = vsel %vm15052_vm13, %v1992_v14, %v1993_v50  ;;  %v2005_v50 = vsel %vm15052_vm13, %v11505_v23, %v2004_v0  ;;  %v14291_v23 = vld [vmem:[#allocation2 + $0x44] sm:$0x1] }
 0x10e   : > { %v11535_v38 = vcombine.low %v1991_v56, %v1994_v3  ;;  %v1942_v3 = vld [vmem:[#allocation2 + $0x3c] sm:$0xe] }
 0x10f   : > { %v722_v54 = vor.u32 %v720_v34, %v15197_v45  ;;  %v14288_v34 = vld [vmem:[#allocation2 + $0x20] sm:$0x1] }
 0x110   : > { %v2007_v61 = vrot.slane %v14288_v34, 5 }
 0x111   : > { %v723_v49 = vsel %vm14643_vm8, %v715_v44, %v722_v54  ;;  %v14289_v44 = vld [vmem:[#allocation2 + $0x2c] sm:$0x1] }
 0x112   : > { %887 = vst [vmem:[#allocation2 + $0xc4] sm:$0xf] %v723_v49  ;;  %v2008_v55 = vsel %vm15052_vm13, %v2006_v32, %v2007_v61  ;;  %v2014_v54 = vrot.slane %v14289_v44, 5  ;;  %v2028_v32 = vrot.slane %v14291_v23, 5  ;;  %v2034_v61 = vrot.slane %v2032_v17, 4 }
 0x113   : > { %v11537_v14 = vcombine.low %v2005_v50, %v2008_v55  ;;  %v2039_v50 = vrot.slane %v15167_v2, 5  ;;  %v2881_v23 = vshrl.u32 %v2811_v33, 16 }
 0x114   : > { %12715 = vmatmul.mubr.bf16.gmra.mrb[20].mxu0 %v11490_v41  ;;  %v884_v41 = vld [vmem:[#allocation2 + $0xc0] sm:$0xf] }
 0x115   : > { %12718 = vmatprep.mubr.bf16.mxu0 %v11491_v57  ;;  %v885_v31 = vsel %vm14651_vm9, %v714_v13, %v884_v41  ;;  %v1997_v57 = vrot.slane %v15042_v28, 5  ;;  %v2013_v13 = vrot.slane %v2011_v25, 4  ;;  %v14069_v41 = vld [vmem:[%s18008_s1 + $0xc8] sm:$0xff]  }
 0x116   : > { %886 = vst [vmem:[#allocation2 + $0xc0] sm:$0xf] %v885_v31  ;;  %v14290_v31 = vld [vmem:[#allocation2 + $0x38] sm:$0x1] }
 0x117   : > { %v1998_v28 = vsel %vm15052_vm13, %v11504_v51, %v1997_v57  ;;  %v2021_v4 = vrot.slane %v14290_v31, 5  ;;  %v2015_v1 = vsel %vm15052_vm13, %v2013_v13, %v2014_v54 }
 0x119   : > { %v2022_v56 = vsel %vm15052_vm13, %v2020_v9, %v2021_v4  ;;  %v14294_v4 = vld [vmem:[#allocation2 + $0x68] sm:$0x1] }
 0x11c   : > { %12719 = vmatmul.mubr.bf16.gmra.mrb[24].mxu0 %v11492_v60  ;;  %v1999_v60 = vrot.slane %v1997_v57, 4  ;;  %v2025_v57 = vrot.slane %v15143_v7, 5 }
 0x11d   : > { %12722 = vmatprep.mubr.bf16.mxu0 %v11493_v36  ;;  %v1941_v36 = vld [vmem:[#allocation2 + $0x30] sm:$0xe] }
 0x11e   : > { %v2001_v47 = vsel %vm15052_vm13, %v1999_v60, %v2000_v48  ;;  %v11507_v49 = vrot.slane %v1941_v36, 9  ;;  %v1943_v48 = vld [vmem:[#allocation2 + $0x48] sm:$0xe]  ;;  %v11508_v60 = vrot.slane %v1942_v3, 9  ;;  %v2027_v7 = vrot.slane %v2025_v57, 4  ;;  %v14074_v3 = vld [vmem:[%s18008_s1 + $0xf0] sm:$0xff]  }
 0x11f   : > { %v11536_v53 = vcombine.low %v1998_v28, %v2001_v47  ;;  %v11509_v34 = vrot.slane %v1943_v48, 9  ;;  %v14071_v28 = vld [vmem:[%s18008_s1 + $0xd8] sm:$0xff]  }
 0x120   : > { %v2019_v0 = vsel %vm15052_vm13, %v11507_v49, %v2018_v43  ;;  %v2026_v30 = vsel %vm15052_vm13, %v11508_v60, %v2025_v57  ;;  %v2029_v47 = vsel %vm15052_vm13, %v2027_v7, %v2028_v32  ;;  %v14293_v49 = vld [vmem:[#allocation2 + $0x5c] sm:$0x1]  ;;  %v888_v60 = vld [vmem:[#allocation2 + $0xc8] sm:$0x1]  ;;  %v2870_v7 = vshrl.u32 %v15312_v16, 16 }
 0x121   : > { %v11539_v51 = vcombine.low %v2019_v0, %v2022_v56  ;;  %v2033_v55 = vsel %vm15052_vm13, %v11509_v34, %v2032_v17  ;;  %v11540_v13 = vcombine.low %v2026_v30, %v2029_v47  ;;  %v2042_v2 = vrot.slane %v14293_v49, 5  ;;  %v14075_v48 = vld [vmem:[%s18008_s1 + $0xf8] sm:$0xff]   ;;  %v3567_v32 = vld [vmem:[#allocation2 + $0x48] sm:$0xe] }
 0x122   : > { %v14085_v30 = vld [vmem:[#allocation2 + $0x54] sm:$0xff]   ;;  %v2872_v49 = vrot.slane %v2870_v7, 4 }
 0x124   : > { %12723 = vmatmul.mubr.bf16.gmra.mrb[28].mxu0 %v11494_v6  ;;  %v11506_v6 = vrot.slane %v1940_v8, 9  ;;  %v14292_v8 = vld [vmem:[#allocation2 + $0x50] sm:$0x1] }
 0x125   : > { %12742 = vmatprep.mubr.bf16.mxu0 %v11535_v38  ;;  %v2035_v36 = vrot.slane %v14292_v8, 5  ;;  %v14083_v8 = vld [vmem:[#allocation2 + $0x48] sm:$0xff]  }
 0x126   : > { %v2012_v18 = vsel %vm15052_vm13, %v11506_v6, %v2011_v25  ;;  %v1944_v25 = vld [vmem:[#allocation2 + $0x54] sm:$0xe]  ;;  %v14072_v6 = vld [vmem:[%s18008_s1 + $0xe0] sm:$0xff]  }
 0x127   : > { %v11538_v38 = vcombine.low %v2012_v18, %v2015_v1  ;;  %v2036_v43 = vsel %vm15052_vm13, %v2034_v61, %v2035_v36  ;;  %v11510_v54 = vrot.slane %v1944_v25, 9  ;;  %v2049_v18 = vrot.slane %v14294_v4, 5 }
 0x128   : > { %v11541_v44 = vcombine.low %v2033_v55, %v2036_v43  ;;  %v2884_v36 = vshll.u32 %v2811_v33, 16  ;;  %v15337_v43 = vld [vmem:[#allocation2 + $0x1c] sm:$0xf] }
 0x129   : > { %v2040_v1 = vsel %vm15052_vm13, %v11510_v54, %v2039_v50  ;;  %v15350_v54 = vld [vmem:[#allocation2 + $0x64] sm:$0xf] }
 0x12c   : > { %12743 = vmatmul.mubr.bf16.vlgmr.msra.gmra.mrb[0].mxu0 %v11536_v53  ;;  %v2046_v53 = vrot.slane %v15173_v10, 5  ;;  %v14073_v10 = vld [vmem:[%s18008_s1 + $0xe8] sm:$0xff]  }
 0x12d   : > { %12775 = vmatpush3.bf16.msra.mxu0 %v15179_v20  ;;  %12746 = vmatprep.mubr.bf16.mxu0 %v11537_v14  ;;  %v14070_v20 = vld [vmem:[%s18008_s1 + $0xd0] sm:$0xff]   ;;  %v1945_v14 = vld [vmem:[#allocation2 + $0x60] sm:$0xe] }
 0x12e   : > { %12776 = vmatprep.subr.bf16.mxu0 %v14069_v41  ;;  %v11511_v9 = vrot.slane %v1945_v14, 9  ;;  %v2048_v31 = vrot.slane %v2046_v53, 4  ;;  %v14096_v14 = vld [vmem:[%s18008_s1 + $0x130] sm:$0xff]  }
 0x130   : > { %v2047_v0 = vsel %vm15052_vm13, %v11511_v9, %v2046_v53  ;;  %v2050_v56 = vsel %vm15052_vm13, %v2048_v31, %v2049_v18  ;;  %v3569_v9 = vld [vmem:[#allocation2 + $0x60] sm:$0xe]  ;;  %v3677_v31 = vrot.slane %v15350_v54, 5 }
 0x131   : > { %12777 = vmatpush3.bf16.msra.mxu0 %v14069_v41  ;;  %v2041_v41 = vrot.slane %v2039_v50, 4  ;;  %v11543_v17 = vcombine.low %v2047_v0, %v2050_v56  ;;  %v14093_v50 = vld [vmem:[%s18008_s1 + $0x128] sm:$0xff]   ;;  %v14086_v18 = vld [vmem:[#allocation2 + $0x60] sm:$0xff]   ;;  %v15359_v0 = vld [vmem:[#allocation2 + $0x14] sm:$0x1]  ;;  %v2894_v56 = vshrl.u32 %v15337_v43, 16 }
 0x132   : > { %12778 = vmatprep.subr.bf16.mxu0 %v14070_v20 }
 0x133   : > { %v2043_v57 = vsel %vm15052_vm13, %v2041_v41, %v2042_v2  ;;  %v15352_v41 = vld [vmem:[#allocation2 + $0x68] sm:$0x1]  ;;  %v15354_v2 = vrot.slane %v2881_v23, 4 }
 0x134   : > { %12747 = vmatmul.mubr.bf16.gmra.mrb[4].mxu0 %v11538_v38  ;;  %v14078_v38 = vld [vmem:[%s18008_s1 + $0x100] sm:$0xff]   ;;  %v3680_v4 = vrot.slane %v15352_v41, 5  ;;  %v15394_v23 = vld [vmem:[#allocation2 + $0x28] sm:$0xf] }
 0x135   : > { %12750 = vmatprep.mubr.bf16.mxu0 %v11539_v51  ;;  %12779 = vmatpush3.bf16.msra.mxu0 %v14070_v20  ;;  %v11542_v20 = vcombine.low %v2040_v1, %v2043_v57  ;;  %v724_v51 = vrot.slane %v15197_v45, 4  ;;  %v15323_v45 = vld [vmem:[#allocation2 + $0x50] sm:$0x1]  ;;  %v11646_v1 = vrot.slane %v3569_v9, 9  ;;  %v2914_v9 = vshll.u32 %v15394_v23, 16 }
 0x136   : > { %12780 = vmatprep.subr.bf16.mxu0 %v14071_v28  ;;  %v3666_v61 = vrot.slane %v15323_v45, 5  ;;  %v14088_v57 = vld [vmem:[#allocation2 + $0x6c] sm:$0xff]  }
 0x137   : > { %v889_v19 = vsel %vm14657_vm10, %v724_v51, %v888_v60  ;;  %v15375_v60 = vld [vmem:[#allocation2 + $0x20] sm:$0x1]  ;;  %v3575_v51 = vld [vmem:[#allocation2 + $0xa8] sm:$0xe] }
 0x138   : > { %890 = vst [vmem:[#allocation2 + $0xc8] sm:$0x1] %v889_v19  ;;  %v2886_v19 = vrot.slane %v2884_v36, 5  ;;  %v2900_v7 = vshll.u32 %v15375_v60, 16 }
 0x139   : > { %12781 = vmatpush3.bf16.msra.mxu0 %v14071_v28  ;;  %v11644_v28 = vrot.slane %v3567_v32, 9 }
 0x13a   : > { %12782 = vmatprep.subr.bf16.mxu0 %v14072_v6 }
 0x13c   : > { %12751 = vmatmul.mubr.bf16.gmra.mrb[8].mxu0 %v11540_v13  ;;  %v2862_v13 = vrot.slane %v2860_v39, 5 }
 0x13d   : > { %12754 = vmatprep.mubr.bf16.mxu0 %v11541_v44  ;;  %12783 = vmatpush3.bf16.msra.mxu0 %v14072_v6 }
 0x13e   : > { %12784 = vmatprep.subr.bf16.mxu0 %v14073_v10 }
 0x141   : > { %12785 = vmatpush3.bf16.msra.mxu0 %v14073_v10  ;;  %v2890_v10 = vshll.u32 %v15337_v43, 16 }
 0x142   : > { %12786 = vmatprep.subr.bf16.mxu0 %v14074_v3 }
 0x144   : > { %12755 = vmatmul.mubr.bf16.gmra.mrb[12].mxu0 %v11542_v20  ;;  %v14099_v20 = vld [vmem:[%s18008_s1 + $0x138] sm:$0xff]  }
 0x145   : > { %12758 = vmatprep.mubr.bf16.mxu0 %v11543_v17  ;;  %12787 = vmatpush3.bf16.msra.mxu0 %v14074_v3  ;;  %v3679_v3 = vrot.slane %v3677_v31, 4  ;;  %v2814_v17 = vld [vmem:[#allocation2 + $0x24] sm:$0xf] }
 0x146   : > { %12788 = vmatprep.subr.bf16.mxu0 %v14075_v48 }
 0x149   : > { %12789 = vmatpush3.bf16.msra.mxu0 %v14075_v48  ;;  %v15367_v48 = vsel %vm15052_vm13, %v11646_v1, %v3677_v31  ;;  %v15418_v31 = vld [vmem:[#allocation2 + $0x34] sm:$0xf] }
 0x14a   : > { %12822 = vmatprep.subr.bf16.mxu0 %v14078_v38  ;;  %18141 = vst [vmem:[#allocation12_spill] sm:$0xff] %v15367_v48  ;;  %v14098_v48 = vld [vmem:[#allocation2 + $0xc0] sm:$0xff]  }
 0x14c   : > { %12759 = vmatmul.mubr.bf16.gmra.mrb[16].mxu0 %v11544_v42  ;;  %v18138_v42 = vcombine.low %v15153_v5, %v15160_v37  ;;  %v2866_v5 = vshll.u32 %v15312_v16, 16  ;;  %v15321_v37 = vld [vmem:[#allocation2 + $0x4c] sm:$0xf] }
 0x14d   : > { %12762 = vmatprep.mubr.bf16.mxu0 %v11545_v52  ;;  %v14079_v52 = vld [vmem:[#allocation2 + $0x24] sm:$0xff]   ;;  %v3663_v34 = vrot.slane %v15321_v37, 5 }
 0x14e   : > { %v15348_v44 = vrot.slane %v2866_v5, 5  ;;  %v14089_v5 = vld [vmem:[#allocation2 + $0x78] sm:$0xff]  }
 0x14f   : > { %v3665_v25 = vrot.slane %v3663_v34, 4  ;;  %v15335_v55 = vsel %vm15052_vm13, %v11644_v28, %v3663_v34  ;;  %v14091_v34 = vld [vmem:[#allocation2 + $0x84] sm:$0xff]  }
 0x150   : > { %18139 = vst [vmem:[#allocation10_spill] sm:$0xff] %v15335_v55 }
 0x151   : > { %v15341_v53 = vsel %vm15052_vm13, %v3665_v25, %v3666_v61 }
 0x152   : > { %18140 = vst [vmem:[#allocation11_spill] sm:$0xff] %v15341_v53  ;;  %v2986_v53 = vshll.u32 %v15321_v37, 16 }
 0x154   : > { %12763 = vmatmul.mubr.bf16.gmra.mrb[20].mxu0 %v11546_v21  ;;  %v14084_v21 = vld [vmem:[%s18008_s1 + $0x110] sm:$0xff]  }
 0x155   : > { %12766 = vmatprep.mubr.bf16.mxu0 %v11547_v58  ;;  %v2857_v58 = vshrl.u32 %v2808_v62, 16 }
 0x157   : > { %v15328_v47 = vrot.slane %v2857_v58, 4  ;;  %v2896_v58 = vrot.slane %v2894_v56, 4  ;;  %v3573_v56 = vld [vmem:[#allocation2 + $0x90] sm:$0xe] }
 0x15c   : > { %12767 = vmatmul.mubr.bf16.gmra.mrb[24].mxu0 %v11548_v46  ;;  %v14090_v46 = vld [vmem:[%s18008_s1 + $0x120] sm:$0xff]  }
 0x15d   : > { %12770 = vmatprep.mubr.bf16.mxu0 %v18137_v15  ;;  %v2876_v15 = vshll.u32 %v15359_v0, 16 }
 0x15f   : > { %v15400_v61 = vrot.slane %v2876_v15, 5 }
 0x164   : > { %12771 = vmatmul.mubr.bf16.gmra.mrb[28].mxu0 %v18138_v42  ;;  %v15380_v42 = vld [vmem:[#allocation2 + $0x80] sm:$0x1] }
 0x165   : > { %12790 = vmatprep.mubr.bf16.mxu0 %v14076_v26  ;;  %v15378_v26 = vld [vmem:[#allocation2 + $0x7c] sm:$0xf] }
 0x166   : > { %v3691_v62 = vrot.slane %v15378_v26, 5 }
 0x168   : > { %v3693_v39 = vrot.slane %v3691_v62, 4 }
 0x16c   : > { %12791 = vmatmul.mubr.bf16.vlgmr.msra.gmra.mrb[0].mxu0 %v14077_v11  ;;  %v2905_v11 = vshrl.u32 %v2814_v17, 16 }
 0x16d   : > { %12823 = vmatpush3.bf16.msra.mxu0 %v14078_v38  ;;  %12794 = vmatprep.mubr.bf16.mxu0 %v14079_v52  ;;  %v15371_v38 = vsel %vm15052_vm13, %v3679_v3, %v3680_v4  ;;  %v2908_v52 = vshll.u32 %v2814_v17, 16  ;;  %v15420_v4 = vrot.slane %v2900_v7, 5 }
 0x16e   : > { %12824 = vmatprep.subr.bf16.mxu0 %v14081_v24  ;;  %18142 = vst [vmem:[#allocation13_spill] sm:$0xff] %v15371_v38  ;;  %v2823_v38 = vld [vmem:[#allocation2 + $0x48] sm:$0xf] }
 0x16f   : > { %v2910_v36 = vrot.slane %v2908_v52, 5  ;;  %v15434_v52 = vrot.slane %v2914_v9, 5 }
 0x171   : > { %12825 = vmatpush3.bf16.msra.mxu0 %v14081_v24  ;;  %v3571_v24 = vld [vmem:[#allocation2 + $0x78] sm:$0xe] }
 0x172   : > { %12826 = vmatprep.subr.bf16.mxu0 %v14084_v21  ;;  %v11648_v33 = vrot.slane %v3571_v24, 9  ;;  %v15436_v24 = vld [vmem:[#allocation2 + $0x38] sm:$0x1] }
 0x174   : > { %12795 = vmatmul.mubr.bf16.gmra.mrb[4].mxu0 %v14080_v59  ;;  %v3694_v59 = vrot.slane %v15380_v42, 5  ;;  %v15398_v32 = vsel %vm15052_vm13, %v11648_v33, %v3691_v62  ;;  %v2820_v62 = vld [vmem:[#allocation2 + $0x3c] sm:$0xf] }
 0x175   : > { %12798 = vmatprep.mubr.bf16.mxu0 %v14082_v27  ;;  %12827 = vmatpush3.bf16.msra.mxu0 %v14084_v21  ;;  %v2863_v21 = vor.u32 %v2862_v13, %v15328_v47  ;;  %v15385_v27 = vrot.slane %v2890_v10, 5  ;;  %18143 = vst [vmem:[#allocation14_spill] sm:$0xff] %v15398_v32  ;;  %v2887_v47 = vor.u32 %v2886_v19, %v15354_v2  ;;  %v2918_v2 = vshrl.u32 %v15394_v23, 16  ;;  %v15425_v10 = vld [vmem:[#allocation2 + $0x98] sm:$0x1] }
 0x176   : > { %12828 = vmatprep.subr.bf16.mxu0 %v14087_v12  ;;  %v15404_v28 = vsel %vm15052_vm13, %v3693_v39, %v3694_v59  ;;  %v2953_v9 = vshrl.u32 %v2820_v62, 16 }
 0x177   : > { %18144 = vst [vmem:[#allocation15_spill] sm:$0xff] %v15404_v28  ;;  %v2897_v25 = vor.u32 %v2896_v58, %v15385_v27  ;;  %v15429_v17 = vrot.slane %v2887_v47, 4  ;;  %v2920_v58 = vrot.slane %v2918_v2, 4 }
 0x179   : > { %12829 = vmatpush3.bf16.msra.mxu0 %v14087_v12  ;;  %v15390_v12 = vld [vmem:[%s18008_s1 + $0x140] sm:$0xff]   ;;  %v15431_v15 = vrot.slane %v2897_v25, 4  ;;  %v2948_v25 = vshll.u32 %v15436_v24, 16 }
 0x17a   : > { %12830 = vmatprep.subr.bf16.mxu0 %v14090_v46 }
 0x17c   : > { %12799 = vmatmul.mubr.bf16.gmra.mrb[8].mxu0 %v14083_v8  ;;  %v2907_v8 = vrot.slane %v2905_v11, 4  ;;  %v11650_v11 = vrot.slane %v3573_v56, 9  ;;  %v15465_v56 = vld [vmem:[#allocation2 + $0xa4] sm:$0x1] }
 0x17d   : > { %12802 = vmatprep.mubr.bf16.mxu0 %v14085_v30  ;;  %12831 = vmatpush3.bf16.msra.mxu0 %v14090_v46  ;;  %v2873_v46 = vor.u32 %v2872_v49, %v15348_v44  ;;  %v15406_v30 = vrot.slane %v2863_v21, 4  ;;  %v15415_v49 = vld [vmem:[#allocation2 + $0x2c] sm:$0x1]  ;;  %v14092_v21 = vld [vmem:[#allocation2 + $0x90] sm:$0xff]  }
 0x17e   : > { %12832 = vmatprep.subr.bf16.mxu0 %v14093_v50  ;;  %v2911_v1 = vor.u32 %v2910_v36, %v2907_v8  ;;  %v2924_v19 = vshll.u32 %v15415_v49, 16  ;;  %v2942_v8 = vshrl.u32 %v15418_v31, 16 }
 0x17f   : > { %v15413_v13 = vrot.slane %v2873_v46, 4  ;;  %v2938_v46 = vshll.u32 %v15418_v31, 16 }
 0x180   : > { %v15443_v7 = vrot.slane %v2911_v1, 4  ;;  %v15452_v47 = vrot.slane %v2924_v19, 5  ;;  %v2869_v1 = vsel %vm14637_vm7, %v15406_v30, %v15348_v44  ;;  %v2921_v19 = vor.u32 %v2920_v58, %v15434_v52 }
 0x181   : > { %12833 = vmatpush3.bf16.msra.mxu0 %v14093_v50  ;;  %v2817_v50 = vld [vmem:[#allocation2 + $0x30] sm:$0xf]  ;;  %v3715_v44 = vrot.slane %v15465_v56, 5  ;;  %v2956_v30 = vshll.u32 %v2820_v62, 16  ;;  %v11652_v58 = vrot.slane %v3575_v51, 9  ;;  %v15482_v35 = vrot.slane %v2938_v46, 5 }
 0x182   : > { %12834 = vmatprep.subr.bf16.mxu0 %v14096_v14  ;;  %v2932_v33 = vshll.u32 %v2817_v50, 16  ;;  %v14097_v51 = vld [vmem:[#allocation2 + $0xb4] sm:$0xff]   ;;  %v2955_v46 = vrot.slane %v2953_v9, 4  ;;  %v2893_v9 = vsel %vm14637_vm7, %v15429_v17, %v15385_v27  ;;  %v15532_v17 = vld [vmem:[#allocation2 + $0xc8] sm:$0x1] }
 0x184   : > { %12803 = vmatmul.mubr.bf16.gmra.mrb[12].mxu0 %v14086_v18  ;;  %v15423_v18 = vld [vmem:[#allocation2 + $0x94] sm:$0xf]  ;;  %v2934_v29 = vrot.slane %v2932_v33, 5  ;;  %v15498_v33 = vrot.slane %v2948_v25, 5 }
 0x185   : > { %12806 = vmatprep.mubr.bf16.mxu0 %v14088_v57  ;;  %12835 = vmatpush3.bf16.msra.mxu0 %v14096_v14  ;;  %v2929_v57 = vshrl.u32 %v2817_v50, 16  ;;  %v3705_v3 = vrot.slane %v15423_v18, 5  ;;  %v15455_v50 = vld [vmem:[#allocation2 + $0x40] sm:$0xf] }
 0x186   : > { %12836 = vmatprep.subr.bf16.mxu0 %v14099_v20  ;;  %v2962_v40 = vshll.u32 %v15455_v50, 16 }
 0x187   : > { %v3707_v59 = vrot.slane %v3705_v3, 4  ;;  %v15441_v39 = vsel %vm15052_vm13, %v11650_v11, %v3705_v3  ;;  %v15467_v3 = vld [vmem:[#allocation2 + $0xac] sm:$0xf]  ;;  %v15474_v11 = vld [vmem:[#allocation2 + $0xb0] sm:$0x1] }
 0x188   : > { %18145 = vst [vmem:[#allocation16_spill] sm:$0xff] %v15441_v39  ;;  %v3722_v6 = vrot.slane %v15474_v11, 5  ;;  %v2944_v39 = vrot.slane %v2942_v8, 4  ;;  %v15506_v8 = vld [vmem:[#allocation2 + $0x44] sm:$0x1] }
 0x189   : > { %12837 = vmatpush3.bf16.msra.mxu0 %v14099_v20  ;;  %v3708_v20 = vrot.slane %v15425_v10, 5  ;;  %18151 = vst [vmem:[#allocation22_spill] sm:$0xff] %v15506_v8 }
 0x18a   : > { %12870 = vmatprep.subr.bf16.mxu0 %v15390_v12  ;;  %v2945_v27 = vor.u32 %v2944_v39, %v15482_v35 }
 0x18b   : > { %v15450_v36 = vsel %vm15052_vm13, %v3707_v59, %v3708_v20  ;;  %v2879_v20 = vsel %vm14637_vm7, %v15413_v13, %v15400_v61  ;;  %v3574_v59 = vld [vmem:[#allocation2 + $0x9c] sm:$0xe]  ;;  %v2966_v61 = vshrl.u32 %v15455_v50, 16 }
 0x18c   : > { %12807 = vmatmul.mubr.bf16.gmra.mrb[16].mxu0 %v14089_v5  ;;  %v14094_v5 = vld [vmem:[#allocation2 + $0x9c] sm:$0xff]   ;;  %18146 = vst [vmem:[#allocation17_spill] sm:$0xff] %v15450_v36  ;;  %v11651_v14 = vrot.slane %v3574_v59, 9  ;;  %v15488_v59 = vrot.slane %v2921_v19, 4  ;;  %v2958_v19 = vrot.slane %v2956_v30, 5  ;;  %v11615_v25 = vcombine.low %v2869_v1, %v2879_v20 }
 0x18d   : > { %12810 = vmatprep.mubr.bf16.mxu0 %v14091_v34  ;;  %v15445_v34 = vrot.slane %v2929_v57, 4  ;;  %v15463_v57 = vld [vmem:[#allocation2 + $0xa0] sm:$0xf]  ;;  %v15524_v30 = vld [vmem:[#allocation2 + $0xb8] sm:$0xf] }
 0x18e   : > { %v3712_v2 = vrot.slane %v15463_v57, 5  ;;  %v15528_v1 = vld [vmem:[#allocation2 + $0xc4] sm:$0xf] }
 0x18f   : > { %v2935_v20 = vor.u32 %v2934_v29, %v15445_v34  ;;  %v2972_v29 = vshll.u32 %v15506_v8, 16  ;;  %v2826_v34 = vld [vmem:[#allocation2 + $0x54] sm:$0xf] }
 0x190   : > { %v3714_v13 = vrot.slane %v3712_v2, 4  ;;  %v15486_v36 = vsel %vm15052_vm13, %v11651_v14, %v3712_v2  ;;  %v3736_v14 = vrot.slane %v15532_v17, 5 }
 0x191   : > { %18147 = vst [vmem:[#allocation18_spill] sm:$0xff] %v15486_v36  ;;  %v15540_v36 = vld [vmem:[#allocation2 + $0x58] sm:$0xf]  ;;  %v15562_v55 = vrot.slane %v2935_v20, 4  ;;  %v2974_v20 = vrot.slane %v2972_v29, 5  ;;  %v3038_v29 = vshrl.u32 %v15350_v54, 16 }
 0x192   : > { %v15492_v28 = vsel %vm15052_vm13, %v3714_v13, %v3715_v44  ;;  %v15508_v44 = vrot.slane %v2962_v40, 5  ;;  %v2968_v13 = vrot.slane %v2966_v61, 4  ;;  %v2917_v40 = vsel %vm14637_vm7, %v15443_v7, %v15434_v52  ;;  %v15526_v61 = vld [vmem:[#allocation2 + $0xbc] sm:$0x1]  ;;  %18152 = vst [vmem:[#allocation23_spill] sm:$0xff] %v15540_v36 }
 0x193   : > { %18148 = vst [vmem:[#allocation19_spill] sm:$0xff] %v15492_v28  ;;  %v2977_v52 = vshrl.u32 %v2823_v38, 16  ;;  %v2980_v28 = vshll.u32 %v2823_v38, 16  ;;  %v3001_v38 = vshrl.u32 %v2826_v34, 16 }
 0x194   : > { %12811 = vmatmul.mubr.bf16.gmra.mrb[20].mxu0 %v14092_v21  ;;  %v3719_v21 = vrot.slane %v15467_v3, 5 }
 0x195   : > { %12814 = vmatprep.mubr.bf16.mxu0 %v14094_v5  ;;  %v14095_v5 = vld [vmem:[#allocation2 + $0xa8] sm:$0xff]  }
 0x196   : > { %v3721_v62 = vrot.slane %v3719_v21, 4  ;;  %v15496_v32 = vsel %vm15052_vm13, %v11652_v58, %v3719_v21  ;;  %v3576_v58 = vld [vmem:[#allocation2 + $0xb4] sm:$0xe]  ;;  %v3733_v21 = vrot.slane %v15528_v1, 5 }
 0x197   : > { %18149 = vst [vmem:[#allocation20_spill] sm:$0xff] %v15496_v32  ;;  %v11653_v7 = vrot.slane %v3576_v58, 9  ;;  %v2969_v32 = vor.u32 %v2968_v13, %v15508_v44 }
 0x198   : > { %v15504_v2 = vsel %vm15052_vm13, %v3721_v62, %v3722_v6  ;;  %v2903_v6 = vsel %vm14637_vm7, %v15431_v15, %v15420_v4  ;;  %v3726_v4 = vrot.slane %v15524_v30, 5  ;;  %v3729_v15 = vrot.slane %v15526_v61, 5  ;;  %v3577_v62 = vld [vmem:[#allocation2 + $0xc0] sm:$0xe] }
 0x199   : > { %18150 = vst [vmem:[#allocation21_spill] sm:$0xff] %v15504_v2  ;;  %v11654_v2 = vrot.slane %v3577_v62, 9  ;;  %v3735_v58 = vrot.slane %v3733_v21, 4  ;;  %v3004_v62 = vshll.u32 %v2826_v34, 16  ;;  %v11616_v8 = vcombine.low %v2893_v9, %v2903_v6 }
 0x19a   : > { %v3728_v39 = vrot.slane %v3726_v4, 4 }
 0x19b   : > { %v15554_v13 = vsel %vm15052_vm13, %v11654_v2, %v3733_v21  ;;  %v2927_v2 = vsel %vm14637_vm7, %v15488_v59, %v15452_v47  ;;  %v15572_v21 = vrot.slane %v2945_v27, 4  ;;  %v15579_v59 = vld [vmem:[#allocation2 + $0x5c] sm:$0x1] }
 0x19c   : > { %12815 = vmatmul.mubr.bf16.gmra.mrb[24].mxu0 %v14095_v5  ;;  %v2959_v5 = vor.u32 %v2958_v19, %v2955_v46  ;;  %v2990_v46 = vshrl.u32 %v15321_v37, 16  ;;  %v15550_v19 = vsel %vm15052_vm13, %v3728_v39, %v3729_v15  ;;  %18155 = vst [vmem:[#allocation26_spill] sm:$0xff] %v15554_v13  ;;  %v3010_v37 = vshll.u32 %v15540_v36, 16 }
 0x19d   : > { %12818 = vmatprep.mubr.bf16.mxu0 %v14097_v51  ;;  %v15544_v51 = vsel %vm15052_vm13, %v11653_v7, %v3726_v4  ;;  %18154 = vst [vmem:[#allocation25_spill] sm:$0xff] %v15550_v19  ;;  %v15560_v7 = vsel %vm15052_vm13, %v3735_v58, %v3736_v14  ;;  %v3014_v15 = vshrl.u32 %v15540_v36, 16  ;;  %v2979_v14 = vrot.slane %v2977_v52, 4 }
 0x19e   : > { %18153 = vst [vmem:[#allocation24_spill] sm:$0xff] %v15544_v51  ;;  %18156 = vst [vmem:[#allocation27_spill] sm:$0xff] %v15560_v7  ;;  %v15574_v34 = vrot.slane %v2959_v5, 4  ;;  %v2982_v58 = vrot.slane %v2980_v28, 5  ;;  %v15576_v4 = vrot.slane %v2986_v53, 5  ;;  %v2992_v19 = vrot.slane %v2990_v46, 4 }
 0x19f   : > { %v2829_v51 = vld [vmem:[#allocation2 + $0x60] sm:$0xf]  ;;  %v2970_v36 = vrot.slane %v2969_v32, 4  ;;  %v2996_v39 = vshll.u32 %v15323_v45, 16  ;;  %v3003_v7 = vrot.slane %v3001_v38, 4  ;;  %v3006_v13 = vrot.slane %v3004_v62, 5 }
 0x1a0   : > { %v11617_v47 = vcombine.low %v2917_v40, %v2927_v2  ;;  %v15581_v27 = vrot.slane %v3010_v37, 5  ;;  %v3016_v52 = vrot.slane %v3014_v15, 4  ;;  %v3025_v5 = vshrl.u32 %v2829_v51, 16  ;;  %v14101_v38 = vld [vmem:[%s18008_s1 + $0x148] sm:$0xff]   ;;  %v2835_v15 = vld [vmem:[#allocation2 + $0x78] sm:$0xf] }
 0x1a1   : > { %v3028_v28 = vshll.u32 %v2829_v51, 16  ;;  %v3034_v53 = vshll.u32 %v15350_v54, 16  ;;  %v2941_v45 = vsel %vm14637_vm7, %v15562_v55, %v15482_v35  ;;  %v2951_v32 = vsel %vm14637_vm7, %v15572_v21, %v15498_v33  ;;  %v15595_v51 = vld [vmem:[#allocation2 + $0x70] sm:$0xf] }
 0x1a2   : > { %v2993_v9 = vor.u32 %v2992_v19, %v15576_v4  ;;  %v3007_v6 = vor.u32 %v3006_v13, %v3003_v7  ;;  %v3020_v40 = vshll.u32 %v15579_v59, 16  ;;  %v2965_v35 = vsel %vm14637_vm7, %v15574_v34, %v15508_v44 }
 0x1a3   : > { %v2975_v55 = vsel %vm14637_vm7, %v2970_v36, %v2974_v20  ;;  %v15606_v33 = vrot.slane %v2996_v39, 5  ;;  %v3017_v19 = vor.u32 %v3016_v52, %v15581_v27  ;;  %v3027_v13 = vrot.slane %v3025_v5, 4 }
 0x1a4   : > { %12819 = vmatmul.mubr.bf16.gmra.mrb[28].mxu0 %v14098_v48  ;;  %v2832_v48 = vld [vmem:[#allocation2 + $0x6c] sm:$0xf]  ;;  %v3030_v62 = vrot.slane %v3028_v28, 5  ;;  %v15609_v7 = vrot.slane %v3034_v53, 5  ;;  %v3040_v37 = vrot.slane %v3038_v29, 4  ;;  %v2994_v21 = vrot.slane %v2993_v9, 4 }
 0x1a5   : > { %12838 = vmatprep.mubr.bf16.mxu0 %v11615_v25  ;;  %v2983_v25 = vor.u32 %v2982_v58, %v2979_v14  ;;  %v3049_v46 = vshrl.u32 %v2832_v48, 16  ;;  %v3052_v54 = vshll.u32 %v2832_v48, 16  ;;  %v3058_v14 = vshll.u32 %v15595_v51, 16  ;;  %v14102_v58 = vld [vmem:[%s18008_s1 + $0x150] sm:$0xff]  }
 0x1a6   : > { %v3062_v44 = vshrl.u32 %v15595_v51, 16  ;;  %v3008_v36 = vrot.slane %v3007_v6, 4  ;;  %v3022_v39 = vrot.slane %v3020_v40, 5  ;;  %v3073_v52 = vshrl.u32 %v2835_v15, 16 }
 0x1a7   : > { %v2984_v2 = vrot.slane %v2983_v25, 4  ;;  %v3051_v34 = vrot.slane %v3049_v46, 4  ;;  %v3054_v20 = vrot.slane %v3052_v54, 5  ;;  %v3082_v48 = vshll.u32 %v15378_v26, 16  ;;  %v2838_v54 = vld [vmem:[#allocation2 + $0x84] sm:$0xf] }
 0x1a8   : > { %v3086_v5 = vshrl.u32 %v15378_v26, 16  ;;  %v3018_v28 = vrot.slane %v3017_v19, 4  ;;  %v3031_v53 = vor.u32 %v3030_v62, %v3027_v13  ;;  %v11618_v29 = vcombine.low %v2941_v45, %v2951_v32  ;;  %v15635_v45 = vld [vmem:[#allocation2 + $0x74] sm:$0x1]  ;;  %v15639_v19 = vld [vmem:[#allocation2 + $0x88] sm:$0xf] }
 0x1a9   : > { %v11619_v25 = vcombine.low %v2965_v35, %v2975_v55  ;;  %v15621_v9 = vrot.slane %v3058_v14, 5  ;;  %v3064_v6 = vrot.slane %v3062_v44, 4  ;;  %v2989_v40 = vsel %vm14637_vm7, %v2984_v2, %v15576_v4 }
 0x1aa   : > { %v2999_v26 = vsel %vm14637_vm7, %v2994_v21, %v15606_v33  ;;  %v3013_v46 = vsel %vm14637_vm7, %v3008_v36, %v15581_v27  ;;  %v3055_v32 = vor.u32 %v3054_v20, %v3051_v34  ;;  %v15637_v4 = vrot.slane %v3082_v48, 5 }
 0x1ab   : > { %v3088_v55 = vrot.slane %v3086_v5, 4  ;;  %v3023_v33 = vsel %vm14637_vm7, %v3018_v28, %v3022_v39  ;;  %v3032_v27 = vrot.slane %v3031_v53, 4  ;;  %v3097_v2 = vshrl.u32 %v2838_v54, 16 }
 0x1ac   : > { %12839 = vmatmul.mubr.bf16.vlgmr.msra.gmra.mrb[0].mxu0 %v11616_v8  ;;  %v3076_v8 = vshll.u32 %v2835_v15, 16  ;;  %v3068_v15 = vshll.u32 %v15635_v45, 16  ;;  %v3100_v21 = vshll.u32 %v2838_v54, 16  ;;  %v3106_v14 = vshll.u32 %v15639_v19, 16 }
 0x1ad   : > { %12871 = vmatpush3.bf16.msra.mxu0 %v15390_v12  ;;  %12842 = vmatprep.mubr.bf16.mxu0 %v11617_v47  ;;  %v3041_v12 = vor.u32 %v3040_v37, %v15609_v7  ;;  %v3044_v47 = vshll.u32 %v15352_v41, 16  ;;  %v14103_v41 = vld [vmem:[%s18008_s1 + $0x158] sm:$0xff]   ;;  %v3065_v37 = vor.u32 %v3064_v6, %v15621_v9  ;;  %v3110_v44 = vshrl.u32 %v15639_v19, 16 }
 0x1ae   : > { %12872 = vmatprep.subr.bf16.mxu0 %v14101_v38  ;;  %v3078_v35 = vrot.slane %v3076_v8, 5  ;;  %v3056_v36 = vrot.slane %v3055_v32, 4  ;;  %v3089_v39 = vor.u32 %v3088_v55, %v15637_v4  ;;  %v3092_v20 = vshll.u32 %v15380_v42, 16  ;;  %v2841_v8 = vld [vmem:[#allocation2 + $0x90] sm:$0xf] }
 0x1af   : > { %v3042_v13 = vrot.slane %v3041_v12, 4  ;;  %v3046_v62 = vrot.slane %v3044_v47, 5  ;;  %v11620_v48 = vcombine.low %v2989_v40, %v2999_v26  ;;  %v11621_v5 = vcombine.low %v3013_v46, %v3023_v33  ;;  %v15657_v42 = vld [vmem:[#allocation2 + $0x8c] sm:$0x1] }
 0x1b0   : > { %v3066_v53 = vrot.slane %v3065_v37, 4  ;;  %v3070_v12 = vrot.slane %v3068_v15, 5  ;;  %v3099_v47 = vrot.slane %v3097_v2, 4  ;;  %v15659_v6 = vrot.slane %v3106_v14, 5 }
 0x1b1   : > { %12873 = vmatpush3.bf16.msra.mxu0 %v14101_v38  ;;  %v3075_v38 = vrot.slane %v3073_v52, 4  ;;  %v14104_v52 = vld [vmem:[%s18008_s1 + $0x160] sm:$0xff]   ;;  %v3047_v28 = vsel %vm14637_vm7, %v3042_v13, %v3046_v62  ;;  %v3112_v32 = vrot.slane %v3110_v44, 4  ;;  %v3121_v40 = vshrl.u32 %v2841_v8, 16 }
 0x1b2   : > { %12874 = vmatprep.subr.bf16.mxu0 %v14102_v58  ;;  %v3124_v26 = vshll.u32 %v2841_v8, 16  ;;  %v3090_v54 = vrot.slane %v3089_v39, 4  ;;  %v3134_v55 = vshrl.u32 %v15423_v18, 16  ;;  %v3071_v13 = vsel %vm14637_vm7, %v3066_v53, %v3070_v12 }
 0x1b3   : > { %v3079_v34 = vor.u32 %v3078_v35, %v3075_v38  ;;  %v3094_v38 = vrot.slane %v3092_v20, 5  ;;  %v14105_v35 = vld [vmem:[%s18008_s1 + $0x168] sm:$0xff]   ;;  %v3154_v62 = vshll.u32 %v15463_v57, 16  ;;  %v3158_v37 = vshrl.u32 %v15463_v57, 16  ;;  %v14106_v57 = vld [vmem:[%s18008_s1 + $0x170] sm:$0xff]  }
 0x1b4   : > { %12843 = vmatmul.mubr.bf16.gmra.mrb[4].mxu0 %v11618_v29  ;;  %v3102_v29 = vrot.slane %v3100_v21, 5  ;;  %v3113_v2 = vor.u32 %v3112_v32, %v15659_v6  ;;  %v3123_v21 = vrot.slane %v3121_v40, 4  ;;  %v3126_v14 = vrot.slane %v3124_v26, 5 }
 0x1b5   : > { %12846 = vmatprep.mubr.bf16.mxu0 %v11619_v25  ;;  %12875 = vmatpush3.bf16.msra.mxu0 %v14102_v58  ;;  %v3037_v58 = vsel %vm14637_vm7, %v3032_v27, %v15609_v7  ;;  %v2844_v25 = vld [vmem:[#allocation2 + $0x9c] sm:$0xf]  ;;  %v3061_v7 = vsel %vm14637_vm7, %v3056_v36, %v15621_v9  ;;  %v3080_v46 = vrot.slane %v3079_v34, 4  ;;  %v3116_v9 = vshll.u32 %v15657_v42, 16 }
 0x1b6   : > { %12876 = vmatprep.subr.bf16.mxu0 %v14103_v41  ;;  %v3145_v33 = vshrl.u32 %v2844_v25, 16  ;;  %v3148_v27 = vshll.u32 %v2844_v25, 16  ;;  %v3103_v15 = vor.u32 %v3102_v29, %v3099_v47  ;;  %v3095_v36 = vsel %vm14637_vm7, %v3090_v54, %v3094_v38  ;;  %v14107_v25 = vld [vmem:[%s18008_s1 + $0x178] sm:$0xff]  }
 0x1b7   : > { %v3085_v44 = vsel %vm14637_vm7, %v3080_v46, %v15637_v4  ;;  %v3136_v39 = vrot.slane %v3134_v55, 4  ;;  %v11623_v8 = vcombine.low %v3061_v7, %v3071_v13  ;;  %v3114_v53 = vrot.slane %v3113_v2, 4  ;;  %v2850_v46 = vld [vmem:[#allocation2 + $0xb4] sm:$0xf] }
 0x1b8   : > { %v3147_v20 = vrot.slane %v3145_v33, 4  ;;  %v3104_v4 = vrot.slane %v3103_v15, 4  ;;  %v3127_v12 = vor.u32 %v3126_v14, %v3123_v21  ;;  %v3140_v47 = vshll.u32 %v15425_v10, 16 }
 0x1b9   : > { %12877 = vmatpush3.bf16.msra.mxu0 %v14103_v41  ;;  %v3130_v41 = vshll.u32 %v15423_v18, 16  ;;  %v11622_v18 = vcombine.low %v3037_v58, %v3047_v28  ;;  %v3160_v58 = vrot.slane %v3158_v37, 4  ;;  %v2847_v28 = vld [vmem:[#allocation2 + $0xa8] sm:$0xf]  ;;  %v11624_v29 = vcombine.low %v3085_v44, %v3095_v36 }
 0x1ba   : > { %12878 = vmatprep.subr.bf16.mxu0 %v14104_v52  ;;  %v3164_v26 = vshll.u32 %v15465_v56, 16  ;;  %v3169_v7 = vshrl.u32 %v2847_v28, 16  ;;  %v3172_v38 = vshll.u32 %v2847_v28, 16  ;;  %v3178_v10 = vshll.u32 %v15467_v3, 16 }
 0x1bb   : > { %v15683_v34 = vrot.slane %v3130_v41, 5  ;;  %v3109_v41 = vsel %vm14637_vm7, %v3104_v4, %v15659_v6  ;;  %v3128_v33 = vrot.slane %v3127_v12, 4  ;;  %v3142_v56 = vrot.slane %v3140_v47, 5 }
 0x1bc   : > { %12847 = vmatmul.mubr.bf16.gmra.mrb[8].mxu0 %v11620_v48  ;;  %v3118_v48 = vrot.slane %v3116_v9, 5  ;;  %v3196_v13 = vshll.u32 %v2850_v46, 16  ;;  %v3202_v9 = vshll.u32 %v15524_v30, 16  ;;  %v3166_v15 = vrot.slane %v3164_v26, 5 }
 0x1bd   : > { %12850 = vmatprep.mubr.bf16.mxu0 %v11621_v5  ;;  %12879 = vmatpush3.bf16.msra.mxu0 %v14104_v52  ;;  %v3150_v52 = vrot.slane %v3148_v27, 5  ;;  %v15685_v5 = vrot.slane %v3154_v62, 5  ;;  %v3137_v32 = vor.u32 %v3136_v39, %v15683_v34  ;;  %v3193_v27 = vshrl.u32 %v2850_v46, 16 }
 0x1be   : > { %12880 = vmatprep.subr.bf16.mxu0 %v14105_v35  ;;  %v3119_v55 = vsel %vm14637_vm7, %v3114_v53, %v3118_v48  ;;  %v3206_v62 = vshrl.u32 %v15524_v30, 16  ;;  %v3171_v2 = vrot.slane %v3169_v7, 4  ;;  %v3174_v14 = vrot.slane %v3172_v38, 5 }
 0x1bf   : > { %v3151_v40 = vor.u32 %v3150_v52, %v3147_v20  ;;  %v3161_v54 = vor.u32 %v3160_v58, %v15685_v5  ;;  %v3138_v37 = vrot.slane %v3137_v32, 4  ;;  %v11625_v36 = vcombine.low %v3109_v41, %v3119_v55  ;;  %v2853_v52 = vld [vmem:[#allocation2 + $0xc0] sm:$0xf] }
 0x1c0   : > { %v3198_v39 = vrot.slane %v3196_v13, 5  ;;  %v3204_v20 = vrot.slane %v3202_v9, 5  ;;  %v3208_v30 = vrot.slane %v3206_v62, 4  ;;  %v3188_v58 = vshll.u32 %v15474_v11, 16 }
 0x1c1   : > { %12881 = vmatpush3.bf16.msra.mxu0 %v14105_v35  ;;  %v3182_v35 = vshrl.u32 %v15467_v3, 16  ;;  %v15706_v3 = vld [vmem:[%s18008_s1 + $0x180] sm:$0xff]   ;;  %v3152_v6 = vrot.slane %v3151_v40, 4  ;;  %v3162_v21 = vrot.slane %v3161_v54, 4  ;;  %v3143_v48 = vsel %vm14637_vm7, %v3138_v37, %v3142_v56 }
 0x1c2   : > { %12882 = vmatprep.subr.bf16.mxu0 %v14106_v57  ;;  %v3175_v53 = vor.u32 %v3174_v14, %v3171_v2  ;;  %v3217_v47 = vshrl.u32 %v2853_v52, 16  ;;  %v3230_v32 = vshrl.u32 %v15528_v1, 16  ;;  %v3209_v26 = vor.u32 %v3208_v30, %v3204_v20 }
 0x1c3   : > { %v3184_v44 = vrot.slane %v3182_v35, 4  ;;  %v3157_v28 = vsel %vm14637_vm7, %v3152_v6, %v15685_v5  ;;  %v3167_v4 = vsel %vm14637_vm7, %v3162_v21, %v3166_v15  ;;  %v3212_v11 = vshll.u32 %v15526_v61, 16  ;;  %v3562_v15 = vld [vmem:[#allocation2 + $0xc] sm:$0xe] }
 0x1c4   : > { %12851 = vmatmul.mubr.bf16.gmra.mrb[12].mxu0 %v11622_v18  ;;  %v3180_v18 = vrot.slane %v3178_v10, 5  ;;  %v11627_v7 = vcombine.low %v3157_v28, %v3167_v4  ;;  %v3176_v46 = vrot.slane %v3175_v53, 4  ;;  %v3190_v54 = vrot.slane %v3188_v58, 5 }
 0x1c5   : > { %12854 = vmatprep.mubr.bf16.mxu0 %v11623_v8  ;;  %12883 = vmatpush3.bf16.msra.mxu0 %v14106_v57  ;;  %v3195_v57 = vrot.slane %v3193_v27, 4  ;;  %v3133_v8 = vsel %vm14637_vm7, %v3128_v33, %v15683_v34  ;;  %v3226_v34 = vshll.u32 %v15528_v1, 16  ;;  %v3219_v38 = vrot.slane %v3217_v47, 4 }
 0x1c6   : > { %12884 = vmatprep.subr.bf16.mxu0 %v14107_v25  ;;  %v3185_v12 = vor.u32 %v3184_v44, %v3180_v18  ;;  %v3232_v41 = vrot.slane %v3230_v32, 4  ;;  %v3210_v33 = vrot.slane %v3209_v26, 4  ;;  %v3214_v56 = vrot.slane %v3212_v11, 5  ;;  %v3565_v26 = vld [vmem:[#allocation2 + $0x30] sm:$0xe] }
 0x1c7   : > { %v3199_v40 = vor.u32 %v3198_v39, %v3195_v57  ;;  %v3228_v35 = vrot.slane %v3226_v34, 5  ;;  %v3181_v1 = vsel %vm14637_vm7, %v3176_v46, %v3180_v18  ;;  %v3236_v9 = vshll.u32 %v15532_v17, 16 }
 0x1c8   : > { %v3186_v5 = vrot.slane %v3185_v12, 4  ;;  %v3215_v37 = vsel %vm14637_vm7, %v3210_v33, %v3214_v56  ;;  %v3628_v6 = vrot.slane %v15312_v16, 5  ;;  %v3631_v39 = vrot.slane %v15359_v0, 5  ;;  %v3564_v0 = vld [vmem:[#allocation2 + $0x24] sm:$0xe]  ;;  %v14110_v56 = vld [vmem:[%s18008_s1 + $0x190] sm:$0xff]  }
 0x1c9   : > { %12885 = vmatpush3.bf16.msra.mxu0 %v14107_v25  ;;  %v3220_v25 = vshll.u32 %v2853_v52, 16  ;;  %v3200_v55 = vrot.slane %v3199_v40, 4  ;;  %v3233_v13 = vor.u32 %v3232_v41, %v3228_v35  ;;  %v3238_v44 = vrot.slane %v3236_v9, 5 }
 0x1ca   : > { %12918 = vmatprep.subr.bf16.mxu0 %v15706_v3  ;;  %v3191_v61 = vsel %vm14637_vm7, %v3186_v5, %v3190_v54  ;;  %v3630_v57 = vrot.slane %v3628_v6, 4  ;;  %v3635_v16 = vrot.slane %v15337_v43, 5  ;;  %v3638_v12 = vrot.slane %v15375_v60, 5 }
 0x1cb   : > { %v3222_v10 = vrot.slane %v3220_v25, 5  ;;  %v3205_v62 = vsel %vm14637_vm7, %v3200_v55, %v3204_v20  ;;  %v11628_v2 = vcombine.low %v3181_v1, %v3191_v61  ;;  %v3234_v18 = vrot.slane %v3233_v13, 4  ;;  %v18158_v1 = vld [vmem:[#allocation23_spill] sm:$0xff] }
 0x1cc   : > { %12855 = vmatmul.mubr.bf16.gmra.mrb[16].mxu0 %v11624_v29  ;;  %v11626_v29 = vcombine.low %v3133_v8, %v3143_v48  ;;  %v11629_v21 = vcombine.low %v3205_v62, %v3215_v37  ;;  %v3632_v52 = vsel %vm15052_vm13, %v3630_v57, %v3631_v39  ;;  %v3563_v8 = vld [vmem:[#allocation2 + $0x18] sm:$0xe]  ;;  %v3642_v48 = vrot.slane %v15394_v23, 5  ;;  %v3568_v61 = vld [vmem:[#allocation2 + $0x54] sm:$0xe]  ;;  %v14113_v39 = vld [vmem:[%s18008_s1 + $0x1a8] sm:$0xff]  }
 0x1cd   : > { %12858 = vmatprep.mubr.bf16.mxu0 %v11625_v36  ;;  %v3223_v27 = vor.u32 %v3222_v10, %v3219_v38  ;;  %v11639_v36 = vrot.slane %v3562_v15, 9  ;;  %v3239_v20 = vsel %vm14637_vm7, %v3234_v18, %v3238_v44  ;;  %v11640_v4 = vrot.slane %v3563_v8, 9  ;;  %v3572_v8 = vld [vmem:[#allocation2 + $0x84] sm:$0xe] }
 0x1ce   : > { %v3637_v53 = vrot.slane %v3635_v16, 4  ;;  %v11641_v47 = vrot.slane %v3564_v0, 9  ;;  %v3644_v25 = vrot.slane %v3642_v48, 4  ;;  %v3645_v43 = vrot.slane %v15415_v49, 5  ;;  %v3566_v49 = vld [vmem:[#allocation2 + $0x3c] sm:$0xe] }
 0x1cf   : > { %v3224_v14 = vrot.slane %v3223_v27, 4  ;;  %v3629_v30 = vsel %vm15052_vm13, %v11639_v36, %v3628_v6  ;;  %v3636_v34 = vsel %vm15052_vm13, %v11640_v4, %v3635_v16  ;;  %v3649_v23 = vrot.slane %v15418_v31, 5  ;;  %v14109_v31 = vld [vmem:[%s18008_s1 + $0x188] sm:$0xff]   ;;  %v14111_v6 = vld [vmem:[%s18008_s1 + $0x198] sm:$0xff]  }
 0x1d0   : > { %v11671_v28 = vcombine.low %v3629_v30, %v3632_v52  ;;  %v3639_v32 = vsel %vm15052_vm13, %v3637_v53, %v3638_v12  ;;  %v3643_v40 = vsel %vm15052_vm13, %v11641_v47, %v3642_v48  ;;  %v3646_v60 = vsel %vm15052_vm13, %v3644_v25, %v3645_v43  ;;  %v14115_v4 = vld [vmem:[%s18008_s1 + $0x1b8] sm:$0xff]   ;;  %v18163_v12 = vld [vmem:[#allocation13_spill] sm:$0xff] }
 0x1d1   : > { %v3229_v17 = vsel %vm14637_vm7, %v3224_v14, %v3228_v35  ;;  %v3656_v11 = vrot.slane %v15455_v50, 5  ;;  %v11642_v46 = vrot.slane %v3565_v26, 9  ;;  %v3651_v5 = vrot.slane %v3649_v23, 4  ;;  %v18157_v35 = vld [vmem:[#allocation22_spill] sm:$0xff]  ;;  %v18162_v53 = vld [vmem:[#allocation12_spill] sm:$0xff] }
 0x1d2   : > { %v11630_v58 = vcombine.low %v3229_v17, %v3239_v20  ;;  %v3652_v54 = vrot.slane %v15436_v24, 5  ;;  %v11643_v38 = vrot.slane %v3566_v49, 9  ;;  %v3659_v41 = vrot.slane %v18157_v35, 5  ;;  %v3570_v14 = vld [vmem:[#allocation2 + $0x6c] sm:$0xe]  ;;  %v18160_v20 = vld [vmem:[#allocation11_spill] sm:$0xff] }
 0x1d3   : > { %v3658_v10 = vrot.slane %v3656_v11, 4  ;;  %v3650_v50 = vsel %vm15052_vm13, %v11642_v46, %v3649_v23  ;;  %v11645_v9 = vrot.slane %v3568_v61, 9  ;;  %v3673_v37 = vrot.slane %v15579_v59, 5  ;;  %v14112_v59 = vld [vmem:[%s18008_s1 + $0x1a0] sm:$0xff]   ;;  %v18159_v17 = vld [vmem:[#allocation10_spill] sm:$0xff]  ;;  %v18172_v49 = vld [vmem:[#allocation19_spill] sm:$0xff] }
 0x1d4   : > { %12859 = vmatmul.mubr.bf16.gmra.mrb[20].mxu0 %v11626_v29  ;;  %v11672_v29 = vcombine.low %v3636_v34, %v3639_v32  ;;  %v3653_v55 = vsel %vm15052_vm13, %v3651_v5, %v3652_v54  ;;  %v3657_v24 = vsel %vm15052_vm13, %v11643_v38, %v3656_v11  ;;  %v11647_v44 = vrot.slane %v3570_v14, 9  ;;  %v18165_v34 = vld [vmem:[#allocation14_spill] sm:$0xff]  ;;  %v18166_v32 = vld [vmem:[#allocation15_spill] sm:$0xff]  ;;  %v18175_v46 = vld [vmem:[#allocation21_spill] sm:$0xff] }
 0x1d5   : > { %12862 = vmatprep.mubr.bf16.mxu0 %v11627_v7  ;;  %v11673_v7 = vcombine.low %v3643_v40, %v3646_v60  ;;  %v3660_v33 = vsel %vm15052_vm13, %v3658_v10, %v3659_v41  ;;  %v11674_v27 = vcombine.low %v3650_v50, %v3653_v55  ;;  %v3687_v57 = vrot.slane %v15635_v45, 5  ;;  %v14114_v45 = vld [vmem:[%s18008_s1 + $0x1b0] sm:$0xff]   ;;  %v18168_v40 = vld [vmem:[#allocation16_spill] sm:$0xff]  ;;  %v18169_v60 = vld [vmem:[#allocation17_spill] sm:$0xff] }
 0x1d6   : > { %v11675_v13 = vcombine.low %v3657_v24, %v3660_v33  ;;  %v18161_v16 = vcombine.low %v18159_v17, %v18160_v20  ;;  %v3698_v52 = vrot.slane %v15639_v19, 5  ;;  %v11649_v0 = vrot.slane %v3572_v8, 9  ;;  %v18171_v11 = vld [vmem:[#allocation18_spill] sm:$0xff]  ;;  %v18177_v54 = vld [vmem:[#allocation24_spill] sm:$0xff]  ;;  %v18181_v41 = vld [vmem:[#allocation27_spill] sm:$0xff] }
 0x1d7   : > { %v18164_v19 = vcombine.low %v18162_v53, %v18163_v12  ;;  %v18167_v23 = vcombine.low %v18165_v34, %v18166_v32  ;;  %v18170_v26 = vcombine.low %v18168_v40, %v18169_v60  ;;  %v14116_v10 = vld [vmem:[#allocation2 + $0x18] sm:$0xff]   ;;  %v18180_v35 = vld [vmem:[#allocation26_spill] sm:$0xff]  ;;  %v14119_v24 = vld [vmem:[#allocation2 + $0x30] sm:$0xff]  }
 0x1d8   : > { %v3699_v47 = vsel %vm15052_vm13, %v11649_v0, %v3698_v52  ;;  %v18182_v50 = vcombine.low %v18180_v35, %v18181_v41  ;;  %v14117_v55 = vld [vmem:[#allocation2 + $0x24] sm:$0xff]   ;;  %v14127_v61 = vld [vmem:[%s18008_s1 + $0x1d8] sm:$0xff]   ;;  %v15872_v0 = vld [vmem:[#allocation2 + $0x74] sm:$0x1] }
 0x1d9   : > { %v14121_v33 = vld [vmem:[%s18008_s1 + $0x1c8] sm:$0xff]   ;;  %v15851_v14 = vld [vmem:[#allocation2 + $0x1c] sm:$0xf]  ;;  %v5319_v12 = vrot.slane %v15872_v0, 5  ;;  %v15883_v40 = vld [vmem:[#allocation2 + $0x20] sm:$0x1] }
 0x1da   : > { %v15864_v20 = vld [vmem:[#allocation2 + $0x28] sm:$0xf]  ;;  %v4515_v41 = vshll.u32 %v15883_v40, 16 }
 0x1dc   : > { %12863 = vmatmul.mubr.bf16.gmra.mrb[24].mxu0 %v11628_v2 }
 0x1dd   : > { %12866 = vmatprep.mubr.bf16.mxu0 %v11629_v21  ;;  %v3684_v21 = vrot.slane %v15595_v51, 5 }
 0x1df   : > { %v3686_v36 = vrot.slane %v3684_v21, 4  ;;  %v3685_v51 = vsel %vm15052_vm13, %v11647_v44, %v3684_v21  ;;  %v14125_v44 = vld [vmem:[#allocation2 + $0x60] sm:$0xff]  }
 0x1e1   : > { %v3688_v30 = vsel %vm15052_vm13, %v3686_v36, %v3687_v57  ;;  %v4450_v36 = vld [vmem:[#allocation2 + $0x24] sm:$0xf] }
 0x1e2   : > { %v11679_v48 = vcombine.low %v3685_v51, %v3688_v30  ;;  %v4505_v30 = vshll.u32 %v15851_v14, 16  ;;  %v4523_v8 = vshll.u32 %v4450_v36, 16 }
 0x1e4   : > { %12867 = vmatmul.mubr.bf16.gmra.mrb[28].mxu0 %v11630_v58  ;;  %v3700_v58 = vrot.slane %v3698_v52, 4  ;;  %v4509_v52 = vshrl.u32 %v15851_v14, 16 }
 0x1e5   : > { %12886 = vmatprep.mubr.bf16.mxu0 %v11671_v28  ;;  %v3701_v28 = vrot.slane %v15657_v42, 5  ;;  %v14118_v42 = vld [vmem:[%s18008_s1 + $0x1c0] sm:$0xff]  }
 0x1e6   : > { %v4511_v34 = vrot.slane %v4509_v52, 4  ;;  %v14131_v52 = vld [vmem:[#allocation2 + $0x90] sm:$0xff]  }
 0x1e7   : > { %v3702_v25 = vsel %vm15052_vm13, %v3700_v58, %v3701_v28  ;;  %v4529_v58 = vshll.u32 %v15864_v20, 16  ;;  %v4533_v28 = vshrl.u32 %v15864_v20, 16 }
 0x1e8   : > { %v11681_v43 = vcombine.low %v3699_v47, %v3702_v25 }
 0x1ec   : > { %12887 = vmatmul.mubr.bf16.vlgmr.msra.gmra.mrb[0].mxu0 %v11672_v29  ;;  %v18173_v29 = vcombine.low %v18171_v11, %v18172_v49  ;;  %v14128_v49 = vld [vmem:[#allocation2 + $0x78] sm:$0xff]  }
 0x1ed   : > { %12919 = vmatpush3.bf16.msra.mxu0 %v15706_v3  ;;  %12890 = vmatprep.mubr.bf16.mxu0 %v11673_v7  ;;  %v3670_v3 = vrot.slane %v18158_v1, 5  ;;  %v18174_v7 = vld [vmem:[#allocation20_spill] sm:$0xff] }
 0x1ee   : > { %12920 = vmatprep.subr.bf16.mxu0 %v14109_v31  ;;  %v18176_v5 = vcombine.low %v18174_v7, %v18175_v46  ;;  %v14120_v1 = vld [vmem:[#allocation2 + $0x3c] sm:$0xff]   ;;  %v15891_v7 = vrot.slane %v4529_v58, 5  ;;  %v4535_v46 = vrot.slane %v4533_v28, 4 }
 0x1ef   : > { %v3672_v62 = vrot.slane %v3670_v3, 4  ;;  %v3671_v15 = vsel %vm15052_vm13, %v11645_v9, %v3670_v3  ;;  %v14122_v3 = vld [vmem:[#allocation2 + $0x48] sm:$0xff]   ;;  %v5206_v9 = vld [vmem:[#allocation2 + $0x54] sm:$0xe] }
 0x1f1   : > { %12921 = vmatpush3.bf16.msra.mxu0 %v14109_v31  ;;  %v3674_v2 = vsel %vm15052_vm13, %v3672_v62, %v3673_v37  ;;  %v18178_v31 = vld [vmem:[#allocation25_spill] sm:$0xff] }
 0x1f2   : > { %12922 = vmatprep.subr.bf16.mxu0 %v14110_v56  ;;  %v11677_v18 = vcombine.low %v3671_v15, %v3674_v2  ;;  %v18179_v38 = vcombine.low %v18177_v54, %v18178_v31  ;;  %v11780_v15 = vrot.slane %v5206_v9, 9  ;;  %v4447_v2 = vld [vmem:[#allocation2 + $0x18] sm:$0xf]  ;;  %v4453_v31 = vld [vmem:[#allocation2 + $0x30] sm:$0xf] }
 0x1f3   : > { %v4496_v17 = vshrl.u32 %v4447_v2, 16  ;;  %v4499_v51 = vshll.u32 %v4447_v2, 16  ;;  %v14139_v54 = vld [vmem:[%s18008_s1 + $0x1f8] sm:$0xff]  }
 0x1f4   : > { %12891 = vmatmul.mubr.bf16.gmra.mrb[4].mxu0 %v11674_v27  ;;  %v15842_v27 = vld [vmem:[#allocation2 + $0x58] sm:$0xf] }
 0x1f5   : > { %12894 = vmatprep.mubr.bf16.mxu0 %v11675_v13  ;;  %12923 = vmatpush3.bf16.msra.mxu0 %v14110_v56  ;;  %v14124_v56 = vld [vmem:[%s18008_s1 + $0x1d0] sm:$0xff]   ;;  %v15844_v13 = vld [vmem:[#allocation2 + $0x5c] sm:$0x1]  ;;  %v5302_v62 = vrot.slane %v15842_v27, 5  ;;  %v4498_v47 = vrot.slane %v4496_v17, 4 }
 0x1f6   : > { %12924 = vmatprep.subr.bf16.mxu0 %v14111_v6  ;;  %v5305_v37 = vrot.slane %v15844_v13, 5 }
 0x1f7   : > { %v5304_v21 = vrot.slane %v5302_v62, 4 }
 0x1f9   : > { %12925 = vmatpush3.bf16.msra.mxu0 %v14111_v6  ;;  %v14130_v6 = vld [vmem:[%s18008_s1 + $0x1e0] sm:$0xff]   ;;  %v15859_v57 = vsel %vm15052_vm13, %v5304_v21, %v5305_v37  ;;  %v15917_v37 = vld [vmem:[#allocation2 + $0x34] sm:$0xf]  ;;  %v15923_v21 = vrot.slane %v4515_v41, 5 }
 0x1fa   : > { %12926 = vmatprep.subr.bf16.mxu0 %v14112_v59  ;;  %18184 = vst [vmem:[#allocation23_spill] sm:$0xff] %v15859_v57  ;;  %v4553_v58 = vshll.u32 %v15917_v37, 16  ;;  %v4462_v57 = vld [vmem:[#allocation2 + $0x54] sm:$0xf] }
 0x1fc   : > { %12895 = vmatmul.mubr.bf16.gmra.mrb[8].mxu0 %v18161_v16  ;;  %v5214_v16 = vld [vmem:[#allocation2 + $0xb4] sm:$0xe] }
 0x1fd   : > { %12898 = vmatprep.mubr.bf16.mxu0 %v11677_v18  ;;  %12927 = vmatpush3.bf16.msra.mxu0 %v14112_v59  ;;  %v14123_v59 = vld [vmem:[#allocation2 + $0x54] sm:$0xff]   ;;  %v15855_v18 = vsel %vm15052_vm13, %v11780_v15, %v5302_v62  ;;  %v15915_v62 = vld [vmem:[%s18008_s1 + $0x200] sm:$0xff]  }
 0x1fe   : > { %12928 = vmatprep.subr.bf16.mxu0 %v14113_v39  ;;  %18183 = vst [vmem:[#allocation22_spill] sm:$0xff] %v15855_v18  ;;  %v14138_v18 = vld [vmem:[#allocation2 + $0xcc] sm:$0xff]  }
 0x201   : > { %12929 = vmatpush3.bf16.msra.mxu0 %v14113_v39  ;;  %v14133_v39 = vld [vmem:[%s18008_s1 + $0x1e8] sm:$0xff]  }
 0x202   : > { %12930 = vmatprep.subr.bf16.mxu0 %v14114_v45 }
 0x204   : > { %12899 = vmatmul.mubr.bf16.gmra.mrb[12].mxu0 %v18164_v19  ;;  %v14136_v19 = vld [vmem:[%s18008_s1 + $0x1f0] sm:$0xff]  }
 0x205   : > { %12902 = vmatprep.mubr.bf16.mxu0 %v11679_v48  ;;  %12931 = vmatpush3.bf16.msra.mxu0 %v14114_v45  ;;  %v4520_v45 = vshrl.u32 %v4450_v36, 16  ;;  %v15870_v48 = vld [vmem:[#allocation2 + $0x70] sm:$0xf]  ;;  %v14129_v36 = vld [vmem:[#allocation2 + $0x84] sm:$0xff]  }
 0x206   : > { %12932 = vmatprep.subr.bf16.mxu0 %v14115_v4  ;;  %v5316_v53 = vrot.slane %v15870_v48, 5 }
 0x207   : > { %v4522_v60 = vrot.slane %v4520_v45, 4 }
 0x208   : > { %v5318_v32 = vrot.slane %v5316_v53, 4 }
 0x209   : > { %12933 = vmatpush3.bf16.msra.mxu0 %v14115_v4  ;;  %v5208_v4 = vld [vmem:[#allocation2 + $0x6c] sm:$0xe] }
 0x20a   : > { %12966 = vmatprep.subr.bf16.mxu0 %v14118_v42  ;;  %v11782_v25 = vrot.slane %v5208_v4, 9  ;;  %v4557_v4 = vshrl.u32 %v15917_v37, 16 }
 0x20c   : > { %12903 = vmatmul.mubr.bf16.gmra.mrb[16].mxu0 %v18167_v23  ;;  %v14126_v23 = vld [vmem:[#allocation2 + $0x6c] sm:$0xff]   ;;  %v15887_v11 = vsel %vm15052_vm13, %v11782_v25, %v5316_v53  ;;  %v15944_v53 = vld [vmem:[#allocation2 + $0x40] sm:$0xf]  ;;  %v15948_v25 = vld [vmem:[#allocation2 + $0x38] sm:$0x1] }
 0x20d   : > { %12906 = vmatprep.mubr.bf16.mxu0 %v11681_v43  ;;  %v15881_v43 = vrot.slane %v4505_v30, 5  ;;  %18185 = vst [vmem:[#allocation10_spill] sm:$0xff] %v15887_v11 }
 0x20f   : > { %v4512_v35 = vor.u32 %v4511_v34, %v15881_v43  ;;  %v15952_v34 = vld [vmem:[#allocation2 + $0x98] sm:$0x1] }
 0x211   : > { %v15921_v2 = vrot.slane %v4512_v35, 4 }
 0x214   : > { %12907 = vmatmul.mubr.bf16.gmra.mrb[20].mxu0 %v18170_v26  ;;  %v4525_v26 = vrot.slane %v4523_v8, 5 }
 0x215   : > { %12910 = vmatprep.mubr.bf16.mxu0 %v18173_v29  ;;  %v15889_v29 = vld [vmem:[#allocation2 + $0x2c] sm:$0x1] }
 0x21c   : > { %12911 = vmatmul.mubr.bf16.gmra.mrb[24].mxu0 %v18176_v5  ;;  %v15895_v5 = vsel %vm15052_vm13, %v5318_v32, %v5319_v12  ;;  %v15954_v32 = vld [vmem:[#allocation2 + $0xa0] sm:$0xf] }
 0x21d   : > { %12914 = vmatprep.mubr.bf16.mxu0 %v18179_v38  ;;  %18186 = vst [vmem:[#allocation11_spill] sm:$0xff] %v15895_v5  ;;  %v5213_v38 = vld [vmem:[#allocation2 + $0xa8] sm:$0xe] }
 0x224   : > { %12915 = vmatmul.mubr.bf16.gmra.mrb[28].mxu0 %v18182_v50  ;;  %v4526_v50 = vor.u32 %v4525_v26, %v4522_v60  ;;  %v5211_v60 = vld [vmem:[#allocation2 + $0x90] sm:$0xe] }
 0x225   : > { %12934 = vmatprep.mubr.bf16.mxu0 %v14116_v10 }
 0x22c   : > { %12935 = vmatmul.mubr.bf16.vlgmr.msra.gmra.mrb[0].mxu0 %v14117_v55  ;;  %v4539_v55 = vshll.u32 %v15889_v29, 16 }
 0x22d   : > { %12967 = vmatpush3.bf16.msra.mxu0 %v14118_v42  ;;  %12938 = vmatprep.mubr.bf16.mxu0 %v14119_v24  ;;  %v4501_v42 = vrot.slane %v4499_v51, 5  ;;  %v15905_v24 = vld [vmem:[#allocation2 + $0x88] sm:$0xf]  ;;  %v4547_v51 = vshll.u32 %v4453_v31, 16 }
 0x22e   : > { %12968 = vmatprep.subr.bf16.mxu0 %v14121_v33  ;;  %v15927_v17 = vrot.slane %v4539_v55, 5 }
 0x22f   : > { %v4502_v10 = vor.u32 %v4501_v42, %v4498_v47  ;;  %v15950_v42 = vld [vmem:[#allocation2 + $0x94] sm:$0xf]  ;;  %v4549_v41 = vrot.slane %v4547_v51, 5  ;;  %v16014_v47 = vld [vmem:[#allocation2 + $0xbc] sm:$0x1] }
 0x230   : > { %v5337_v26 = vrot.slane %v15950_v42, 5 }
 0x231   : > { %12969 = vmatpush3.bf16.msra.mxu0 %v14121_v33  ;;  %v15907_v33 = vld [vmem:[#allocation2 + $0x8c] sm:$0x1]  ;;  %v15919_v15 = vrot.slane %v4502_v10, 4  ;;  %v5344_v10 = vrot.slane %v15954_v32, 5 }
 0x232   : > { %12970 = vmatprep.subr.bf16.mxu0 %v14124_v56  ;;  %v5333_v9 = vrot.slane %v15907_v33, 5  ;;  %v5339_v55 = vrot.slane %v5337_v26, 4 }
 0x234   : > { %12939 = vmatmul.mubr.bf16.gmra.mrb[4].mxu0 %v14120_v1  ;;  %v4544_v1 = vshrl.u32 %v4453_v31, 16  ;;  %v5212_v31 = vld [vmem:[#allocation2 + $0x9c] sm:$0xe] }
 0x235   : > { %12942 = vmatprep.mubr.bf16.mxu0 %v14122_v3  ;;  %12971 = vmatpush3.bf16.msra.mxu0 %v14124_v56  ;;  %v4536_v56 = vor.u32 %v4535_v46, %v15891_v7  ;;  %v5210_v3 = vld [vmem:[#allocation2 + $0x84] sm:$0xe]  ;;  %v4577_v46 = vshll.u32 %v15944_v53, 16 }
 0x236   : > { %12972 = vmatprep.subr.bf16.mxu0 %v14127_v61  ;;  %v15935_v8 = vrot.slane %v4544_v1, 4  ;;  %v4559_v1 = vrot.slane %v4557_v4, 4 }
 0x237   : > { %v15933_v45 = vrot.slane %v4536_v56, 4  ;;  %v11786_v56 = vrot.slane %v5212_v31, 9  ;;  %v15994_v31 = vld [vmem:[#allocation2 + $0x4c] sm:$0xf] }
 0x238   : > { %18194 = vst [vmem:[#allocation19_spill] sm:$0xff] %v15994_v31 }
 0x239   : > { %12973 = vmatpush3.bf16.msra.mxu0 %v14127_v61  ;;  %v5330_v61 = vrot.slane %v15905_v24, 5 }
 0x23a   : > { %12974 = vmatprep.subr.bf16.mxu0 %v14130_v6 }
 0x23c   : > { %12943 = vmatmul.mubr.bf16.gmra.mrb[8].mxu0 %v14123_v59  ;;  %v4456_v59 = vld [vmem:[#allocation2 + $0x3c] sm:$0xf] }
 0x23d   : > { %12946 = vmatprep.mubr.bf16.mxu0 %v14125_v44  ;;  %12975 = vmatpush3.bf16.msra.mxu0 %v14130_v6  ;;  %v11784_v6 = vrot.slane %v5210_v3, 9  ;;  %v5332_v44 = vrot.slane %v5330_v61, 4  ;;  %v4568_v12 = vshrl.u32 %v4456_v59, 16  ;;  %v15965_v3 = vld [vmem:[#allocation2 + $0x44] sm:$0x1] }
 0x23e   : > { %12976 = vmatprep.subr.bf16.mxu0 %v14133_v39  ;;  %18189 = vst [vmem:[#allocation14_spill] sm:$0xff] %v15965_v3 }
 0x23f   : > { %v15931_v30 = vsel %vm15052_vm13, %v11784_v6, %v5330_v61  ;;  %v15940_v28 = vsel %vm15052_vm13, %v5332_v44, %v5333_v9  ;;  %v4459_v61 = vld [vmem:[#allocation2 + $0x48] sm:$0xf]  ;;  %v5346_v6 = vrot.slane %v5344_v10, 4  ;;  %v4563_v44 = vshll.u32 %v15948_v25, 16 }
 0x240   : > { %18187 = vst [vmem:[#allocation12_spill] sm:$0xff] %v15931_v30  ;;  %18188 = vst [vmem:[#allocation13_spill] sm:$0xff] %v15940_v28 }
 0x241   : > { %12977 = vmatpush3.bf16.msra.mxu0 %v14133_v39  ;;  %v15925_v39 = vrot.slane %v4526_v50, 4  ;;  %v15963_v50 = vrot.slane %v4553_v58, 5  ;;  %v14134_v58 = vld [vmem:[#allocation2 + $0xa8] sm:$0xff]  }
 0x242   : > { %12978 = vmatprep.subr.bf16.mxu0 %v14136_v19 }
 0x244   : > { %12947 = vmatmul.mubr.bf16.gmra.mrb[12].mxu0 %v14126_v23  ;;  %v15956_v23 = vld [vmem:[#allocation2 + $0xa4] sm:$0x1] }
 0x245   : > { %12950 = vmatprep.mubr.bf16.mxu0 %v14128_v49  ;;  %12979 = vmatpush3.bf16.msra.mxu0 %v14136_v19  ;;  %v4571_v19 = vshll.u32 %v4456_v59, 16  ;;  %v5340_v49 = vrot.slane %v15952_v34, 5  ;;  %v5347_v35 = vrot.slane %v15956_v23, 5  ;;  %v14132_v59 = vld [vmem:[#allocation2 + $0x9c] sm:$0xff]  }
 0x246   : > { %12980 = vmatprep.subr.bf16.mxu0 %v14139_v54 }
 0x247   : > { %v15976_v51 = vsel %vm15052_vm13, %v5339_v55, %v5340_v49  ;;  %v15982_v4 = vrot.slane %v4571_v19, 5  ;;  %v4587_v49 = vshll.u32 %v15965_v3, 16  ;;  %v4550_v55 = vor.u32 %v4549_v41, %v15935_v8 }
 0x248   : > { %18191 = vst [vmem:[#allocation16_spill] sm:$0xff] %v15976_v51  ;;  %v4560_v19 = vor.u32 %v4559_v1, %v15963_v50  ;;  %v4595_v8 = vshll.u32 %v4459_v61, 16  ;;  %v11787_v41 = vrot.slane %v5213_v38, 9  ;;  %v11788_v1 = vrot.slane %v5214_v16, 9 }
 0x249   : > { %12981 = vmatpush3.bf16.msra.mxu0 %v14139_v54  ;;  %v11785_v54 = vrot.slane %v5211_v60, 9  ;;  %v15984_v60 = vrot.slane %v4577_v46, 5  ;;  %v4508_v46 = vsel %vm14637_vm7, %v15919_v15, %v15881_v43  ;;  %v16022_v51 = vrot.slane %v4550_v55, 4  ;;  %v14137_v55 = vld [vmem:[#allocation2 + $0xc0] sm:$0xff]  }
 0x24a   : > { %13014 = vmatprep.subr.bf16.mxu0 %v15915_v62  ;;  %v16030_v28 = vrot.slane %v4560_v19, 4  ;;  %v4625_v3 = vshll.u32 %v15842_v27, 16 }
 0x24b   : > { %v15969_v9 = vsel %vm15052_vm13, %v11785_v54, %v5337_v26  ;;  %v4581_v54 = vshrl.u32 %v15944_v53, 16  ;;  %v4518_v26 = vsel %vm14637_vm7, %v15921_v2, %v15923_v21  ;;  %v4605_v2 = vshrl.u32 %v15994_v31, 16 }
 0x24c   : > { %12951 = vmatmul.mubr.bf16.gmra.mrb[16].mxu0 %v14129_v36  ;;  %18190 = vst [vmem:[#allocation15_spill] sm:$0xff] %v15969_v9  ;;  %v15972_v36 = vrot.slane %v4568_v12, 4  ;;  %v15990_v12 = vsel %vm15052_vm13, %v5346_v6, %v5347_v35  ;;  %v16005_v35 = vld [vmem:[#allocation2 + $0xb0] sm:$0x1]  ;;  %v16007_v6 = vld [vmem:[#allocation2 + $0xb8] sm:$0xf] }
 0x24d   : > { %12954 = vmatprep.mubr.bf16.mxu0 %v14131_v52  ;;  %v15980_v52 = vsel %vm15052_vm13, %v11786_v56, %v5344_v10  ;;  %18193 = vst [vmem:[#allocation18_spill] sm:$0xff] %v15990_v12  ;;  %v4592_v10 = vshrl.u32 %v4459_v61, 16  ;;  %v16003_v56 = vld [vmem:[#allocation2 + $0xac] sm:$0xf]  ;;  %v5354_v15 = vrot.slane %v16005_v35, 5  ;;  %v5361_v12 = vrot.slane %v16014_v47, 5 }
 0x24e   : > { %18192 = vst [vmem:[#allocation17_spill] sm:$0xff] %v15980_v52  ;;  %v5351_v43 = vrot.slane %v16003_v56, 5  ;;  %v4601_v52 = vshll.u32 %v15994_v31, 16  ;;  %v16024_v9 = vrot.slane %v4563_v44, 5  ;;  %v14135_v61 = vld [vmem:[#allocation2 + $0xb4] sm:$0xff]   ;;  %v4583_v30 = vrot.slane %v4581_v54, 4 }
 0x24f   : > { %v16040_v44 = vrot.slane %v4587_v49, 5  ;;  %v4594_v11 = vrot.slane %v4592_v10, 4  ;;  %v16048_v54 = vld [vmem:[#allocation2 + $0x50] sm:$0x1]  ;;  %v11751_v49 = vcombine.low %v4508_v46, %v4518_v26  ;;  %v4532_v10 = vsel %vm14637_vm7, %v15925_v39, %v15891_v7  ;;  %v16075_v26 = vld [vmem:[#allocation2 + $0xd4] sm:$0x1] }
 0x250   : > { %v5353_v21 = vrot.slane %v5351_v43, 4  ;;  %18199 = vst [vmem:[#allocation26_spill] sm:$0xff] %v16048_v54  ;;  %v4556_v7 = vsel %vm14637_vm7, %v16022_v51, %v15963_v50  ;;  %v4584_v39 = vor.u32 %v4583_v30, %v15984_v60  ;;  %v4611_v50 = vshll.u32 %v16048_v54, 16  ;;  %v4465_v51 = vld [vmem:[#allocation2 + $0x60] sm:$0xf] }
 0x251   : > { %v16119_v54 = vrot.slane %v4625_v3, 5  ;;  %v4677_v3 = vshrl.u32 %v15870_v48, 16 }
 0x252   : > { %v16034_v5 = vsel %vm15052_vm13, %v5353_v21, %v5354_v15  ;;  %v4597_v15 = vrot.slane %v4595_v8, 5  ;;  %v4607_v21 = vrot.slane %v4605_v2, 4  ;;  %v4574_v8 = vor.u32 %v15982_v4, %v15972_v36  ;;  %v16066_v2 = vld [vmem:[#allocation2 + $0xc8] sm:$0x1] }
 0x253   : > { %18196 = vst [vmem:[#allocation21_spill] sm:$0xff] %v16034_v5  ;;  %v5368_v36 = vrot.slane %v16066_v2, 5  ;;  %v4616_v4 = vshrl.u32 %v4462_v57, 16  ;;  %v4619_v5 = vshll.u32 %v4462_v57, 16  ;;  %v4640_v57 = vshrl.u32 %v4465_v51, 16 }
 0x254   : > { %12955 = vmatmul.mubr.bf16.gmra.mrb[20].mxu0 %v14132_v59  ;;  %v5358_v59 = vrot.slane %v16007_v6, 5 }
 0x255   : > { %12958 = vmatprep.mubr.bf16.mxu0 %v14134_v58  ;;  %v16028_v58 = vsel %vm15052_vm13, %v11787_v41, %v5351_v43  ;;  %v16050_v41 = vrot.slane %v4601_v52, 5  ;;  %v16064_v52 = vld [vmem:[#allocation2 + $0xc4] sm:$0xf]  ;;  %v4598_v43 = vor.u32 %v4597_v15, %v4594_v11  ;;  %v4629_v11 = vshrl.u32 %v15842_v27, 16 }
 0x256   : > { %18195 = vst [vmem:[#allocation20_spill] sm:$0xff] %v16028_v58  ;;  %v5360_v38 = vrot.slane %v5358_v59, 4  ;;  %v16038_v16 = vsel %vm15052_vm13, %v11788_v1, %v5358_v59  ;;  %v16068_v1 = vld [vmem:[#allocation2 + $0xd0] sm:$0xf]  ;;  %v5375_v59 = vrot.slane %v16075_v26, 5  ;;  %v4566_v27 = vsel %vm14637_vm7, %v16030_v28, %v16024_v9 }
 0x257   : > { %18197 = vst [vmem:[#allocation24_spill] sm:$0xff] %v16038_v16  ;;  %v4608_v16 = vor.u32 %v4607_v21, %v16050_v41  ;;  %v16083_v58 = vld [vmem:[#allocation2 + $0x64] sm:$0xf]  ;;  %v4631_v28 = vrot.slane %v4629_v11, 4  ;;  %v4642_v31 = vrot.slane %v4640_v57, 4 }
 0x258   : > { %v16046_v19 = vsel %vm15052_vm13, %v5360_v38, %v5361_v12  ;;  %v4542_v12 = vsel %vm14637_vm7, %v15933_v45, %v15927_v17  ;;  %v5215_v17 = vld [vmem:[#allocation2 + $0xc0] sm:$0xe]  ;;  %v5365_v45 = vrot.slane %v16064_v52, 5  ;;  %v5216_v38 = vld [vmem:[#allocation2 + $0xcc] sm:$0xe]  ;;  %18200 = vst [vmem:[#allocation27_spill] sm:$0xff] %v16083_v58 }
 0x259   : > { %18198 = vst [vmem:[#allocation25_spill] sm:$0xff] %v16046_v19  ;;  %v11789_v46 = vrot.slane %v5215_v17, 9  ;;  %v11790_v19 = vrot.slane %v5216_v38, 9  ;;  %v4643_v38 = vshll.u32 %v4465_v51, 16  ;;  %v16116_v51 = vrot.slane %v4611_v50, 5 }
 0x25a   : > { %v5367_v30 = vrot.slane %v5365_v45, 4  ;;  %v4609_v9 = vrot.slane %v4608_v16, 4  ;;  %v16122_v50 = vld [vmem:[#allocation2 + $0x68] sm:$0x1]  ;;  %v16138_v11 = vld [vmem:[#allocation2 + $0x7c] sm:$0xf] }
 0x25c   : > { %12959 = vmatmul.mubr.bf16.gmra.mrb[24].mxu0 %v14135_v61  ;;  %v5372_v61 = vrot.slane %v16068_v1, 5  ;;  %v16093_v15 = vsel %vm15052_vm13, %v5367_v30, %v5368_v36  ;;  %v16109_v36 = vrot.slane %v4574_v8, 4  ;;  %v4649_v30 = vshll.u32 %v16083_v58, 16 }
 0x25d   : > { %12962 = vmatprep.mubr.bf16.mxu0 %v14137_v55  ;;  %v16087_v55 = vsel %vm15052_vm13, %v11789_v46, %v5365_v45  ;;  %18202 = vst [vmem:[#allocation29_spill] sm:$0xff] %v16093_v15  ;;  %v4618_v45 = vrot.slane %v4616_v4, 4  ;;  %v4599_v15 = vrot.slane %v4598_v43, 4  ;;  %v4635_v8 = vshll.u32 %v15844_v13, 16 }
 0x25e   : > { %18201 = vst [vmem:[#allocation28_spill] sm:$0xff] %v16087_v55  ;;  %v5374_v17 = vrot.slane %v5372_v61, 4  ;;  %v16097_v21 = vsel %vm15052_vm13, %v11790_v19, %v5372_v61  ;;  %v16114_v61 = vrot.slane %v4584_v39, 4  ;;  %v4621_v55 = vrot.slane %v4619_v5, 5 }
 0x25f   : > { %18203 = vst [vmem:[#allocation30_spill] sm:$0xff] %v16097_v21  ;;  %v4645_v19 = vrot.slane %v4643_v38, 5  ;;  %v11752_v39 = vcombine.low %v4532_v10, %v4542_v12  ;;  %v16124_v4 = vrot.slane %v4649_v30, 5  ;;  %v4673_v5 = vshll.u32 %v15870_v48, 16  ;;  %v14141_v38 = vld [vmem:[%s18008_s1 + $0x208] sm:$0xff]  }
 0x260   : > { %v16103_v46 = vsel %vm15052_vm13, %v5374_v17, %v5375_v59  ;;  %v4653_v59 = vshrl.u32 %v16083_v58, 16  ;;  %v4468_v17 = vld [vmem:[#allocation2 + $0x6c] sm:$0xf]  ;;  %v4471_v58 = vld [vmem:[#allocation2 + $0x78] sm:$0xf]  ;;  %v4580_v13 = vsel %vm14637_vm7, %v16109_v36, %v15984_v60  ;;  %v4590_v16 = vsel %vm14637_vm7, %v16114_v61, %v16040_v44 }
 0x261   : > { %18204 = vst [vmem:[#allocation31_spill] sm:$0xff] %v16103_v46  ;;  %v11753_v46 = vcombine.low %v4556_v7, %v4566_v27  ;;  %v4664_v21 = vshrl.u32 %v4468_v17, 16  ;;  %v4667_v43 = vshll.u32 %v4468_v17, 16  ;;  %v4632_v10 = vor.u32 %v4631_v28, %v16119_v54  ;;  %v4474_v30 = vld [vmem:[#allocation2 + $0x84] sm:$0xf]  ;;  %v14142_v28 = vld [vmem:[%s18008_s1 + $0x210] sm:$0xff]  }
 0x262   : > { %v4646_v12 = vor.u32 %v4645_v19, %v4642_v31  ;;  %v4659_v7 = vshll.u32 %v16122_v50, 16  ;;  %v4688_v57 = vshrl.u32 %v4471_v58, 16  ;;  %v4691_v48 = vshll.u32 %v4471_v58, 16 }
 0x263   : > { %v4604_v60 = vsel %vm14637_vm7, %v4599_v15, %v16050_v41  ;;  %v4614_v44 = vsel %vm14637_vm7, %v4609_v9, %v16116_v51  ;;  %v4666_v31 = vrot.slane %v4664_v21, 4  ;;  %v4669_v27 = vrot.slane %v4667_v43, 5 }
 0x264   : > { %12963 = vmatmul.mubr.bf16.gmra.mrb[28].mxu0 %v14138_v18  ;;  %v4655_v18 = vrot.slane %v4653_v59, 4  ;;  %v16152_v36 = vrot.slane %v4673_v5, 5  ;;  %v4679_v58 = vrot.slane %v4677_v3, 4  ;;  %v4633_v61 = vrot.slane %v4632_v10, 4 }
 0x265   : > { %12982 = vmatprep.mubr.bf16.mxu0 %v11751_v49  ;;  %v4622_v49 = vor.u32 %v4621_v55, %v4618_v45  ;;  %v16149_v55 = vrot.slane %v4635_v8, 5  ;;  %v4697_v59 = vshll.u32 %v16138_v11, 16  ;;  %v4701_v41 = vshrl.u32 %v16138_v11, 16 }
 0x266   : > { %v4656_v45 = vor.u32 %v4655_v18, %v16124_v4  ;;  %v4647_v15 = vrot.slane %v4646_v12, 4  ;;  %v4661_v51 = vrot.slane %v4659_v7, 5  ;;  %v4690_v21 = vrot.slane %v4688_v57, 4 }
 0x267   : > { %v4623_v19 = vrot.slane %v4622_v49, 4  ;;  %v4693_v17 = vrot.slane %v4691_v48, 5  ;;  %v4712_v9 = vshrl.u32 %v4474_v30, 16  ;;  %v4715_v8 = vshll.u32 %v4474_v30, 16  ;;  %v16175_v48 = vld [vmem:[#allocation2 + $0x80] sm:$0x1] }
 0x268   : > { %v4725_v18 = vshrl.u32 %v15905_v24, 16  ;;  %v4657_v43 = vrot.slane %v4656_v45, 4  ;;  %v4670_v5 = vor.u32 %v4669_v27, %v4666_v31  ;;  %v11754_v3 = vcombine.low %v4580_v13, %v4590_v16  ;;  %v4477_v13 = vld [vmem:[#allocation2 + $0x90] sm:$0xf]  ;;  %v14143_v16 = vld [vmem:[%s18008_s1 + $0x218] sm:$0xff]  }
 0x269   : > { %v11755_v49 = vcombine.low %v4604_v60, %v4614_v44  ;;  %v16164_v10 = vrot.slane %v4697_v59, 5  ;;  %v4703_v12 = vrot.slane %v4701_v41, 4  ;;  %v4628_v7 = vsel %vm14637_vm7, %v4623_v19, %v16119_v54 }
 0x26a   : > { %v4652_v57 = vsel %vm14637_vm7, %v4647_v15, %v16124_v4  ;;  %v4717_v60 = vrot.slane %v4715_v8, 5  ;;  %v4727_v44 = vrot.slane %v4725_v18, 4  ;;  %v4671_v31 = vrot.slane %v4670_v5, 4 }
 0x26b   : > { %v4704_v27 = vor.u32 %v4703_v12, %v16164_v10  ;;  %v4736_v30 = vshrl.u32 %v4477_v13, 16  ;;  %v4739_v19 = vshll.u32 %v4477_v13, 16  ;;  %v4749_v59 = vshrl.u32 %v15950_v42, 16 }
 0x26c   : > { %12983 = vmatmul.mubr.bf16.vlgmr.msra.gmra.mrb[0].mxu0 %v11752_v39  ;;  %v4721_v39 = vshll.u32 %v15905_v24, 16  ;;  %v4638_v24 = vsel %vm14637_vm7, %v4633_v61, %v16149_v55  ;;  %v4662_v55 = vsel %vm14637_vm7, %v4657_v43, %v4661_v51  ;;  %v4745_v61 = vshll.u32 %v15950_v42, 16 }
 0x26d   : > { %13015 = vmatpush3.bf16.msra.mxu0 %v15915_v62  ;;  %12986 = vmatprep.mubr.bf16.mxu0 %v11753_v46  ;;  %v4680_v62 = vor.u32 %v4679_v58, %v16152_v36  ;;  %v4683_v46 = vshll.u32 %v15872_v0, 16  ;;  %v4694_v0 = vor.u32 %v4693_v17, %v4690_v21  ;;  %v4707_v58 = vshll.u32 %v16175_v48, 16  ;;  %v14144_v17 = vld [vmem:[%s18008_s1 + $0x220] sm:$0xff]  }
 0x26e   : > { %13016 = vmatprep.subr.bf16.mxu0 %v14141_v38  ;;  %v16180_v54 = vrot.slane %v4721_v39, 5  ;;  %v4731_v21 = vshll.u32 %v15907_v33, 16  ;;  %v11756_v8 = vcombine.low %v4628_v7, %v4638_v24  ;;  %v11757_v39 = vcombine.low %v4652_v57, %v4662_v55 }
 0x26f   : > { %v4681_v45 = vrot.slane %v4680_v62, 4  ;;  %v4685_v4 = vrot.slane %v4683_v46, 5  ;;  %v4695_v41 = vrot.slane %v4694_v0, 4  ;;  %v4705_v18 = vrot.slane %v4704_v27, 4  ;;  %v4483_v46 = vld [vmem:[#allocation2 + $0xa8] sm:$0xf] }
 0x270   : > { %v4728_v51 = vor.u32 %v4727_v44, %v16180_v54  ;;  %v4709_v43 = vrot.slane %v4707_v58, 5  ;;  %v4738_v5 = vrot.slane %v4736_v30, 4  ;;  %v4741_v62 = vrot.slane %v4739_v19, 5  ;;  %v14145_v0 = vld [vmem:[%s18008_s1 + $0x228] sm:$0xff]  }
 0x271   : > { %13017 = vmatpush3.bf16.msra.mxu0 %v14141_v38  ;;  %v4714_v38 = vrot.slane %v4712_v9, 4  ;;  %v4480_v9 = vld [vmem:[#allocation2 + $0x9c] sm:$0xf]  ;;  %v4686_v42 = vsel %vm14637_vm7, %v4681_v45, %v4685_v4  ;;  %v16198_v33 = vrot.slane %v4745_v61, 5  ;;  %v4700_v7 = vsel %vm14637_vm7, %v4695_v41, %v16164_v10 }
 0x272   : > { %13018 = vmatprep.subr.bf16.mxu0 %v14142_v28  ;;  %v4763_v12 = vshll.u32 %v4480_v9, 16  ;;  %v4733_v57 = vrot.slane %v4731_v21, 5  ;;  %v4769_v13 = vshll.u32 %v15954_v32, 16  ;;  %v4710_v44 = vsel %vm14637_vm7, %v4705_v18, %v4709_v43  ;;  %v14147_v18 = vld [vmem:[%s18008_s1 + $0x238] sm:$0xff]  }
 0x273   : > { %v4718_v15 = vor.u32 %v4717_v60, %v4714_v38  ;;  %v4784_v38 = vshrl.u32 %v4483_v46, 16  ;;  %v4787_v60 = vshll.u32 %v4483_v46, 16  ;;  %v4755_v10 = vshll.u32 %v15952_v34, 16  ;;  %v14146_v34 = vld [vmem:[%s18008_s1 + $0x230] sm:$0xff]  }
 0x274   : > { %12987 = vmatmul.mubr.bf16.gmra.mrb[4].mxu0 %v11754_v3  ;;  %v4751_v3 = vrot.slane %v4749_v59, 4  ;;  %v4793_v55 = vshll.u32 %v16003_v56, 16  ;;  %v4742_v45 = vor.u32 %v4741_v62, %v4738_v5  ;;  %v4765_v58 = vrot.slane %v4763_v12, 5 }
 0x275   : > { %12990 = vmatprep.mubr.bf16.mxu0 %v11755_v49  ;;  %13019 = vmatpush3.bf16.msra.mxu0 %v14142_v28  ;;  %v4676_v28 = vsel %vm14637_vm7, %v4671_v31, %v16152_v36  ;;  %v4760_v49 = vshrl.u32 %v4480_v9, 16  ;;  %v4719_v24 = vrot.slane %v4718_v15, 4  ;;  %v4729_v36 = vrot.slane %v4728_v51, 4  ;;  %v4486_v9 = vld [vmem:[#allocation2 + $0xb4] sm:$0xf] }
 0x276   : > { %13020 = vmatprep.subr.bf16.mxu0 %v14143_v16  ;;  %v4797_v31 = vshrl.u32 %v16003_v56, 16  ;;  %v4752_v4 = vor.u32 %v4751_v3, %v16198_v33  ;;  %v16222_v56 = vrot.slane %v4769_v13, 5  ;;  %v4786_v59 = vrot.slane %v4784_v38, 4  ;;  %v4489_v3 = vld [vmem:[#allocation2 + $0xc0] sm:$0xf] }
 0x277   : > { %v4762_v27 = vrot.slane %v4760_v49, 4  ;;  %v4724_v30 = vsel %vm14637_vm7, %v4719_v24, %v16180_v54  ;;  %v4734_v19 = vsel %vm14637_vm7, %v4729_v36, %v4733_v57  ;;  %v4789_v41 = vrot.slane %v4787_v60, 5 }
 0x278   : > { %v11759_v15 = vcombine.low %v4700_v7, %v4710_v44  ;;  %v4757_v51 = vrot.slane %v4755_v10, 5  ;;  %v16224_v21 = vrot.slane %v4793_v55, 5  ;;  %v4743_v54 = vrot.slane %v4742_v45, 4 }
 0x279   : > { %13021 = vmatpush3.bf16.msra.mxu0 %v14143_v16  ;;  %v4773_v16 = vshrl.u32 %v15954_v32, 16  ;;  %v11758_v32 = vcombine.low %v4676_v28, %v4686_v42  ;;  %v4779_v28 = vshll.u32 %v15956_v23, 16  ;;  %v11760_v42 = vcombine.low %v4724_v30, %v4734_v19  ;;  %v4492_v19 = vld [vmem:[#allocation2 + $0xcc] sm:$0xf] }
 0x27a   : > { %13022 = vmatprep.subr.bf16.mxu0 %v14144_v17  ;;  %v4790_v5 = vor.u32 %v4789_v41, %v4786_v59  ;;  %v4803_v62 = vshll.u32 %v16005_v35, 16  ;;  %v4808_v46 = vshrl.u32 %v4486_v9, 16  ;;  %v4811_v12 = vshll.u32 %v4486_v9, 16 }
 0x27b   : > { %v4775_v61 = vrot.slane %v4773_v16, 4  ;;  %v4817_v23 = vshll.u32 %v16007_v6, 16  ;;  %v4821_v7 = vshrl.u32 %v16007_v6, 16  ;;  %v4748_v24 = vsel %vm14637_vm7, %v4743_v54, %v16198_v33 }
 0x27c   : > { %12991 = vmatmul.mubr.bf16.gmra.mrb[8].mxu0 %v11756_v8  ;;  %v4753_v8 = vrot.slane %v4752_v4, 4  ;;  %v4781_v35 = vrot.slane %v4779_v28, 5  ;;  %v4835_v13 = vshll.u32 %v4489_v3, 16  ;;  %v4841_v16 = vshll.u32 %v16064_v52, 16 }
 0x27d   : > { %12994 = vmatprep.mubr.bf16.mxu0 %v11757_v39  ;;  %13023 = vmatpush3.bf16.msra.mxu0 %v14144_v17  ;;  %v4799_v17 = vrot.slane %v4797_v31, 4  ;;  %v4766_v39 = vor.u32 %v4765_v58, %v4762_v27  ;;  %v4776_v43 = vor.u32 %v4775_v61, %v16222_v56  ;;  %v4845_v38 = vshrl.u32 %v16064_v52, 16 }
 0x27e   : > { %13024 = vmatprep.subr.bf16.mxu0 %v14145_v0  ;;  %v4758_v36 = vsel %vm14637_vm7, %v4753_v8, %v4757_v51  ;;  %v4791_v6 = vrot.slane %v4790_v5, 4  ;;  %v4805_v44 = vrot.slane %v4803_v62, 5  ;;  %v4810_v10 = vrot.slane %v4808_v46, 4 }
 0x27f   : > { %v4800_v49 = vor.u32 %v4799_v17, %v16224_v21  ;;  %v4767_v57 = vrot.slane %v4766_v39, 4  ;;  %v4777_v60 = vrot.slane %v4776_v43, 4  ;;  %v4813_v31 = vrot.slane %v4811_v12, 5 }
 0x280   : > { %v4819_v33 = vrot.slane %v4817_v23, 5  ;;  %v4823_v45 = vrot.slane %v4821_v7, 4  ;;  %v11761_v4 = vcombine.low %v4748_v24, %v4758_v36  ;;  %v4837_v58 = vrot.slane %v4835_v13, 5  ;;  %v5201_v13 = vld [vmem:[#allocation2 + $0x18] sm:$0xe] }
 0x281   : > { %13025 = vmatpush3.bf16.msra.mxu0 %v14145_v0  ;;  %v4832_v0 = vshrl.u32 %v4489_v3, 16  ;;  %v4801_v55 = vrot.slane %v4800_v49, 4  ;;  %v4847_v30 = vrot.slane %v4845_v38, 4  ;;  %v4772_v52 = vsel %vm14637_vm7, %v4767_v57, %v16222_v56 }
 0x282   : > { %13026 = vmatprep.subr.bf16.mxu0 %v14146_v34  ;;  %v4827_v61 = vshll.u32 %v16014_v47, 16  ;;  %v4796_v59 = vsel %vm14637_vm7, %v4791_v6, %v16224_v21  ;;  %v4824_v51 = vor.u32 %v4823_v45, %v4819_v33  ;;  %v4856_v17 = vshrl.u32 %v4492_v19, 16 }
 0x283   : > { %v4834_v27 = vrot.slane %v4832_v0, 4  ;;  %v4806_v41 = vsel %vm14637_vm7, %v4801_v55, %v4805_v44  ;;  %v4859_v9 = vshll.u32 %v4492_v19, 16  ;;  %v4865_v56 = vshll.u32 %v16068_v1, 16 }
 0x284   : > { %12995 = vmatmul.mubr.bf16.gmra.mrb[12].mxu0 %v11758_v32  ;;  %v4843_v32 = vrot.slane %v4841_v16, 5  ;;  %v4869_v54 = vshrl.u32 %v16068_v1, 16  ;;  %v4851_v47 = vshll.u32 %v16066_v2, 16  ;;  %v4825_v21 = vrot.slane %v4824_v51, 4 }
 0x285   : > { %12998 = vmatprep.mubr.bf16.mxu0 %v11759_v15  ;;  %13027 = vmatpush3.bf16.msra.mxu0 %v14146_v34  ;;  %v4782_v34 = vsel %vm14637_vm7, %v4777_v60, %v4781_v35  ;;  %v4814_v15 = vor.u32 %v4813_v31, %v4810_v10  ;;  %v4838_v8 = vor.u32 %v4837_v58, %v4834_v27  ;;  %v4829_v43 = vrot.slane %v4827_v61, 5  ;;  %v5202_v27 = vld [vmem:[#allocation2 + $0x24] sm:$0xe] }
 0x286   : > { %13028 = vmatprep.subr.bf16.mxu0 %v14147_v18  ;;  %v4848_v39 = vor.u32 %v4847_v30, %v4843_v32  ;;  %v11762_v28 = vcombine.low %v4772_v52, %v4782_v34  ;;  %v4858_v5 = vrot.slane %v4856_v17, 4  ;;  %v4861_v62 = vrot.slane %v4859_v9, 5  ;;  %v5204_v17 = vld [vmem:[#allocation2 + $0x3c] sm:$0xe]  ;;  %v18205_v9 = vld [vmem:[#allocation19_spill] sm:$0xff] }
 0x287   : > { %v4867_v46 = vrot.slane %v4865_v56, 5  ;;  %v4871_v3 = vrot.slane %v4869_v54, 4  ;;  %v4839_v49 = vrot.slane %v4838_v8, 4  ;;  %v4853_v23 = vrot.slane %v4851_v47, 5 }
 0x288   : > { %v4849_v12 = vrot.slane %v4848_v39, 4  ;;  %v4830_v2 = vsel %vm14637_vm7, %v4825_v21, %v4829_v43  ;;  %v4862_v7 = vor.u32 %v4861_v62, %v4858_v5  ;;  %v4875_v36 = vshll.u32 %v16075_v26, 16  ;;  %v18207_v43 = vld [vmem:[#allocation26_spill] sm:$0xff] }
 0x289   : > { %13029 = vmatpush3.bf16.msra.mxu0 %v14147_v18  ;;  %v4815_v18 = vrot.slane %v4814_v15, 4  ;;  %v4872_v24 = vor.u32 %v4871_v3, %v4867_v46  ;;  %v4844_v57 = vsel %vm14637_vm7, %v4839_v49, %v4843_v32  ;;  %v5267_v0 = vrot.slane %v15851_v14, 5  ;;  %v18208_v49 = vld [vmem:[#allocation27_spill] sm:$0xff] }
 0x28a   : > { %v4854_v35 = vsel %vm14637_vm7, %v4849_v12, %v4853_v23  ;;  %v4863_v60 = vrot.slane %v4862_v7, 4  ;;  %v4877_v44 = vrot.slane %v4875_v36, 5  ;;  %v11775_v10 = vrot.slane %v5201_v13, 9  ;;  %v5207_v23 = vld [vmem:[#allocation2 + $0x60] sm:$0xe] }
 0x28b   : > { %v4820_v1 = vsel %vm14637_vm7, %v4815_v18, %v4819_v33  ;;  %v11765_v38 = vcombine.low %v4844_v57, %v4854_v35  ;;  %v4873_v6 = vrot.slane %v4872_v24, 4  ;;  %v5269_v55 = vrot.slane %v5267_v0, 4  ;;  %v5209_v13 = vld [vmem:[#allocation2 + $0x78] sm:$0xe] }
 0x28c   : > { %12999 = vmatmul.mubr.bf16.gmra.mrb[16].mxu0 %v11760_v42  ;;  %v11763_v42 = vcombine.low %v4796_v59, %v4806_v41  ;;  %v11764_v16 = vcombine.low %v4820_v1, %v4830_v2  ;;  %v5270_v31 = vrot.slane %v15883_v40, 5  ;;  %v4868_v26 = vsel %vm14637_vm7, %v4863_v60, %v4867_v46  ;;  %v5203_v40 = vld [vmem:[#allocation2 + $0x30] sm:$0xe] }
 0x28d   : > { %13002 = vmatprep.mubr.bf16.mxu0 %v11761_v4  ;;  %v4878_v33 = vsel %vm14637_vm7, %v4873_v6, %v4877_v44  ;;  %v5274_v14 = vrot.slane %v15864_v20, 5  ;;  %v5268_v45 = vsel %vm15052_vm13, %v11775_v10, %v5267_v0  ;;  %v5281_v58 = vrot.slane %v15917_v37, 5  ;;  %v18209_v44 = vld [vmem:[#allocation22_spill] sm:$0xff]  ;;  %v18210_v10 = vld [vmem:[#allocation23_spill] sm:$0xff] }
 0x28e   : > { %v5271_v4 = vsel %vm15052_vm13, %v5269_v55, %v5270_v31  ;;  %v11766_v32 = vcombine.low %v4868_v26, %v4878_v33  ;;  %v11776_v19 = vrot.slane %v5202_v27, 9  ;;  %v5277_v34 = vrot.slane %v15889_v29, 5  ;;  %v18212_v33 = vld [vmem:[#allocation10_spill] sm:$0xff]  ;;  %v18218_v27 = vld [vmem:[#allocation15_spill] sm:$0xff] }
 0x28f   : > { %v11807_v30 = vcombine.low %v5268_v45, %v5271_v4  ;;  %v5276_v52 = vrot.slane %v5274_v14, 4  ;;  %v11777_v61 = vrot.slane %v5203_v40, 9  ;;  %v5283_v59 = vrot.slane %v5281_v58, 4  ;;  %v18215_v45 = vld [vmem:[#allocation12_spill] sm:$0xff]  ;;  %v18216_v4 = vld [vmem:[#allocation13_spill] sm:$0xff] }
 0x290   : > { %v5284_v20 = vrot.slane %v15948_v25, 5  ;;  %v5275_v41 = vsel %vm15052_vm13, %v11776_v19, %v5274_v14  ;;  %v5288_v37 = vrot.slane %v15944_v53, 5  ;;  %v5295_v56 = vrot.slane %v18205_v9, 5  ;;  %v5205_v25 = vld [vmem:[#allocation2 + $0x48] sm:$0xe] }
 0x291   : > { %v5278_v15 = vsel %vm15052_vm13, %v5276_v52, %v5277_v34  ;;  %v5282_v51 = vsel %vm15052_vm13, %v11777_v61, %v5281_v58  ;;  %v11778_v39 = vrot.slane %v5204_v17, 9  ;;  %v11779_v18 = vrot.slane %v5205_v25, 9  ;;  %v18219_v58 = vld [vmem:[#allocation16_spill] sm:$0xff]  ;;  %v18225_v34 = vld [vmem:[#allocation21_spill] sm:$0xff]  ;;  %v18234_v17 = vld [vmem:[#allocation31_spill] sm:$0xff] }
 0x292   : > { %v5285_v29 = vsel %vm15052_vm13, %v5283_v59, %v5284_v20  ;;  %v11808_v54 = vcombine.low %v5275_v41, %v5278_v15  ;;  %v5290_v47 = vrot.slane %v5288_v37, 4  ;;  %v5297_v21 = vrot.slane %v5295_v56, 4  ;;  %v18224_v52 = vld [vmem:[#allocation20_spill] sm:$0xff]  ;;  %v18228_v20 = vld [vmem:[#allocation25_spill] sm:$0xff] }
 0x293   : > { %v11809_v8 = vcombine.low %v5282_v51, %v5285_v29  ;;  %v5298_v53 = vrot.slane %v18207_v43, 5  ;;  %v5289_v5 = vsel %vm15052_vm13, %v11778_v39, %v5288_v37  ;;  %v5296_v46 = vsel %vm15052_vm13, %v11779_v18, %v5295_v56  ;;  %v18227_v59 = vld [vmem:[#allocation24_spill] sm:$0xff]  ;;  %v18231_v37 = vld [vmem:[#allocation29_spill] sm:$0xff]  ;;  %v18233_v29 = vld [vmem:[#allocation30_spill] sm:$0xff] }
 0x294   : > { %13003 = vmatmul.mubr.bf16.gmra.mrb[20].mxu0 %v11762_v28  ;;  %v18206_v28 = vld [vmem:[#allocation14_spill] sm:$0xff]  ;;  %v5309_v12 = vrot.slane %v18208_v49, 5  ;;  %v11781_v7 = vrot.slane %v5207_v23, 9  ;;  %v5312_v36 = vrot.slane %v16122_v50, 5  ;;  %v5323_v0 = vrot.slane %v16138_v11, 5  ;;  %v18213_v11 = vld [vmem:[#allocation11_spill] sm:$0xff] }
 0x295   : > { %13006 = vmatprep.mubr.bf16.mxu0 %v11763_v42  ;;  %v5291_v42 = vrot.slane %v18206_v28, 5  ;;  %v5299_v3 = vsel %vm15052_vm13, %v5297_v21, %v5298_v53  ;;  %v5326_v6 = vrot.slane %v16175_v48, 5  ;;  %v18211_v55 = vcombine.low %v18209_v44, %v18210_v10  ;;  %v18230_v15 = vld [vmem:[#allocation28_spill] sm:$0xff]  ;;  %v14148_v56 = vld [vmem:[#allocation4 + $0x40] sm:$0xff]   ;;  %v14154_v28 = vld [vmem:[#allocation4 + $0x70] sm:$0xff]  }
 0x296   : > { %v11811_v2 = vcombine.low %v5296_v46, %v5299_v3  ;;  %v5311_v24 = vrot.slane %v5309_v12, 4  ;;  %v5310_v57 = vsel %vm15052_vm13, %v11781_v7, %v5309_v12  ;;  %v5325_v60 = vrot.slane %v5323_v0, 4  ;;  %13062 = vmatprep.subr.bf16.mxu1 %v14148_v56  ;;  %v14149_v25 = vld [vmem:[#allocation4 + $0x48] sm:$0xff]   ;;  %v14152_v39 = vld [vmem:[#allocation4 + $0x60] sm:$0xff]   ;;  %v14155_v12 = vld [vmem:[#allocation4 + $0x78] sm:$0xff]  }
 0x297   : > { %v5292_v62 = vsel %vm15052_vm13, %v5290_v47, %v5291_v42  ;;  %v18214_v14 = vcombine.low %v18212_v33, %v18213_v11  ;;  %v18217_v48 = vcombine.low %v18215_v45, %v18216_v4  ;;  %v18220_v40 = vcombine.low %v18218_v27, %v18219_v58  ;;  %13063 = vmatpush3.bf16.msra.mxu1 %v14148_v56  ;;  %v14153_v47 = vld [vmem:[#allocation4 + $0x68] sm:$0xff]   ;;  %v6472_v23 = vld [vmem:[#allocation3 + $0x8] sm:$0x1] }
 0x298   : > { %v11810_v1 = vcombine.low %v5289_v5, %v5292_v62  ;;  %v5313_v35 = vsel %vm15052_vm13, %v5311_v24, %v5312_v36  ;;  %v5327_v31 = vsel %vm15052_vm13, %v5325_v60, %v5326_v6  ;;  %v18226_v61 = vcombine.low %v18224_v52, %v18225_v34  ;;  %13064 = vmatprep.subr.bf16.mxu1 %v14149_v25  ;;  %v6424_v42 = vld [vmem:[#allocation3] sm:$0xf]  ;;  %v6425_v18 = vld [vmem:[#allocation3 + $0x4] sm:$0xf]  ;;  %v16353_v6 = vld [vmem:[%s18010_s3] ss:$0 sm:$0xff] }
 0x299   : > { %v18229_v41 = vcombine.low %v18227_v59, %v18228_v20  ;;  %v18232_v51 = vcombine.low %v18230_v15, %v18231_v37  ;;  %v18235_v9 = vcombine.low %v18233_v29, %v18234_v17  ;;  %v6489_v21 = vshrl.u32 %v6424_v42, 16  ;;  %v6319_v29 = vld [vmem:[#allocation3 + $0x18] sm:$0xf] }
 0x29a   : > { %v6492_v43 = vshll.u32 %v6424_v42, 16  ;;  %v6498_v53 = vshll.u32 %v6425_v18, 16  ;;  %v6502_v5 = vshrl.u32 %v6425_v18, 16  ;;  %v6508_v7 = vshll.u32 %v6472_v23, 16  ;;  %v6312_v18 = vld [vmem:[#allocation3 + $0xc] sm:$0xf] }
 0x29b   : > { %13065 = vmatpush3.bf16.msra.mxu1 %v14149_v25  ;;  %v6491_v62 = vrot.slane %v6489_v21, 4 }
 0x29c   : > { %13007 = vmatmul.mubr.bf16.gmra.mrb[24].mxu0 %v11764_v16  ;;  %v11813_v16 = vcombine.low %v5310_v57, %v5313_v35  ;;  %v6494_v46 = vrot.slane %v6492_v43, 5  ;;  %v6500_v3 = vrot.slane %v6498_v53, 5  ;;  %v6504_v49 = vrot.slane %v6502_v5, 4 }
 0x29d   : > { %13010 = vmatprep.mubr.bf16.mxu0 %v11765_v38  ;;  %v11783_v38 = vrot.slane %v5209_v13, 9  ;;  %v6510_v57 = vrot.slane %v6508_v7, 5 }
 0x29f   : > { %v5324_v50 = vsel %vm15052_vm13, %v11783_v38, %v5323_v0  ;;  %v16348_v38 = vld [vmem:[%s18009_s2] ss:$0 sm:$0xff] }
 0x2a0   : > { %v11815_v26 = vcombine.low %v5324_v50, %v5327_v31 }
 0x2a4   : > { %13011 = vmatmul.mubr.bf16.gmra.mrb[28].mxu0 %v11766_v32  ;;  %v18221_v32 = vld [vmem:[#allocation17_spill] sm:$0xff] }
 0x2a5   : > { %13030 = vmatprep.mubr.bf16.mxu0 %v11807_v30  ;;  %v18222_v30 = vld [vmem:[#allocation18_spill] sm:$0xff] }
 0x2a6   : > { %v18223_v19 = vcombine.low %v18221_v32, %v18222_v30 }
 0x2ac   : > { %13031 = vmatmul.mubr.bf16.vlgmr.msra.gmra.mrb[0].mxu0 %v11808_v54  ;;  %v14150_v54 = vld [vmem:[#allocation4 + $0x50] sm:$0xff]  }
 0x2ad   : > { %13034 = vmatprep.mubr.bf16.mxu0 %v11809_v8  ;;  %13066 = vmatprep.subr.bf16.mxu1 %v14150_v54  ;;  %v14151_v8 = vld [vmem:[#allocation4 + $0x58] sm:$0xff]  }
 0x2ae   : > { %13067 = vmatpush3.bf16.msra.mxu1 %v14150_v54 }
 0x2af   : > { %13068 = vmatprep.subr.bf16.mxu1 %v14151_v8 }
 0x2b2   : > { %13069 = vmatpush3.bf16.msra.mxu1 %v14151_v8 }
 0x2b3   : > { %13070 = vmatprep.subr.bf16.mxu1 %v14152_v39 }
 0x2b4   : > { %13035 = vmatmul.mubr.bf16.gmra.mrb[4].mxu0 %v11810_v1  ;;  %v6495_v1 = vor.u32 %v6494_v46, %v6491_v62  ;;  %v6323_v62 = vld [vmem:[#allocation3 + $0x20] sm:$0x1] }
 0x2b5   : > { %13038 = vmatprep.mubr.bf16.mxu0 %v11811_v2  ;;  %v6505_v2 = vor.u32 %v6504_v49, %v6500_v3 }
 0x2b6   : > { %13071 = vmatpush3.bf16.msra.mxu1 %v14152_v39  ;;  %v6496_v24 = vrot.slane %v6495_v1, 4  ;;  %v6316_v1 = vld [vmem:[#allocation3 + $0x14] sm:$0x1] }
 0x2b7   : > { %13072 = vmatprep.subr.bf16.mxu1 %v14153_v47  ;;  %v6506_v36 = vrot.slane %v6505_v2, 4 }
 0x2b8   : > { %v6501_v35 = vsel %vm14637_vm7, %v6496_v24, %v6500_v3 }
 0x2b9   : > { %v6511_v0 = vsel %vm14637_vm7, %v6506_v36, %v6510_v57 }
 0x2ba   : > { %13073 = vmatpush3.bf16.msra.mxu1 %v14153_v47  ;;  %v11865_v13 = vcombine.low %v6501_v35, %v6511_v0 }
 0x2bb   : > { %13074 = vmatprep.subr.bf16.mxu1 %v14154_v28 }
 0x2bc   : > { %13039 = vmatmul.mubr.bf16.gmra.mrb[8].mxu0 %v18211_v55  ;;  %13078 = vmatprep.mubr.bf16.mxu1 %v11865_v13 }
 0x2bd   : > { %13042 = vmatprep.mubr.bf16.mxu0 %v11813_v16  ;;  %v16342_v16 = vld [vmem:[#allocation4] sm:$0xff]  }
 0x2be   : > { %13075 = vmatpush3.bf16.msra.mxu1 %v14154_v28 }
 0x2bf   : > { %13076 = vmatprep.subr.bf16.mxu1 %v14155_v12 }
 0x2c2   : > { %13077 = vmatpush3.bf16.msra.mxu1 %v14155_v12 }
 0x2c3   : > { %13110 = vmatprep.subr.bf16.mxu1 %v16342_v16 }
 0x2c4   : > { %13043 = vmatmul.mubr.bf16.gmra.mrb[12].mxu0 %v18214_v14 }
 0x2c5   : > { %13046 = vmatprep.mubr.bf16.mxu0 %v11815_v26 }
 0x2cc   : > { %13047 = vmatmul.mubr.bf16.gmra.mrb[16].mxu0 %v18217_v48 }
 0x2cd   : > { %13050 = vmatprep.mubr.bf16.mxu0 %v18220_v40 }
 0x2d4   : > { %13051 = vmatmul.mubr.bf16.gmra.mrb[20].mxu0 %v18223_v19 }
 0x2d5   : > { %13054 = vmatprep.mubr.bf16.mxu0 %v18226_v61 }
 0x2dc   : > { %13055 = vmatmul.mubr.bf16.gmra.mrb[24].mxu0 %v18229_v41 }
 0x2dd   : > { %13058 = vmatprep.mubr.bf16.mxu0 %v18232_v51 }
 0x2e4   : > { %13059 = vmatmul.mubr.bf16.gmra.mrb[28].mxu0 %v18235_v9 }
 0x37f   : > { %v13032_v60 = vpop.f32.mrb[0].mxu0 }
 0x380   : > { %v5708_v44 = vadd.f32 %v13032_v60, %v16348_v38  ;;  %v5540_v10 = vpop.f32.mrb[1].mxu0 }
 0x381   : > { %v5706_v55 = vadd.f32 %v16348_v38, %v5540_v10  ;;  %v13033_v50 = vpop.f32.mrb[2].mxu0 }
 0x382   : > { %vm5740_vm14 = vcmp.ge.f32.partialorder %v5708_v44, 0.0  ;;  %v5779_v31 = vmul.f32 %v16353_v6, %v5708_v44  ;;  %v5709_v26 = vadd.f32 %v13033_v50, %v16348_v38  ;;  %v5543_v33 = vpop.f32.mrb[3].mxu0 }
 0x383   : > { %vm5738_vm15 = vcmp.ge.f32.partialorder %v5706_v55, 0.0  ;;  %v5777_v11 = vmul.f32 %v16353_v6, %v5706_v55  ;;  %v5707_v14 = vadd.f32 %v16348_v38, %v5543_v33 }
 0x384   : > { %v5811_v45 = vsel %vm5740_vm14, %v5708_v44, %v5779_v31  ;;  %vm5741_vm0 = vcmp.ge.f32.partialorder %v5709_v26, 0.0  ;;  %v5780_v4 = vmul.f32 %v16353_v6, %v5709_v26 }
 0x385   : > { %v12168_v48 = vpack.c.bf16 %v5811_v45, %v5811_v45  ;;  %v5809_v27 = vsel %vm5738_vm15, %v5706_v55, %v5777_v11  ;;  %vm5739_vm1 = vcmp.ge.f32.partialorder %v5707_v14, 0.0  ;;  %v5778_v58 = vmul.f32 %v16353_v6, %v5707_v14 }
 0x386   : > { %v12166_v40 = vpack.c.bf16 %v5809_v27, %v5809_v27  ;;  %v5812_v32 = vsel %vm5741_vm0, %v5709_v26, %v5780_v4 }
 0x387   : > { %v6009_v30 = vshrl.u32 %v12168_v48, 16  ;;  %v6012_v19 = vshll.u32 %v12168_v48, 16  ;;  %v12169_v52 = vpack.c.bf16 %v5812_v32, %v5812_v32  ;;  %v5810_v34 = vsel %vm5739_vm1, %v5707_v14, %v5778_v58  ;;  %v13036_v61 = vpop.f32.mrb[4].mxu0 }
 0x388   : > { %v5992_v59 = vshrl.u32 %v12166_v40, 16  ;;  %v5995_v20 = vshll.u32 %v12166_v40, 16  ;;  %v12167_v41 = vpack.c.bf16 %v5810_v34, %v5810_v34  ;;  %v5712_v15 = vadd.f32 %v13036_v61, %v16348_v38  ;;  %v5556_v37 = vpop.f32.mrb[5].mxu0 }
 0x389   : > { %v6011_v51 = vrot.slane %v6009_v30, 7  ;;  %v6017_v17 = vshrl.u32 %v12169_v52, 16  ;;  %v6020_v9 = vshll.u32 %v12169_v52, 16  ;;  %v5710_v56 = vadd.f32 %v16348_v38, %v5556_v37  ;;  %v13037_v25 = vpop.f32.mrb[6].mxu0 }
 0x38a   : > { %v5994_v54 = vrot.slane %v5992_v59, 7  ;;  %v6000_v8 = vshrl.u32 %v12167_v41, 16  ;;  %v6003_v39 = vshll.u32 %v12167_v41, 16  ;;  %vm5744_vm2 = vcmp.ge.f32.partialorder %v5712_v15, 0.0  ;;  %v5559_v47 = vpop.f32.mrb[7].mxu0 }
 0x38b   : > { %v6014_v28 = vor.u32 %v6012_v19, %v6011_v51  ;;  %v6015_v42 = vrot.slane %v6011_v51, 4  ;;  %v6019_v21 = vrot.slane %v6017_v17, 7  ;;  %v5783_v43 = vmul.f32 %v16353_v6, %v5712_v15  ;;  %v6333_v19 = vld [vmem:[#allocation3 + $0x30] sm:$0xf] }
 0x38c   : > { %v5997_v53 = vor.u32 %v5995_v20, %v5994_v54  ;;  %v5998_v5 = vrot.slane %v5994_v54, 4  ;;  %v6002_v46 = vrot.slane %v6000_v8, 7  ;;  %vm5742_vm3 = vcmp.ge.f32.partialorder %v5710_v56, 0.0 }
 0x38d   : > { %v6320_v49 = vsel %vm14651_vm9, %v6014_v28, %v6319_v29  ;;  %v6022_v12 = vor.u32 %v6020_v9, %v6019_v21  ;;  %v6024_v23 = vrot.slane %v6019_v21, 4  ;;  %v5815_v2 = vsel %vm5744_vm2, %v5712_v15, %v5783_v43 }
 0x38e   : > { %6321 = vst [vmem:[#allocation3 + $0x18] sm:$0xf] %v6320_v49  ;;  %v6313_v7 = vsel %vm14651_vm9, %v5997_v53, %v6312_v18  ;;  %v6005_v24 = vor.u32 %v6003_v39, %v6002_v46  ;;  %v6007_v36 = vrot.slane %v6002_v46, 4  ;;  %v12172_v57 = vpack.c.bf16 %v5815_v2, %v5815_v2  ;;  %v6330_v2 = vld [vmem:[#allocation3 + $0x2c] sm:$0x1] }
 0x38f   : > { %6314 = vst [vmem:[#allocation3 + $0xc] sm:$0xf] %v6313_v7  ;;  %v6023_v0 = vsel %vm14643_vm8, %v6015_v42, %v6022_v12  ;;  %v6324_v60 = vsel %vm14657_vm10, %v6024_v23, %v6323_v62  ;;  %v5781_v44 = vmul.f32 %v16353_v6, %v5710_v56  ;;  %v5713_v10 = vadd.f32 %v13037_v25, %v16348_v38  ;;  %v13040_v55 = vpop.f32.mrb[8].mxu0  ;;  %v6326_v25 = vld [vmem:[#allocation3 + $0x24] sm:$0xf] }
 0x390   : > { %6322 = vst [vmem:[#allocation3 + $0x1c] sm:$0xf] %v6023_v0  ;;  %6325 = vst [vmem:[#allocation3 + $0x20] sm:$0x1] %v6324_v60  ;;  %v6006_v50 = vsel %vm14643_vm8, %v5998_v5, %v6005_v24  ;;  %v6317_v31 = vsel %vm14657_vm10, %v6007_v36, %v6316_v1  ;;  %v6043_v26 = vshrl.u32 %v12172_v57, 16  ;;  %v6046_v33 = vshll.u32 %v12172_v57, 16 }
 0x391   : > { %v5572_v11 = vpop.f32.mrb[9].mxu0  ;;  %6315 = vst [vmem:[#allocation3 + $0x10] sm:$0xf] %v6006_v50  ;;  %6318 = vst [vmem:[#allocation3 + $0x14] sm:$0x1] %v6317_v31  ;;  %v5813_v14 = vsel %vm5742_vm3, %v5710_v56, %v5781_v44  ;;  %vm5745_vm4 = vcmp.ge.f32.partialorder %v5713_v10, 0.0  ;;  %v5784_v45 = vmul.f32 %v16353_v6, %v5713_v10  ;;  %v5711_v4 = vadd.f32 %v16348_v38, %v5559_v47 }
 0x392   : > { %v13041_v48 = vpop.f32.mrb[10].mxu0  ;;  %v6045_v27 = vrot.slane %v6043_v26, 7  ;;  %v12170_v58 = vpack.c.bf16 %v5813_v14, %v5813_v14  ;;  %v5716_v40 = vadd.f32 %v13040_v55, %v16348_v38  ;;  %v5714_v32 = vadd.f32 %v16348_v38, %v5572_v11  ;;  %v6337_v23 = vld [vmem:[#allocation3 + $0x38] sm:$0x1] }
 0x393   : > { %v16386_v30 = vpop.f32.mrb[11].mxu0  ;;  %v5816_v52 = vsel %vm5745_vm4, %v5713_v10, %v5784_v45  ;;  %vm5743_vm5 = vcmp.ge.f32.partialorder %v5711_v4, 0.0  ;;  %v5782_v34 = vmul.f32 %v16353_v6, %v5711_v4  ;;  %v5717_v61 = vadd.f32 %v13041_v48, %v16348_v38  ;;  %v6347_v48 = vld [vmem:[#allocation3 + $0x48] sm:$0xf] }
 0x394   : > { %v6048_v59 = vor.u32 %v6046_v33, %v6045_v27  ;;  %v6049_v20 = vrot.slane %v6045_v27, 4  ;;  %v6026_v41 = vshrl.u32 %v12170_v58, 16  ;;  %v6029_v15 = vshll.u32 %v12170_v58, 16 }
 0x395   : > { %v12173_v37 = vpack.c.bf16 %v5816_v52, %v5816_v52  ;;  %v5814_v51 = vsel %vm5743_vm5, %v5711_v4, %v5782_v34  ;;  %vm5748_vm6 = vcmp.ge.f32.partialorder %v5716_v40, 0.0  ;;  %v5787_v29 = vmul.f32 %v16353_v6, %v5716_v40 }
 0x396   : > { %v6334_v17 = vsel %vm14651_vm9, %v6048_v59, %v6333_v19  ;;  %v6028_v9 = vrot.slane %v6026_v41, 7  ;;  %v12171_v56 = vpack.c.bf16 %v5814_v51, %v5814_v51  ;;  %vm5746_vm11 = vcmp.ge.f32.partialorder %v5714_v32, 0.0  ;;  %v6340_v19 = vld [vmem:[#allocation3 + $0x3c] sm:$0xf] }
 0x397   : > { %6335 = vst [vmem:[#allocation3 + $0x30] sm:$0xf] %v6334_v17  ;;  %v6051_v54 = vshrl.u32 %v12173_v37, 16  ;;  %v6054_v8 = vshll.u32 %v12173_v37, 16  ;;  %v5819_v39 = vsel %vm5748_vm6, %v5716_v40, %v5787_v29  ;;  %v5785_v47 = vmul.f32 %v16353_v6, %v5714_v32  ;;  %v13044_v28 = vpop.f32.mrb[12].mxu0 }
 0x398   : > { %v6031_v42 = vor.u32 %v6029_v15, %v6028_v9  ;;  %v6032_v18 = vrot.slane %v6028_v9, 4  ;;  %v6034_v21 = vshrl.u32 %v12171_v56, 16  ;;  %v6037_v43 = vshll.u32 %v12171_v56, 16  ;;  %v5588_v53 = vpop.f32.mrb[13].mxu0 }
 0x399   : > { %v6053_v5 = vrot.slane %v6051_v54, 7  ;;  %v12176_v62 = vpack.c.bf16 %v5819_v39, %v5819_v39  ;;  %v5817_v46 = vsel %vm5746_vm11, %v5714_v32, %v5785_v47  ;;  %vm5749_vm12 = vcmp.ge.f32.partialorder %v5717_v61, 0.0  ;;  %v13045_v49 = vpop.f32.mrb[14].mxu0 }
 0x39a   : > { %v6327_v12 = vsel %vm14651_vm9, %v6031_v42, %v6326_v25  ;;  %v6036_v1 = vrot.slane %v6034_v21, 7  ;;  %v12174_v7 = vpack.c.bf16 %v5817_v46, %v5817_v46  ;;  %v5788_v24 = vmul.f32 %v16353_v6, %v5717_v61  ;;  %v5591_v36 = vpop.f32.mrb[15].mxu0 }
 0x39b   : > { %6328 = vst [vmem:[#allocation3 + $0x24] sm:$0xf] %v6327_v12  ;;  %v6056_v57 = vor.u32 %v6054_v8, %v6053_v5  ;;  %v6058_v0 = vrot.slane %v6053_v5, 4  ;;  %v6077_v60 = vshrl.u32 %v12176_v62, 16  ;;  %v6080_v44 = vshll.u32 %v12176_v62, 16 }
 0x39c   : > { %v6039_v10 = vor.u32 %v6037_v43, %v6036_v1  ;;  %v6041_v55 = vrot.slane %v6036_v1, 4  ;;  %v6060_v50 = vshrl.u32 %v12174_v7, 16  ;;  %v6063_v31 = vshll.u32 %v12174_v7, 16  ;;  %v6351_v8 = vld [vmem:[#allocation3 + $0x50] sm:$0x1] }
 0x39d   : > { %v6057_v26 = vsel %vm14643_vm8, %v6049_v20, %v6056_v57  ;;  %v6338_v33 = vsel %vm14657_vm10, %v6058_v0, %v6337_v23  ;;  %v6079_v11 = vrot.slane %v6077_v60, 7  ;;  %v5820_v14 = vsel %vm5749_vm12, %v5717_v61, %v5788_v24 }
 0x39e   : > { %6336 = vst [vmem:[#allocation3 + $0x34] sm:$0xf] %v6057_v26  ;;  %6339 = vst [vmem:[#allocation3 + $0x38] sm:$0x1] %v6338_v33  ;;  %v6040_v45 = vsel %vm14643_vm8, %v6032_v18, %v6039_v10  ;;  %v6331_v4 = vsel %vm14657_vm10, %v6041_v55, %v6330_v2  ;;  %v16406_v27 = vrot.slane %v6060_v50, 7  ;;  %v12177_v58 = vpack.c.bf16 %v5820_v14, %v5820_v14 }
 0x39f   : > { %6329 = vst [vmem:[#allocation3 + $0x28] sm:$0xf] %v6040_v45  ;;  %6332 = vst [vmem:[#allocation3 + $0x2c] sm:$0x1] %v6331_v4  ;;  %v6082_v40 = vor.u32 %v6080_v44, %v6079_v11  ;;  %v6083_v32 = vrot.slane %v6079_v11, 4  ;;  %v5715_v52 = vadd.f32 %v16348_v38, %v16386_v30  ;;  %v5720_v34 = vadd.f32 %v13044_v28, %v16348_v38  ;;  %v13048_v61 = vpop.f32.mrb[16].mxu0 }
 0x3a0   : > { %v6065_v59 = vor.u32 %v6063_v31, %v16406_v27  ;;  %v6066_v20 = vrot.slane %v16406_v27, 4  ;;  %v6085_v41 = vshrl.u32 %v12177_v58, 16  ;;  %v6088_v15 = vshll.u32 %v12177_v58, 16  ;;  %v16413_v37 = vpop.f32.mrb[17].mxu0  ;;  %v6344_v10 = vld [vmem:[#allocation3 + $0x44] sm:$0x1] }
 0x3a1   : > { %v6348_v51 = vsel %vm14651_vm9, %v6082_v40, %v6347_v48  ;;  %vm5747_vm14 = vcmp.ge.f32.partialorder %v5715_v52, 0.0  ;;  %v5786_v29 = vmul.f32 %v16353_v6, %v5715_v52  ;;  %vm5752_vm15 = vcmp.ge.f32.partialorder %v5720_v34, 0.0  ;;  %v16418_v17 = vpop.f32.mrb[18].mxu0  ;;  %v6361_v14 = vld [vmem:[#allocation3 + $0x60] sm:$0xf] }
 0x3a2   : > { %6349 = vst [vmem:[#allocation3 + $0x48] sm:$0xf] %v6348_v51  ;;  %v6341_v30 = vsel %vm14651_vm9, %v6065_v59, %v6340_v19  ;;  %v6087_v9 = vrot.slane %v6085_v41, 7  ;;  %v5791_v56 = vmul.f32 %v16353_v6, %v5720_v34  ;;  %v5718_v25 = vadd.f32 %v16348_v38, %v5588_v53  ;;  %v16424_v54 = vpop.f32.mrb[19].mxu0 }
 0x3a3   : > { %6342 = vst [vmem:[#allocation3 + $0x3c] sm:$0xf] %v6341_v30  ;;  %v5818_v39 = vsel %vm5747_vm14, %v5715_v52, %v5786_v29  ;;  %v5721_v47 = vadd.f32 %v13045_v49, %v16348_v38  ;;  %v5719_v28 = vadd.f32 %v16348_v38, %v5591_v36  ;;  %v5724_v42 = vadd.f32 %v13048_v61, %v16348_v38 }
 0x3a4   : > { %v6090_v18 = vor.u32 %v6088_v15, %v6087_v9  ;;  %v6092_v21 = vrot.slane %v6087_v9, 4  ;;  %v12175_v43 = vpack.c.bf16 %v5818_v39, %v5818_v39  ;;  %v5823_v5 = vsel %vm5752_vm15, %v5720_v34, %v5791_v56  ;;  %v6426_v9 = vld [vmem:[#allocation3 + $0xc] sm:$0xf] }
 0x3a5   : > { %v12180_v62 = vpack.c.bf16 %v5823_v5, %v5823_v5  ;;  %vm5750_vm0 = vcmp.ge.f32.partialorder %v5718_v25, 0.0  ;;  %v5789_v53 = vmul.f32 %v16353_v6, %v5718_v25  ;;  %vm5753_vm1 = vcmp.ge.f32.partialorder %v5721_v47, 0.0 }
 0x3a6   : > { %v6091_v46 = vsel %vm14643_vm8, %v6083_v32, %v6090_v18  ;;  %v6352_v49 = vsel %vm14657_vm10, %v6092_v21, %v6351_v8  ;;  %v6068_v12 = vshrl.u32 %v12175_v43, 16  ;;  %v6071_v23 = vshll.u32 %v12175_v43, 16  ;;  %v6354_v32 = vld [vmem:[#allocation3 + $0x54] sm:$0xf] }
 0x3a7   : > { %6350 = vst [vmem:[#allocation3 + $0x4c] sm:$0xf] %v6091_v46  ;;  %6353 = vst [vmem:[#allocation3 + $0x50] sm:$0x1] %v6352_v49  ;;  %v6111_v1 = vshrl.u32 %v12180_v62, 16  ;;  %v6114_v2 = vshll.u32 %v12180_v62, 16  ;;  %v5821_v7 = vsel %vm5750_vm0, %v5718_v25, %v5789_v53  ;;  %v5792_v24 = vmul.f32 %v16353_v6, %v5721_v47 }
 0x3a8   : > { %v16436_v36 = vpop.f32.mrb[20].mxu0  ;;  %v6070_v57 = vrot.slane %v6068_v12, 7  ;;  %v12178_v0 = vpack.c.bf16 %v5821_v7, %v5821_v7  ;;  %vm5751_vm2 = vcmp.ge.f32.partialorder %v5719_v28, 0.0  ;;  %v5790_v60 = vmul.f32 %v16353_v6, %v5719_v28 }
 0x3a9   : > { %v16439_v44 = vpop.f32.mrb[21].mxu0  ;;  %v6113_v55 = vrot.slane %v6111_v1, 7  ;;  %v5824_v50 = vsel %vm5753_vm1, %v5721_v47, %v5792_v24  ;;  %vm5756_vm3 = vcmp.ge.f32.partialorder %v5724_v42, 0.0  ;;  %v5795_v31 = vmul.f32 %v16353_v6, %v5724_v42 }
 0x3aa   : > { %v16443_v26 = vpop.f32.mrb[22].mxu0  ;;  %v6073_v33 = vor.u32 %v6071_v23, %v6070_v57  ;;  %v6075_v11 = vrot.slane %v6070_v57, 4  ;;  %v6094_v45 = vshrl.u32 %v12178_v0, 16  ;;  %v6097_v4 = vshll.u32 %v12178_v0, 16 }
 0x3ab   : > { %v16445_v48 = vpop.f32.mrb[23].mxu0  ;;  %v6116_v58 = vor.u32 %v6114_v2, %v6113_v55  ;;  %v6117_v40 = vrot.slane %v6113_v55, 4  ;;  %v12181_v19 = vpack.c.bf16 %v5824_v50, %v5824_v50  ;;  %v5822_v52 = vsel %vm5751_vm2, %v5719_v28, %v5790_v60  ;;  %v6375_v55 = vld [vmem:[#allocation3 + $0x78] sm:$0xf] }
 0x3ac   : > { %v6074_v34 = vsel %vm14643_vm8, %v6066_v20, %v6073_v33  ;;  %v6345_v61 = vsel %vm14657_vm10, %v6075_v11, %v6344_v10  ;;  %v6096_v59 = vrot.slane %v6094_v45, 7  ;;  %v12179_v41 = vpack.c.bf16 %v5822_v52, %v5822_v52 }
 0x3ad   : > { %6343 = vst [vmem:[#allocation3 + $0x40] sm:$0xf] %v6074_v34  ;;  %6346 = vst [vmem:[#allocation3 + $0x44] sm:$0x1] %v6345_v61  ;;  %v6362_v15 = vsel %vm14651_vm9, %v6116_v58, %v6361_v14  ;;  %v6119_v51 = vshrl.u32 %v12181_v19, 16  ;;  %v6122_v29 = vshll.u32 %v12181_v19, 16  ;;  %v5827_v30 = vsel %vm5756_vm3, %v5724_v42, %v5795_v31 }
 0x3ae   : > { %6363 = vst [vmem:[#allocation3 + $0x60] sm:$0xf] %v6362_v15  ;;  %v6099_v27 = vor.u32 %v6097_v4, %v6096_v59  ;;  %v6100_v56 = vrot.slane %v6096_v59, 4  ;;  %v6102_v25 = vshrl.u32 %v12179_v41, 16  ;;  %v6105_v20 = vshll.u32 %v12179_v41, 16 }
 0x3af   : > { %v6121_v8 = vrot.slane %v6119_v51, 7  ;;  %v12184_v39 = vpack.c.bf16 %v5827_v30, %v5827_v30  ;;  %v5722_v47 = vadd.f32 %v16348_v38, %v16413_v37  ;;  %v5725_v28 = vadd.f32 %v16418_v17, %v16348_v38  ;;  %v16461_v18 = vpop.f32.mrb[24].mxu0  ;;  %v6365_v42 = vld [vmem:[#allocation3 + $0x68] sm:$0x1]  ;;  %v6358_v37 = vld [vmem:[#allocation3 + $0x5c] sm:$0x1] }
 0x3b0   : > { %v6355_v21 = vsel %vm14651_vm9, %v6099_v27, %v6354_v32  ;;  %v6104_v43 = vrot.slane %v6102_v25, 7  ;;  %v5723_v5 = vadd.f32 %v16348_v38, %v16424_v54  ;;  %v6513_v62 = vshrl.u32 %v6426_v9, 16  ;;  %v16467_v53 = vpop.f32.mrb[25].mxu0  ;;  %v6427_v14 = vld [vmem:[#allocation3 + $0x10] sm:$0xf] }
 0x3b1   : > { %6356 = vst [vmem:[#allocation3 + $0x54] sm:$0xf] %v6355_v21  ;;  %v6124_v46 = vor.u32 %v6122_v29, %v6121_v8  ;;  %v6126_v49 = vrot.slane %v6121_v8, 4  ;;  %v6145_v12 = vshrl.u32 %v12184_v39, 16  ;;  %v6148_v23 = vshll.u32 %v12184_v39, 16  ;;  %v16469_v17 = vpop.f32.mrb[26].mxu0 }
 0x3b2   : > { %v6107_v1 = vor.u32 %v6105_v20, %v6104_v43  ;;  %v6109_v2 = vrot.slane %v6104_v43, 4  ;;  %vm5754_vm4 = vcmp.ge.f32.partialorder %v5722_v47, 0.0  ;;  %v5793_v7 = vmul.f32 %v16353_v6, %v5722_v47  ;;  %v16472_v24 = vpop.f32.mrb[27].mxu0  ;;  %v6473_v58 = vld [vmem:[#allocation3 + $0x14] sm:$0x1] }
 0x3b3   : > { %v6125_v54 = vsel %vm14643_vm8, %v6117_v40, %v6124_v46  ;;  %v6366_v57 = vsel %vm14657_vm10, %v6126_v49, %v6365_v42  ;;  %v16478_v0 = vrot.slane %v6145_v12, 7  ;;  %vm5757_vm5 = vcmp.ge.f32.partialorder %v5725_v28, 0.0  ;;  %v6368_v8 = vld [vmem:[#allocation3 + $0x6c] sm:$0xf]  ;;  %v6428_v49 = vld [vmem:[#allocation3 + $0x18] sm:$0xf] }
 0x3b4   : > { %6364 = vst [vmem:[#allocation3 + $0x64] sm:$0xf] %v6125_v54  ;;  %6367 = vst [vmem:[#allocation3 + $0x68] sm:$0x1] %v6366_v57  ;;  %v6108_v60 = vsel %vm14643_vm8, %v6100_v56, %v6107_v1  ;;  %v6359_v10 = vsel %vm14657_vm10, %v6109_v2, %v6358_v37  ;;  %v5825_v50 = vsel %vm5754_vm4, %v5722_v47, %v5793_v7  ;;  %vm5755_vm6 = vcmp.ge.f32.partialorder %v5723_v5, 0.0 }
 0x3b5   : > { %v5796_v31 = vmul.f32 %v16353_v6, %v5725_v28  ;;  %6357 = vst [vmem:[#allocation3 + $0x58] sm:$0xf] %v6108_v60  ;;  %6360 = vst [vmem:[#allocation3 + $0x5c] sm:$0x1] %v6359_v10  ;;  %v6150_v33 = vor.u32 %v6148_v23, %v16478_v0  ;;  %v12182_v11 = vpack.c.bf16 %v5825_v50, %v5825_v50  ;;  %v6515_v40 = vrot.slane %v6513_v62, 4 }
 0x3b6   : > { %v5794_v4 = vmul.f32 %v16353_v6, %v5723_v5  ;;  %v6516_v32 = vshll.u32 %v6426_v9, 16  ;;  %v6151_v19 = vrot.slane %v16478_v0, 4  ;;  %v6522_v51 = vshll.u32 %v6427_v14, 16  ;;  %v6379_v12 = vld [vmem:[#allocation3 + $0x80] sm:$0x1] }
 0x3b7   : > { %v5828_v45 = vsel %vm5757_vm5, %v5725_v28, %v5796_v31  ;;  %v6376_v52 = vsel %vm14651_vm9, %v6150_v33, %v6375_v55  ;;  %v6128_v34 = vshrl.u32 %v12182_v11, 16  ;;  %v16490_v59 = vpop.f32.mrb[28].mxu0  ;;  %v6526_v29 = vshrl.u32 %v6427_v14, 16  ;;  %v6429_v60 = vld [vmem:[#allocation3 + $0x1c] sm:$0xf] }
 0x3b8   : > { %v12185_v61 = vpack.c.bf16 %v5828_v45, %v5828_v45  ;;  %6377 = vst [vmem:[#allocation3 + $0x78] sm:$0xf] %v6376_v52  ;;  %v5826_v41 = vsel %vm5755_vm6, %v5723_v5, %v5794_v4  ;;  %v6518_v15 = vrot.slane %v6516_v32, 5  ;;  %v16492_v30 = vpop.f32.mrb[29].mxu0  ;;  %v6131_v56 = vshll.u32 %v12182_v11, 16 }
 0x3b9   : > { %v6130_v27 = vrot.slane %v6128_v34, 7  ;;  %v12183_v9 = vpack.c.bf16 %v5826_v41, %v5826_v41  ;;  %v16494_v20 = vpop.f32.mrb[30].mxu0  ;;  %v6524_v47 = vrot.slane %v6522_v51, 5  ;;  %v6528_v28 = vrot.slane %v6526_v29, 4  ;;  %v6372_v10 = vld [vmem:[#allocation3 + $0x74] sm:$0x1] }
 0x3ba   : > { %v6153_v25 = vshrl.u32 %v12185_v61, 16  ;;  %v6519_v39 = vor.u32 %v6518_v15, %v6515_v40  ;;  %v6532_v21 = vshll.u32 %v6473_v58, 16  ;;  %v16496_v42 = vpop.f32.mrb[31].mxu0  ;;  %v6156_v62 = vshll.u32 %v12185_v61, 16  ;;  %v6474_v58 = vld [vmem:[#allocation3 + $0x20] sm:$0x1] }
 0x3bb   : > { %v6133_v43 = vor.u32 %v6131_v56, %v6130_v27  ;;  %v6136_v46 = vshrl.u32 %v12183_v9, 16  ;;  %v6134_v37 = vrot.slane %v6130_v27, 4  ;;  %v6139_v23 = vshll.u32 %v12183_v9, 16  ;;  %v14157_v51 = vld [vmem:[#allocation4 + $0x8] sm:$0xff]  }
 0x3bc   : > { %v6155_v5 = vrot.slane %v6153_v25, 7  ;;  %v6520_v1 = vrot.slane %v6519_v39, 4  ;;  %v6529_v2 = vor.u32 %v6528_v28, %v6524_v47  ;;  %v6534_v31 = vrot.slane %v6532_v21, 5  ;;  %v9992_v63 = vld [vmem:[#allocation3 + $0x60] sm:$0xf] }
 0x3bd   : > { %v6369_v7 = vsel %vm14651_vm9, %v6133_v43, %v6368_v8  ;;  %v6138_v0 = vrot.slane %v6136_v46, 7  ;;  %v6537_v33 = vshrl.u32 %v6428_v49, 16  ;;  %v6540_v52 = vshll.u32 %v6428_v49, 16 }
 0x3be   : > { %v6158_v54 = vor.u32 %v6156_v62, %v6155_v5  ;;  %v6160_v57 = vrot.slane %v6155_v5, 4  ;;  %6370 = vst [vmem:[#allocation3 + $0x6c] sm:$0xf] %v6369_v7  ;;  %v6525_v55 = vsel %vm14637_vm7, %v6520_v1, %v6524_v47  ;;  %v6530_v50 = vrot.slane %v6529_v2, 4  ;;  %v6430_v62 = vld [vmem:[#allocation3 + $0x24] sm:$0xf] }
 0x3bf   : > { %v6141_v45 = vor.u32 %v6139_v23, %v6138_v0  ;;  %v6143_v4 = vrot.slane %v6138_v0, 4  ;;  %v6539_v32 = vrot.slane %v6537_v33, 4  ;;  %v6546_v34 = vshll.u32 %v6429_v60, 16  ;;  %v16678_v13 = vld [vmem:[#allocation3 + $0x78] sm:$0xf] }
 0x3c0   : > { %v6159_v11 = vsel %vm14643_vm8, %v6151_v19, %v6158_v54  ;;  %v6380_v14 = vsel %vm14657_vm10, %v6160_v57, %v6379_v12  ;;  %v6535_v40 = vsel %vm14637_vm7, %v6530_v50, %v6534_v31  ;;  %v6550_v15 = vshrl.u32 %v6429_v60, 16 }
 0x3c1   : > { %6378 = vst [vmem:[#allocation3 + $0x7c] sm:$0xf] %v6159_v11  ;;  %6381 = vst [vmem:[#allocation3 + $0x80] sm:$0x1] %v6380_v14  ;;  %v6142_v61 = vsel %vm14643_vm8, %v6134_v37, %v6141_v45  ;;  %v6373_v19 = vsel %vm14657_vm10, %v6143_v4, %v6372_v10  ;;  %v11866_v41 = vcombine.low %v6525_v55, %v6535_v40  ;;  %v6542_v29 = vrot.slane %v6540_v52, 5  ;;  %v14159_v55 = vld [vmem:[#allocation4 + $0x18] sm:$0xff]  }
 0x3c2   : > { %6371 = vst [vmem:[#allocation3 + $0x70] sm:$0xf] %v6142_v61  ;;  %6374 = vst [vmem:[#allocation3 + $0x74] sm:$0x1] %v6373_v19  ;;  %v6548_v27 = vrot.slane %v6546_v34, 5  ;;  %v6556_v56 = vshll.u32 %v6474_v58, 16  ;;  %v5728_v25 = vadd.f32 %v16436_v36, %v16348_v38  ;;  %v5726_v8 = vadd.f32 %v16348_v38, %v16439_v44 }
 0x3c3   : > { %13079 = vmatmul.mubr.bf16.vlgmr.msra.gmra.mrb[0].mxu1 %v11866_v41  ;;  %v6552_v9 = vrot.slane %v6550_v15, 4  ;;  %v5729_v39 = vadd.f32 %v16443_v26, %v16348_v38  ;;  %v5727_v47 = vadd.f32 %v16348_v38, %v16445_v48  ;;  %v6543_v28 = vor.u32 %v6542_v29, %v6539_v32  ;;  %v14158_v44 = vld [vmem:[#allocation4 + $0x10] sm:$0xff]   ;;  %v6389_v45 = vld [vmem:[#allocation3 + $0x90] sm:$0xf]  ;;  %v6382_v52 = vld [vmem:[#allocation3 + $0x84] sm:$0xf] }
 0x3c4   : > { %v6558_v21 = vrot.slane %v6556_v56, 5  ;;  %13111 = vmatpush3.bf16.msra.mxu1 %v16342_v16  ;;  %vm5760_vm11 = vcmp.ge.f32.partialorder %v5728_v25, 0.0  ;;  %v5799_v43 = vmul.f32 %v16353_v6, %v5728_v25  ;;  %vm5758_vm12 = vcmp.ge.f32.partialorder %v5726_v8, 0.0  ;;  %v16529_v10 = vld [vmem:[#allocation3 + $0x28] sm:$0xf]  ;;  %v14160_v56 = vld [vmem:[#allocation4 + $0x20] sm:$0xff]  }
 0x3c5   : > { %v6553_v5 = vor.u32 %v6552_v9, %v6548_v27  ;;  %v5797_v36 = vmul.f32 %v16353_v6, %v5726_v8  ;;  %vm5761_vm14 = vcmp.ge.f32.partialorder %v5729_v39, 0.0  ;;  %13112 = vmatprep.subr.bf16.mxu1 %v14157_v51  ;;  %v6544_v46 = vrot.slane %v6543_v28, 4  ;;  %v6393_v29 = vld [vmem:[#allocation3 + $0x98] sm:$0x1]  ;;  %v16533_v28 = vld [vmem:[#allocation3 + $0x30] sm:$0xf] }
 0x3c6   : > { %v5831_v26 = vsel %vm5760_vm11, %v5728_v25, %v5799_v43  ;;  %v5800_v49 = vmul.f32 %v16353_v6, %v5729_v39  ;;  %vm5759_vm15 = vcmp.ge.f32.partialorder %v5727_v47, 0.0  ;;  %v5798_v16 = vmul.f32 %v16353_v6, %v5727_v47 }
 0x3c7   : > { %v6554_v48 = vrot.slane %v6553_v5, 4  ;;  %v12188_v37 = vpack.c.bf16 %v5831_v26, %v5831_v26  ;;  %v5829_v12 = vsel %vm5758_vm12, %v5726_v8, %v5797_v36  ;;  %v6549_v23 = vsel %vm14637_vm7, %v6544_v46, %v6548_v27 }
 0x3c8   : > { %v12186_v1 = vpack.c.bf16 %v5829_v12, %v5829_v12  ;;  %v5832_v2 = vsel %vm5761_vm14, %v5729_v39, %v5800_v49  ;;  %v6561_v7 = vshrl.u32 %v6430_v62, 16  ;;  %13113 = vmatpush3.bf16.msra.mxu1 %v14157_v51  ;;  %v5830_v11 = vsel %vm5759_vm15, %v5727_v47, %v5798_v16  ;;  %v6386_v39 = vld [vmem:[#allocation3 + $0x8c] sm:$0x1] }
 0x3c9   : > { %v6559_v54 = vsel %vm14637_vm7, %v6554_v48, %v6558_v21  ;;  %v6179_v57 = vshrl.u32 %v12188_v37, 16  ;;  %v6182_v0 = vshll.u32 %v12188_v37, 16  ;;  %v12189_v60 = vpack.c.bf16 %v5832_v2, %v5832_v2  ;;  %13114 = vmatprep.subr.bf16.mxu1 %v14158_v44  ;;  %v16664_v3 = vld [vmem:[#allocation3 + $0x70] sm:$0xf] }
 0x3ca   : > { %v11867_v50 = vcombine.low %v6549_v23, %v6559_v54  ;;  %v6162_v31 = vshrl.u32 %v12186_v1, 16  ;;  %v6165_v33 = vshll.u32 %v12186_v1, 16  ;;  %v12187_v40 = vpack.c.bf16 %v5830_v11, %v5830_v11  ;;  %v14161_v1 = vld [vmem:[#allocation4 + $0x28] sm:$0xff]  }
 0x3cb   : > { %v6181_v14 = vrot.slane %v6179_v57, 7  ;;  %v6187_v4 = vshrl.u32 %v12189_v60, 16  ;;  %v6190_v58 = vshll.u32 %v12189_v60, 16  ;;  %v6563_v34 = vrot.slane %v6561_v7, 4  ;;  %v6476_v57 = vld [vmem:[#allocation3 + $0x38] sm:$0x1] }
 0x3cc   : > { %13082 = vmatprep.mubr.bf16.mxu1 %v11867_v50  ;;  %v6164_v32 = vrot.slane %v6162_v31, 7  ;;  %v6564_v61 = vshll.u32 %v6430_v62, 16  ;;  %v6570_v19 = vshll.u32 %v16529_v10, 16  ;;  %13115 = vmatpush3.bf16.msra.mxu1 %v14158_v44  ;;  %v6170_v27 = vshrl.u32 %v12187_v40, 16  ;;  %v6475_v62 = vld [vmem:[#allocation3 + $0x2c] sm:$0x1] }
 0x3cd   : > { %v6184_v41 = vor.u32 %v6182_v0, %v6181_v14  ;;  %v6185_v15 = vrot.slane %v6181_v14, 4  ;;  %v6189_v51 = vrot.slane %v6187_v4, 7  ;;  %13116 = vmatprep.subr.bf16.mxu1 %v14159_v55  ;;  %v6173_v8 = vshll.u32 %v12187_v40, 16  ;;  %v16537_v44 = vld [vmem:[#allocation3 + $0x34] sm:$0xf]  ;;  %v14162_v4 = vld [vmem:[#allocation4 + $0x30] sm:$0xff]  }
 0x3ce   : > { %v6167_v25 = vor.u32 %v6165_v33, %v6164_v32  ;;  %v6168_v9 = vrot.slane %v6164_v32, 4  ;;  %v6566_v47 = vrot.slane %v6564_v61, 5  ;;  %v6172_v36 = vrot.slane %v6170_v27, 7 }
 0x3cf   : > { %v6390_v21 = vsel %vm14651_vm9, %v6184_v41, %v6389_v45  ;;  %v6192_v43 = vor.u32 %v6190_v58, %v6189_v51  ;;  %v6194_v5 = vrot.slane %v6189_v51, 4  ;;  %v6572_v49 = vrot.slane %v6570_v19, 5 }
 0x3d0   : > { %6391 = vst [vmem:[#allocation3 + $0x90] sm:$0xf] %v6390_v21  ;;  %v6383_v46 = vsel %vm14651_vm9, %v6167_v25, %v6382_v52  ;;  %v6567_v26 = vor.u32 %v6566_v47, %v6563_v34  ;;  %v6574_v48 = vshrl.u32 %v16529_v10, 16  ;;  %13117 = vmatpush3.bf16.msra.mxu1 %v14159_v55  ;;  %v6175_v16 = vor.u32 %v6173_v8, %v6172_v36 }
 0x3d1   : > { %6384 = vst [vmem:[#allocation3 + $0x84] sm:$0xf] %v6383_v46  ;;  %v6193_v37 = vsel %vm14643_vm8, %v6185_v15, %v6192_v43  ;;  %v6394_v12 = vsel %vm14657_vm10, %v6194_v5, %v6393_v29  ;;  %v6177_v23 = vrot.slane %v6172_v36, 4  ;;  %13118 = vmatprep.subr.bf16.mxu1 %v14160_v56  ;;  %v6580_v54 = vshll.u32 %v6475_v62, 16  ;;  %v16577_v46 = vld [vmem:[%s18010_s3] ss:$0 sm:$0xff] }
 0x3d2   : > { %6392 = vst [vmem:[#allocation3 + $0x94] sm:$0xf] %v6193_v37  ;;  %6395 = vst [vmem:[#allocation3 + $0x98] sm:$0x1] %v6394_v12  ;;  %v6568_v2 = vrot.slane %v6567_v26, 4  ;;  %v6576_v7 = vrot.slane %v6574_v48, 4  ;;  %v6176_v60 = vsel %vm14643_vm8, %v6168_v9, %v6175_v16  ;;  %v5732_v61 = vadd.f32 %v16461_v18, %v16348_v38 }
 0x3d3   : > { %v6585_v0 = vshrl.u32 %v16533_v28, 16  ;;  %v6387_v55 = vsel %vm14657_vm10, %v6177_v23, %v6386_v39  ;;  %v6588_v50 = vshll.u32 %v16533_v28, 16  ;;  %v6594_v31 = vshll.u32 %v16537_v44, 16  ;;  %6385 = vst [vmem:[#allocation3 + $0x88] sm:$0xf] %v6176_v60  ;;  %v14163_v39 = vld [vmem:[#allocation4 + $0x38] sm:$0xff]  }
 0x3d4   : > { %6388 = vst [vmem:[#allocation3 + $0x8c] sm:$0x1] %v6387_v55  ;;  %v6573_v33 = vsel %vm14637_vm7, %v6568_v2, %v6572_v49  ;;  %v6577_v11 = vor.u32 %v6576_v7, %v6572_v49  ;;  %v6582_v14 = vrot.slane %v6580_v54, 5  ;;  %13119 = vmatpush3.bf16.msra.mxu1 %v14160_v56  ;;  %v6598_v32 = vshrl.u32 %v16537_v44, 16  ;;  %v16583_v16 = vld [vmem:[#allocation3 + $0x40] sm:$0xf] }
 0x3d5   : > { %v6587_v45 = vrot.slane %v6585_v0, 4  ;;  %v6590_v58 = vrot.slane %v6588_v50, 5  ;;  %v6596_v40 = vrot.slane %v6594_v31, 5  ;;  %v6604_v52 = vshll.u32 %v6476_v57, 16  ;;  %13120 = vmatprep.subr.bf16.mxu1 %v14161_v1  ;;  %v16585_v23 = vld [vmem:[#allocation4 + $0x80] sm:$0xff]  }
 0x3d6   : > { %v6578_v34 = vrot.slane %v6577_v11, 4  ;;  %v5730_v19 = vadd.f32 %v16348_v38, %v16467_v53  ;;  %v5733_v41 = vadd.f32 %v16469_v17, %v16348_v38  ;;  %v6600_v51 = vrot.slane %v6598_v32, 4  ;;  %v16568_v17 = vld [vmem:[#allocation3 + $0x3c] sm:$0xf]  ;;  %v6403_v50 = vld [vmem:[#allocation3 + $0xa8] sm:$0xf] }
 0x3d7   : > { %v6591_v15 = vor.u32 %v6590_v58, %v6587_v45  ;;  %v6606_v29 = vrot.slane %v6604_v52, 5  ;;  %v5731_v27 = vadd.f32 %v16348_v38, %v16472_v24  ;;  %vm5764_vm0 = vcmp.ge.f32.partialorder %v5732_v61, 0.0  ;;  %v6396_v58 = vld [vmem:[#allocation3 + $0x9c] sm:$0xf] }
 0x3d8   : > { %v6583_v56 = vsel %vm14637_vm7, %v6578_v34, %v6582_v14  ;;  %v5803_v25 = vmul.f32 %v16353_v6, %v5732_v61  ;;  %vm5762_vm1 = vcmp.ge.f32.partialorder %v5730_v19, 0.0  ;;  %13121 = vmatpush3.bf16.msra.mxu1 %v14161_v1  ;;  %v6601_v53 = vor.u32 %v6600_v51, %v6596_v40 }
 0x3d9   : > { %v11868_v18 = vcombine.low %v6573_v33, %v6583_v56  ;;  %v6592_v9 = vrot.slane %v6591_v15, 4  ;;  %v5801_v8 = vmul.f32 %v16353_v6, %v5730_v19  ;;  %13122 = vmatprep.subr.bf16.mxu1 %v14162_v4  ;;  %vm5765_vm2 = vcmp.ge.f32.partialorder %v5733_v41, 0.0  ;;  %v16593_v56 = vld [vmem:[#allocation3 + $0x44] sm:$0x1] }
 0x3da   : > { %v5835_v47 = vsel %vm5764_vm0, %v5732_v61, %v5803_v25  ;;  %v5804_v38 = vmul.f32 %v16353_v6, %v5733_v41  ;;  %vm5763_vm3 = vcmp.ge.f32.partialorder %v5731_v27, 0.0  ;;  %v6602_v21 = vrot.slane %v6601_v53, 4  ;;  %v6407_v61 = vld [vmem:[#allocation3 + $0xb0] sm:$0x1]  ;;  %v16595_v25 = vld [vmem:[#allocation3 + $0x48] sm:$0xf] }
 0x3db   : > { %13083 = vmatmul.mubr.bf16.gmra.mrb[4].mxu1 %v11868_v18  ;;  %v6597_v24 = vsel %vm14637_vm7, %v6592_v9, %v6596_v40  ;;  %v12192_v43 = vpack.c.bf16 %v5835_v47, %v5835_v47  ;;  %v5833_v5 = vsel %vm5762_vm1, %v5730_v19, %v5801_v8  ;;  %v5802_v26 = vmul.f32 %v16577_v46, %v5731_v27  ;;  %v6400_v9 = vld [vmem:[#allocation3 + $0xa4] sm:$0x1]  ;;  %v16600_v47 = vld [vmem:[#allocation3 + $0x4c] sm:$0xf] }
 0x3dc   : > { %v12190_v36 = vpack.c.bf16 %v5833_v5, %v5833_v5  ;;  %v5836_v62 = vsel %vm5765_vm2, %v5733_v41, %v5804_v38  ;;  %v6609_v6 = vshrl.u32 %v16568_v17, 16  ;;  %13123 = vmatpush3.bf16.msra.mxu1 %v14162_v4  ;;  %v6607_v49 = vsel %vm14637_vm7, %v6602_v21, %v6606_v29 }
 0x3dd   : > { %v6213_v48 = vshrl.u32 %v12192_v43, 16  ;;  %v6216_v37 = vshll.u32 %v12192_v43, 16  ;;  %v12193_v12 = vpack.c.bf16 %v5836_v62, %v5836_v62  ;;  %13124 = vmatprep.subr.bf16.mxu1 %v14163_v39  ;;  %v11869_v1 = vcombine.low %v6597_v24, %v6607_v49 }
 0x3de   : > { %v6196_v2 = vshrl.u32 %v12190_v36, 16  ;;  %v6199_v7 = vshll.u32 %v12190_v36, 16  ;;  %v5834_v54 = vsel %vm5763_vm3, %v5731_v27, %v5802_v26  ;;  %v6611_v33 = vrot.slane %v6609_v6, 4  ;;  %v16607_v26 = vld [vmem:[#allocation3 + $0x50] sm:$0x1] }
 0x3df   : > { %v6215_v57 = vrot.slane %v6213_v48, 7  ;;  %v6221_v0 = vshrl.u32 %v12193_v12, 16  ;;  %v6224_v60 = vshll.u32 %v12193_v12, 16  ;;  %v12191_v55 = vpack.c.bf16 %v5834_v54, %v5834_v54  ;;  %13086 = vmatprep.mubr.bf16.mxu1 %v11869_v1 }
 0x3e0   : > { %v6198_v31 = vrot.slane %v6196_v2, 7  ;;  %v6612_v11 = vshll.u32 %v16568_v17, 16  ;;  %v6618_v14 = vshll.u32 %v16583_v16, 16  ;;  %13125 = vmatpush3.bf16.msra.mxu1 %v14163_v39  ;;  %v6622_v39 = vshrl.u32 %v16583_v16, 16 }
 0x3e1   : > { %v6218_v45 = vor.u32 %v6216_v37, %v6215_v57  ;;  %v6219_v4 = vrot.slane %v6215_v57, 4  ;;  %v6223_v40 = vrot.slane %v6221_v0, 7  ;;  %v6204_v32 = vshrl.u32 %v12191_v55, 16  ;;  %13158 = vmatprep.subr.bf16.mxu1 %v16585_v23 }
 0x3e2   : > { %v6201_v52 = vor.u32 %v6199_v7, %v6198_v31  ;;  %v6202_v34 = vrot.slane %v6198_v31, 4  ;;  %v6207_v19 = vshll.u32 %v12191_v55, 16  ;;  %v6614_v41 = vrot.slane %v6612_v11, 5  ;;  %v14296_v31 = vld [vmem:[%s18009_s2] ss:$0 sm:$0xff] }
 0x3e3   : > { %v6404_v15 = vsel %vm14651_vm9, %v6218_v45, %v6403_v50  ;;  %v6226_v51 = vor.u32 %v6224_v60, %v6223_v40  ;;  %v6228_v29 = vrot.slane %v6223_v40, 4  ;;  %v6206_v27 = vrot.slane %v6204_v32, 7 }
 0x3e4   : > { %6405 = vst [vmem:[#allocation3 + $0xa8] sm:$0xf] %v6404_v15  ;;  %v6397_v18 = vsel %vm14651_vm9, %v6201_v52, %v6396_v58  ;;  %v6615_v53 = vor.u32 %v6614_v41, %v6611_v33  ;;  %v6620_v8 = vrot.slane %v6618_v14, 5  ;;  %v6624_v36 = vrot.slane %v6622_v39, 4 }
 0x3e5   : > { %6398 = vst [vmem:[#allocation3 + $0x9c] sm:$0xf] %v6397_v18  ;;  %v6227_v38 = vsel %vm14643_vm8, %v6219_v4, %v6226_v51  ;;  %v6408_v24 = vsel %vm14657_vm10, %v6228_v29, %v6407_v61  ;;  %v6209_v21 = vor.u32 %v6207_v19, %v6206_v27  ;;  %v6211_v43 = vrot.slane %v6206_v27, 4 }
 0x3e6   : > { %6406 = vst [vmem:[#allocation3 + $0xac] sm:$0xf] %v6227_v38  ;;  %6409 = vst [vmem:[#allocation3 + $0xb0] sm:$0x1] %v6408_v24  ;;  %v6616_v5 = vrot.slane %v6615_v53, 4  ;;  %v6628_v62 = vshll.u32 %v16593_v56, 16  ;;  %v6625_v2 = vor.u32 %v6624_v36, %v6620_v8  ;;  %v5736_v33 = vadd.f32 %v14296_v31, %v16490_v59 }
 0x3e7   : > { %v6633_v6 = vshrl.u32 %v16595_v25, 16  ;;  %v6210_v49 = vsel %vm14643_vm8, %v6202_v34, %v6209_v21  ;;  %v6401_v48 = vsel %vm14657_vm10, %v6211_v43, %v6400_v9  ;;  %v6636_v37 = vshll.u32 %v16595_v25, 16  ;;  %v16640_v21 = vld [vmem:[#allocation3 + $0x58] sm:$0xf] }
 0x3e8   : > { %v6642_v12 = vshll.u32 %v16600_v47, 16  ;;  %6399 = vst [vmem:[#allocation3 + $0xa0] sm:$0xf] %v6210_v49  ;;  %6402 = vst [vmem:[#allocation3 + $0xa4] sm:$0x1] %v6401_v48  ;;  %v6621_v1 = vsel %vm14637_vm7, %v6616_v5, %v6620_v8  ;;  %v6630_v7 = vrot.slane %v6628_v62, 5  ;;  %v5734_v11 = vadd.f32 %v14296_v31, %v16492_v30 }
 0x3e9   : > { %v6635_v54 = vrot.slane %v6633_v6, 4  ;;  %v6638_v57 = vrot.slane %v6636_v37, 5  ;;  %v6646_v60 = vshrl.u32 %v16600_v47, 16  ;;  %v6652_v55 = vshll.u32 %v16607_v26, 16  ;;  %v16631_v30 = vld [vmem:[#allocation3 + $0x54] sm:$0xf] }
 0x3ea   : > { %v6644_v0 = vrot.slane %v6642_v12, 5  ;;  %v6626_v50 = vrot.slane %v6625_v2, 4  ;;  %v5737_v14 = vadd.f32 %v14296_v31, %v16494_v20  ;;  %v5735_v40 = vadd.f32 %v14296_v31, %v16496_v42  ;;  %v6417_v49 = vld [vmem:[#allocation3 + $0xc0] sm:$0xf] }
 0x3eb   : > { %v6639_v45 = vor.u32 %v6638_v57, %v6635_v54  ;;  %v6648_v4 = vrot.slane %v6646_v60, 4  ;;  %v6654_v58 = vrot.slane %v6652_v55, 5  ;;  %vm5768_vm4 = vcmp.ge.f32.partialorder %v5736_v33, 0.0  ;;  %v6421_v55 = vld [vmem:[#allocation3 + $0xc8] sm:$0x1] }
 0x3ec   : > { %v6631_v32 = vsel %vm14637_vm7, %v6626_v50, %v6630_v7  ;;  %v5807_v52 = vmul.f32 %v16577_v46, %v5736_v33  ;;  %vm5766_vm5 = vcmp.ge.f32.partialorder %v5734_v11, 0.0  ;;  %v5805_v59 = vmul.f32 %v16577_v46, %v5734_v11 }
 0x3ed   : > { %v11870_v34 = vcombine.low %v6621_v1, %v6631_v32  ;;  %v6640_v61 = vrot.slane %v6639_v45, 4  ;;  %v6649_v19 = vor.u32 %v6648_v4, %v6644_v0  ;;  %vm5769_vm6 = vcmp.ge.f32.partialorder %v5737_v14, 0.0  ;;  %v6410_v1 = vld [vmem:[#allocation3 + $0xb4] sm:$0xf] }
 0x3ee   : > { %v5839_v20 = vsel %vm5768_vm4, %v5736_v33, %v5807_v52  ;;  %v5808_v41 = vmul.f32 %v16577_v46, %v5737_v14  ;;  %vm5767_vm11 = vcmp.ge.f32.partialorder %v5735_v40, 0.0  ;;  %v5837_v29 = vsel %vm5766_vm5, %v5734_v11, %v5805_v59  ;;  %v16647_v52 = vld [vmem:[#allocation3 + $0x5c] sm:$0x1] }
 0x3ef   : > { %13087 = vmatmul.mubr.bf16.gmra.mrb[8].mxu1 %v11870_v34  ;;  %v6645_v42 = vsel %vm14637_vm7, %v6640_v61, %v6644_v0  ;;  %v6650_v15 = vrot.slane %v6649_v19, 4  ;;  %v12196_v51 = vpack.c.bf16 %v5839_v20, %v5839_v20  ;;  %v12194_v27 = vpack.c.bf16 %v5837_v29, %v5837_v29  ;;  %v16649_v34 = vld [vmem:[#allocation3 + $0x60] sm:$0xf] }
 0x3f0   : > { %v5840_v18 = vsel %vm5769_vm6, %v5737_v14, %v5808_v41  ;;  %v5806_v9 = vmul.f32 %v16577_v46, %v5735_v40  ;;  %v6657_v53 = vshrl.u32 %v16631_v30, 16  ;;  %v6660_v7 = vshll.u32 %v16631_v30, 16  ;;  %v6414_v14 = vld [vmem:[#allocation3 + $0xbc] sm:$0x1]  ;;  %v16654_v41 = vld [vmem:[#allocation3 + $0x64] sm:$0xf] }
 0x3f1   : > { %v6655_v8 = vsel %vm14637_vm7, %v6650_v15, %v6654_v58  ;;  %v6247_v39 = vshrl.u32 %v12196_v51, 16  ;;  %v6250_v38 = vshll.u32 %v12196_v51, 16  ;;  %v12197_v24 = vpack.c.bf16 %v5840_v18, %v5840_v18  ;;  %v16662_v18 = vld [vmem:[#allocation3 + $0x6c] sm:$0xf] }
 0x3f2   : > { %v11871_v43 = vcombine.low %v6645_v42, %v6655_v8  ;;  %v6230_v5 = vshrl.u32 %v12194_v27, 16  ;;  %v6233_v36 = vshll.u32 %v12194_v27, 16  ;;  %v5838_v62 = vsel %vm5767_vm11, %v5735_v40, %v5806_v9  ;;  %v16656_v42 = vld [vmem:[#allocation3 + $0x68] sm:$0x1] }
 0x3f3   : > { %v6249_v6 = vrot.slane %v6247_v39, 7  ;;  %v6255_v48 = vshrl.u32 %v12197_v24, 16  ;;  %v6258_v37 = vshll.u32 %v12197_v24, 16  ;;  %v12195_v46 = vpack.c.bf16 %v5838_v62, %v5838_v62 }
 0x3f4   : > { %13090 = vmatprep.mubr.bf16.mxu1 %v11871_v43  ;;  %v6232_v12 = vrot.slane %v6230_v5, 7  ;;  %v6659_v2 = vrot.slane %v6657_v53, 4  ;;  %v6666_v54 = vshll.u32 %v16640_v21, 16  ;;  %v6662_v45 = vrot.slane %v6660_v7, 5 }
 0x3f5   : > { %v6252_v57 = vor.u32 %v6250_v38, %v6249_v6  ;;  %v6253_v0 = vrot.slane %v6249_v6, 4  ;;  %v6257_v60 = vrot.slane %v6255_v48, 7  ;;  %v6238_v50 = vshrl.u32 %v12195_v46, 16 }
 0x3f6   : > { %v6235_v31 = vor.u32 %v6233_v36, %v6232_v12  ;;  %v6236_v33 = vrot.slane %v6232_v12, 4  ;;  %v6241_v11 = vshll.u32 %v12195_v46, 16  ;;  %v6663_v19 = vor.u32 %v6662_v45, %v6659_v2 }
 0x3f7   : > { %v6418_v4 = vsel %vm14651_vm9, %v6252_v57, %v6417_v49  ;;  %v6260_v58 = vor.u32 %v6258_v37, %v6257_v60  ;;  %v6262_v40 = vrot.slane %v6257_v60, 4  ;;  %v6240_v32 = vrot.slane %v6238_v50, 7 }
 0x3f8   : > { %6419 = vst [vmem:[#allocation3 + $0xc0] sm:$0xf] %v6418_v4  ;;  %v6411_v61 = vsel %vm14651_vm9, %v6235_v31, %v6410_v1  ;;  %v6668_v59 = vrot.slane %v6666_v54, 5  ;;  %v6670_v20 = vshrl.u32 %v16640_v21, 16  ;;  %v6664_v9 = vrot.slane %v6663_v19, 4 }
 0x3f9   : > { %6412 = vst [vmem:[#allocation3 + $0xb4] sm:$0xf] %v6411_v61  ;;  %v6261_v15 = vsel %vm14643_vm8, %v6253_v0, %v6260_v58  ;;  %v6422_v51 = vsel %vm14657_vm10, %v6262_v40, %v6421_v55  ;;  %v6243_v29 = vor.u32 %v6241_v11, %v6240_v32  ;;  %v6245_v27 = vrot.slane %v6240_v32, 4  ;;  %v16680_v1 = vld [vmem:[#allocation3 + $0x74] sm:$0x1] }
 0x3fa   : > { %6420 = vst [vmem:[#allocation3 + $0xc4] sm:$0xf] %v6261_v15  ;;  %6423 = vst [vmem:[#allocation3 + $0xc8] sm:$0x1] %v6422_v51  ;;  %v6672_v53 = vrot.slane %v6670_v20, 4  ;;  %v6676_v8 = vshll.u32 %v16647_v52, 16  ;;  %v6669_v36 = vsel %vm14637_vm7, %v6664_v9, %v6668_v59 }
 0x3fb   : > { %v6681_v39 = vshrl.u32 %v16649_v34, 16  ;;  %v6244_v38 = vsel %vm14643_vm8, %v6236_v33, %v6243_v29  ;;  %v6415_v24 = vsel %vm14657_vm10, %v6245_v27, %v6414_v14  ;;  %v6684_v43 = vshll.u32 %v16649_v34, 16  ;;  %v16688_v14 = vld [vmem:[#allocation3 + $0x7c] sm:$0xf]  ;;  %v16695_v29 = vld [vmem:[#allocation3 + $0x80] sm:$0x1] }
 0x3fc   : > { %v6690_v5 = vshll.u32 %v16654_v41, 16  ;;  %6413 = vst [vmem:[#allocation3 + $0xb8] sm:$0xf] %v6244_v38  ;;  %6416 = vst [vmem:[#allocation3 + $0xbc] sm:$0x1] %v6415_v24  ;;  %v6673_v62 = vor.u32 %v6672_v53, %v6668_v59  ;;  %v6678_v6 = vrot.slane %v6676_v8, 5 }
 0x3fd   : > { %v6683_v49 = vrot.slane %v6681_v39, 4  ;;  %v6686_v48 = vrot.slane %v6684_v43, 5  ;;  %v6694_v35 = vshrl.u32 %v16654_v41, 16  ;;  %v6700_v46 = vshll.u32 %v16656_v42, 16  ;;  %v16698_v9 = vld [vmem:[#allocation3 + $0x84] sm:$0xf] }
 0x3fe   : > { %v6692_v37 = vrot.slane %v6690_v5, 5  ;;  %v6674_v12 = vrot.slane %v6673_v62, 4  ;;  %v6705_v2 = vshrl.u32 %v16662_v18, 16  ;;  %v6708_v7 = vshll.u32 %v16662_v18, 16  ;;  %v16703_v62 = vld [vmem:[#allocation3 + $0x88] sm:$0xf] }
 0x3ff   : > { %v6714_v54 = vshll.u32 %v16664_v3, 16  ;;  %v6687_v57 = vor.u32 %v6686_v48, %v6683_v49  ;;  %v6696_v0 = vrot.slane %v6694_v35, 4  ;;  %v6702_v60 = vrot.slane %v6700_v46, 5  ;;  %v16708_v35 = vld [vmem:[#allocation3 + $0x90] sm:$0xf] }
 0x400   : > { %v6718_v55 = vshrl.u32 %v16664_v3, 16  ;;  %v6679_v50 = vsel %vm14637_vm7, %v6674_v12, %v6678_v6  ;;  %v6707_v31 = vrot.slane %v6705_v2, 4  ;;  %v6710_v33 = vrot.slane %v6708_v7, 5  ;;  %v16712_v2 = vld [vmem:[#allocation3 + $0x8c] sm:$0x1] }
 0x401   : > { %v6716_v11 = vrot.slane %v6714_v54, 5  ;;  %v11872_v45 = vcombine.low %v6669_v36, %v6679_v50  ;;  %v6688_v4 = vrot.slane %v6687_v57, 4  ;;  %v6697_v58 = vor.u32 %v6696_v0, %v6692_v37 }
 0x402   : > { %v6720_v40 = vrot.slane %v6718_v55, 4  ;;  %v6711_v32 = vor.u32 %v6710_v33, %v6707_v31  ;;  %v6724_v61 = vshll.u32 %v16680_v1, 16  ;;  %v6729_v19 = vshrl.u32 %v16678_v13, 16 }
 0x403   : > { %v6732_v59 = vshll.u32 %v16678_v13, 16  ;;  %13091 = vmatmul.mubr.bf16.gmra.mrb[12].mxu1 %v11872_v45  ;;  %v6693_v20 = vsel %vm14637_vm7, %v6688_v4, %v6692_v37  ;;  %v6698_v15 = vrot.slane %v6697_v58, 4  ;;  %v6738_v27 = vshll.u32 %v16688_v14, 16  ;;  %v16718_v45 = vld [vmem:[#allocation3 + $0x94] sm:$0xf] }
 0x404   : > { %v6721_v51 = vor.u32 %v6720_v40, %v6716_v11  ;;  %v6712_v53 = vrot.slane %v6711_v32, 4  ;;  %v6726_v8 = vrot.slane %v6724_v61, 5  ;;  %v6731_v39 = vrot.slane %v6729_v19, 4  ;;  %v16723_v32 = vld [vmem:[#allocation3 + $0x98] sm:$0x1] }
 0x405   : > { %v6734_v38 = vrot.slane %v6732_v59, 5  ;;  %v6703_v24 = vsel %vm14637_vm7, %v6698_v15, %v6702_v60  ;;  %v6740_v5 = vrot.slane %v6738_v27, 5  ;;  %v6742_v36 = vshrl.u32 %v16688_v14, 16 }
 0x406   : > { %v6722_v43 = vrot.slane %v6721_v51, 4  ;;  %v11873_v6 = vcombine.low %v6693_v20, %v6703_v24  ;;  %v6717_v49 = vsel %vm14637_vm7, %v6712_v53, %v6716_v11  ;;  %v6748_v37 = vshll.u32 %v16695_v29, 16  ;;  %v16727_v51 = vld [vmem:[#allocation3 + $0x9c] sm:$0xf] }
 0x407   : > { %v6735_v48 = vor.u32 %v6734_v38, %v6731_v39  ;;  %v6744_v12 = vrot.slane %v6742_v36, 4  ;;  %v6753_v7 = vshrl.u32 %v16698_v9, 16  ;;  %v6756_v54 = vshll.u32 %v16698_v9, 16  ;;  %v16731_v38 = vld [vmem:[#allocation3 + $0xa0] sm:$0xf] }
 0x408   : > { %v6727_v46 = vsel %vm14637_vm7, %v6722_v43, %v6726_v8  ;;  %13094 = vmatprep.mubr.bf16.mxu1 %v11873_v6  ;;  %v6750_v60 = vrot.slane %v6748_v37, 5  ;;  %v6762_v55 = vshll.u32 %v16703_v62, 16  ;;  %v6766_v11 = vshrl.u32 %v16703_v62, 16 }
 0x409   : > { %v11874_v57 = vcombine.low %v6717_v49, %v6727_v46  ;;  %v6736_v0 = vrot.slane %v6735_v48, 4  ;;  %v6745_v50 = vor.u32 %v6744_v12, %v6740_v5  ;;  %v6755_v31 = vrot.slane %v6753_v7, 4 }
 0x40a   : > { %v6758_v33 = vrot.slane %v6756_v54, 5  ;;  %v6764_v58 = vrot.slane %v6762_v55, 5  ;;  %v6772_v40 = vshll.u32 %v16712_v2, 16  ;;  %v6777_v61 = vshrl.u32 %v16708_v35, 16  ;;  %v16741_v55 = vld [vmem:[#allocation3 + $0xa4] sm:$0x1] }
 0x40b   : > { %v6741_v4 = vsel %vm14637_vm7, %v6736_v0, %v6740_v5  ;;  %13095 = vmatmul.mubr.bf16.gmra.mrb[16].mxu1 %v11874_v57  ;;  %v6746_v19 = vrot.slane %v6745_v50, 4  ;;  %v6768_v20 = vrot.slane %v6766_v11, 4  ;;  %v6780_v15 = vshll.u32 %v16708_v35, 16  ;;  %v16739_v57 = vld [vmem:[#allocation3 + $0xa8] sm:$0xf] }
 0x40c   : > { %v6759_v59 = vor.u32 %v6758_v33, %v6755_v31  ;;  %v6774_v27 = vrot.slane %v6772_v40, 5  ;;  %v6779_v53 = vrot.slane %v6777_v61, 4  ;;  %v6786_v8 = vshll.u32 %v16718_v45, 16  ;;  %v16748_v40 = vld [vmem:[#allocation3 + $0xac] sm:$0xf] }
 0x40d   : > { %v6790_v39 = vshrl.u32 %v16718_v45, 16  ;;  %v6751_v24 = vsel %vm14637_vm7, %v6746_v19, %v6750_v60  ;;  %v6769_v5 = vor.u32 %v6768_v20, %v6764_v58  ;;  %v6782_v36 = vrot.slane %v6780_v15, 5 }
 0x40e   : > { %v6760_v43 = vrot.slane %v6759_v59, 4  ;;  %v11875_v6 = vcombine.low %v6741_v4, %v6751_v24  ;;  %v6788_v49 = vrot.slane %v6786_v8, 5  ;;  %v6796_v37 = vshll.u32 %v16723_v32, 16 }
 0x40f   : > { %v6792_v48 = vrot.slane %v6790_v39, 4  ;;  %v6770_v12 = vrot.slane %v6769_v5, 4  ;;  %v6783_v7 = vor.u32 %v6782_v36, %v6779_v53  ;;  %v6801_v54 = vshrl.u32 %v16727_v51, 16  ;;  %v16758_v36 = vld [vmem:[#allocation3 + $0xb4] sm:$0xf] }
 0x410   : > { %v6765_v46 = vsel %vm14637_vm7, %v6760_v43, %v6764_v58  ;;  %13098 = vmatprep.mubr.bf16.mxu1 %v11875_v6  ;;  %v6798_v60 = vrot.slane %v6796_v37, 5  ;;  %v6804_v50 = vshll.u32 %v16727_v51, 16  ;;  %v6810_v31 = vshll.u32 %v16731_v38, 16  ;;  %v16760_v37 = vld [vmem:[#allocation3 + $0xb0] sm:$0x1] }
 0x411   : > { %v6793_v0 = vor.u32 %v6792_v48, %v6788_v49  ;;  %v6775_v33 = vsel %vm14637_vm7, %v6770_v12, %v6774_v27  ;;  %v6784_v11 = vrot.slane %v6783_v7, 4  ;;  %v6803_v4 = vrot.slane %v6801_v54, 4 }
 0x412   : > { %v6814_v58 = vshrl.u32 %v16731_v38, 16  ;;  %v11876_v61 = vcombine.low %v6765_v46, %v6775_v33  ;;  %v6806_v59 = vrot.slane %v6804_v50, 5  ;;  %v6812_v20 = vrot.slane %v6810_v31, 5  ;;  %v16762_v46 = vld [vmem:[#allocation3 + $0xb8] sm:$0xf] }
 0x413   : > { %v6794_v19 = vrot.slane %v6793_v0, 4  ;;  %v6789_v15 = vsel %vm14637_vm7, %v6784_v11, %v6788_v49  ;;  %v6820_v8 = vshll.u32 %v16741_v55, 16  ;;  %v6825_v39 = vshrl.u32 %v16739_v57, 16 }
 0x414   : > { %v6816_v53 = vrot.slane %v6814_v58, 4  ;;  %13099 = vmatmul.mubr.bf16.gmra.mrb[20].mxu1 %v11876_v61  ;;  %v6807_v24 = vor.u32 %v6806_v59, %v6803_v4  ;;  %v6828_v43 = vshll.u32 %v16739_v57, 16  ;;  %v6834_v5 = vshll.u32 %v16748_v40, 16  ;;  %v16768_v61 = vld [vmem:[#allocation3 + $0xbc] sm:$0x1] }
 0x415   : > { %v6799_v27 = vsel %vm14637_vm7, %v6794_v19, %v6798_v60  ;;  %v6827_v49 = vrot.slane %v6825_v39, 4  ;;  %v6838_v0 = vshrl.u32 %v16748_v40, 16  ;;  %v6822_v50 = vrot.slane %v6820_v8, 5 }
 0x416   : > { %v11877_v6 = vcombine.low %v6789_v15, %v6799_v27  ;;  %v6817_v48 = vor.u32 %v6816_v53, %v6812_v20  ;;  %v6808_v12 = vrot.slane %v6807_v24, 4  ;;  %v6830_v7 = vrot.slane %v6828_v43, 5 }
 0x417   : > { %v6836_v54 = vrot.slane %v6834_v5, 5  ;;  %v6849_v31 = vshrl.u32 %v16758_v36, 16  ;;  %v6852_v33 = vshll.u32 %v16758_v36, 16  ;;  %v6840_v4 = vrot.slane %v6838_v0, 4 }
 0x418   : > { %13102 = vmatprep.mubr.bf16.mxu1 %v11877_v6  ;;  %v6818_v60 = vrot.slane %v6817_v48, 4  ;;  %v6831_v11 = vor.u32 %v6830_v7, %v6827_v49  ;;  %v6844_v58 = vshll.u32 %v16760_v37, 16  ;;  %v6858_v19 = vshll.u32 %v16762_v46, 16 }
 0x419   : > { %v6813_v59 = vsel %vm14637_vm7, %v6808_v12, %v6812_v20  ;;  %v6851_v53 = vrot.slane %v6849_v31, 4  ;;  %v6854_v8 = vrot.slane %v6852_v33, 5  ;;  %v6841_v24 = vor.u32 %v6840_v4, %v6836_v54 }
 0x41a   : > { %v6823_v15 = vsel %vm14637_vm7, %v6818_v60, %v6822_v50  ;;  %v6832_v27 = vrot.slane %v6831_v11, 4  ;;  %v6860_v5 = vrot.slane %v6858_v19, 5  ;;  %v6862_v6 = vshrl.u32 %v16762_v46, 16 }
 0x41b   : > { %v11878_v39 = vcombine.low %v6813_v59, %v6823_v15  ;;  %v6855_v43 = vor.u32 %v6854_v8, %v6851_v53  ;;  %v6868_v48 = vshll.u32 %v16768_v61, 16  ;;  %v6842_v49 = vrot.slane %v6841_v24, 4  ;;  %v7477_v8 = vld [vmem:[#allocation3 + $0x78] sm:$0xe]  ;;  %v7481_v15 = vld [vmem:[#allocation3 + $0xa8] sm:$0xe] }
 0x41c   : > { %v6846_v7 = vrot.slane %v6844_v58, 5  ;;  %v6864_v0 = vrot.slane %v6862_v6, 4  ;;  %v6837_v20 = vsel %vm14637_vm7, %v6832_v27, %v6836_v54  ;;  %v16803_v6 = vld [vmem:[#allocation3 + $0x4] sm:$0xf] }
 0x41d   : > { %13103 = vmatmul.mubr.bf16.gmra.mrb[24].mxu1 %v11878_v39  ;;  %v6856_v60 = vrot.slane %v6855_v43, 4  ;;  %v6870_v33 = vrot.slane %v6868_v48, 5  ;;  %v14297_v43 = vld [vmem:[#allocation3] sm:$0xf] }
 0x41e   : > { %v6847_v12 = vsel %vm14637_vm7, %v6842_v49, %v6846_v7  ;;  %v6865_v31 = vor.u32 %v6864_v0, %v6860_v5  ;;  %v11889_v48 = vcombine.low %v14297_v43, %v16803_v6  ;;  %v7474_v7 = vld [vmem:[#allocation3 + $0x54] sm:$0xe]  ;;  %v14299_v0 = vld [vmem:[#allocation3 + $0xc] sm:$0xf]  ;;  %v14303_v43 = vld [vmem:[#allocation3 + $0x24] sm:$0xf] }
 0x41f   : > { %v11879_v50 = vcombine.low %v6837_v20, %v6847_v12  ;;  %v6861_v27 = vsel %vm14637_vm7, %v6856_v60, %v6860_v5  ;;  %v16806_v20 = vld [vmem:[#allocation3 + $0x10] sm:$0xf]  ;;  %v16809_v5 = vld [vmem:[#allocation3 + $0x1c] sm:$0xf] }
 0x420   : > { %v6866_v59 = vrot.slane %v6865_v31, 4  ;;  %v11890_v12 = vcombine.low %v14299_v0, %v16806_v20  ;;  %v14301_v31 = vld [vmem:[#allocation3 + $0x18] sm:$0xf]  ;;  %v11894_v0 = vcombine.low %v16568_v17, %v16583_v16  ;;  %v14187_v17 = vld [vmem:[#allocation4 + $0xb8] sm:$0xff]   ;;  %v18239_v16 = vcombine.low %v16631_v30, %v16640_v21 }
 0x421   : > { %13106 = vmatprep.mubr.bf16.mxu1 %v11879_v50  ;;  %v14169_v50 = vld [vmem:[#allocation4 + $0x88] sm:$0xff]   ;;  %v11891_v60 = vcombine.low %v14301_v31, %v16809_v5  ;;  %v11895_v31 = vcombine.low %v16595_v25, %v16600_v47  ;;  %v18240_v25 = vcombine.low %v16649_v34, %v16654_v41  ;;  %v18243_v30 = vcombine.low %v16698_v9, %v16703_v62 }
 0x422   : > { %v6871_v24 = vsel %vm14637_vm7, %v6866_v59, %v6870_v33  ;;  %v7566_v33 = vrot.slane %v16640_v21, 5  ;;  %v7475_v59 = vld [vmem:[#allocation3 + $0x60] sm:$0xe]  ;;  %v18244_v21 = vcombine.low %v16708_v35, %v16718_v45  ;;  %v7517_v34 = vrot.slane %v16803_v6, 5 }
 0x423   : > { %v11880_v49 = vcombine.low %v6861_v27, %v6871_v24  ;;  %v11892_v27 = vcombine.low %v14303_v43, %v16529_v10  ;;  %v11893_v24 = vcombine.low %v16533_v28, %v16537_v44  ;;  %v14172_v10 = vld [vmem:[#allocation4 + $0x90] sm:$0xff]   ;;  %v11921_v44 = vrot.slane %v7475_v59, 9 }
 0x424   : > { %v7568_v39 = vrot.slane %v7566_v33, 4  ;;  %v7576_v43 = vrot.slane %v16656_v42, 5  ;;  %v11923_v59 = vrot.slane %v7477_v8, 9  ;;  %v7590_v42 = vrot.slane %v16695_v29, 5 }
 0x425   : > { %13107 = vmatmul.mubr.bf16.gmra.mrb[28].mxu1 %v11880_v49  ;;  %v7476_v49 = vld [vmem:[#allocation3 + $0x6c] sm:$0xe]  ;;  %v7597_v29 = vrot.slane %v16712_v2, 5  ;;  %v7604_v2 = vrot.slane %v16723_v32, 5  ;;  %v7531_v35 = vrot.slane %v16809_v5, 5 }
 0x426   : > { %13126 = vmatprep.mubr.bf16.mxu1 %v11889_v48  ;;  %v11920_v48 = vrot.slane %v7474_v7, 9  ;;  %v7573_v7 = vrot.slane %v16654_v41, 5  ;;  %v11922_v53 = vrot.slane %v7476_v49, 9  ;;  %v14175_v49 = vld [vmem:[#allocation4 + $0x98] sm:$0xff]   ;;  %v7467_v41 = vld [vmem:[#allocation3] sm:$0xe] }
 0x428   : > { %v16824_v28 = vsel %vm15052_vm13, %v11920_v48, %v7566_v33  ;;  %v7575_v54 = vrot.slane %v7573_v7, 4  ;;  %v7583_v33 = vrot.slane %v16680_v1, 5  ;;  %v7478_v48 = vld [vmem:[#allocation3 + $0x84] sm:$0xe]  ;;  %v16839_v19 = vsel %vm15052_vm13, %v11921_v44, %v7573_v7  ;;  %v7479_v44 = vld [vmem:[#allocation3 + $0x90] sm:$0xe] }
 0x42a   : > { %v16844_v58 = vsel %vm15052_vm13, %v7575_v54, %v7576_v43  ;;  %v7482_v43 = vld [vmem:[#allocation3 + $0xb4] sm:$0xe] }
 0x42d   : > { %13127 = vmatmul.mubr.bf16.vlgmr.msra.gmra.mrb[0].mxu1 %v11890_v12  ;;  %v7569_v12 = vrot.slane %v16647_v52, 5  ;;  %v7587_v52 = vrot.slane %v16688_v14, 5 }
 0x42e   : > { %13130 = vmatprep.mubr.bf16.mxu1 %v11891_v60  ;;  %13159 = vmatpush3.bf16.msra.mxu1 %v16585_v23  ;;  %v7580_v23 = vrot.slane %v16664_v3, 5 }
 0x42f   : > { %13160 = vmatprep.subr.bf16.mxu1 %v14169_v50  ;;  %v16830_v60 = vsel %vm15052_vm13, %v7568_v39, %v7569_v12  ;;  %v7589_v12 = vrot.slane %v7587_v52, 4  ;;  %v16852_v8 = vsel %vm15052_vm13, %v11923_v59, %v7587_v52 }
 0x430   : > { %v7582_v39 = vrot.slane %v7580_v23, 4  ;;  %v16848_v1 = vsel %vm15052_vm13, %v11922_v53, %v7580_v23  ;;  %v11924_v53 = vrot.slane %v7478_v48, 9  ;;  %v7480_v23 = vld [vmem:[#allocation3 + $0x9c] sm:$0xe]  ;;  %v7601_v48 = vrot.slane %v16718_v45, 5 }
 0x431   : > { %v16863_v54 = vsel %vm15052_vm13, %v7589_v12, %v7590_v42  ;;  %v14178_v12 = vld [vmem:[#allocation4 + $0xa0] sm:$0xff]   ;;  %v11926_v52 = vrot.slane %v7480_v23, 9 }
 0x432   : > { %13161 = vmatpush3.bf16.msra.mxu1 %v14169_v50  ;;  %v7594_v50 = vrot.slane %v16703_v62, 5  ;;  %v16859_v7 = vsel %vm15052_vm13, %v7582_v39, %v7583_v33  ;;  %v11925_v39 = vrot.slane %v7479_v44, 9  ;;  %v7611_v44 = vrot.slane %v16741_v55, 5 }
 0x433   : > { %13162 = vmatprep.subr.bf16.mxu1 %v14172_v10  ;;  %v7524_v62 = vrot.slane %v16806_v20, 5 }
 0x434   : > { %v7596_v59 = vrot.slane %v7594_v50, 4  ;;  %v16872_v33 = vsel %vm15052_vm13, %v11924_v53, %v7594_v50  ;;  %v7603_v50 = vrot.slane %v7601_v48, 4  ;;  %v11927_v53 = vrot.slane %v7481_v15, 9 }
 0x435   : > { %13131 = vmatmul.mubr.bf16.gmra.mrb[4].mxu1 %v11892_v27  ;;  %v7608_v27 = vrot.slane %v16731_v38, 5  ;;  %v16887_v4 = vsel %vm15052_vm13, %v11925_v39, %v7601_v48  ;;  %v7622_v15 = vrot.slane %v16762_v46, 5  ;;  %v14181_v39 = vld [vmem:[#allocation4 + $0xa8] sm:$0xff]   ;;  %v7526_v6 = vrot.slane %v7524_v62, 4 }
 0x436   : > { %13134 = vmatprep.mubr.bf16.mxu1 %v11893_v24  ;;  %13163 = vmatpush3.bf16.msra.mxu1 %v14172_v10  ;;  %v16878_v42 = vsel %vm15052_vm13, %v7596_v59, %v7597_v29  ;;  %v7615_v24 = vrot.slane %v16748_v40, 5  ;;  %v7618_v59 = vrot.slane %v16760_v37, 5  ;;  %v16892_v32 = vsel %vm15052_vm13, %v7603_v50, %v7604_v2  ;;  %v17125_v37 = vld [vmem:[#allocation3 + $0xa0] sm:$0xf] }
 0x437   : > { %13164 = vmatprep.subr.bf16.mxu1 %v14175_v49  ;;  %v7610_v11 = vrot.slane %v7608_v27, 4  ;;  %v16896_v23 = vsel %vm15052_vm13, %v11926_v52, %v7608_v27  ;;  %v11928_v52 = vrot.slane %v7482_v43, 9  ;;  %v7625_v50 = vrot.slane %v16768_v61, 5  ;;  %v9100_v27 = vld [vmem:[#allocation3 + $0x90] sm:$0xe] }
 0x438   : > { %v7617_v29 = vrot.slane %v7615_v24, 4  ;;  %v16900_v55 = vsel %vm15052_vm13, %v11927_v53, %v7615_v24  ;;  %v7624_v24 = vrot.slane %v7622_v15, 4  ;;  %v14304_v53 = vld [vmem:[#allocation3 + $0x8] sm:$0x1]  ;;  %v18266_v10 = vcombine.low %v16872_v33, %v16878_v42 }
 0x43a   : > { %13165 = vmatpush3.bf16.msra.mxu1 %v14175_v49  ;;  %v16907_v49 = vsel %vm15052_vm13, %v7610_v11, %v7611_v44  ;;  %v16911_v48 = vsel %vm15052_vm13, %v7617_v29, %v7618_v59  ;;  %v16926_v11 = vsel %vm15052_vm13, %v11928_v52, %v7622_v15  ;;  %v16930_v43 = vsel %vm15052_vm13, %v7624_v24, %v7625_v50  ;;  %v14184_v44 = vld [vmem:[#allocation4 + $0xb0] sm:$0xff]   ;;  %v14306_v52 = vld [vmem:[#allocation3 + $0x20] sm:$0x1] }
 0x43b   : > { %13166 = vmatprep.subr.bf16.mxu1 %v14178_v12  ;;  %v7520_v29 = vrot.slane %v14304_v53, 5  ;;  %v11913_v59 = vrot.slane %v7467_v41, 9  ;;  %v7533_v15 = vrot.slane %v7531_v35, 4  ;;  %v7534_v24 = vrot.slane %v14306_v52, 5  ;;  %v7470_v41 = vld [vmem:[#allocation3 + $0x24] sm:$0xe] }
 0x43d   : > { %13135 = vmatmul.mubr.bf16.gmra.mrb[8].mxu1 %v11894_v0  ;;  %v14188_v0 = vld [vmem:[#allocation4 + $0xc0] sm:$0xff]  }
 0x43e   : > { %13138 = vmatprep.mubr.bf16.mxu1 %v11895_v31  ;;  %13167 = vmatpush3.bf16.msra.mxu1 %v14178_v12  ;;  %v18241_v31 = vcombine.low %v16662_v18, %v16664_v3  ;;  %v18242_v12 = vcombine.low %v16678_v13, %v16688_v14  ;;  %v7519_v18 = vrot.slane %v7517_v34, 4  ;;  %v18245_v3 = vcombine.low %v16727_v51, %v16731_v38  ;;  %v7468_v38 = vld [vmem:[#allocation3 + $0xc] sm:$0xe] }
 0x43f   : > { %13168 = vmatprep.subr.bf16.mxu1 %v14181_v39  ;;  %v18246_v13 = vcombine.low %v16739_v57, %v16748_v40  ;;  %v7518_v14 = vsel %vm15052_vm13, %v11913_v59, %v7517_v34  ;;  %v18247_v51 = vcombine.low %v16758_v36, %v16762_v46  ;;  %v14305_v57 = vld [vmem:[#allocation3 + $0x14] sm:$0x1]  ;;  %v11914_v50 = vrot.slane %v7468_v38, 9 }
 0x440   : > { %v7521_v9 = vsel %vm15052_vm13, %v7519_v18, %v7520_v29  ;;  %v7527_v40 = vrot.slane %v14305_v57, 5  ;;  %v14308_v36 = vld [vmem:[#allocation3 + $0x34] sm:$0xf]  ;;  %v14309_v29 = vld [vmem:[#allocation3 + $0x2c] sm:$0x1]  ;;  %v7559_v38 = vrot.slane %v16600_v47, 5 }
 0x441   : > { %v11929_v45 = vcombine.low %v7518_v14, %v7521_v9  ;;  %v7545_v46 = vrot.slane %v14308_v36, 5  ;;  %v7541_v59 = vrot.slane %v14309_v29, 5  ;;  %v7471_v18 = vld [vmem:[#allocation3 + $0x30] sm:$0xe]  ;;  %v14190_v14 = vld [vmem:[#allocation4 + $0xd0] sm:$0xff]   ;;  %v11916_v9 = vrot.slane %v7470_v41, 9 }
 0x442   : > { %13169 = vmatpush3.bf16.msra.mxu1 %v14181_v39  ;;  %v7469_v39 = vld [vmem:[#allocation3 + $0x18] sm:$0xe]  ;;  %v7528_v20 = vsel %vm15052_vm13, %v7526_v6, %v7527_v40  ;;  %v11917_v6 = vrot.slane %v7471_v18, 9  ;;  %v14191_v40 = vld [vmem:[#allocation4 + $0xd8] sm:$0xff]   ;;  %v7562_v47 = vrot.slane %v16607_v26, 5  ;;  %v14193_v26 = vld [vmem:[#allocation4 + $0xe8] sm:$0xff]  }
 0x443   : > { %13170 = vmatprep.subr.bf16.mxu1 %v14184_v44  ;;  %v7547_v53 = vrot.slane %v7545_v46, 4  ;;  %v16997_v41 = vld [vmem:[#allocation3 + $0x2c] sm:$0x1]  ;;  %v17001_v29 = vld [vmem:[#allocation3 + $0x38] sm:$0x1] }
 0x444   : > { %v7546_v57 = vsel %vm15052_vm13, %v11917_v6, %v7545_v46  ;;  %v17003_v18 = vld [vmem:[#allocation3 + $0x4c] sm:$0xf]  ;;  %v17013_v6 = vld [vmem:[#allocation3 + $0x50] sm:$0x1] }
 0x445   : > { %13139 = vmatmul.mubr.bf16.gmra.mrb[12].mxu1 %v18239_v16  ;;  %v7535_v16 = vsel %vm15052_vm13, %v7533_v15, %v7534_v24  ;;  %v7472_v24 = vld [vmem:[#allocation3 + $0x3c] sm:$0xe] }
 0x446   : > { %13142 = vmatprep.mubr.bf16.mxu1 %v18240_v25  ;;  %13171 = vmatpush3.bf16.msra.mxu1 %v14184_v44  ;;  %v14307_v44 = vld [vmem:[#allocation3 + $0x28] sm:$0xf]  ;;  %v7525_v25 = vsel %vm15052_vm13, %v11914_v50, %v7524_v62  ;;  %v7561_v50 = vrot.slane %v7559_v38, 4 }
 0x447   : > { %13172 = vmatprep.subr.bf16.mxu1 %v14187_v17  ;;  %v7538_v5 = vrot.slane %v14307_v44, 5  ;;  %v7473_v44 = vld [vmem:[#allocation3 + $0x48] sm:$0xe] }
 0x448   : > { %v11919_v36 = vrot.slane %v7473_v44, 9  ;;  %v7563_v46 = vsel %vm15052_vm13, %v7561_v50, %v7562_v47 }
 0x449   : > { %v7540_v34 = vrot.slane %v7538_v5, 4 }
 0x44a   : > { %13173 = vmatpush3.bf16.msra.mxu1 %v14187_v17  ;;  %v11915_v17 = vrot.slane %v7469_v39, 9 }
 0x44b   : > { %13206 = vmatprep.subr.bf16.mxu1 %v14188_v0  ;;  %v7542_v62 = vsel %vm15052_vm13, %v7540_v34, %v7541_v59  ;;  %v9091_v34 = vld [vmem:[#allocation3 + $0x24] sm:$0xe]  ;;  %v14195_v59 = vld [vmem:[#allocation4 + $0xf8] sm:$0xff]  }
 0x44d   : > { %13143 = vmatmul.mubr.bf16.gmra.mrb[16].mxu1 %v18241_v31  ;;  %v11930_v31 = vcombine.low %v7525_v25, %v7528_v20  ;;  %v7555_v20 = vrot.slane %v16593_v56, 5  ;;  %v7560_v56 = vsel %vm15052_vm13, %v11919_v36, %v7559_v38  ;;  %v9172_v38 = vrot.slane %v16997_v41, 5  ;;  %v17042_v36 = vld [vmem:[#allocation3 + $0x68] sm:$0x1] }
 0x44e   : > { %13146 = vmatprep.mubr.bf16.mxu1 %v18242_v12  ;;  %v7532_v12 = vsel %vm15052_vm13, %v11915_v17, %v7531_v35  ;;  %v14311_v35 = vld [vmem:[#allocation3 + $0x40] sm:$0xf]  ;;  %v11918_v17 = vrot.slane %v7472_v24, 9 }
 0x455   : > { %13147 = vmatmul.mubr.bf16.gmra.mrb[20].mxu1 %v18243_v30  ;;  %v14189_v30 = vld [vmem:[#allocation4 + $0xc8] sm:$0xff]  }
 0x456   : > { %13150 = vmatprep.mubr.bf16.mxu1 %v18244_v21  ;;  %v11931_v21 = vcombine.low %v7532_v12, %v7535_v16  ;;  %v11935_v12 = vcombine.low %v7560_v56, %v7563_v46 }
 0x45d   : > { %13151 = vmatmul.mubr.bf16.gmra.mrb[24].mxu1 %v18245_v3  ;;  %v14310_v3 = vld [vmem:[#allocation3 + $0x38] sm:$0x1] }
 0x45e   : > { %13154 = vmatprep.mubr.bf16.mxu1 %v18246_v13  ;;  %v7548_v13 = vrot.slane %v14310_v3, 5 }
 0x465   : > { %13155 = vmatmul.mubr.bf16.gmra.mrb[28].mxu1 %v18247_v51  ;;  %v7549_v51 = vsel %vm15052_vm13, %v7547_v53, %v7548_v13  ;;  %v16999_v53 = vld [vmem:[#allocation3 + $0x34] sm:$0xf]  ;;  %v9092_v13 = vld [vmem:[#allocation3 + $0x30] sm:$0xe] }
 0x466   : > { %13174 = vmatprep.mubr.bf16.mxu1 %v11929_v45  ;;  %v7552_v45 = vrot.slane %v14311_v35, 5  ;;  %v11933_v39 = vcombine.low %v7546_v57, %v7549_v51  ;;  %v18248_v35 = vcombine.low %v16824_v28, %v16830_v60  ;;  %v12004_v28 = vrot.slane %v9092_v13, 9  ;;  %v9096_v13 = vld [vmem:[#allocation3 + $0x60] sm:$0xe] }
 0x467   : > { %v9176_v60 = vrot.slane %v16999_v53, 5 }
 0x468   : > { %v7554_v52 = vrot.slane %v7552_v45, 4  ;;  %v7553_v25 = vsel %vm15052_vm13, %v11918_v17, %v7552_v45  ;;  %v17011_v45 = vld [vmem:[#allocation3 + $0x44] sm:$0x1]  ;;  %v9095_v17 = vld [vmem:[#allocation3 + $0x54] sm:$0xe] }
 0x469   : > { %v9178_v44 = vrot.slane %v9176_v60, 4  ;;  %v9186_v47 = vrot.slane %v17011_v45, 5  ;;  %v17046_v46 = vsel %vm15052_vm13, %v12004_v28, %v9176_v60  ;;  %v17075_v28 = vld [vmem:[#allocation3 + $0x80] sm:$0x1] }
 0x46a   : > { %v7556_v16 = vsel %vm15052_vm13, %v7554_v52, %v7555_v20  ;;  %v17028_v52 = vld [vmem:[#allocation3 + $0x5c] sm:$0x1]  ;;  %v9221_v61 = vrot.slane %v17075_v28, 5 }
 0x46d   : > { %13175 = vmatmul.mubr.bf16.vlgmr.msra.gmra.mrb[0].mxu1 %v11930_v31  ;;  %v11934_v31 = vcombine.low %v7553_v25, %v7556_v16  ;;  %v17040_v16 = vld [vmem:[#allocation3 + $0x64] sm:$0xf] }
 0x46e   : > { %13178 = vmatprep.mubr.bf16.mxu1 %v11931_v21  ;;  %13207 = vmatpush3.bf16.msra.mxu1 %v14188_v0  ;;  %v7539_v0 = vsel %vm15052_vm13, %v11916_v9, %v7538_v5  ;;  %v14192_v5 = vld [vmem:[#allocation4 + $0xe0] sm:$0xff]   ;;  %v16995_v21 = vld [vmem:[#allocation3 + $0x28] sm:$0xf]  ;;  %v12003_v9 = vrot.slane %v9091_v34, 9  ;;  %v9193_v34 = vrot.slane %v17013_v6, 5 }
 0x46f   : > { %13208 = vmatprep.subr.bf16.mxu1 %v14189_v30  ;;  %v11932_v15 = vcombine.low %v7539_v0, %v7542_v62  ;;  %v9169_v3 = vrot.slane %v16995_v21, 5  ;;  %v9093_v62 = vld [vmem:[#allocation3 + $0x3c] sm:$0xe]  ;;  %v18249_v0 = vcombine.low %v16839_v19, %v16844_v58  ;;  %v9179_v19 = vrot.slane %v17001_v29, 5 }
 0x470   : > { %v12005_v24 = vrot.slane %v9093_v62, 9 }
 0x471   : > { %v9171_v51 = vrot.slane %v9169_v3, 4  ;;  %v17023_v57 = vsel %vm15052_vm13, %v12003_v9, %v9169_v3  ;;  %v17061_v9 = vld [vmem:[#allocation3 + $0x70] sm:$0xf] }
 0x472   : > { %13209 = vmatpush3.bf16.msra.mxu1 %v14189_v30  ;;  %v14194_v30 = vld [vmem:[#allocation4 + $0xf0] sm:$0xff]  }
 0x473   : > { %13210 = vmatprep.subr.bf16.mxu1 %v14190_v14  ;;  %v17032_v58 = vsel %vm15052_vm13, %v9171_v51, %v9172_v38  ;;  %v12007_v51 = vrot.slane %v9095_v17, 9  ;;  %v9097_v38 = vld [vmem:[#allocation3 + $0x6c] sm:$0xe]  ;;  %v12008_v17 = vrot.slane %v9096_v13, 9 }
 0x475   : > { %13179 = vmatmul.mubr.bf16.gmra.mrb[4].mxu1 %v11932_v15  ;;  %v17019_v15 = vld [vmem:[#allocation3 + $0x58] sm:$0xf] }
 0x476   : > { %13182 = vmatprep.mubr.bf16.mxu1 %v11933_v39  ;;  %13211 = vmatpush3.bf16.msra.mxu1 %v14190_v14  ;;  %v17006_v14 = vld [vmem:[#allocation3 + $0x40] sm:$0xf]  ;;  %v17026_v39 = vld [vmem:[#allocation4 + $0x100] sm:$0xff]   ;;  %v9197_v3 = vrot.slane %v17019_v15, 5 }
 0x477   : > { %13212 = vmatprep.subr.bf16.mxu1 %v14191_v40  ;;  %v9183_v50 = vrot.slane %v17006_v14, 5 }
 0x479   : > { %v17050_v25 = vsel %vm15052_vm13, %v12005_v24, %v9183_v50  ;;  %v9200_v24 = vrot.slane %v17028_v52, 5 }
 0x47a   : > { %13213 = vmatpush3.bf16.msra.mxu1 %v14191_v40  ;;  %v9094_v40 = vld [vmem:[#allocation3 + $0x48] sm:$0xe]  ;;  %18250 = vst [vmem:[#allocation19_spill] sm:$0xff] %v17050_v25  ;;  %v10734_v25 = vld [vmem:[#allocation3 + $0x60] sm:$0xe] }
 0x47b   : > { %13214 = vmatprep.subr.bf16.mxu1 %v14192_v5  ;;  %v12006_v56 = vrot.slane %v9094_v40, 9 }
 0x47d   : > { %13183 = vmatmul.mubr.bf16.gmra.mrb[8].mxu1 %v11934_v31  ;;  %v9185_v31 = vrot.slane %v9183_v50, 4  ;;  %v18255_v50 = vcombine.low %v16848_v1, %v16859_v7  ;;  %v9207_v7 = vrot.slane %v17042_v36, 5 }
 0x47e   : > { %13186 = vmatprep.mubr.bf16.mxu1 %v11935_v12  ;;  %13215 = vmatpush3.bf16.msra.mxu1 %v14192_v5  ;;  %v9190_v5 = vrot.slane %v17003_v18, 5  ;;  %v17056_v12 = vsel %vm15052_vm13, %v9178_v44, %v9179_v19  ;;  %v9199_v19 = vrot.slane %v9197_v3, 4  ;;  %v17087_v44 = vld [vmem:[#allocation3 + $0x88] sm:$0xf] }
 0x47f   : > { %13216 = vmatprep.subr.bf16.mxu1 %v14193_v26  ;;  %18251 = vst [vmem:[#allocation14_spill] sm:$0xff] %v17056_v12  ;;  %v9225_v2 = vrot.slane %v17087_v44, 5  ;;  %v9996_v12 = vld [vmem:[#allocation3 + $0x70] sm:$0xf] }
 0x480   : > { %v17101_v1 = vsel %vm15052_vm13, %v9199_v19, %v9200_v24 }
 0x481   : > { %18258 = vst [vmem:[#allocation10_spill] sm:$0xff] %v17101_v1 }
 0x482   : > { %13217 = vmatpush3.bf16.msra.mxu1 %v14193_v26  ;;  %v17052_v26 = vld [vmem:[#allocation3 + $0x7c] sm:$0xf] }
 0x483   : > { %13218 = vmatprep.subr.bf16.mxu1 %v14194_v30  ;;  %v9218_v60 = vrot.slane %v17052_v26, 5 }
 0x485   : > { %13187 = vmatmul.mubr.bf16.gmra.mrb[12].mxu1 %v18248_v35  ;;  %v17071_v35 = vsel %vm15052_vm13, %v12006_v56, %v9190_v5  ;;  %v9098_v56 = vld [vmem:[#allocation3 + $0x78] sm:$0xe]  ;;  %v9220_v20 = vrot.slane %v9218_v60, 4 }
 0x486   : > { %13190 = vmatprep.mubr.bf16.mxu1 %v18249_v0  ;;  %13219 = vmatpush3.bf16.msra.mxu1 %v14194_v30  ;;  %v9192_v30 = vrot.slane %v9190_v5, 4  ;;  %18253 = vst [vmem:[#allocation27_spill] sm:$0xff] %v17071_v35  ;;  %v17073_v0 = vld [vmem:[#allocation3 + $0x74] sm:$0x1]  ;;  %v17093_v5 = vsel %vm15052_vm13, %v12007_v51, %v9197_v3  ;;  %v12010_v62 = vrot.slane %v9098_v56, 9 }
 0x487   : > { %13220 = vmatprep.subr.bf16.mxu1 %v14195_v59  ;;  %18256 = vst [vmem:[#allocation23_spill] sm:$0xff] %v17093_v5  ;;  %v9214_v51 = vrot.slane %v17073_v0, 5  ;;  %v17141_v1 = vsel %vm15052_vm13, %v9220_v20, %v9221_v61  ;;  %v17153_v61 = vld [vmem:[#allocation3 + $0xb8] sm:$0xf]  ;;  %v10731_v5 = vld [vmem:[#allocation3 + $0x3c] sm:$0xe] }
 0x488   : > { %v17081_v40 = vsel %vm15052_vm13, %v9192_v30, %v9193_v34  ;;  %v18257_v30 = vcombine.low %v16852_v8, %v16863_v54  ;;  %v8367_v34 = vld [vmem:[#allocation3 + $0x8c] sm:$0x1]  ;;  %v9099_v8 = vld [vmem:[#allocation3 + $0x84] sm:$0xe]  ;;  %v17109_v54 = vld [vmem:[#allocation3 + $0x94] sm:$0xf] }
 0x489   : > { %18254 = vst [vmem:[#allocation22_spill] sm:$0xff] %v17081_v40  ;;  %v12011_v56 = vrot.slane %v9099_v8, 9  ;;  %18264 = vst [vmem:[#allocation17_spill] sm:$0xff] %v17141_v1  ;;  %v9232_v8 = vrot.slane %v17109_v54, 5  ;;  %v9239_v1 = vrot.slane %v17125_v37, 5 }
 0x48a   : > { %13221 = vmatpush3.bf16.msra.mxu1 %v14195_v59  ;;  %v17067_v59 = vsel %vm15052_vm13, %v9185_v31, %v9186_v47  ;;  %v9204_v31 = vrot.slane %v17040_v16, 5  ;;  %v9211_v47 = vrot.slane %v17061_v9, 5  ;;  %v10733_v40 = vld [vmem:[#allocation3 + $0x54] sm:$0xe] }
 0x48b   : > { %13254 = vmatprep.subr.bf16.mxu1 %v17026_v39  ;;  %18252 = vst [vmem:[#allocation26_spill] sm:$0xff] %v17067_v59  ;;  %v9993_v59 = vld [vmem:[#allocation3 + $0x64] sm:$0xf] }
 0x48c   : > { %v9206_v13 = vrot.slane %v9204_v31, 4  ;;  %v17113_v19 = vsel %vm15052_vm13, %v12008_v17, %v9204_v31  ;;  %v9213_v24 = vrot.slane %v9211_v47, 4  ;;  %v9227_v17 = vrot.slane %v9225_v2, 4 }
 0x48d   : > { %13191 = vmatmul.mubr.bf16.gmra.mrb[16].mxu1 %v18255_v50  ;;  %v12009_v50 = vrot.slane %v9097_v38, 9  ;;  %18259 = vst [vmem:[#allocation11_spill] sm:$0xff] %v17113_v19  ;;  %v8376_v19 = vld [vmem:[#allocation3 + $0xb0] sm:$0x1] }
 0x48e   : > { %13194 = vmatprep.mubr.bf16.mxu1 %v18257_v30  ;;  %v8370_v30 = vld [vmem:[#allocation3 + $0x98] sm:$0x1]  ;;  %v17121_v3 = vsel %vm15052_vm13, %v9206_v13, %v9207_v7  ;;  %v17131_v31 = vsel %vm15052_vm13, %v9213_v24, %v9214_v51  ;;  %v9101_v7 = vld [vmem:[#allocation3 + $0x9c] sm:$0xe]  ;;  %v8375_v13 = vld [vmem:[#allocation3 + $0xac] sm:$0xf] }
 0x48f   : > { %v17117_v38 = vsel %vm15052_vm13, %v12009_v50, %v9211_v47  ;;  %18261 = vst [vmem:[#allocation13_spill] sm:$0xff] %v17121_v3  ;;  %18262 = vst [vmem:[#allocation15_spill] sm:$0xff] %v17131_v31  ;;  %v17135_v47 = vsel %vm15052_vm13, %v12010_v62, %v9218_v60  ;;  %v8373_v50 = vld [vmem:[#allocation3 + $0xa4] sm:$0x1]  ;;  %v9228_v3 = vrot.slane %v8367_v34, 5  ;;  %v17147_v62 = vsel %vm15052_vm13, %v12011_v56, %v9225_v2 }
 0x490   : > { %18260 = vst [vmem:[#allocation12_spill] sm:$0xff] %v17117_v38  ;;  %18263 = vst [vmem:[#allocation16_spill] sm:$0xff] %v17135_v47  ;;  %v12012_v60 = vrot.slane %v9100_v27, 9  ;;  %v9102_v24 = vld [vmem:[#allocation3 + $0xa8] sm:$0xe]  ;;  %v9235_v34 = vrot.slane %v8370_v30, 5  ;;  %v18268_v27 = vcombine.low %v16887_v4, %v16892_v32 }
 0x491   : > { %18265 = vst [vmem:[#allocation18_spill] sm:$0xff] %v17147_v62  ;;  %v17157_v20 = vsel %vm15052_vm13, %v9227_v17, %v9228_v3  ;;  %v12013_v51 = vrot.slane %v9101_v7, 9  ;;  %v9234_v56 = vrot.slane %v9232_v8, 4  ;;  %v9242_v33 = vrot.slane %v8373_v50, 5  ;;  %v8379_v47 = vld [vmem:[#allocation3 + $0xbc] sm:$0x1] }
 0x492   : > { %18267 = vst [vmem:[#allocation20_spill] sm:$0xff] %v17157_v20  ;;  %v9246_v42 = vrot.slane %v8375_v13, 5  ;;  %v17167_v3 = vsel %vm15052_vm13, %v12012_v60, %v9232_v8  ;;  %v9241_v17 = vrot.slane %v9239_v1, 4  ;;  %v12014_v7 = vrot.slane %v9102_v24, 9  ;;  %v8381_v4 = vld [vmem:[#allocation3 + $0xc4] sm:$0xf] }
 0x493   : > { %18269 = vst [vmem:[#allocation21_spill] sm:$0xff] %v17167_v3  ;;  %v17171_v30 = vsel %vm15052_vm13, %v12013_v51, %v9239_v1  ;;  %v17175_v32 = vsel %vm15052_vm13, %v9234_v56, %v9235_v34  ;;  %v9249_v50 = vrot.slane %v8376_v19, 5  ;;  %v9253_v13 = vrot.slane %v17153_v61, 5  ;;  %v8382_v8 = vld [vmem:[#allocation3 + $0xc8] sm:$0x1]  ;;  %v14219_v3 = vld [vmem:[#allocation4 + $0x138] sm:$0xff]  }
 0x494   : > { %18270 = vst [vmem:[#allocation24_spill] sm:$0xff] %v17171_v30  ;;  %18271 = vst [vmem:[#allocation25_spill] sm:$0xff] %v17175_v32  ;;  %v17182_v60 = vsel %vm15052_vm13, %v9241_v17, %v9242_v33  ;;  %v17186_v1 = vsel %vm15052_vm13, %v12014_v7, %v9246_v42  ;;  %v9256_v56 = vrot.slane %v8379_v47, 5  ;;  %v9104_v2 = vld [vmem:[#allocation3 + $0xc0] sm:$0xe]  ;;  %v9260_v17 = vrot.slane %v8381_v4, 5 }
 0x495   : > { %13195 = vmatmul.mubr.bf16.gmra.mrb[20].mxu1 %v18266_v10  ;;  %v9103_v10 = vld [vmem:[#allocation3 + $0xb4] sm:$0xe]  ;;  %18272 = vst [vmem:[#allocation28_spill] sm:$0xff] %v17182_v60  ;;  %18273 = vst [vmem:[#allocation29_spill] sm:$0xff] %v17186_v1  ;;  %v9255_v34 = vrot.slane %v9253_v13, 4  ;;  %v18277_v7 = vcombine.low %v16896_v23, %v16907_v49  ;;  %v9263_v24 = vrot.slane %v8382_v8, 5  ;;  %v18278_v4 = vcombine.low %v16900_v55, %v16911_v48 }
 0x496   : > { %13198 = vmatprep.mubr.bf16.mxu1 %v18268_v27  ;;  %v9248_v27 = vrot.slane %v9246_v42, 4  ;;  %v12015_v51 = vrot.slane %v9103_v10, 9  ;;  %v14196_v49 = vld [vmem:[#allocation3 + $0xc] sm:$0xff]   ;;  %v14197_v8 = vld [vmem:[#allocation3 + $0x18] sm:$0xff]   ;;  %v14201_v55 = vld [vmem:[#allocation4 + $0x108] sm:$0xff]  }
 0x497   : > { %v17202_v10 = vsel %vm15052_vm13, %v9255_v34, %v9256_v56  ;;  %v14199_v48 = vld [vmem:[#allocation3 + $0x24] sm:$0xff]   ;;  %v8335_v56 = vld [vmem:[#allocation3 + $0xc] sm:$0xf] }
 0x498   : > { %v17192_v19 = vsel %vm15052_vm13, %v9248_v27, %v9249_v50  ;;  %v17198_v42 = vsel %vm15052_vm13, %v12015_v51, %v9253_v13  ;;  %18276 = vst [vmem:[#allocation8_spill] sm:$0xff] %v17202_v10  ;;  %v12016_v27 = vrot.slane %v9104_v2, 9  ;;  %v9262_v50 = vrot.slane %v9260_v17, 4  ;;  %v14204_v34 = vld [vmem:[#allocation4 + $0x110] sm:$0xff]   ;;  %v14206_v32 = vld [vmem:[#allocation3 + $0x60] sm:$0xff]  }
 0x499   : > { %18274 = vst [vmem:[#allocation30_spill] sm:$0xff] %v17192_v19  ;;  %18275 = vst [vmem:[#allocation31_spill] sm:$0xff] %v17198_v42  ;;  %v18281_v2 = vcombine.low %v16926_v11, %v16930_v43  ;;  %v8338_v11 = vld [vmem:[#allocation3 + $0x18] sm:$0xf]  ;;  %v14202_v43 = vld [vmem:[#allocation3 + $0x3c] sm:$0xff]  }
 0x49a   : > { %v17214_v13 = vsel %vm15052_vm13, %v12016_v27, %v9260_v17  ;;  %v17218_v51 = vsel %vm15052_vm13, %v9262_v50, %v9263_v24  ;;  %v8336_v24 = vld [vmem:[#allocation3 + $0x10] sm:$0xf]  ;;  %v14205_v19 = vld [vmem:[#allocation3 + $0x54] sm:$0xff]   ;;  %v14216_v1 = vld [vmem:[#allocation4 + $0x130] sm:$0xff]  }
 0x49b   : > { %18279 = vst [vmem:[#allocation7_spill] sm:$0xff] %v17214_v13  ;;  %18280 = vst [vmem:[#allocation9_spill] sm:$0xff] %v17218_v51  ;;  %v14200_v17 = vld [vmem:[#allocation3 + $0x30] sm:$0xff]   ;;  %v8393_v27 = vshll.u32 %v8336_v24, 16  ;;  %v8397_v50 = vshrl.u32 %v8336_v24, 16 }
 0x49c   : > { %v17228_v51 = vld [vmem:[#allocation3 + $0x14] sm:$0x1] }
 0x49d   : > { %13199 = vmatmul.mubr.bf16.gmra.mrb[24].mxu1 %v18277_v7  ;;  %v14207_v7 = vld [vmem:[#allocation4 + $0x118] sm:$0xff]   ;;  %v17226_v23 = vrot.slane %v8393_v27, 5  ;;  %v8341_v27 = vld [vmem:[#allocation3 + $0x24] sm:$0xf] }
 0x49e   : > { %13202 = vmatprep.mubr.bf16.mxu1 %v18278_v4  ;;  %v8339_v4 = vld [vmem:[#allocation3 + $0x1c] sm:$0xf] }
 0x49f   : > { %v8417_v47 = vshll.u32 %v8339_v4, 16  ;;  %v8421_v33 = vshrl.u32 %v8339_v4, 16 }
 0x4a1   : > { %v8423_v42 = vrot.slane %v8421_v33, 4  ;;  %v8441_v33 = vshll.u32 %v16995_v21, 16 }
 0x4a3   : > { %v17244_v20 = vrot.slane %v8441_v33, 5 }
 0x4a5   : > { %13203 = vmatmul.mubr.bf16.gmra.mrb[28].mxu1 %v18281_v2  ;;  %v8387_v2 = vshll.u32 %v8335_v56, 16 }
 0x4a6   : > { %13222 = vmatprep.mubr.bf16.mxu1 %v14196_v49  ;;  %v8384_v49 = vshrl.u32 %v8335_v56, 16 }
 0x4a7   : > { %v8389_v13 = vrot.slane %v8387_v2, 5 }
 0x4a8   : > { %v8386_v24 = vrot.slane %v8384_v49, 4  ;;  %v17234_v49 = vld [vmem:[#allocation3 + $0x20] sm:$0x1] }
 0x4aa   : > { %v8390_v4 = vor.u32 %v8389_v13, %v8386_v24  ;;  %v8469_v13 = vshrl.u32 %v16999_v53, 16 }
 0x4ac   : > { %v8391_v24 = vrot.slane %v8390_v4, 4  ;;  %v8347_v4 = vld [vmem:[#allocation3 + $0x3c] sm:$0xf] }
 0x4ad   : > { %13223 = vmatmul.mubr.bf16.vlgmr.msra.gmra.mrb[0].mxu1 %v14197_v8  ;;  %v8408_v8 = vshrl.u32 %v8338_v11, 16 }
 0x4ae   : > { %13226 = vmatprep.mubr.bf16.mxu1 %v14199_v48  ;;  %13255 = vmatpush3.bf16.msra.mxu1 %v17026_v39  ;;  %v8411_v39 = vshll.u32 %v8338_v11, 16  ;;  %v14210_v48 = vld [vmem:[#allocation4 + $0x120] sm:$0xff]   ;;  %v17231_v11 = vrot.slane %v8417_v47, 5 }
 0x4af   : > { %13256 = vmatprep.subr.bf16.mxu1 %v14201_v55  ;;  %v8410_v10 = vrot.slane %v8408_v8, 4  ;;  %v8432_v8 = vshrl.u32 %v8341_v27, 16 }
 0x4b0   : > { %v8424_v47 = vor.u32 %v8423_v42, %v17231_v11  ;;  %v14208_v42 = vld [vmem:[#allocation3 + $0x6c] sm:$0xff]  }
 0x4b2   : > { %13257 = vmatpush3.bf16.msra.mxu1 %v14201_v55  ;;  %v8399_v55 = vrot.slane %v8397_v50, 4  ;;  %v8403_v50 = vshll.u32 %v17228_v51, 16 }
 0x4b3   : > { %13258 = vmatprep.subr.bf16.mxu1 %v14204_v34 }
 0x4b4   : > { %v8400_v56 = vor.u32 %v8399_v55, %v17226_v23 }
 0x4b5   : > { %13227 = vmatmul.mubr.bf16.gmra.mrb[4].mxu1 %v14200_v17  ;;  %v8413_v17 = vrot.slane %v8411_v39, 5  ;;  %v8435_v39 = vshll.u32 %v8341_v27, 16  ;;  %v8434_v27 = vrot.slane %v8432_v8, 4  ;;  %v8493_v8 = vshrl.u32 %v17006_v14, 16 }
 0x4b6   : > { %13230 = vmatprep.mubr.bf16.mxu1 %v14202_v43  ;;  %13259 = vmatpush3.bf16.msra.mxu1 %v14204_v34  ;;  %v14203_v43 = vld [vmem:[#allocation3 + $0x48] sm:$0xff]   ;;  %v14213_v34 = vld [vmem:[#allocation4 + $0x128] sm:$0xff]   ;;  %v8401_v55 = vrot.slane %v8400_v56, 4 }
 0x4b7   : > { %13260 = vmatprep.subr.bf16.mxu1 %v14207_v7  ;;  %v8414_v2 = vor.u32 %v8413_v17, %v8410_v10  ;;  %v8427_v10 = vshll.u32 %v17234_v49, 16  ;;  %v8437_v56 = vrot.slane %v8435_v39, 5  ;;  %v8396_v39 = vsel %vm14637_vm7, %v8391_v24, %v17226_v23 }
 0x4b9   : > { %v8415_v17 = vrot.slane %v8414_v2, 4  ;;  %v8489_v2 = vshll.u32 %v17006_v14, 16 }
 0x4ba   : > { %13261 = vmatpush3.bf16.msra.mxu1 %v14207_v7  ;;  %v8344_v7 = vld [vmem:[#allocation3 + $0x30] sm:$0xf] }
 0x4bb   : > { %13262 = vmatprep.subr.bf16.mxu1 %v14210_v48  ;;  %v8456_v60 = vshrl.u32 %v8344_v7, 16  ;;  %v8459_v30 = vshll.u32 %v8344_v7, 16  ;;  %v8425_v7 = vrot.slane %v8424_v47, 4  ;;  %v8438_v47 = vor.u32 %v8437_v56, %v8434_v27  ;;  %v14209_v56 = vld [vmem:[#allocation3 + $0x78] sm:$0xff]  }
 0x4bd   : > { %13231 = vmatmul.mubr.bf16.gmra.mrb[8].mxu1 %v14203_v43  ;;  %v8445_v43 = vshrl.u32 %v16995_v21, 16 }
 0x4be   : > { %13234 = vmatprep.mubr.bf16.mxu1 %v14205_v19  ;;  %13263 = vmatpush3.bf16.msra.mxu1 %v14210_v48  ;;  %v8465_v19 = vshll.u32 %v16999_v53, 16  ;;  %v8405_v48 = vrot.slane %v8403_v50, 5  ;;  %v8458_v53 = vrot.slane %v8456_v60, 4  ;;  %v8461_v50 = vrot.slane %v8459_v30, 5  ;;  %v8350_v30 = vld [vmem:[#allocation3 + $0x48] sm:$0xf] }
 0x4bf   : > { %13264 = vmatprep.subr.bf16.mxu1 %v14213_v34  ;;  %v8447_v62 = vrot.slane %v8445_v43, 4  ;;  %v8451_v60 = vshll.u32 %v16997_v41, 16  ;;  %v17259_v43 = vld [vmem:[#allocation4 + $0x140] sm:$0xff]   ;;  %v8483_v41 = vshll.u32 %v8347_v4, 16  ;;  %v8504_v24 = vshrl.u32 %v8350_v30, 16 }
 0x4c0   : > { %v8406_v21 = vsel %vm14637_vm7, %v8401_v55, %v8405_v48  ;;  %v17246_v31 = vrot.slane %v8465_v19, 5  ;;  %v8429_v55 = vrot.slane %v8427_v10, 5  ;;  %v8462_v19 = vor.u32 %v8461_v50, %v8458_v53 }
 0x4c1   : > { %v17254_v33 = vcombine.low %v8396_v39, %v8406_v21  ;;  %v8448_v14 = vor.u32 %v8447_v62, %v17244_v20  ;;  %v17265_v48 = vrot.slane %v8489_v2, 5  ;;  %v8495_v10 = vrot.slane %v8493_v8, 4  ;;  %v14211_v21 = vld [vmem:[#allocation3 + $0x84] sm:$0xff]  }
 0x4c2   : > { %13265 = vmatpush3.bf16.msra.mxu1 %v14213_v34  ;;  %v8471_v34 = vrot.slane %v8469_v13, 4  ;;  %v8430_v23 = vsel %vm14637_vm7, %v8425_v7, %v8429_v55  ;;  %v8507_v27 = vshll.u32 %v8350_v30, 16  ;;  %v8517_v62 = vshrl.u32 %v17003_v18, 16  ;;  %v8356_v55 = vld [vmem:[#allocation3 + $0x60] sm:$0xf] }
 0x4c3   : > { %13266 = vmatprep.subr.bf16.mxu1 %v14216_v1  ;;  %v8449_v7 = vrot.slane %v8448_v14, 4  ;;  %v8475_v53 = vshll.u32 %v17001_v29, 16  ;;  %v8485_v2 = vrot.slane %v8483_v41, 5  ;;  %v8541_v8 = vshrl.u32 %v17019_v15, 16 }
 0x4c4   : > { %v8472_v13 = vor.u32 %v8471_v34, %v17246_v31  ;;  %v8353_v34 = vld [vmem:[#allocation3 + $0x54] sm:$0xf]  ;;  %v8509_v30 = vrot.slane %v8507_v27, 5  ;;  %v8519_v14 = vrot.slane %v8517_v62, 4  ;;  %v8552_v41 = vshrl.u32 %v8356_v55, 16 }
 0x4c5   : > { %13235 = vmatmul.mubr.bf16.gmra.mrb[12].mxu1 %v14206_v32  ;;  %v8420_v32 = vsel %vm14637_vm7, %v8415_v17, %v17231_v11  ;;  %v8439_v11 = vrot.slane %v8438_v47, 4  ;;  %v8453_v17 = vrot.slane %v8451_v60, 5  ;;  %v8506_v60 = vrot.slane %v8504_v24, 4 }
 0x4c6   : > { %13238 = vmatprep.mubr.bf16.mxu1 %v14208_v42  ;;  %13267 = vmatpush3.bf16.msra.mxu1 %v14216_v1  ;;  %v8480_v1 = vshrl.u32 %v8347_v4, 16  ;;  %v8513_v42 = vshll.u32 %v17003_v18, 16  ;;  %v17269_v39 = vcombine.low %v8420_v32, %v8430_v23  ;;  %v8463_v4 = vrot.slane %v8462_v19, 4 }
 0x4c7   : > { %13268 = vmatprep.subr.bf16.mxu1 %v14219_v3  ;;  %v8473_v47 = vrot.slane %v8472_v13, 4  ;;  %v8496_v18 = vor.u32 %v8495_v10, %v17265_v48  ;;  %v8528_v29 = vshrl.u32 %v8353_v34, 16  ;;  %v8444_v23 = vsel %vm14637_vm7, %v8439_v11, %v17244_v20 }
 0x4c8   : > { %v8482_v50 = vrot.slane %v8480_v1, 4  ;;  %v17276_v32 = vrot.slane %v8513_v42, 5  ;;  %v8531_v1 = vshll.u32 %v8353_v34, 16  ;;  %v8477_v19 = vrot.slane %v8475_v53, 5 }
 0x4c9   : > { %v8499_v13 = vshll.u32 %v17011_v45, 16  ;;  %v8543_v10 = vrot.slane %v8541_v8, 4  ;;  %v8454_v24 = vsel %vm14637_vm7, %v8449_v7, %v8453_v17  ;;  %v8468_v27 = vsel %vm14637_vm7, %v8463_v4, %v17246_v31  ;;  %v14212_v45 = vld [vmem:[#allocation3 + $0x90] sm:$0xff]   ;;  %v14214_v7 = vld [vmem:[#allocation3 + $0x9c] sm:$0xff]  }
 0x4ca   : > { %13269 = vmatpush3.bf16.msra.mxu1 %v14219_v3  ;;  %v8537_v3 = vshll.u32 %v17019_v15, 16  ;;  %v8555_v15 = vshll.u32 %v8356_v55, 16  ;;  %v8486_v38 = vor.u32 %v8485_v2, %v8482_v50  ;;  %v8478_v42 = vsel %vm14637_vm7, %v8473_v47, %v8477_v19  ;;  %v8359_v55 = vld [vmem:[#allocation3 + $0x6c] sm:$0xf] }
 0x4cb   : > { %13302 = vmatprep.subr.bf16.mxu1 %v17259_v43  ;;  %v8510_v20 = vor.u32 %v8509_v30, %v8506_v60  ;;  %v8497_v11 = vrot.slane %v8496_v18, 4  ;;  %v8520_v62 = vor.u32 %v8519_v14, %v17276_v32  ;;  %v8533_v53 = vrot.slane %v8531_v1, 5 }
 0x4cc   : > { %v8554_v50 = vrot.slane %v8552_v41, 4  ;;  %v8557_v34 = vrot.slane %v8555_v15, 5  ;;  %v8561_v2 = vshll.u32 %v17040_v16, 16  ;;  %v8565_v17 = vshrl.u32 %v17040_v16, 16  ;;  %v17312_v41 = vld [vmem:[#allocation3 + $0x78] sm:$0xf] }
 0x4cd   : > { %13239 = vmatmul.mubr.bf16.gmra.mrb[16].mxu1 %v14209_v56  ;;  %v17282_v56 = vrot.slane %v8537_v3, 5  ;;  %v8487_v3 = vrot.slane %v8486_v38, 4  ;;  %v8501_v8 = vrot.slane %v8499_v13, 5  ;;  %v8523_v31 = vshll.u32 %v17013_v6, 16  ;;  %v17314_v15 = vld [vmem:[#allocation3 + $0x1c] sm:$0xf] }
 0x4ce   : > { %13242 = vmatprep.mubr.bf16.mxu1 %v14211_v21  ;;  %v8530_v21 = vrot.slane %v8528_v29, 4  ;;  %v17296_v47 = vcombine.low %v8444_v23, %v8454_v24  ;;  %v17298_v18 = vcombine.low %v8468_v27, %v8478_v42  ;;  %v17300_v60 = vrot.slane %v8510_v20, 4  ;;  %18282 = vst [vmem:[#allocation32_spill] sm:$0xff] %v17314_v15  ;;  %v10728_v27 = vld [vmem:[#allocation3 + $0x18] sm:$0xe] }
 0x4cf   : > { %v8544_v4 = vor.u32 %v8543_v10, %v17282_v56  ;;  %v8547_v30 = vshll.u32 %v17028_v52, 16  ;;  %v8502_v16 = vsel %vm14637_vm7, %v8497_v11, %v8501_v8  ;;  %v17305_v38 = vrot.slane %v8520_v62, 4 }
 0x4d0   : > { %v8534_v14 = vor.u32 %v8533_v53, %v8530_v21  ;;  %v8571_v6 = vshll.u32 %v17042_v36, 16  ;;  %v8558_v29 = vor.u32 %v8557_v34, %v8554_v50  ;;  %v17308_v1 = vrot.slane %v8561_v2, 5  ;;  %v17323_v36 = vld [vmem:[#allocation3 + $0x20] sm:$0x1]  ;;  %v17336_v21 = vld [vmem:[#allocation3 + $0x34] sm:$0xf] }
 0x4d1   : > { %v17310_v23 = vrot.slane %v8565_v17, 4  ;;  %v8576_v19 = vshrl.u32 %v8359_v55, 16  ;;  %v8492_v52 = vsel %vm14637_vm7, %v8487_v3, %v17265_v48  ;;  %v17319_v13 = vrot.slane %v8523_v31, 5  ;;  %18283 = vst [vmem:[#allocation33_spill] sm:$0xff] %v17323_v36  ;;  %v17334_v48 = vld [vmem:[#allocation3 + $0x28] sm:$0xf] }
 0x4d2   : > { %v17321_v10 = vrot.slane %v8544_v4, 4  ;;  %v8579_v24 = vshll.u32 %v8359_v55, 16  ;;  %v17325_v42 = vcombine.low %v8492_v52, %v8502_v16  ;;  %v17331_v11 = vrot.slane %v8547_v30, 5  ;;  %18284 = vst [vmem:[#allocation34_spill] sm:$0xff] %v17334_v48  ;;  %18285 = vst [vmem:[#allocation35_spill] sm:$0xff] %v17336_v21  ;;  %v14215_v17 = vld [vmem:[#allocation3 + $0xa8] sm:$0xff]  }
 0x4d3   : > { %v8585_v62 = vshll.u32 %v17061_v9, 16  ;;  %v17344_v50 = vrot.slane %v8571_v6, 5  ;;  %v8589_v34 = vshrl.u32 %v17061_v9, 16  ;;  %v17347_v2 = vld [vmem:[#allocation3 + $0x2c] sm:$0x1]  ;;  %v17353_v8 = vrot.slane %v8576_v19, 4 }
 0x4d4   : > { %18286 = vst [vmem:[#allocation36_spill] sm:$0xff] %v17347_v2  ;;  %v17355_v31 = vld [vmem:[#allocation3 + $0x38] sm:$0x1]  ;;  %v10794_v4 = vrot.slane %v17314_v15, 5  ;;  %v10729_v55 = vld [vmem:[#allocation3 + $0x24] sm:$0xe] }
 0x4d5   : > { %13243 = vmatmul.mubr.bf16.gmra.mrb[20].mxu1 %v14212_v45  ;;  %v17342_v45 = vrot.slane %v8534_v14, 4  ;;  %18287 = vst [vmem:[#allocation37_spill] sm:$0xff] %v17355_v31  ;;  %v14217_v30 = vld [vmem:[#allocation3 + $0xb4] sm:$0xff]   ;;  %v17362_v16 = vrot.slane %v8579_v24, 5  ;;  %v12089_v6 = vrot.slane %v10728_v27, 9  ;;  %v17365_v19 = vrot.slane %v8585_v62, 5 }
 0x4d6   : > { %13246 = vmatprep.mubr.bf16.mxu1 %v14214_v7  ;;  %v17349_v7 = vrot.slane %v8558_v29, 4  ;;  %v10730_v29 = vld [vmem:[#allocation3 + $0x30] sm:$0xe]  ;;  %v17367_v52 = vld [vmem:[#allocation3 + $0x40] sm:$0xf]  ;;  %v10796_v20 = vrot.slane %v10794_v4, 4 }
 0x4d7   : > { %18288 = vst [vmem:[#allocation38_spill] sm:$0xff] %v17367_v52  ;;  %v10797_v53 = vrot.slane %v17323_v36, 5  ;;  %v10801_v3 = vrot.slane %v17334_v48, 5  ;;  %v17371_v15 = vrot.slane %v8589_v34, 4  ;;  %v17373_v9 = vld [vmem:[#allocation3 + $0x44] sm:$0x1]  ;;  %v17379_v27 = vsel %vm15052_vm13, %v12089_v6, %v10794_v4 }
 0x4d8   : > { %18289 = vst [vmem:[#allocation39_spill] sm:$0xff] %v17373_v9  ;;  %v17375_v24 = vld [vmem:[#allocation3 + $0x4c] sm:$0xf]  ;;  %18290 = vst [vmem:[#allocation40_spill] sm:$0xff] %v17379_v27  ;;  %v12090_v62 = vrot.slane %v10729_v55, 9  ;;  %v10804_v34 = vrot.slane %v17347_v2, 5 }
 0x4d9   : > { %v9988_v14 = vld [vmem:[#allocation3 + $0x50] sm:$0x1]  ;;  %v17384_v36 = vsel %vm15052_vm13, %v10796_v20, %v10797_v53  ;;  %v10803_v48 = vrot.slane %v10801_v3, 4  ;;  %v10811_v55 = vrot.slane %v17355_v31, 5  ;;  %v10732_v6 = vld [vmem:[#allocation3 + $0x48] sm:$0xe] }
 0x4da   : > { %18291 = vst [vmem:[#allocation41_spill] sm:$0xff] %v17384_v36  ;;  %v17395_v20 = vsel %vm15052_vm13, %v12090_v62, %v10801_v3  ;;  %v10815_v35 = vrot.slane %v17367_v52, 5  ;;  %v9991_v36 = vld [vmem:[#allocation3 + $0x5c] sm:$0x1]  ;;  %v9994_v27 = vld [vmem:[#allocation3 + $0x68] sm:$0x1] }
 0x4db   : > { %18293 = vst [vmem:[#allocation43_spill] sm:$0xff] %v17395_v20  ;;  %v17399_v53 = vsel %vm15052_vm13, %v10803_v48, %v10804_v34  ;;  %v12092_v62 = vrot.slane %v10731_v5, 9  ;;  %v10818_v48 = vrot.slane %v17373_v9, 5  ;;  %v14218_v34 = vld [vmem:[#allocation3 + $0xc0] sm:$0xff]   ;;  %v12093_v2 = vrot.slane %v10732_v6, 9 }
 0x4dc   : > { %18294 = vst [vmem:[#allocation44_spill] sm:$0xff] %v17399_v53  ;;  %v10822_v52 = vrot.slane %v17375_v24, 5  ;;  %v10825_v53 = vrot.slane %v9988_v14, 5  ;;  %v10000_v9 = vld [vmem:[#allocation3 + $0x80] sm:$0x1] }
 0x4dd   : > { %13247 = vmatmul.mubr.bf16.gmra.mrb[24].mxu1 %v14215_v17  ;;  %v10808_v17 = vrot.slane %v17336_v21, 5  ;;  %v17391_v21 = vld [vmem:[#allocation3 + $0x58] sm:$0xf]  ;;  %v17418_v31 = vsel %vm15052_vm13, %v12092_v62, %v10815_v35  ;;  %v12095_v62 = vrot.slane %v10734_v25, 9 }
 0x4de   : > { %13250 = vmatprep.mubr.bf16.mxu1 %v14217_v30  ;;  %v12091_v30 = vrot.slane %v10730_v29, 9  ;;  %18292 = vst [vmem:[#allocation42_spill] sm:$0xff] %v17391_v21  ;;  %18297 = vst [vmem:[#allocation47_spill] sm:$0xff] %v17418_v31  ;;  %v10829_v5 = vrot.slane %v17391_v21, 5  ;;  %v17427_v6 = vsel %vm15052_vm13, %v12093_v2, %v10822_v52  ;;  %v10003_v31 = vld [vmem:[#allocation3 + $0x8c] sm:$0x1] }
 0x4df   : > { %v10810_v4 = vrot.slane %v10808_v17, 4  ;;  %18299 = vst [vmem:[#allocation49_spill] sm:$0xff] %v17427_v6  ;;  %v10008_v21 = vld [vmem:[#allocation3 + $0xa0] sm:$0xf] }
 0x4e0   : > { %v17403_v29 = vsel %vm15052_vm13, %v12091_v30, %v10808_v17  ;;  %v10817_v30 = vrot.slane %v10815_v35, 4  ;;  %v10824_v17 = vrot.slane %v10822_v52, 4  ;;  %v9999_v35 = vld [vmem:[#allocation3 + $0x7c] sm:$0xf]  ;;  %v10831_v14 = vrot.slane %v10829_v5, 4  ;;  %v14221_v6 = vld [vmem:[#allocation4 + $0x148] sm:$0xff]  }
 0x4e1   : > { %18295 = vst [vmem:[#allocation45_spill] sm:$0xff] %v17403_v29  ;;  %v17410_v3 = vsel %vm15052_vm13, %v10810_v4, %v10811_v55  ;;  %v12094_v4 = vrot.slane %v10733_v40, 9  ;;  %v9997_v55 = vld [vmem:[#allocation3 + $0x74] sm:$0x1]  ;;  %v10735_v29 = vld [vmem:[#allocation3 + $0x6c] sm:$0xe] }
 0x4e2   : > { %18296 = vst [vmem:[#allocation46_spill] sm:$0xff] %v17410_v3  ;;  %v17423_v20 = vsel %vm15052_vm13, %v10817_v30, %v10818_v48  ;;  %v10832_v3 = vrot.slane %v9991_v36, 5  ;;  %v17434_v48 = vsel %vm15052_vm13, %v10824_v17, %v10825_v53  ;;  %v10839_v36 = vrot.slane %v9994_v27, 5  ;;  %v10736_v30 = vld [vmem:[#allocation3 + $0x78] sm:$0xe] }
 0x4e3   : > { %18298 = vst [vmem:[#allocation48_spill] sm:$0xff] %v17423_v20  ;;  %18300 = vst [vmem:[#allocation50_spill] sm:$0xff] %v17434_v48  ;;  %v17438_v2 = vsel %vm15052_vm13, %v12094_v4, %v10829_v5  ;;  %v10843_v52 = vrot.slane %v9996_v12, 5  ;;  %v12096_v40 = vrot.slane %v10735_v29, 9  ;;  %v10737_v20 = vld [vmem:[#allocation3 + $0x84] sm:$0xe] }
 0x4e4   : > { %18301 = vst [vmem:[#allocation51_spill] sm:$0xff] %v17438_v2  ;;  %v17444_v25 = vsel %vm15052_vm13, %v10831_v14, %v10832_v3  ;;  %v10005_v53 = vld [vmem:[#allocation3 + $0x94] sm:$0xf]  ;;  %v10006_v17 = vld [vmem:[#allocation3 + $0x98] sm:$0x1]  ;;  %v10846_v5 = vrot.slane %v9997_v55, 5 }
 0x4e5   : > { %13251 = vmatmul.mubr.bf16.gmra.mrb[28].mxu1 %v14218_v34  ;;  %v10836_v34 = vrot.slane %v9993_v59, 5  ;;  %18302 = vst [vmem:[#allocation52_spill] sm:$0xff] %v17444_v25  ;;  %v10845_v27 = vrot.slane %v10843_v52, 4  ;;  %v17458_v29 = vsel %vm15052_vm13, %v12096_v40, %v10843_v52  ;;  %v12097_v14 = vrot.slane %v10736_v30, 9  ;;  %v10738_v25 = vld [vmem:[#allocation3 + $0x90] sm:$0xe] }
 0x4e6   : > { %13270 = vmatprep.mubr.bf16.mxu1 %v17254_v33  ;;  %v10002_v33 = vld [vmem:[#allocation3 + $0x88] sm:$0xf]  ;;  %18303 = vst [vmem:[#allocation53_spill] sm:$0xff] %v17458_v29  ;;  %v10850_v48 = vrot.slane %v9999_v35, 5  ;;  %v12098_v55 = vrot.slane %v10737_v20, 9  ;;  %v10853_v52 = vrot.slane %v10000_v9, 5 }
 0x4e7   : > { %v10838_v59 = vrot.slane %v10836_v34, 4  ;;  %v17450_v12 = vsel %vm15052_vm13, %v12095_v62, %v10836_v34  ;;  %v17464_v62 = vsel %vm15052_vm13, %v10845_v27, %v10846_v5  ;;  %v10857_v34 = vrot.slane %v10002_v33, 5  ;;  %v10011_v2 = vld [vmem:[#allocation3 + $0xac] sm:$0xf]  ;;  %v10739_v30 = vld [vmem:[#allocation3 + $0x9c] sm:$0xe] }
 0x4e8   : > { %18304 = vst [vmem:[#allocation54_spill] sm:$0xff] %v17464_v62  ;;  %v17470_v40 = vsel %vm15052_vm13, %v12097_v14, %v10850_v48  ;;  %v10852_v35 = vrot.slane %v10850_v48, 4  ;;  %v10860_v33 = vrot.slane %v10003_v31, 5  ;;  %v10864_v5 = vrot.slane %v10005_v53, 5  ;;  %v10014_v14 = vld [vmem:[#allocation3 + $0xb8] sm:$0xf] }
 0x4e9   : > { %v17454_v3 = vsel %vm15052_vm13, %v10838_v59, %v10839_v36  ;;  %v10009_v59 = vld [vmem:[#allocation3 + $0xa4] sm:$0x1]  ;;  %v17475_v27 = vsel %vm15052_vm13, %v12098_v55, %v10857_v34  ;;  %v10859_v20 = vrot.slane %v10857_v34, 4  ;;  %v10012_v36 = vld [vmem:[#allocation3 + $0xb0] sm:$0x1]  ;;  %v12099_v48 = vrot.slane %v10738_v25, 9 }
 0x4ea   : > { %18305 = vst [vmem:[#allocation55_spill] sm:$0xff] %v17475_v27  ;;  %v17481_v9 = vsel %vm15052_vm13, %v10852_v35, %v10853_v52  ;;  %v10871_v4 = vrot.slane %v10008_v21, 5  ;;  %v14222_v62 = vld [vmem:[#allocation4 + $0x150] sm:$0xff]   ;;  %v8613_v34 = vshrl.u32 %v17052_v26, 16  ;;  %v10741_v21 = vld [vmem:[#allocation3 + $0xb4] sm:$0xe] }
 0x4eb   : > { %18306 = vst [vmem:[#allocation56_spill] sm:$0xff] %v17481_v9  ;;  %v17487_v31 = vsel %vm15052_vm13, %v10859_v20, %v10860_v33  ;;  %v10740_v53 = vld [vmem:[#allocation3 + $0xa8] sm:$0xe]  ;;  %v10015_v52 = vld [vmem:[#allocation3 + $0xbc] sm:$0x1]  ;;  %v17494_v55 = vsel %vm15052_vm13, %v12099_v48, %v10864_v5  ;;  %v10878_v33 = vrot.slane %v10011_v2, 5 }
 0x4ec   : > { %18307 = vst [vmem:[#allocation57_spill] sm:$0xff] %v17487_v31  ;;  %v10873_v25 = vrot.slane %v10871_v4, 4  ;;  %v10017_v29 = vld [vmem:[#allocation3 + $0xc4] sm:$0xf]  ;;  %v12101_v31 = vrot.slane %v10740_v53, 9  ;;  %v14223_v27 = vld [vmem:[#allocation4 + $0x158] sm:$0xff]  }
 0x4ed   : > { %13271 = vmatmul.mubr.bf16.vlgmr.msra.gmra.mrb[0].mxu1 %v17269_v39  ;;  %v10867_v39 = vrot.slane %v10006_v17, 5  ;;  %v10874_v17 = vrot.slane %v10009_v59, 5  ;;  %v10742_v48 = vld [vmem:[#allocation3 + $0xc0] sm:$0xe]  ;;  %v12102_v2 = vrot.slane %v10741_v21, 9  ;;  %v10888_v59 = vrot.slane %v10015_v52, 5 }
 0x4ee   : > { %13274 = vmatprep.mubr.bf16.mxu1 %v17296_v47  ;;  %13303 = vmatpush3.bf16.msra.mxu1 %v17259_v43  ;;  %v10866_v47 = vrot.slane %v10864_v5, 4  ;;  %v12100_v43 = vrot.slane %v10739_v30, 9  ;;  %v10885_v5 = vrot.slane %v10014_v14, 5  ;;  %v17516_v14 = vsel %vm15052_vm13, %v12101_v31, %v10878_v33  ;;  %v18375_v22 = vld [vmem:[#allocation49_spill] sm:$0xff] }
 0x4ef   : > { %13304 = vmatprep.subr.bf16.mxu1 %v14221_v6  ;;  %v17508_v35 = vsel %vm15052_vm13, %v10873_v25, %v10874_v17  ;;  %v8592_v21 = vor.u32 %v17371_v15, %v17365_v19  ;;  %v18309_v52 = vshll.u32 %v17052_v26, 16  ;;  %v8582_v15 = vor.u32 %v17362_v16, %v17353_v8 }
 0x4f0   : > { %v17498_v20 = vsel %vm15052_vm13, %v10866_v47, %v10867_v39  ;;  %v17502_v30 = vsel %vm15052_vm13, %v12100_v43, %v10871_v4  ;;  %v10018_v39 = vld [vmem:[#allocation3 + $0xc8] sm:$0x1]  ;;  %v10880_v4 = vrot.slane %v10878_v33, 4  ;;  %v10881_v43 = vrot.slane %v10012_v36, 5 }
 0x4f1   : > { %18308 = vst [vmem:[#allocation58_spill] sm:$0xff] %v17498_v20  ;;  %v12116_v47 = vcombine.low %v17502_v30, %v17508_v35  ;;  %v10887_v9 = vrot.slane %v10885_v5, 4  ;;  %v10892_v20 = vrot.slane %v10017_v29, 5  ;;  %v17524_v25 = vsel %vm15052_vm13, %v12102_v2, %v10885_v5 }
 0x4f2   : > { %13305 = vmatpush3.bf16.msra.mxu1 %v14221_v6  ;;  %v8603_v6 = vshll.u32 %v17312_v41, 16  ;;  %v17520_v53 = vsel %vm15052_vm13, %v10880_v4, %v10881_v43  ;;  %v12103_v36 = vrot.slane %v10742_v48, 9  ;;  %v10895_v17 = vrot.slane %v10018_v39, 5 }
 0x4f3   : > { %13306 = vmatprep.subr.bf16.mxu1 %v14222_v62  ;;  %v12117_v29 = vcombine.low %v17516_v14, %v17520_v53  ;;  %v10894_v31 = vrot.slane %v10892_v20, 4  ;;  %v17537_v33 = vrot.slane %v18309_v52, 5  ;;  %v8615_v5 = vrot.slane %v8613_v34, 4 }
 0x4f4   : > { %v8595_v39 = vshll.u32 %v17073_v0, 16  ;;  %v17547_v4 = vsel %vm15052_vm13, %v12103_v36, %v10892_v20  ;;  %v8633_v34 = vshll.u32 %v17087_v44, 16  ;;  %v8637_v43 = vshrl.u32 %v17087_v44, 16 }
 0x4f5   : > { %13275 = vmatmul.mubr.bf16.gmra.mrb[4].mxu1 %v17298_v18  ;;  %v17531_v18 = vsel %vm15052_vm13, %v10887_v9, %v10888_v59  ;;  %v18310_v9 = vor.u32 %v17310_v23, %v17308_v1  ;;  %v17551_v26 = vsel %vm15052_vm13, %v10894_v31, %v10895_v17  ;;  %v18311_v0 = vshrl.u32 %v17312_v41, 16 }
 0x4f6   : > { %13278 = vmatprep.mubr.bf16.mxu1 %v17325_v42  ;;  %13307 = vmatpush3.bf16.msra.mxu1 %v14222_v62  ;;  %v14224_v42 = vld [vmem:[#allocation4 + $0x160] sm:$0xff]   ;;  %v8365_v62 = vld [vmem:[#allocation3 + $0x84] sm:$0xf]  ;;  %v12118_v48 = vcombine.low %v17524_v25, %v17531_v18  ;;  %v12119_v23 = vcombine.low %v17547_v4, %v17551_v26  ;;  %v8605_v20 = vrot.slane %v8603_v6, 5  ;;  %v18312_v31 = vsel %vm14637_vm7, %v17305_v38, %v17319_v13 }
 0x4f7   : > { %13308 = vmatprep.subr.bf16.mxu1 %v14223_v27  ;;  %v8569_v59 = vrot.slane %v18310_v9, 4  ;;  %v8602_v2 = vrot.slane %v18311_v0, 4  ;;  %v8624_v36 = vshrl.u32 %v8365_v62, 16  ;;  %v8627_v52 = vshll.u32 %v8365_v62, 16  ;;  %v14225_v6 = vld [vmem:[#allocation4 + $0x168] sm:$0xff]  }
 0x4f8   : > { %v18313_v44 = vsel %vm14637_vm7, %v17300_v60, %v17276_v32  ;;  %v8540_v41 = vsel %vm14637_vm7, %v17342_v45, %v17282_v56  ;;  %v8593_v16 = vrot.slane %v8592_v21, 4  ;;  %v18314_v38 = vsel %vm14637_vm7, %v17321_v10, %v17331_v11  ;;  %v14344_v4 = vld [vmem:[%s14625_s26 + $0x18] sm:$0xff] }
 0x4f9   : > { %v11982_v8 = vcombine.low %v18313_v44, %v18312_v31  ;;  %v11983_v13 = vcombine.low %v8540_v41, %v18314_v38  ;;  %v8564_v32 = vsel %vm14637_vm7, %v17349_v7, %v17308_v1  ;;  %v8574_v56 = vsel %vm14637_vm7, %v8569_v59, %v17344_v50  ;;  %v14226_v50 = vld [vmem:[#allocation4 + $0x170] sm:$0xff]   ;;  %v14227_v38 = vld [vmem:[#allocation4 + $0x178] sm:$0xff]  }
 0x4fa   : > { %13309 = vmatpush3.bf16.msra.mxu1 %v14223_v27  ;;  %v8616_v27 = vor.u32 %v8615_v5, %v17537_v33  ;;  %v8597_v60 = vrot.slane %v8595_v39, 5  ;;  %v8619_v45 = vshll.u32 %v17075_v28, 16  ;;  %v17589_v17 = vrot.slane %v8633_v34, 5  ;;  %v8368_v5 = vld [vmem:[#allocation3 + $0x90] sm:$0xf] }
 0x4fb   : > { %13310 = vmatprep.subr.bf16.mxu1 %v14224_v42  ;;  %v8639_v21 = vrot.slane %v8637_v43, 4  ;;  %v8583_v10 = vrot.slane %v8582_v15, 4  ;;  %v8606_v11 = vor.u32 %v8605_v20, %v8602_v2  ;;  %v8626_v62 = vrot.slane %v8624_v36, 4  ;;  %v8371_v43 = vld [vmem:[#allocation3 + $0x9c] sm:$0xf] }
 0x4fc   : > { %v8629_v9 = vrot.slane %v8627_v52, 5  ;;  %v11984_v0 = vcombine.low %v8564_v32, %v8574_v56  ;;  %v8598_v1 = vsel %vm14637_vm7, %v8593_v16, %v8597_v60  ;;  %v8617_v7 = vrot.slane %v8616_v27, 4  ;;  %v14312_v44 = vld [vmem:[#allocation3 + $0x8c] sm:$0x1] }
 0x4fd   : > { %13279 = vmatmul.mubr.bf16.gmra.mrb[8].mxu1 %v11982_v8  ;;  %v8648_v59 = vshrl.u32 %v8368_v5, 16  ;;  %v8651_v39 = vshll.u32 %v8368_v5, 16  ;;  %v8657_v28 = vshll.u32 %v17109_v54, 16  ;;  %v8661_v34 = vshrl.u32 %v17109_v54, 16 }
 0x4fe   : > { %13282 = vmatprep.mubr.bf16.mxu1 %v11983_v13  ;;  %13311 = vmatpush3.bf16.msra.mxu1 %v14224_v42  ;;  %v8621_v31 = vrot.slane %v8619_v45, 5  ;;  %v8640_v15 = vor.u32 %v8639_v21, %v17589_v17  ;;  %v8681_v2 = vshll.u32 %v17125_v37, 16  ;;  %v8685_v42 = vshrl.u32 %v17125_v37, 16 }
 0x4ff   : > { %13312 = vmatprep.subr.bf16.mxu1 %v14225_v6  ;;  %v8588_v20 = vsel %vm14637_vm7, %v8583_v10, %v17365_v19  ;;  %v8607_v36 = vrot.slane %v8606_v11, 4  ;;  %v8630_v52 = vor.u32 %v8629_v9, %v8626_v62  ;;  %v8643_v8 = vshll.u32 %v14312_v44, 16  ;;  %v8374_v9 = vld [vmem:[#allocation3 + $0xa8] sm:$0xf]  ;;  %v14315_v44 = vld [vmem:[#allocation3 + $0xa4] sm:$0x1] }
 0x500   : > { %v11985_v41 = vcombine.low %v8588_v20, %v8598_v1  ;;  %v8622_v54 = vsel %vm14637_vm7, %v8617_v7, %v8621_v31  ;;  %v8672_v16 = vshrl.u32 %v8371_v43, 16  ;;  %v8675_v27 = vshll.u32 %v8371_v43, 16  ;;  %v17610_v1 = vld [vmem:[#allocation4 + $0x180] sm:$0xff]  }
 0x501   : > { %v8650_v13 = vrot.slane %v8648_v59, 4  ;;  %v8653_v32 = vrot.slane %v8651_v39, 5  ;;  %v17603_v37 = vrot.slane %v8657_v28, 5  ;;  %v8663_v56 = vrot.slane %v8661_v34, 4  ;;  %v14313_v59 = vld [vmem:[#allocation3 + $0xac] sm:$0xf] }
 0x502   : > { %13313 = vmatpush3.bf16.msra.mxu1 %v14225_v6  ;;  %v8641_v19 = vrot.slane %v8640_v15, 4  ;;  %v17605_v60 = vrot.slane %v8681_v2, 5  ;;  %v8687_v45 = vrot.slane %v8685_v42, 4  ;;  %v8612_v6 = vsel %vm14637_vm7, %v8607_v36, %v17537_v33  ;;  %v8377_v34 = vld [vmem:[#allocation3 + $0xb4] sm:$0xf] }
 0x503   : > { %13314 = vmatprep.subr.bf16.mxu1 %v14226_v50  ;;  %v8631_v21 = vrot.slane %v8630_v52, 4  ;;  %v11986_v5 = vcombine.low %v8612_v6, %v8622_v54  ;;  %v8645_v10 = vrot.slane %v8643_v8, 5  ;;  %v8674_v11 = vrot.slane %v8672_v16, 4  ;;  %v14314_v2 = vld [vmem:[#allocation3 + $0x98] sm:$0x1] }
 0x504   : > { %v8677_v62 = vrot.slane %v8675_v27, 5  ;;  %v8664_v7 = vor.u32 %v8663_v56, %v17603_v37  ;;  %v8705_v39 = vshll.u32 %v14313_v59, 16  ;;  %v8709_v28 = vshrl.u32 %v14313_v59, 16 }
 0x505   : > { %13283 = vmatmul.mubr.bf16.gmra.mrb[12].mxu1 %v11984_v0  ;;  %v8654_v0 = vor.u32 %v8653_v32, %v8650_v13  ;;  %v8646_v33 = vsel %vm14637_vm7, %v8641_v19, %v8645_v10  ;;  %v8729_v43 = vshll.u32 %v17153_v61, 16  ;;  %v8733_v31 = vshrl.u32 %v17153_v61, 16 }
 0x506   : > { %13286 = vmatprep.mubr.bf16.mxu1 %v11985_v41  ;;  %13315 = vmatpush3.bf16.msra.mxu1 %v14226_v50  ;;  %v8688_v50 = vor.u32 %v8687_v45, %v17605_v60  ;;  %v8636_v15 = vsel %vm14637_vm7, %v8631_v21, %v17589_v17  ;;  %v8667_v42 = vshll.u32 %v14314_v2, 16  ;;  %v8696_v20 = vshrl.u32 %v8374_v9, 16 }
 0x507   : > { %13316 = vmatprep.subr.bf16.mxu1 %v14227_v38  ;;  %v8699_v36 = vshll.u32 %v8374_v9, 16  ;;  %v8678_v52 = vor.u32 %v8677_v62, %v8674_v11  ;;  %v8691_v8 = vshll.u32 %v14315_v44, 16  ;;  %v8720_v41 = vshrl.u32 %v8377_v34, 16  ;;  %v8380_v9 = vld [vmem:[#allocation3 + $0xc0] sm:$0xf] }
 0x508   : > { %v8723_v54 = vshll.u32 %v8377_v34, 16  ;;  %v11987_v16 = vcombine.low %v8636_v15, %v8646_v33  ;;  %v8665_v27 = vrot.slane %v8664_v7, 4  ;;  %v8707_v13 = vrot.slane %v8705_v39, 5  ;;  %v14316_v39 = vld [vmem:[#allocation3 + $0xc4] sm:$0xf] }
 0x509   : > { %v8711_v61 = vrot.slane %v8709_v28, 4  ;;  %v8655_v32 = vrot.slane %v8654_v0, 4  ;;  %v8689_v56 = vrot.slane %v8688_v50, 4  ;;  %v8731_v17 = vrot.slane %v8729_v43, 5  ;;  %v14317_v43 = vld [vmem:[#allocation3 + $0xb0] sm:$0x1] }
 0x50a   : > { %13317 = vmatpush3.bf16.msra.mxu1 %v14227_v38  ;;  %v8735_v19 = vrot.slane %v8733_v31, 4  ;;  %v8669_v45 = vrot.slane %v8667_v42, 5  ;;  %v8698_v6 = vrot.slane %v8696_v20, 4  ;;  %v8701_v38 = vrot.slane %v8699_v36, 5 }
 0x50b   : > { %13350 = vmatprep.subr.bf16.mxu1 %v17610_v1  ;;  %v8679_v21 = vrot.slane %v8678_v52, 4  ;;  %v8693_v10 = vrot.slane %v8691_v8, 5  ;;  %v8722_v11 = vrot.slane %v8720_v41, 4  ;;  %v8725_v62 = vrot.slane %v8723_v54, 5  ;;  %v14318_v52 = vld [vmem:[#allocation3 + $0xbc] sm:$0x1] }
 0x50c   : > { %v8670_v59 = vsel %vm14637_vm7, %v8665_v27, %v8669_v45  ;;  %v8712_v7 = vor.u32 %v8711_v61, %v8707_v13  ;;  %v8753_v28 = vshll.u32 %v14316_v39, 16  ;;  %v8660_v0 = vsel %vm14637_vm7, %v8655_v32, %v17603_v37 }
 0x50d   : > { %13287 = vmatmul.mubr.bf16.gmra.mrb[16].mxu1 %v11986_v5  ;;  %v8757_v5 = vshrl.u32 %v14316_v39, 16  ;;  %v8694_v34 = vsel %vm14637_vm7, %v8689_v56, %v8693_v10  ;;  %v8736_v33 = vor.u32 %v8735_v19, %v8731_v17  ;;  %v8702_v50 = vor.u32 %v8701_v38, %v8698_v6 }
 0x50e   : > { %13290 = vmatprep.mubr.bf16.mxu1 %v11987_v16  ;;  %v8715_v31 = vshll.u32 %v14317_v43, 16  ;;  %v8744_v15 = vshrl.u32 %v8380_v9, 16  ;;  %v8747_v2 = vshll.u32 %v8380_v9, 16  ;;  %v11988_v42 = vcombine.low %v8660_v0, %v8670_v59  ;;  %v14320_v9 = vld [vmem:[#allocation3 + $0xc8] sm:$0x1] }
 0x50f   : > { %v8684_v20 = vsel %vm14637_vm7, %v8679_v21, %v17605_v60  ;;  %v8726_v36 = vor.u32 %v8725_v62, %v8722_v11  ;;  %v8739_v44 = vshll.u32 %v14318_v52, 16  ;;  %v8713_v41 = vrot.slane %v8712_v7, 4  ;;  %v14319_v21 = vld [vmem:[#allocation3 + $0x10] sm:$0xf] }
 0x510   : > { %v11989_v8 = vcombine.low %v8684_v20, %v8694_v34  ;;  %v8755_v37 = vrot.slane %v8753_v28, 5  ;;  %v8759_v54 = vrot.slane %v8757_v5, 4  ;;  %v8737_v16 = vrot.slane %v8736_v33, 4 }
 0x511   : > { %v8703_v27 = vrot.slane %v8702_v50, 4  ;;  %v8717_v61 = vrot.slane %v8715_v31, 5  ;;  %v8746_v32 = vrot.slane %v8744_v15, 4  ;;  %v8749_v56 = vrot.slane %v8747_v2, 5  ;;  %v9089_v50 = vld [vmem:[#allocation3 + $0xc] sm:$0xe] }
 0x512   : > { %v8727_v19 = vrot.slane %v8726_v36, 4  ;;  %v8741_v45 = vrot.slane %v8739_v44, 5  ;;  %v8760_v60 = vor.u32 %v8759_v54, %v8755_v37  ;;  %v9155_v10 = vrot.slane %v14319_v21, 5  ;;  %v14321_v31 = vld [vmem:[#allocation3 + $0x1c] sm:$0xf] }
 0x513   : > { %v8718_v6 = vsel %vm14637_vm7, %v8713_v41, %v8717_v61  ;;  %v8708_v11 = vsel %vm14637_vm7, %v8703_v27, %v8707_v13  ;;  %v8750_v62 = vor.u32 %v8749_v56, %v8746_v32  ;;  %v8763_v59 = vshll.u32 %v14320_v9, 16  ;;  %v14230_v32 = vld [vmem:[#allocation4 + $0x190] sm:$0xff]   ;;  %v18316_v56 = vld [vmem:[#allocation14_spill] sm:$0xff] }
 0x514   : > { %v8742_v38 = vsel %vm14637_vm7, %v8737_v16, %v8741_v45  ;;  %v11990_v7 = vcombine.low %v8708_v11, %v8718_v6  ;;  %v8732_v39 = vsel %vm14637_vm7, %v8727_v19, %v8731_v17  ;;  %v8761_v5 = vrot.slane %v8760_v60, 4  ;;  %v18318_v45 = vld [vmem:[#allocation19_spill] sm:$0xff]  ;;  %v18319_v6 = vld [vmem:[#allocation26_spill] sm:$0xff] }
 0x515   : > { %13291 = vmatmul.mubr.bf16.gmra.mrb[20].mxu1 %v11988_v42  ;;  %v11991_v28 = vcombine.low %v8732_v39, %v8742_v38  ;;  %v9157_v0 = vrot.slane %v9155_v10, 4  ;;  %v8751_v34 = vrot.slane %v8750_v62, 4  ;;  %v8765_v33 = vrot.slane %v8763_v59, 5  ;;  %v14232_v38 = vld [vmem:[#allocation4 + $0x1a0] sm:$0xff]   ;;  %v18325_v11 = vld [vmem:[#allocation10_spill] sm:$0xff] }
 0x516   : > { %13294 = vmatprep.mubr.bf16.mxu1 %v11989_v8  ;;  %v9158_v43 = vrot.slane %v17228_v51, 5  ;;  %v9162_v15 = vrot.slane %v14321_v31, 5  ;;  %v12001_v2 = vrot.slane %v9089_v50, 9  ;;  %v9090_v51 = vld [vmem:[#allocation3 + $0x18] sm:$0xe]  ;;  %v9165_v8 = vrot.slane %v17234_v49, 5 }
 0x517   : > { %v8766_v13 = vsel %vm14637_vm7, %v8761_v5, %v8765_v33  ;;  %v8756_v17 = vsel %vm14637_vm7, %v8751_v34, %v8755_v37  ;;  %v12002_v41 = vrot.slane %v9090_v51, 9  ;;  %v14229_v37 = vld [vmem:[#allocation4 + $0x188] sm:$0xff]   ;;  %v18315_v61 = vcombine.low %v17023_v57, %v17032_v58  ;;  %v14231_v49 = vld [vmem:[#allocation4 + $0x198] sm:$0xff]   ;;  %v18321_v58 = vld [vmem:[#allocation27_spill] sm:$0xff] }
 0x518   : > { %v9159_v42 = vsel %vm15052_vm13, %v9157_v0, %v9158_v43  ;;  %v11992_v20 = vcombine.low %v8756_v17, %v8766_v13  ;;  %v9156_v36 = vsel %vm15052_vm13, %v12001_v2, %v9155_v10  ;;  %v9164_v44 = vrot.slane %v9162_v15, 4  ;;  %v14233_v57 = vld [vmem:[#allocation4 + $0x1a8] sm:$0xff]   ;;  %v18324_v10 = vld [vmem:[#allocation23_spill] sm:$0xff]  ;;  %v14235_v9 = vld [vmem:[#allocation4 + $0x1b8] sm:$0xff]  }
 0x519   : > { %v12017_v52 = vcombine.low %v9156_v36, %v9159_v42  ;;  %v9163_v16 = vsel %vm15052_vm13, %v12002_v41, %v9162_v15  ;;  %v18317_v19 = vcombine.low %v17046_v46, %v18316_v56  ;;  %v18320_v60 = vcombine.low %v18318_v45, %v18319_v6  ;;  %v14234_v46 = vld [vmem:[#allocation4 + $0x1b0] sm:$0xff]   ;;  %v18327_v59 = vld [vmem:[#allocation11_spill] sm:$0xff]  ;;  %v18333_v33 = vld [vmem:[#allocation16_spill] sm:$0xff] }
 0x51a   : > { %v9166_v54 = vsel %vm15052_vm13, %v9164_v44, %v9165_v8  ;;  %v18326_v62 = vcombine.low %v18324_v10, %v18325_v11  ;;  %v18331_v5 = vld [vmem:[#allocation15_spill] sm:$0xff]  ;;  %v18334_v50 = vld [vmem:[#allocation17_spill] sm:$0xff]  ;;  %v18336_v13 = vld [vmem:[#allocation18_spill] sm:$0xff] }
 0x51b   : > { %v12018_v27 = vcombine.low %v9163_v16, %v9166_v54  ;;  %v14238_v34 = vld [vmem:[#allocation4 + $0x1c0] sm:$0xff]   ;;  %v18335_v43 = vcombine.low %v18333_v33, %v18334_v50  ;;  %v18337_v31 = vld [vmem:[#allocation20_spill] sm:$0xff]  ;;  %v18339_v2 = vld [vmem:[#allocation21_spill] sm:$0xff] }
 0x51c   : > { %v18338_v15 = vcombine.low %v18336_v13, %v18337_v31  ;;  %v18340_v42 = vld [vmem:[#allocation25_spill] sm:$0xff]  ;;  %v18343_v36 = vld [vmem:[#allocation28_spill] sm:$0xff]  ;;  %v18346_v51 = vld [vmem:[#allocation30_spill] sm:$0xff] }
 0x51d   : > { %13295 = vmatmul.mubr.bf16.gmra.mrb[24].mxu1 %v11990_v7  ;;  %v18328_v7 = vld [vmem:[#allocation13_spill] sm:$0xff]  ;;  %v18341_v17 = vcombine.low %v18339_v2, %v18340_v42  ;;  %v18348_v41 = vld [vmem:[#allocation31_spill] sm:$0xff]  ;;  %v18349_v54 = vld [vmem:[#allocation8_spill] sm:$0xff] }
 0x51e   : > { %13298 = vmatprep.mubr.bf16.mxu1 %v11991_v28  ;;  %v18329_v39 = vcombine.low %v18327_v59, %v18328_v7  ;;  %v18330_v28 = vld [vmem:[#allocation12_spill] sm:$0xff]  ;;  %v18345_v44 = vld [vmem:[#allocation29_spill] sm:$0xff]  ;;  %v18350_v16 = vcombine.low %v18348_v41, %v18349_v54  ;;  %v17697_v59 = vld [vmem:[#allocation4 + $0x200] sm:$0xff]  }
 0x51f   : > { %v18332_v0 = vcombine.low %v18330_v28, %v18331_v5  ;;  %v18347_v8 = vcombine.low %v18345_v44, %v18346_v51  ;;  %v14241_v56 = vld [vmem:[#allocation4 + $0x1c8] sm:$0xff]   ;;  %v14244_v45 = vld [vmem:[#allocation4 + $0x1d0] sm:$0xff]   ;;  %v14251_v33 = vld [vmem:[#allocation3 + $0x90] sm:$0xff]  }
 0x520   : > { %v14240_v6 = vld [vmem:[#allocation3 + $0x3c] sm:$0xff]   ;;  %v14256_v10 = vld [vmem:[#allocation4 + $0x1f0] sm:$0xff]   ;;  %v9977_v13 = vld [vmem:[#allocation3 + $0x24] sm:$0xf] }
 0x521   : > { %v14246_v11 = vld [vmem:[#allocation3 + $0x6c] sm:$0xff]   ;;  %v18354_v7 = vld [vmem:[#allocation32_spill] sm:$0xff]  ;;  %v10047_v2 = vshrl.u32 %v9977_v13, 16 }
 0x522   : > { %v10036_v28 = vshrl.u32 %v18354_v7, 16  ;;  %v9980_v44 = vld [vmem:[#allocation3 + $0x30] sm:$0xf]  ;;  %v14252_v54 = vld [vmem:[#allocation3 + $0x9c] sm:$0xff]  }
 0x525   : > { %13299 = vmatmul.mubr.bf16.gmra.mrb[28].mxu1 %v11992_v20  ;;  %v18342_v20 = vld [vmem:[#allocation24_spill] sm:$0xff] }
 0x526   : > { %13318 = vmatprep.mubr.bf16.mxu1 %v12017_v52  ;;  %v18344_v52 = vcombine.low %v18342_v20, %v18343_v36  ;;  %v18355_v20 = vld [vmem:[#allocation34_spill] sm:$0xff] }
 0x527   : > { %v10056_v36 = vshll.u32 %v18355_v20, 16 }
 0x52d   : > { %13319 = vmatmul.mubr.bf16.vlgmr.msra.gmra.mrb[0].mxu1 %v12018_v27  ;;  %v14236_v27 = vld [vmem:[#allocation3 + $0x18] sm:$0xff]  }
 0x52e   : > { %13322 = vmatprep.mubr.bf16.mxu1 %v18315_v61  ;;  %13351 = vmatpush3.bf16.msra.mxu1 %v17610_v1  ;;  %v18322_v1 = vld [vmem:[#allocation22_spill] sm:$0xff]  ;;  %v18352_v61 = vld [vmem:[#allocation9_spill] sm:$0xff] }
 0x52f   : > { %13352 = vmatprep.subr.bf16.mxu1 %v14229_v37  ;;  %v18323_v21 = vcombine.low %v18321_v58, %v18322_v1  ;;  %v14243_v58 = vld [vmem:[#allocation3 + $0x54] sm:$0xff]   ;;  %v14253_v1 = vld [vmem:[#allocation4 + $0x1e8] sm:$0xff]  }
 0x532   : > { %13353 = vmatpush3.bf16.msra.mxu1 %v14229_v37  ;;  %v18351_v37 = vld [vmem:[#allocation7_spill] sm:$0xff] }
 0x533   : > { %13354 = vmatprep.subr.bf16.mxu1 %v14230_v32 }
 0x535   : > { %13323 = vmatmul.mubr.bf16.gmra.mrb[4].mxu1 %v18317_v19  ;;  %v14239_v19 = vld [vmem:[#allocation3 + $0x30] sm:$0xff]  }
 0x536   : > { %13326 = vmatprep.mubr.bf16.mxu1 %v18320_v60  ;;  %13355 = vmatpush3.bf16.msra.mxu1 %v14230_v32  ;;  %v18353_v32 = vcombine.low %v18351_v37, %v18352_v61  ;;  %v14247_v60 = vld [vmem:[#allocation4 + $0x1d8] sm:$0xff]  }
 0x537   : > { %13356 = vmatprep.subr.bf16.mxu1 %v14231_v49 }
 0x53a   : > { %13357 = vmatpush3.bf16.msra.mxu1 %v14231_v49  ;;  %v14237_v49 = vld [vmem:[#allocation3 + $0x24] sm:$0xff]  }
 0x53b   : > { %13358 = vmatprep.subr.bf16.mxu1 %v14232_v38 }
 0x53d   : > { %13327 = vmatmul.mubr.bf16.gmra.mrb[8].mxu1 %v18323_v21  ;;  %v14245_v21 = vld [vmem:[#allocation3 + $0x60] sm:$0xff]  }
 0x53e   : > { %13330 = vmatprep.mubr.bf16.mxu1 %v18326_v62  ;;  %13359 = vmatpush3.bf16.msra.mxu1 %v14232_v38  ;;  %v14242_v38 = vld [vmem:[#allocation3 + $0x48] sm:$0xff]   ;;  %v14259_v62 = vld [vmem:[#allocation4 + $0x1f8] sm:$0xff]  }
 0x53f   : > { %13360 = vmatprep.subr.bf16.mxu1 %v14233_v57 }
 0x542   : > { %13361 = vmatpush3.bf16.msra.mxu1 %v14233_v57  ;;  %v14250_v57 = vld [vmem:[#allocation4 + $0x1e0] sm:$0xff]  }
 0x543   : > { %13362 = vmatprep.subr.bf16.mxu1 %v14234_v46 }
 0x545   : > { %13331 = vmatmul.mubr.bf16.gmra.mrb[12].mxu1 %v18329_v39  ;;  %v10032_v39 = vshll.u32 %v18354_v7, 16 }
 0x546   : > { %13334 = vmatprep.mubr.bf16.mxu1 %v18332_v0  ;;  %13363 = vmatpush3.bf16.msra.mxu1 %v14234_v46  ;;  %v14248_v46 = vld [vmem:[#allocation3 + $0x78] sm:$0xff]  }
 0x547   : > { %13364 = vmatprep.subr.bf16.mxu1 %v14235_v9  ;;  %v10034_v50 = vrot.slane %v10032_v39, 5 }
 0x54a   : > { %13365 = vmatpush3.bf16.msra.mxu1 %v14235_v9  ;;  %v9974_v9 = vld [vmem:[#allocation3 + $0x18] sm:$0xf] }
 0x54b   : > { %13398 = vmatprep.subr.bf16.mxu1 %v14238_v34  ;;  %v10023_v5 = vshrl.u32 %v9974_v9, 16  ;;  %v10026_v0 = vshll.u32 %v9974_v9, 16 }
 0x54d   : > { %13335 = vmatmul.mubr.bf16.gmra.mrb[16].mxu1 %v18335_v43  ;;  %v10038_v43 = vrot.slane %v10036_v28, 4  ;;  %v10025_v31 = vrot.slane %v10023_v5, 4 }
 0x54e   : > { %13338 = vmatprep.mubr.bf16.mxu1 %v18338_v15  ;;  %v10028_v15 = vrot.slane %v10026_v0, 5  ;;  %v14255_v0 = vld [vmem:[#allocation3 + $0xb4] sm:$0xff]  }
 0x54f   : > { %v10039_v42 = vor.u32 %v10038_v43, %v10034_v50 }
 0x550   : > { %v10029_v51 = vor.u32 %v10028_v15, %v10025_v31  ;;  %v14257_v31 = vld [vmem:[#allocation3 + $0xc0] sm:$0xff]  }
 0x551   : > { %v10040_v37 = vrot.slane %v10039_v42, 4 }
 0x555   : > { %13339 = vmatmul.mubr.bf16.gmra.mrb[20].mxu1 %v18341_v17  ;;  %v10050_v17 = vshll.u32 %v9977_v13, 16  ;;  %v9986_v13 = vld [vmem:[#allocation3 + $0x48] sm:$0xf] }
 0x556   : > { %13342 = vmatprep.mubr.bf16.mxu1 %v18344_v52  ;;  %v10060_v52 = vshrl.u32 %v18355_v20, 16 }
 0x557   : > { %v10052_v61 = vrot.slane %v10050_v17, 5  ;;  %v18360_v17 = vld [vmem:[#allocation38_spill] sm:$0xff] }
 0x558   : > { %v10104_v20 = vshll.u32 %v18360_v17, 16 }
 0x55d   : > { %13343 = vmatmul.mubr.bf16.gmra.mrb[24].mxu1 %v18347_v8  ;;  %v18356_v8 = vld [vmem:[#allocation33_spill] sm:$0xff] }
 0x55e   : > { %13346 = vmatprep.mubr.bf16.mxu1 %v18350_v16  ;;  %v10042_v41 = vshll.u32 %v18356_v8, 16  ;;  %v10049_v16 = vrot.slane %v10047_v2, 4  ;;  %v18359_v2 = vld [vmem:[#allocation37_spill] sm:$0xff]  ;;  %v17722_v8 = vld [vmem:[#allocation3 + $0xd0] sm:$0xf] }
 0x55f   : > { %v10090_v42 = vshll.u32 %v18359_v2, 16 }
 0x565   : > { %13347 = vmatmul.mubr.bf16.gmra.mrb[28].mxu1 %v18353_v32  ;;  %v17705_v32 = vrot.slane %v10056_v36, 5  ;;  %v10108_v36 = vshrl.u32 %v18360_v17, 16 }
 0x566   : > { %13366 = vmatprep.mubr.bf16.mxu1 %v14236_v27  ;;  %v14254_v27 = vld [vmem:[#allocation3 + $0xa8] sm:$0xff]  }
 0x56d   : > { %13367 = vmatmul.mubr.bf16.vlgmr.msra.gmra.mrb[0].mxu1 %v14237_v49  ;;  %v10071_v49 = vshrl.u32 %v9980_v44, 16 }
 0x56e   : > { %13370 = vmatprep.mubr.bf16.mxu1 %v14239_v19  ;;  %13399 = vmatpush3.bf16.msra.mxu1 %v14238_v34  ;;  %v14249_v34 = vld [vmem:[#allocation3 + $0x84] sm:$0xff]   ;;  %v10074_v19 = vshll.u32 %v9980_v44, 16 }
 0x56f   : > { %13400 = vmatprep.subr.bf16.mxu1 %v14241_v56 }
 0x570   : > { %v10076_v9 = vrot.slane %v10074_v19, 5  ;;  %v18361_v19 = vld [vmem:[#allocation42_spill] sm:$0xff] }
 0x572   : > { %13401 = vmatpush3.bf16.msra.mxu1 %v14241_v56  ;;  %v10062_v56 = vrot.slane %v10060_v52, 4 }
 0x573   : > { %13402 = vmatprep.subr.bf16.mxu1 %v14244_v45 }
 0x575   : > { %13371 = vmatmul.mubr.bf16.gmra.mrb[4].mxu1 %v14240_v6 }
 0x576   : > { %13374 = vmatprep.mubr.bf16.mxu1 %v14242_v38  ;;  %13403 = vmatpush3.bf16.msra.mxu1 %v14244_v45  ;;  %v18357_v45 = vld [vmem:[#allocation35_spill] sm:$0xff]  ;;  %v10030_v38 = vrot.slane %v10029_v51, 4 }
 0x577   : > { %13404 = vmatprep.subr.bf16.mxu1 %v14247_v60  ;;  %v10080_v6 = vshll.u32 %v18357_v45, 16 }
 0x578   : > { %v10035_v28 = vsel %vm14637_vm7, %v10030_v38, %v10034_v50  ;;  %v10128_v50 = vshll.u32 %v17375_v24, 16  ;;  %v17731_v38 = vrot.slane %v10104_v20, 5  ;;  %v18362_v20 = vld [vmem:[#allocation39_spill] sm:$0xff] }
 0x579   : > { %v17713_v7 = vrot.slane %v10080_v6, 5  ;;  %v10156_v6 = vshrl.u32 %v18361_v19, 16 }
 0x57a   : > { %13405 = vmatpush3.bf16.msra.mxu1 %v14247_v60  ;;  %v10084_v60 = vshrl.u32 %v18357_v45, 16  ;;  %v10152_v45 = vshll.u32 %v18361_v19, 16  ;;  %v14322_v19 = vld [vmem:[#allocation3 + $0x50] sm:$0x1] }
 0x57b   : > { %13406 = vmatprep.subr.bf16.mxu1 %v14250_v57 }
 0x57c   : > { %v10086_v39 = vrot.slane %v10084_v60, 4 }
 0x57d   : > { %13375 = vmatmul.mubr.bf16.gmra.mrb[8].mxu1 %v14243_v58  ;;  %v18358_v58 = vld [vmem:[#allocation36_spill] sm:$0xff] }
 0x57e   : > { %13378 = vmatprep.mubr.bf16.mxu1 %v14245_v21  ;;  %13407 = vmatpush3.bf16.msra.mxu1 %v14250_v57  ;;  %v10044_v57 = vrot.slane %v10042_v41, 5  ;;  %v9983_v21 = vld [vmem:[#allocation3 + $0x3c] sm:$0xf]  ;;  %v10087_v51 = vor.u32 %v10086_v39, %v17713_v7  ;;  %v17724_v41 = vld [vmem:[#allocation3 + $0xd4] sm:$0x1] }
 0x57f   : > { %13408 = vmatprep.subr.bf16.mxu1 %v14253_v1  ;;  %v10095_v5 = vshrl.u32 %v9983_v21, 16  ;;  %v10098_v43 = vshll.u32 %v9983_v21, 16  ;;  %v14258_v21 = vld [vmem:[#allocation3 + $0xcc] sm:$0xff]  }
 0x582   : > { %13409 = vmatpush3.bf16.msra.mxu1 %v14253_v1  ;;  %v10066_v1 = vshll.u32 %v18358_v58, 16  ;;  %v10119_v58 = vshrl.u32 %v9986_v13, 16 }
 0x583   : > { %13410 = vmatprep.subr.bf16.mxu1 %v14256_v10 }
 0x585   : > { %13379 = vmatmul.mubr.bf16.gmra.mrb[12].mxu1 %v14246_v11  ;;  %v10053_v11 = vor.u32 %v10052_v61, %v10049_v16  ;;  %v10132_v16 = vshrl.u32 %v17375_v24, 16  ;;  %v10902_v61 = vrot.slane %v17724_v41, 5  ;;  %v10122_v24 = vshll.u32 %v9986_v13, 16 }
 0x586   : > { %13382 = vmatprep.mubr.bf16.mxu1 %v14248_v46  ;;  %13411 = vmatpush3.bf16.msra.mxu1 %v14256_v10  ;;  %v10045_v10 = vsel %vm14637_vm7, %v10040_v37, %v10044_v57  ;;  %v10063_v46 = vor.u32 %v10062_v56, %v17705_v32  ;;  %v10899_v37 = vrot.slane %v17722_v8, 5  ;;  %v9989_v56 = vld [vmem:[#allocation3 + $0x54] sm:$0xf]  ;;  %v10110_v57 = vrot.slane %v10108_v36, 4 }
 0x587   : > { %13412 = vmatprep.subr.bf16.mxu1 %v14259_v62  ;;  %v10054_v15 = vrot.slane %v10053_v11, 4  ;;  %v17733_v11 = vrot.slane %v10128_v50, 5  ;;  %v10146_v39 = vshll.u32 %v9989_v56, 16  ;;  %v10114_v36 = vshll.u32 %v18362_v20, 16 }
 0x588   : > { %v10064_v52 = vrot.slane %v10063_v46, 4  ;;  %v10134_v46 = vrot.slane %v10132_v16, 4  ;;  %v10111_v50 = vor.u32 %v10110_v57, %v17731_v38  ;;  %v10121_v16 = vrot.slane %v10119_v58, 4 }
 0x589   : > { %v10116_v58 = vrot.slane %v10114_v36, 5 }
 0x58a   : > { %13413 = vmatpush3.bf16.msra.mxu1 %v14259_v62  ;;  %v10073_v62 = vrot.slane %v10071_v49, 4  ;;  %v10100_v49 = vrot.slane %v10098_v43, 5  ;;  %v10158_v43 = vrot.slane %v10156_v6, 4 }
 0x58b   : > { %13446 = vmatprep.subr.bf16.mxu1 %v17697_v59 }
 0x58c   : > { %v10077_v44 = vor.u32 %v10076_v9, %v10073_v62  ;;  %v10143_v9 = vshrl.u32 %v9989_v56, 16 }
 0x58d   : > { %13383 = vmatmul.mubr.bf16.gmra.mrb[16].mxu1 %v14249_v34  ;;  %v12065_v34 = vcombine.low %v10035_v28, %v10045_v10  ;;  %v10088_v10 = vrot.slane %v10087_v51, 4 }
 0x58e   : > { %13386 = vmatprep.mubr.bf16.mxu1 %v14251_v33  ;;  %v10068_v33 = vrot.slane %v10066_v1, 5  ;;  %v10901_v1 = vrot.slane %v10899_v37, 4  ;;  %v10078_v17 = vrot.slane %v10077_v44, 4  ;;  %v10170_v44 = vshll.u32 %v9992_v63, 16 }
 0x590   : > { %v17741_v28 = vsel %vm15052_vm13, %v10901_v1, %v10902_v61  ;;  %v10069_v2 = vsel %vm14637_vm7, %v10064_v52, %v10068_v33  ;;  %v10167_v52 = vshrl.u32 %v9992_v63, 16  ;;  %v10083_v56 = vsel %vm14637_vm7, %v10078_v17, %v17713_v7  ;;  %v14324_v1 = vld [vmem:[#allocation3 + $0x5c] sm:$0x1] }
 0x595   : > { %13387 = vmatmul.mubr.bf16.gmra.mrb[20].mxu1 %v14252_v54  ;;  %v10097_v54 = vrot.slane %v10095_v5, 4  ;;  %v10092_v5 = vrot.slane %v10090_v42, 5 }
 0x596   : > { %13390 = vmatprep.mubr.bf16.mxu1 %v14254_v27  ;;  %v10743_v27 = vld [vmem:[#allocation3 + $0xcc] sm:$0xe] }
 0x597   : > { %v12104_v60 = vrot.slane %v10743_v27, 9  ;;  %v10093_v42 = vsel %vm14637_vm7, %v10088_v10, %v10092_v5  ;;  %v10101_v51 = vor.u32 %v10100_v49, %v10097_v54  ;;  %v10124_v27 = vrot.slane %v10122_v24, 5  ;;  %v14323_v49 = vld [vmem:[#allocation3 + $0x64] sm:$0xf] }
 0x598   : > { %v10138_v54 = vshll.u32 %v14322_v19, 16  ;;  %v10180_v6 = vshrl.u32 %v14323_v49, 16  ;;  %v10112_v10 = vrot.slane %v10111_v50, 4 }
 0x599   : > { %v17737_v62 = vsel %vm15052_vm13, %v12104_v60, %v10899_v37  ;;  %v10135_v37 = vor.u32 %v10134_v46, %v17733_v11  ;;  %v12067_v60 = vcombine.low %v10083_v56, %v10093_v42  ;;  %v10102_v57 = vrot.slane %v10101_v51, 4  ;;  %v14325_v51 = vld [vmem:[#allocation3 + $0x70] sm:$0xf] }
 0x59a   : > { %v12120_v13 = vcombine.low %v17737_v62, %v17741_v28  ;;  %v10125_v24 = vor.u32 %v10124_v27, %v10121_v16  ;;  %v10182_v20 = vrot.slane %v10180_v6, 4  ;;  %v10200_v50 = vshll.u32 %v14325_v51, 16  ;;  %v9998_v27 = vld [vmem:[#allocation3 + $0x78] sm:$0xf] }
 0x59b   : > { %v10136_v46 = vrot.slane %v10135_v37, 4  ;;  %v10107_v36 = vsel %vm14637_vm7, %v10102_v57, %v17731_v38  ;;  %v10204_v16 = vshrl.u32 %v14325_v51, 16  ;;  %v10117_v37 = vsel %vm14637_vm7, %v10112_v10, %v10116_v58 }
 0x59c   : > { %v17774_v6 = vrot.slane %v10200_v50, 5 }
 0x59d   : > { %13391 = vmatmul.mubr.bf16.gmra.mrb[24].mxu1 %v14255_v0  ;;  %v17743_v0 = vrot.slane %v10152_v45, 5  ;;  %v10176_v45 = vshll.u32 %v14323_v49, 16  ;;  %v10215_v49 = vshrl.u32 %v9998_v27, 16 }
 0x59e   : > { %13394 = vmatprep.mubr.bf16.mxu1 %v14257_v31  ;;  %v10059_v31 = vsel %vm14637_vm7, %v10054_v15, %v17705_v32  ;;  %v10145_v32 = vrot.slane %v10143_v9, 4  ;;  %v10148_v15 = vrot.slane %v10146_v39, 5  ;;  %v14261_v39 = vld [vmem:[#allocation4 + $0x208] sm:$0xff]  }
 0x59f   : > { %v12066_v61 = vcombine.low %v10059_v31, %v10069_v2  ;;  %v10159_v33 = vor.u32 %v10158_v43, %v17743_v0  ;;  %v10169_v43 = vrot.slane %v10167_v52, 4  ;;  %v10172_v31 = vrot.slane %v10170_v44, 5  ;;  %v14326_v44 = vld [vmem:[#allocation3 + $0x68] sm:$0x1] }
 0x5a0   : > { %v10149_v9 = vor.u32 %v10148_v15, %v10145_v32  ;;  %v10140_v2 = vrot.slane %v10138_v54, 5  ;;  %v17761_v17 = vrot.slane %v10176_v45, 5  ;;  %v10126_v32 = vrot.slane %v10125_v24, 4 }
 0x5a1   : > { %v10160_v5 = vrot.slane %v10159_v33, 4  ;;  %v14262_v33 = vld [vmem:[#allocation4 + $0x210] sm:$0xff]   ;;  %v10173_v52 = vor.u32 %v10172_v31, %v10169_v43  ;;  %v10186_v56 = vshll.u32 %v14326_v44, 16  ;;  %v10218_v45 = vshll.u32 %v9998_v27, 16  ;;  %v14263_v43 = vld [vmem:[#allocation4 + $0x218] sm:$0xff]  }
 0x5a2   : > { %v10141_v15 = vsel %vm14637_vm7, %v10136_v46, %v10140_v2  ;;  %v10183_v54 = vor.u32 %v10182_v20, %v17761_v17  ;;  %v10001_v31 = vld [vmem:[#allocation3 + $0x84] sm:$0xf]  ;;  %v14328_v2 = vld [vmem:[#allocation3 + $0x74] sm:$0x1]  ;;  %v14329_v27 = vld [vmem:[#allocation3 + $0x88] sm:$0xf] }
 0x5a3   : > { %v10210_v20 = vshll.u32 %v14328_v2, 16  ;;  %v10239_v50 = vshrl.u32 %v10001_v31, 16  ;;  %v14265_v2 = vld [vmem:[#allocation4 + $0x228] sm:$0xff]  }
 0x5a5   : > { %13395 = vmatmul.mubr.bf16.gmra.mrb[28].mxu1 %v14258_v21  ;;  %v10162_v21 = vshll.u32 %v14324_v1, 16  ;;  %v12068_v1 = vcombine.low %v10107_v36, %v10117_v37  ;;  %v10220_v36 = vrot.slane %v10218_v45, 5  ;;  %v10248_v37 = vshll.u32 %v14329_v27, 16 }
 0x5a6   : > { %13414 = vmatprep.mubr.bf16.mxu1 %v12065_v34  ;;  %v9995_v34 = vld [vmem:[#allocation3 + $0x6c] sm:$0xf] }
 0x5a7   : > { %v10191_v7 = vshrl.u32 %v9995_v34, 16  ;;  %v10194_v63 = vshll.u32 %v9995_v34, 16  ;;  %v10164_v42 = vrot.slane %v10162_v21, 5  ;;  %v10206_v34 = vrot.slane %v10204_v16, 4 }
 0x5a8   : > { %v10131_v21 = vsel %vm14637_vm7, %v10126_v32, %v17733_v11  ;;  %v10184_v11 = vrot.slane %v10183_v54, 4  ;;  %v10242_v16 = vshll.u32 %v10001_v31, 16  ;;  %v10252_v32 = vshrl.u32 %v14329_v27, 16 }
 0x5a9   : > { %v10165_v38 = vsel %vm14637_vm7, %v10160_v5, %v10164_v42  ;;  %v10193_v19 = vrot.slane %v10191_v7, 4  ;;  %v12069_v24 = vcombine.low %v10131_v21, %v10141_v15  ;;  %v10188_v5 = vrot.slane %v10186_v56, 5  ;;  %v10004_v42 = vld [vmem:[#allocation3 + $0x90] sm:$0xf]  ;;  %v14264_v15 = vld [vmem:[#allocation4 + $0x220] sm:$0xff]  }
 0x5aa   : > { %v17791_v21 = vrot.slane %v10248_v37, 5 }
 0x5ad   : > { %13415 = vmatmul.mubr.bf16.vlgmr.msra.gmra.mrb[0].mxu1 %v12066_v61  ;;  %v10150_v61 = vrot.slane %v10149_v9, 4  ;;  %v10174_v9 = vrot.slane %v10173_v52, 4  ;;  %v14330_v52 = vld [vmem:[#allocation3 + $0x94] sm:$0xf] }
 0x5ae   : > { %13418 = vmatprep.mubr.bf16.mxu1 %v12067_v60  ;;  %13447 = vmatpush3.bf16.msra.mxu1 %v17697_v59  ;;  %v10196_v59 = vrot.slane %v10194_v63, 5  ;;  %v14327_v60 = vld [vmem:[#allocation3 + $0x7c] sm:$0xf]  ;;  %v10217_v63 = vrot.slane %v10215_v49, 4  ;;  %v10272_v44 = vshll.u32 %v14330_v52, 16  ;;  %v10276_v56 = vshrl.u32 %v14330_v52, 16 }
 0x5af   : > { %13448 = vmatprep.subr.bf16.mxu1 %v14261_v39  ;;  %v10224_v57 = vshll.u32 %v14327_v60, 16  ;;  %v10228_v58 = vshrl.u32 %v14327_v60, 16  ;;  %v10155_v10 = vsel %vm14637_vm7, %v10150_v61, %v17743_v0  ;;  %v10263_v61 = vshrl.u32 %v10004_v42, 16  ;;  %v14331_v60 = vld [vmem:[#allocation3 + $0x80] sm:$0x1] }
 0x5b0   : > { %v12070_v46 = vcombine.low %v10155_v10, %v10165_v38  ;;  %v10197_v7 = vor.u32 %v10196_v59, %v10193_v19  ;;  %v10266_v38 = vshll.u32 %v10004_v42, 16  ;;  %v10179_v19 = vsel %vm14637_vm7, %v10174_v9, %v17761_v17 }
 0x5b1   : > { %v17783_v51 = vrot.slane %v10224_v57, 5  ;;  %v10230_v0 = vrot.slane %v10228_v58, 4  ;;  %v10212_v59 = vrot.slane %v10210_v20, 5  ;;  %v10221_v49 = vor.u32 %v10220_v36, %v10217_v63 }
 0x5b2   : > { %13449 = vmatpush3.bf16.msra.mxu1 %v14261_v39  ;;  %v10207_v39 = vor.u32 %v10206_v34, %v17774_v6  ;;  %v10198_v54 = vrot.slane %v10197_v7, 4  ;;  %v10234_v57 = vshll.u32 %v14331_v60, 16  ;;  %v10241_v58 = vrot.slane %v10239_v50, 4 }
 0x5b3   : > { %13450 = vmatprep.subr.bf16.mxu1 %v14262_v33  ;;  %v10231_v34 = vor.u32 %v10230_v0, %v17783_v51  ;;  %v10254_v10 = vrot.slane %v10252_v32, 4  ;;  %v10265_v17 = vrot.slane %v10263_v61, 4  ;;  %v10268_v9 = vrot.slane %v10266_v38, 5  ;;  %v14266_v32 = vld [vmem:[#allocation4 + $0x230] sm:$0xff]   ;;  %v14333_v38 = vld [vmem:[#allocation3 + $0xa0] sm:$0xf] }
 0x5b4   : > { %v10208_v45 = vrot.slane %v10207_v39, 4  ;;  %v17793_v31 = vrot.slane %v10272_v44, 5  ;;  %v10278_v7 = vrot.slane %v10276_v56, 4  ;;  %v10222_v20 = vrot.slane %v10221_v49, 4  ;;  %v10010_v56 = vld [vmem:[#allocation3 + $0xa8] sm:$0xf] }
 0x5b5   : > { %13419 = vmatmul.mubr.bf16.gmra.mrb[4].mxu1 %v12068_v1  ;;  %v10244_v1 = vrot.slane %v10242_v16, 5  ;;  %v10232_v36 = vrot.slane %v10231_v34, 4  ;;  %v10236_v50 = vrot.slane %v10234_v57, 5  ;;  %v14332_v16 = vld [vmem:[#allocation3 + $0x8c] sm:$0x1]  ;;  %v10269_v37 = vor.u32 %v10268_v9, %v10265_v17 }
 0x5b6   : > { %13422 = vmatprep.mubr.bf16.mxu1 %v12069_v24  ;;  %13451 = vmatpush3.bf16.msra.mxu1 %v14262_v33  ;;  %v10189_v33 = vsel %vm14637_vm7, %v10184_v11, %v10188_v5  ;;  %v10007_v24 = vld [vmem:[#allocation3 + $0x9c] sm:$0xf]  ;;  %v10213_v63 = vsel %vm14637_vm7, %v10208_v45, %v10212_v59  ;;  %v10255_v11 = vor.u32 %v10254_v10, %v17791_v21  ;;  %v10258_v27 = vshll.u32 %v14332_v16, 16  ;;  %v14335_v59 = vld [vmem:[#allocation3 + $0xac] sm:$0xf] }
 0x5b7   : > { %13452 = vmatprep.subr.bf16.mxu1 %v14263_v43  ;;  %v12071_v5 = vcombine.low %v10179_v19, %v10189_v33  ;;  %v10245_v42 = vor.u32 %v10244_v1, %v10241_v58  ;;  %v10287_v39 = vshrl.u32 %v10007_v24, 16  ;;  %v10290_v0 = vshll.u32 %v10007_v24, 16  ;;  %v14334_v19 = vld [vmem:[#allocation3 + $0x98] sm:$0x1]  ;;  %v14267_v24 = vld [vmem:[#allocation4 + $0x238] sm:$0xff]  }
 0x5b8   : > { %v10227_v61 = vsel %vm14637_vm7, %v10222_v20, %v17783_v51  ;;  %v10296_v52 = vshll.u32 %v14333_v38, 16  ;;  %v10300_v44 = vshrl.u32 %v14333_v38, 16  ;;  %v10320_v49 = vshll.u32 %v14335_v59, 16 }
 0x5b9   : > { %v10324_v33 = vshrl.u32 %v14335_v59, 16  ;;  %v10246_v45 = vrot.slane %v10245_v42, 4  ;;  %v10256_v34 = vrot.slane %v10255_v11, 4  ;;  %v10289_v60 = vrot.slane %v10287_v39, 4  ;;  %v14336_v39 = vld [vmem:[#allocation3 + $0xa4] sm:$0x1] }
 0x5ba   : > { %13453 = vmatpush3.bf16.msra.mxu1 %v14263_v43  ;;  %v10203_v43 = vsel %vm14637_vm7, %v10198_v54, %v17774_v6  ;;  %v10282_v54 = vshll.u32 %v14334_v19, 16  ;;  %v10292_v57 = vrot.slane %v10290_v0, 5  ;;  %v10270_v58 = vrot.slane %v10269_v37, 4 }
 0x5bb   : > { %13454 = vmatprep.subr.bf16.mxu1 %v14264_v15  ;;  %v12072_v6 = vcombine.low %v10203_v43, %v10213_v63  ;;  %v10311_v51 = vshrl.u32 %v10010_v56, 16  ;;  %v10314_v10 = vshll.u32 %v10010_v56, 16  ;;  %v10260_v9 = vrot.slane %v10258_v27, 5  ;;  %v14338_v56 = vld [vmem:[#allocation3 + $0xc4] sm:$0xf] }
 0x5bc   : > { %v10284_v20 = vrot.slane %v10282_v54, 5  ;;  %v17809_v43 = vrot.slane %v10320_v49, 5  ;;  %v10326_v63 = vrot.slane %v10324_v33, 4  ;;  %v10293_v11 = vor.u32 %v10292_v57, %v10289_v60 }
 0x5bd   : > { %13423 = vmatmul.mubr.bf16.gmra.mrb[8].mxu1 %v12070_v46  ;;  %v10279_v46 = vor.u32 %v10278_v7, %v17793_v31  ;;  %v17807_v7 = vrot.slane %v10296_v52, 5  ;;  %v10261_v42 = vsel %vm14637_vm7, %v10256_v34, %v10260_v9  ;;  %v10306_v0 = vshll.u32 %v14336_v39, 16  ;;  %v10016_v52 = vld [vmem:[#allocation3 + $0xc0] sm:$0xf] }
 0x5be   : > { %13426 = vmatprep.mubr.bf16.mxu1 %v12071_v5  ;;  %13455 = vmatpush3.bf16.msra.mxu1 %v14264_v15  ;;  %v10237_v15 = vsel %vm14637_vm7, %v10232_v36, %v10236_v50  ;;  %v10302_v5 = vrot.slane %v10300_v44, 4  ;;  %v10013_v36 = vld [vmem:[#allocation3 + $0xb4] sm:$0xf]  ;;  %v10275_v50 = vsel %vm14637_vm7, %v10270_v58, %v17793_v31  ;;  %v10313_v27 = vrot.slane %v10311_v51, 4  ;;  %v10019_v58 = vld [vmem:[#allocation3 + $0xcc] sm:$0xf] }
 0x5bf   : > { %13456 = vmatprep.subr.bf16.mxu1 %v14265_v2  ;;  %v10280_v1 = vrot.slane %v10279_v46, 4  ;;  %v12073_v17 = vcombine.low %v10227_v61, %v10237_v15  ;;  %v10316_v37 = vrot.slane %v10314_v10, 5  ;;  %v10327_v44 = vor.u32 %v10326_v63, %v17809_v43 }
 0x5c0   : > { %v10303_v46 = vor.u32 %v10302_v5, %v17807_v7  ;;  %v10368_v15 = vshll.u32 %v14338_v56, 16  ;;  %v10372_v19 = vshrl.u32 %v14338_v56, 16  ;;  %v10294_v59 = vrot.slane %v10293_v11, 4 }
 0x5c1   : > { %v10285_v16 = vsel %vm14637_vm7, %v10280_v1, %v10284_v20  ;;  %v10308_v49 = vrot.slane %v10306_v0, 5  ;;  %v10317_v33 = vor.u32 %v10316_v37, %v10313_v27  ;;  %v10359_v60 = vshrl.u32 %v10016_v52, 16 }
 0x5c2   : > { %13457 = vmatpush3.bf16.msra.mxu1 %v14265_v2  ;;  %v10251_v2 = vsel %vm14637_vm7, %v10246_v45, %v17791_v21  ;;  %v10335_v21 = vshrl.u32 %v10013_v36, 16  ;;  %v12075_v54 = vcombine.low %v10275_v50, %v10285_v16  ;;  %v14339_v45 = vld [vmem:[#allocation3 + $0xb0] sm:$0x1]  ;;  %v10362_v57 = vshll.u32 %v10016_v52, 16 }
 0x5c3   : > { %13458 = vmatprep.subr.bf16.mxu1 %v14266_v32  ;;  %v12074_v31 = vcombine.low %v10251_v2, %v10261_v42  ;;  %v10330_v34 = vshll.u32 %v14339_v45, 16  ;;  %v10304_v1 = vrot.slane %v10303_v46, 4  ;;  %v10328_v9 = vrot.slane %v10327_v44, 4 }
 0x5c4   : > { %v10337_v51 = vrot.slane %v10335_v21, 4  ;;  %v10370_v20 = vrot.slane %v10368_v15, 5  ;;  %v10374_v63 = vrot.slane %v10372_v19, 4  ;;  %v10386_v2 = vshll.u32 %v10019_v58, 16  ;;  %v14341_v19 = vld [vmem:[#allocation3 + $0xc8] sm:$0x1] }
 0x5c5   : > { %13427 = vmatmul.mubr.bf16.gmra.mrb[12].mxu1 %v12072_v6  ;;  %v14337_v6 = vld [vmem:[#allocation3 + $0xb8] sm:$0xf]  ;;  %v10396_v42 = vshrl.u32 %v17722_v8, 16  ;;  %v10318_v11 = vrot.slane %v10317_v33, 4  ;;  %v10332_v39 = vrot.slane %v10330_v34, 5  ;;  %v10361_v0 = vrot.slane %v10359_v60, 4 }
 0x5c6   : > { %13430 = vmatprep.mubr.bf16.mxu1 %v12073_v17  ;;  %13459 = vmatpush3.bf16.msra.mxu1 %v14266_v32  ;;  %v10344_v61 = vshll.u32 %v14337_v6, 16  ;;  %v10348_v38 = vshrl.u32 %v14337_v6, 16  ;;  %v10338_v32 = vshll.u32 %v10013_v36, 16  ;;  %v10383_v36 = vshrl.u32 %v10019_v58, 16  ;;  %v14340_v6 = vld [vmem:[#allocation3 + $0xbc] sm:$0x1] }
 0x5c7   : > { %13460 = vmatprep.subr.bf16.mxu1 %v14267_v24  ;;  %v10364_v50 = vrot.slane %v10362_v57, 5  ;;  %v10299_v16 = vsel %vm14637_vm7, %v10294_v59, %v17807_v7  ;;  %v10309_v27 = vsel %vm14637_vm7, %v10304_v1, %v10308_v49  ;;  %v10333_v46 = vsel %vm14637_vm7, %v10328_v9, %v10332_v39  ;;  %v18363_v39 = vld [vmem:[#allocation40_spill] sm:$0xff] }
 0x5c8   : > { %v10346_v10 = vrot.slane %v10344_v61, 5  ;;  %v10350_v17 = vrot.slane %v10348_v38, 4  ;;  %v10340_v5 = vrot.slane %v10338_v32, 5  ;;  %v10354_v61 = vshll.u32 %v14340_v6, 16  ;;  %v18373_v6 = vld [vmem:[#allocation48_spill] sm:$0xff] }
 0x5c9   : > { %v10375_v38 = vor.u32 %v10374_v63, %v10370_v20  ;;  %v10388_v52 = vrot.slane %v10386_v2, 5  ;;  %v10398_v32 = vrot.slane %v10396_v42, 4  ;;  %v12076_v56 = vcombine.low %v10299_v16, %v10309_v27  ;;  %v18367_v16 = vld [vmem:[#allocation44_spill] sm:$0xff] }
 0x5ca   : > { %13461 = vmatpush3.bf16.msra.mxu1 %v14267_v24  ;;  %v10392_v24 = vshll.u32 %v17722_v8, 16  ;;  %v10351_v37 = vor.u32 %v10350_v17, %v10346_v10  ;;  %v10341_v21 = vor.u32 %v10340_v5, %v10337_v51  ;;  %v10385_v8 = vrot.slane %v10383_v36, 4 }
 0x5cb   : > { %v10323_v7 = vsel %vm14637_vm7, %v10318_v11, %v17809_v43  ;;  %v10365_v15 = vor.u32 %v10364_v50, %v10361_v0  ;;  %v10356_v49 = vrot.slane %v10354_v61, 5  ;;  %v10376_v33 = vrot.slane %v10375_v38, 4  ;;  %v18366_v50 = vld [vmem:[#allocation43_spill] sm:$0xff]  ;;  %v18376_v38 = vld [vmem:[#allocation50_spill] sm:$0xff] }
 0x5cc   : > { %v10394_v44 = vrot.slane %v10392_v24, 5  ;;  %v10352_v59 = vrot.slane %v10351_v37, 4  ;;  %v10342_v45 = vrot.slane %v10341_v21, 4  ;;  %v10389_v34 = vor.u32 %v10388_v52, %v10385_v8  ;;  %v18370_v37 = vld [vmem:[#allocation46_spill] sm:$0xff]  ;;  %v18372_v21 = vld [vmem:[#allocation47_spill] sm:$0xff] }
 0x5cd   : > { %13431 = vmatmul.mubr.bf16.gmra.mrb[16].mxu1 %v12074_v31  ;;  %v10378_v31 = vshll.u32 %v14341_v19, 16  ;;  %v10402_v57 = vshll.u32 %v17724_v41, 16  ;;  %v10366_v58 = vrot.slane %v10365_v15, 4  ;;  %v18368_v27 = vcombine.low %v18366_v50, %v18367_v16  ;;  %v18378_v52 = vld [vmem:[#allocation51_spill] sm:$0xff]  ;;  %v18383_v15 = vld [vmem:[#allocation54_spill] sm:$0xff] }
 0x5ce   : > { %13434 = vmatprep.mubr.bf16.mxu1 %v12075_v54  ;;  %v12077_v54 = vcombine.low %v10323_v7, %v10333_v46  ;;  %v10399_v60 = vor.u32 %v10398_v32, %v10394_v44  ;;  %v10357_v51 = vsel %vm14637_vm7, %v10352_v59, %v10356_v49  ;;  %v10347_v17 = vsel %vm14637_vm7, %v10342_v45, %v10346_v10  ;;  %v18364_v10 = vld [vmem:[#allocation41_spill] sm:$0xff]  ;;  %v18387_v59 = vld [vmem:[#allocation55_spill] sm:$0xff]  ;;  %v18390_v45 = vld [vmem:[#allocation58_spill] sm:$0xff] }
 0x5cf   : > { %v10380_v1 = vrot.slane %v10378_v31, 5  ;;  %v10390_v9 = vrot.slane %v10389_v34, 4  ;;  %v10404_v63 = vrot.slane %v10402_v57, 5  ;;  %v12078_v36 = vcombine.low %v10347_v17, %v10357_v51  ;;  %v18382_v7 = vld [vmem:[#allocation53_spill] sm:$0xff]  ;;  %v18385_v31 = vld [vmem:[#allocation56_spill] sm:$0xff]  ;;  %v14350_v50 = vld [vmem:[%s14625_s26 + $0x50] sm:$0xff] }
 0x5d0   : > { %v10400_v5 = vrot.slane %v10399_v60, 4  ;;  %v10371_v2 = vsel %vm14637_vm7, %v10366_v58, %v10370_v20  ;;  %v18365_v0 = vcombine.low %v18363_v39, %v18364_v10  ;;  %v18369_v20 = vld [vmem:[#allocation45_spill] sm:$0xff]  ;;  %v18374_v61 = vcombine.low %v18372_v21, %v18373_v6  ;;  %v14352_v6 = vld [vmem:[%s14625_s26 + $0x58] sm:$0xff] }
 0x5d1   : > { %v10381_v43 = vsel %vm14637_vm7, %v10376_v33, %v10380_v1  ;;  %v10395_v41 = vsel %vm14637_vm7, %v10390_v9, %v10394_v44  ;;  %v18371_v46 = vcombine.low %v18369_v20, %v18370_v37  ;;  %v18377_v8 = vcombine.low %v18375_v22, %v18376_v38  ;;  %v18379_v44 = vld [vmem:[#allocation52_spill] sm:$0xff]  ;;  %v18388_v49 = vld [vmem:[#allocation57_spill] sm:$0xff]  ;;  %v14346_v1 = vld [vmem:[%s14625_s26 + $0x30] sm:$0xff] }
 0x5d2   : > { %v12079_v24 = vcombine.low %v10371_v2, %v10381_v43  ;;  %v10405_v42 = vsel %vm14637_vm7, %v10400_v5, %v10404_v63  ;;  %v18380_v32 = vcombine.low %v18378_v52, %v18379_v44  ;;  %v18384_v19 = vcombine.low %v18382_v7, %v18383_v15  ;;  %v14347_v9 = vld [vmem:[%s14625_s26 + $0x20] sm:$0xff]  ;;  %v14353_v22 = vld [vmem:[%s14625_s26 + $0x48] sm:$0xff]  ;;  %v14354_v7 = vld [vmem:[%s14625_s26 + $0x70] sm:$0xff] }
 0x5d3   : > { %v12080_v11 = vcombine.low %v10395_v41, %v10405_v42  ;;  %v18389_v33 = vcombine.low %v18387_v59, %v18388_v49  ;;  %v18391_v34 = vcombine.low %v17494_v55, %v18390_v45  ;;  %v14351_v37 = vld [vmem:[%s14625_s26 + $0x40] sm:$0xff] }
 0x5d5   : > { %13435 = vmatmul.mubr.bf16.gmra.mrb[20].mxu1 %v12076_v56  ;;  %v18381_v56 = vcombine.low %v17450_v12, %v17454_v3  ;;  %v17899_v12 = vld [vmem:[%s18012_s5] ss:$0 sm:$0xff] }
 0x5d6   : > { %13438 = vmatprep.mubr.bf16.mxu1 %v12077_v54  ;;  %v18386_v54 = vcombine.low %v17470_v40, %v18385_v31 }
 0x5dd   : > { %13439 = vmatmul.mubr.bf16.gmra.mrb[24].mxu1 %v12078_v36  ;;  %v14348_v36 = vld [vmem:[%s14625_s26 + $0x38] sm:$0xff] }
 0x5de   : > { %13442 = vmatprep.mubr.bf16.mxu1 %v12079_v24  ;;  %v14349_v24 = vld [vmem:[%s14625_s26 + $0x28] sm:$0xff] }
 0x5e5   : > { %13443 = vmatmul.mubr.bf16.gmra.mrb[28].mxu1 %v12080_v11 }
 0x5e6   : > { %13462 = vmatprep.mubr.bf16.mxu1 %v18365_v0 }
 0x5ed   : > { %13463 = vmatmul.mubr.bf16.vlgmr.msra.gmra.mrb[0].mxu1 %v18368_v27 }
 0x5ee   : > { %13466 = vmatprep.mubr.bf16.mxu1 %v18371_v46 }
 0x5f5   : > { %13467 = vmatmul.mubr.bf16.gmra.mrb[4].mxu1 %v18374_v61 }
 0x5f6   : > { %13470 = vmatprep.mubr.bf16.mxu1 %v18377_v8 }
 0x5fd   : > { %13471 = vmatmul.mubr.bf16.gmra.mrb[8].mxu1 %v18380_v32 }
 0x5fe   : > { %13474 = vmatprep.mubr.bf16.mxu1 %v18381_v56 }
 0x605   : > { %13475 = vmatmul.mubr.bf16.gmra.mrb[12].mxu1 %v18384_v19 }
 0x606   : > { %13478 = vmatprep.mubr.bf16.mxu1 %v18386_v54  ;;  %v14355_v54 = vld [vmem:[%s14625_s26 + $0x60] sm:$0xff] }
 0x60d   : > { %13479 = vmatmul.mubr.bf16.gmra.mrb[16].mxu1 %v18389_v33  ;;  %v14356_v33 = vld [vmem:[%s14625_s26 + $0x78] sm:$0xff] }
 0x60e   : > { %13482 = vmatprep.mubr.bf16.mxu1 %v18391_v34  ;;  %v14357_v34 = vld [vmem:[%s14625_s26 + $0x68] sm:$0xff] }
 0x615   : > { %13483 = vmatmul.mubr.bf16.gmra.mrb[20].mxu1 %v12116_v47  ;;  %v14342_v47 = vld [vmem:[%s14625_s26 + $0x10] sm:$0xff] }
 0x616   : > { %13486 = vmatprep.mubr.bf16.mxu1 %v12117_v29  ;;  %v14343_v29 = vld [vmem:[%s14625_s26] sm:$0xff] }
 0x61d   : > { %13487 = vmatmul.mubr.bf16.gmra.mrb[24].mxu1 %v12118_v48 }
 0x61e   : > { %13490 = vmatprep.mubr.bf16.mxu1 %v12119_v23  ;;  %v14345_v23 = vld [vmem:[%s14625_s26 + $0x8] sm:$0xff] }
 0x625   : > { %13491 = vmatmul.mubr.bf16.gmra.mrb[28].mxu1 %v12120_v13 }
 0x6c0   : > { %v13464_v3 = vpop.f32.mrb[0].mxu1 }
 0x6c1   : > { %v11235_v40 = vadd.f32 %v13464_v3, %v17899_v12  ;;  %v11067_v55 = vpop.f32.mrb[1].mxu1 }
 0x6c2   : > { %v11233_v35 = vadd.f32 %v17899_v12, %v11067_v55  ;;  %v13465_v30 = vpop.f32.mrb[2].mxu1 }
 0x6c3   : > { %v11267_v14 = vadd.f32 %v14342_v47, %v11235_v40  ;;  %v11236_v53 = vadd.f32 %v13465_v30, %v17899_v12  ;;  %v11070_v25 = vpop.f32.mrb[3].mxu1 }
 0x6c4   : > { %v11265_v18 = vadd.f32 %v14343_v29, %v11233_v35  ;;  %v11234_v48 = vadd.f32 %v17899_v12, %v11070_v25 }
 0x6c5   : > { %11299 = vst [vmem:[%s17907_s13 + $0x10] sm:$0xff] %v11267_v14  ;;  %v11268_v26 = vadd.f32 %v14344_v4, %v11236_v53  ;;  %v14358_v14 = vld [vmem:[%s14625_s26 + $0x90] sm:$0xff] }
 0x6c6   : > { %11297 = vst [vmem:[%s17907_s13] sm:$0xff] %v11265_v18  ;;  %v11266_v62 = vadd.f32 %v14345_v23, %v11234_v48  ;;  %v14359_v18 = vld [vmem:[%s14625_s26 + $0x80] sm:$0xff] }
 0x6c7   : > { %11300 = vst [vmem:[%s17907_s13 + $0x18] sm:$0xff] %v11268_v26  ;;  %v14360_v26 = vld [vmem:[%s14625_s26 + $0x98] sm:$0xff] }
 0x6c8   : > { %11298 = vst [vmem:[%s17907_s13 + $0x8] sm:$0xff] %v11266_v62  ;;  %v13468_v28 = vpop.f32.mrb[4].mxu1  ;;  %v14361_v62 = vld [vmem:[%s14625_s26 + $0x88] sm:$0xff] }
 0x6c9   : > { %v11239_v13 = vadd.f32 %v13468_v28, %v17899_v12  ;;  %v11083_v60 = vpop.f32.mrb[5].mxu1 }
 0x6ca   : > { %v11237_v57 = vadd.f32 %v17899_v12, %v11083_v60  ;;  %v13469_v58 = vpop.f32.mrb[6].mxu1 }
 0x6cb   : > { %v11271_v51 = vadd.f32 %v14346_v1, %v11239_v13  ;;  %v11240_v43 = vadd.f32 %v13469_v58, %v17899_v12  ;;  %v11086_v17 = vpop.f32.mrb[7].mxu1 }
 0x6cc   : > { %v11269_v5 = vadd.f32 %v14347_v9, %v11237_v57  ;;  %v11238_v63 = vadd.f32 %v17899_v12, %v11086_v17 }
 0x6cd   : > { %11303 = vst [vmem:[%s17907_s13 + $0x30] sm:$0xff] %v11271_v51  ;;  %v11272_v2 = vadd.f32 %v14348_v36, %v11240_v43  ;;  %v14362_v51 = vld [vmem:[%s14625_s26 + $0xb0] sm:$0xff] }
 0x6ce   : > { %11301 = vst [vmem:[%s17907_s13 + $0x20] sm:$0xff] %v11269_v5  ;;  %v11270_v41 = vadd.f32 %v14349_v24, %v11238_v63  ;;  %v14363_v5 = vld [vmem:[%s14625_s26 + $0xa0] sm:$0xff] }
 0x6cf   : > { %11304 = vst [vmem:[%s17907_s13 + $0x38] sm:$0xff] %v11272_v2  ;;  %v14364_v2 = vld [vmem:[%s14625_s26 + $0xb8] sm:$0xff] }
 0x6d0   : > { %11302 = vst [vmem:[%s17907_s13 + $0x28] sm:$0xff] %v11270_v41  ;;  %v13472_v42 = vpop.f32.mrb[8].mxu1  ;;  %v14365_v41 = vld [vmem:[%s14625_s26 + $0xa8] sm:$0xff] }
 0x6d1   : > { %v11243_v11 = vadd.f32 %v13472_v42, %v17899_v12  ;;  %v11099_v39 = vpop.f32.mrb[9].mxu1 }
 0x6d2   : > { %v11241_v10 = vadd.f32 %v17899_v12, %v11099_v39  ;;  %v13473_v0 = vpop.f32.mrb[10].mxu1 }
 0x6d3   : > { %v11275_v16 = vadd.f32 %v14350_v50, %v11243_v11  ;;  %v11244_v27 = vadd.f32 %v13473_v0, %v17899_v12  ;;  %v11102_v20 = vpop.f32.mrb[11].mxu1 }
 0x6d4   : > { %v11273_v46 = vadd.f32 %v14351_v37, %v11241_v10  ;;  %v11242_v21 = vadd.f32 %v17899_v12, %v11102_v20 }
 0x6d5   : > { %11307 = vst [vmem:[%s17907_s13 + $0x50] sm:$0xff] %v11275_v16  ;;  %v11276_v61 = vadd.f32 %v14352_v6, %v11244_v27  ;;  %v14366_v16 = vld [vmem:[%s14625_s26 + $0xd0] sm:$0xff] }
 0x6d6   : > { %11305 = vst [vmem:[%s17907_s13 + $0x40] sm:$0xff] %v11273_v46  ;;  %v11274_v38 = vadd.f32 %v14353_v22, %v11242_v21  ;;  %v14367_v46 = vld [vmem:[%s14625_s26 + $0xc0] sm:$0xff] }
 0x6d7   : > { %11308 = vst [vmem:[%s17907_s13 + $0x58] sm:$0xff] %v11276_v61  ;;  %v14368_v61 = vld [vmem:[%s14625_s26 + $0xd8] sm:$0xff] }
 0x6d8   : > { %11306 = vst [vmem:[%s17907_s13 + $0x48] sm:$0xff] %v11274_v38  ;;  %v13476_v8 = vpop.f32.mrb[12].mxu1  ;;  %v14369_v38 = vld [vmem:[%s14625_s26 + $0xc8] sm:$0xff] }
 0x6d9   : > { %v11247_v52 = vadd.f32 %v13476_v8, %v17899_v12  ;;  %v11115_v44 = vpop.f32.mrb[13].mxu1 }
 0x6da   : > { %v11245_v32 = vadd.f32 %v17899_v12, %v11115_v44  ;;  %v13477_v56 = vpop.f32.mrb[14].mxu1 }
 0x6db   : > { %v11279_v15 = vadd.f32 %v14354_v7, %v11247_v52  ;;  %v11248_v19 = vadd.f32 %v13477_v56, %v17899_v12  ;;  %v11118_v31 = vpop.f32.mrb[15].mxu1 }
 0x6dc   : > { %v11277_v59 = vadd.f32 %v14355_v54, %v11245_v32  ;;  %v11246_v49 = vadd.f32 %v17899_v12, %v11118_v31 }
 0x6dd   : > { %11311 = vst [vmem:[%s17907_s13 + $0x70] sm:$0xff] %v11279_v15  ;;  %v11280_v45 = vadd.f32 %v14356_v33, %v11248_v19  ;;  %v14370_v15 = vld [vmem:[%s14625_s26 + $0xf0] sm:$0xff] }
 0x6de   : > { %11309 = vst [vmem:[%s17907_s13 + $0x60] sm:$0xff] %v11277_v59  ;;  %v11278_v3 = vadd.f32 %v14357_v34, %v11246_v49  ;;  %v14371_v59 = vld [vmem:[%s14625_s26 + $0xe0] sm:$0xff] }
 0x6df   : > { %11312 = vst [vmem:[%s17907_s13 + $0x78] sm:$0xff] %v11280_v45  ;;  %v14372_v45 = vld [vmem:[%s14625_s26 + $0xf8] sm:$0xff] }
 0x6e0   : > { %11310 = vst [vmem:[%s17907_s13 + $0x68] sm:$0xff] %v11278_v3  ;;  %v13480_v40 = vpop.f32.mrb[16].mxu1  ;;  %v14373_v3 = vld [vmem:[%s14625_s26 + $0xe8] sm:$0xff] }
 0x6e1   : > { %v11251_v55 = vadd.f32 %v13480_v40, %v17899_v12  ;;  %v11131_v35 = vpop.f32.mrb[17].mxu1 }
 0x6e2   : > { %v11249_v30 = vadd.f32 %v17899_v12, %v11131_v35  ;;  %v13481_v47 = vpop.f32.mrb[18].mxu1 }
 0x6e3   : > { %v11283_v53 = vadd.f32 %v14358_v14, %v11251_v55  ;;  %v11252_v25 = vadd.f32 %v13481_v47, %v17899_v12  ;;  %v11134_v29 = vpop.f32.mrb[19].mxu1 }
 0x6e4   : > { %v11281_v48 = vadd.f32 %v14359_v18, %v11249_v30  ;;  %v11250_v4 = vadd.f32 %v17899_v12, %v11134_v29 }
 0x6e5   : > { %11315 = vst [vmem:[%s17907_s13 + $0x90] sm:$0xff] %v11283_v53  ;;  %v11284_v23 = vadd.f32 %v14360_v26, %v11252_v25 }
 0x6e6   : > { %11313 = vst [vmem:[%s17907_s13 + $0x80] sm:$0xff] %v11281_v48  ;;  %v11282_v28 = vadd.f32 %v14361_v62, %v11250_v4 }
 0x6e7   : > { %11316 = vst [vmem:[%s17907_s13 + $0x98] sm:$0xff] %v11284_v23 }
 0x6e8   : > { %11314 = vst [vmem:[%s17907_s13 + $0x88] sm:$0xff] %v11282_v28  ;;  %v13484_v13 = vpop.f32.mrb[20].mxu1 }
 0x6e9   : > { %v11255_v60 = vadd.f32 %v13484_v13, %v17899_v12  ;;  %v11147_v57 = vpop.f32.mrb[21].mxu1 }
 0x6ea   : > { %v11253_v58 = vadd.f32 %v17899_v12, %v11147_v57  ;;  %v13485_v1 = vpop.f32.mrb[22].mxu1 }
 0x6eb   : > { %v11287_v43 = vadd.f32 %v14362_v51, %v11255_v60  ;;  %v11256_v17 = vadd.f32 %v13485_v1, %v17899_v12  ;;  %v11150_v9 = vpop.f32.mrb[23].mxu1 }
 0x6ec   : > { %v11285_v63 = vadd.f32 %v14363_v5, %v11253_v58  ;;  %v11254_v36 = vadd.f32 %v17899_v12, %v11150_v9 }
 0x6ed   : > { %11319 = vst [vmem:[%s17907_s13 + $0xb0] sm:$0xff] %v11287_v43  ;;  %v11288_v24 = vadd.f32 %v14364_v2, %v11256_v17 }
 0x6ee   : > { %11317 = vst [vmem:[%s17907_s13 + $0xa0] sm:$0xff] %v11285_v63  ;;  %v11286_v42 = vadd.f32 %v14365_v41, %v11254_v36 }
 0x6ef   : > { %11320 = vst [vmem:[%s17907_s13 + $0xb8] sm:$0xff] %v11288_v24 }
 0x6f0   : > { %11318 = vst [vmem:[%s17907_s13 + $0xa8] sm:$0xff] %v11286_v42  ;;  %v13488_v11 = vpop.f32.mrb[24].mxu1 }
 0x6f1   : > { %v11259_v39 = vadd.f32 %v13488_v11, %v17899_v12  ;;  %v11163_v10 = vpop.f32.mrb[25].mxu1 }
 0x6f2   : > { %v11257_v0 = vadd.f32 %v17899_v12, %v11163_v10  ;;  %v13489_v50 = vpop.f32.mrb[26].mxu1 }
 0x6f3   : > { %v11291_v27 = vadd.f32 %v14366_v16, %v11259_v39  ;;  %v11260_v20 = vadd.f32 %v13489_v50, %v17899_v12  ;;  %v11166_v37 = vpop.f32.mrb[27].mxu1 }
 0x6f4   : > { %v11289_v21 = vadd.f32 %v14367_v46, %v11257_v0  ;;  %v11258_v6 = vadd.f32 %v17899_v12, %v11166_v37 }
 0x6f5   : > { %11323 = vst [vmem:[%s17907_s13 + $0xd0] sm:$0xff] %v11291_v27  ;;  %v11292_v22 = vadd.f32 %v14368_v61, %v11260_v20 }
 0x6f6   : > { %11321 = vst [vmem:[%s17907_s13 + $0xc0] sm:$0xff] %v11289_v21  ;;  %v11290_v8 = vadd.f32 %v14369_v38, %v11258_v6 }
 0x6f7   : > { %11324 = vst [vmem:[%s17907_s13 + $0xd8] sm:$0xff] %v11292_v22 }
 0x6f8   : > { %11322 = vst [vmem:[%s17907_s13 + $0xc8] sm:$0xff] %v11290_v8  ;;  %v13492_v52 = vpop.f32.mrb[28].mxu1 }
 0x6f9   : > { %v11263_v44 = vadd.f32 %v13492_v52, %v17899_v12  ;;  %v11179_v32 = vpop.f32.mrb[29].mxu1 }
 0x6fa   : > { %v11261_v56 = vadd.f32 %v17899_v12, %v11179_v32  ;;  %v13493_v7 = vpop.f32.mrb[30].mxu1 }
 0x6fb   : > { %v11295_v19 = vadd.f32 %v14370_v15, %v11263_v44  ;;  %v11264_v31 = vadd.f32 %v13493_v7, %v17899_v12  ;;  %v11182_v54 = vpop.f32.mrb[31].mxu1 }
 0x6fc   : > { %v11293_v49 = vadd.f32 %v14371_v59, %v11261_v56  ;;  %v11262_v33 = vadd.f32 %v17899_v12, %v11182_v54 }
 0x6fd   : > { %11327 = vst [vmem:[%s17907_s13 + $0xf0] sm:$0xff] %v11295_v19  ;;  %v11296_v34 = vadd.f32 %v14372_v45, %v11264_v31 }
 0x6fe   : > { %11325 = vst [vmem:[%s17907_s13 + $0xe0] sm:$0xff] %v11293_v49  ;;  %v11294_v40 = vadd.f32 %v14373_v3, %v11262_v33 }
 0x6ff   : > { %11328 = vst [vmem:[%s17907_s13 + $0xf8] sm:$0xff] %v11296_v34 }
 0x700   : > { %11326 = vst [vmem:[%s17907_s13 + $0xe8] sm:$0xff] %v11294_v40 }
 0x701 PF: > { %s17_s21 = sadd.s32 1, %s14412_s21  }
 0x702   : > { %p14_p3 = scmp.ge.s32.totalorder %s17_s21, 4  }
 0x704   :  { %16 = sbr.rel (!%p14_p3) target bundleno = 1 (0x1), region = 99 }
 0x70b   :  { %11350 = vsyncpa [#allocation5], 1 }
 0x70c   :  { %11352 = vsyncpa [#allocation5 + $0x1], 1 }

</bundles_post_ra>
